<compile_context>
chip_gen: v7x
topology: tpu7x:2x2x1
jax: 0.10.0
libtpu: 0.0.40
codegen_flags: <defaults>
</compile_context>

<pallas_src>
import jax
import jax.numpy as jnp
from jax.experimental import pallas as pl
from jax.experimental.pallas import tpu as pltpu

# ---- hyperparameters (mirror PoetryModel.__init__) --------------------------
LSTM_LAYERS = 3
EMBEDDING_DIM = 50
HIDDEN_DIM = 100
VOCAB_OUT = 2            # `vocab_size` in the module (final classifier width)
EMB_VOCAB = 32           # rows of the (pretrained) embedding table, synthetic
MLP_DIMS = (2048, 256, 32, VOCAB_OUT)

# ---- padded kernel layout ----------------------------------------------------
BP = 8                   # padded batch (sublane multiple)
HP = 128                 # padded hidden / embedding width (lane multiple)
EP = 128
GP = 4 * HP              # padded gate width (512), 128-aligned gate blocks
VP = 128                 # padded classifier output width (lane-dense store)
VOCP = -(-EMB_VOCAB // 8) * 8   # embedding rows rounded up to sublane multiple


# ---- fused model kernel ------------------------------------------------------
def make_model_kernel(S, B):
    Bp, Hp = BP, HP

    def kernel(lens_ref,                                   # (B,) int32, SMEM (scalar prefetch)
               ids_ref, emb_ref,                           # (S*Bp,1) i32, (VOCP,EP) f32
               wx0, wh0, b0, wx1, wh1, b1, wx2, wh2, b2,   # LSTM weights (padded)
               w1_hbm, c1, w2_hbm, c2, w3, c3, w4, c4,     # MLP weights (w1/w2 in HBM)
               out_ref, h_ref, c_ref,                      # outputs
               gx, seq, w1v, w2v, sem):                    # scratch
        # Start DMAing the big MLP-head weights now; hidden under the LSTM
        # recurrence, waited on just before the head matmuls.
        cp_w1 = pltpu.make_async_copy(w1_hbm, w1v, sem.at[0])
        cp_w2 = pltpu.make_async_copy(w2_hbm, w2v, sem.at[1])
        cp_w1.start()
        cp_w2.start()

        # Embedding lookup as a one-hot matmul (exact row selection); no padded
        # activation tensor ever touches HBM.
        ids = ids_ref[...]                                            # (S*Bp, 1)
        iota = jax.lax.broadcasted_iota(jnp.int32, (S * Bp, VOCP), 1)
        onehot = jnp.where(iota == ids, 1.0, 0.0)                     # (S*Bp, VOCP)
        x0 = jnp.dot(onehot, emb_ref[...],
                     preferred_element_type=jnp.float32)              # (S*Bp, EP)

        def sigmoid(v):
            # single-EUP-op sigmoid: 0.5*(1 + tanh(x/2))
            return 0.5 * jnp.tanh(0.5 * v) + 0.5

        for l, (wx, wh, b) in enumerate(
                ((wx0, wh0, b0), (wx1, wh1, b1), (wx2, wh2, b2))):
            seq_in = x0 if l == 0 else seq[...]
            # batched input->gates matmul for all S timesteps of this layer
            gx[...] = jnp.dot(seq_in, wx[...],
                              preferred_element_type=jnp.float32) + b[...]
            wh_l = wh[...]
            # TODO(synk): pltpu.matmul_push_rhs/_acc_lhs to pin W_hh in the MXU
            # across timesteps; relying on Mosaic hoisting the invariant RHS.

            def step(t, carry, wh_l=wh_l):
                h, c = carry
                r0 = pl.multiple_of(t * Bp, Bp)
                g = gx[pl.ds(r0, Bp), :] + jnp.dot(
                    h, wh_l, preferred_element_type=jnp.float32)
                # 128-aligned gate slices (i, f, g, o)
                i_g = sigmoid(g[:, 0 * Hp:1 * Hp])
                f_g = sigmoid(g[:, 1 * Hp:2 * Hp])
                g_g = jnp.tanh(g[:, 2 * Hp:3 * Hp])
                o_g = sigmoid(g[:, 3 * Hp:4 * Hp])
                c_new = f_g * c + i_g * g_g
                h_new = o_g * jnp.tanh(c_new)
                seq[pl.ds(r0, Bp), :] = h_new
                return (h_new, c_new)

            # hidden=None in the module -> zero-initialized carries
            zero = jnp.zeros((Bp, Hp), jnp.float32)
            hT, cT = jax.lax.fori_loop(0, S, step, (zero, zero),
                                       unroll=min(S, 8))
            h_ref[l] = hT
            c_ref[l] = cT
            # TODO(synk): nn.LSTM inter-layer dropout (p=0.5) is train-mode
            # only; inference semantics (identity) are implemented here.

        # per-sample gather of the top-layer output at t = batchs[i] - 1:
        # single-row loads assembled into one (Bp, Hp) value (scalar reads of
        # lens_ref happen before the DMA waits below).
        rows = [seq[pl.ds(lens_ref[i] * Bp + i, 1), :] for i in range(B)]
        if B < Bp:
            rows.append(jnp.zeros((Bp - B, Hp), jnp.float32))
        feat = jnp.concatenate(rows, axis=0)                          # (Bp, Hp)

        # fused 4-layer MLP head on the gathered rows only (Bp rows).
        cp_w1.wait()
        h1 = jnp.tanh(jnp.dot(feat, w1v[...],
                              preferred_element_type=jnp.float32) + c1[...])
        cp_w2.wait()
        h2 = jnp.tanh(jnp.dot(h1, w2v[...],
                              preferred_element_type=jnp.float32) + c2[...])
        # TODO(synk): nn.Dropout(p=0.5) is train-mode only; identity here.
        h3 = jnp.tanh(jnp.dot(h2, w3[...],
                              preferred_element_type=jnp.float32) + c3[...])
        out_ref[...] = jnp.dot(h3, w4[...],
                               preferred_element_type=jnp.float32) + c4[...]

    return kernel


def run_model(lens, ids_col, emb_pad, lstm_pad, mlp_pad, S, B):
    L, Bp, Hp = LSTM_LAYERS, BP, HP
    lstm_args = [t for layer in lstm_pad for t in layer]
    (w1p, c1p), (w2p, c2p), (w3p, c3p), (w4p, c4p) = mlp_pad

    def full_spec(a):
        return pl.BlockSpec(a.shape, lambda i, lens_ref, n=a.ndim: (0,) * n)

    any_spec = pl.BlockSpec(memory_space=pl.ANY)    # manual DMA in the kernel

    in_specs = ([full_spec(ids_col), full_spec(emb_pad)]
                + [full_spec(a) for a in lstm_args]
                + [any_spec, full_spec(c1p), any_spec, full_spec(c2p),
                   full_spec(w3p), full_spec(c3p),
                   full_spec(w4p), full_spec(c4p)])

    out_shape = (jax.ShapeDtypeStruct((Bp, VP), jnp.float32),       # head out
                 jax.ShapeDtypeStruct((L, Bp, Hp), jnp.float32),    # h_n
                 jax.ShapeDtypeStruct((L, Bp, Hp), jnp.float32))    # c_n
    out_specs = (pl.BlockSpec((Bp, VP), lambda i, lens_ref: (0, 0)),
                 pl.BlockSpec((L, Bp, Hp), lambda i, lens_ref: (0, 0, 0)),
                 pl.BlockSpec((L, Bp, Hp), lambda i, lens_ref: (0, 0, 0)))
    scratch = [pltpu.VMEM((S * Bp, GP), jnp.float32),   # per-layer x->gates
               pltpu.VMEM((S * Bp, Hp), jnp.float32),   # per-layer output seq
               pltpu.VMEM(w1p.shape, jnp.float32),      # head w1 (manual DMA)
               pltpu.VMEM(w2p.shape, jnp.float32),      # head w2 (manual DMA)
               pltpu.SemaphoreType.DMA((2,))]
    grid_spec = pltpu.PrefetchScalarGridSpec(
        num_scalar_prefetch=1, grid=(1,),
        in_specs=in_specs, out_specs=out_specs, scratch_shapes=scratch)
    return pl.pallas_call(
        make_model_kernel(S, B),
        out_shape=out_shape,
        grid_spec=grid_spec,
        compiler_params=pltpu.CompilerParams(
            dimension_semantics=("arbitrary",),
            vmem_limit_bytes=32 * 1024 * 1024),
    )(lens, ids_col, emb_pad, *lstm_args,
      w1p, c1p, w2p, c2p, w3p, c3p, w4p, c4p)


# ---- padding helpers (zero padding so padded lanes never leak) ---------------
def _pad2(a, rows, cols):
    return jnp.pad(a, ((0, rows - a.shape[0]), (0, cols - a.shape[1])))


def _pad_lstm(wx, wh, b):
    """(in,4H)/(H,4H)/(1,4H) -> (128,512)/(128,512)/(1,512), gate-blockwise."""
    H = HIDDEN_DIM

    def gate_pad(m, rows):
        blocks = [_pad2(m[:, k * H:(k + 1) * H], rows, HP) for k in range(4)]
        return jnp.concatenate(blocks, axis=1)

    return gate_pad(wx, HP), gate_pad(wh, HP), gate_pad(b, 1)


# ---- full forward (glue: id layout, padding, result slicing) -----------------
def poetry_model_forward(params, input_ids, batchs, hidden=None):
    # hidden=None -> zero-initialized h/c inside the kernel (module default).
    # TODO(synk): passing a non-None `hidden` state into the kernel is not wired.
    B, S = input_ids.shape
    assert B <= BP
    H = HIDDEN_DIM

    # time-major token ids, batch-padded (padded rows compute garbage that is
    # sliced off and never reaches real batch rows)
    ids = jnp.pad(input_ids.T.astype(jnp.int32), ((0, 0), (0, BP - B)))
    ids_col = ids.reshape(S * BP, 1)
    emb_pad = _pad2(params["embedding"], VOCP, EP)        # (32, 128)

    # torch's sample_pre[i][batchs[i]-1] (negative index wraps for length 0)
    lens = ((batchs.astype(jnp.int32) - 1) % S).astype(jnp.int32)

    lstm_pad = tuple(_pad_lstm(*layer) for layer in params["lstm"])
    (w1, b1), (w2, b2), (w3, b3), (w4, b4) = params["mlp"]
    mlp_pad = ((_pad2(w1, HP, MLP_DIMS[0]), b1),
               (w2, b2),
               (_pad2(w3, MLP_DIMS[1], HP), _pad2(b3, 1, HP)),
               (_pad2(w4, HP, VP), _pad2(b4, 1, VP)))

    out_pad, h_pad, c_pad = run_model(lens, ids_col, emb_pad,
                                      lstm_pad, mlp_pad, S, B)
    sample_out = out_pad[:B, :VOCAB_OUT]
    h_n = h_pad[:, :B, :H]
    c_n = c_pad[:, :B, :H]
    return sample_out, (h_n, c_n)


# ---- deterministic synthetic parameters --------------------------------------
def init_params(key):
    keys = iter(jax.random.split(key, 64))

    def uni(shape, bound):
        return jax.random.uniform(next(keys), shape, jnp.float32, -bound, bound)

    # The original loads a pretrained (word2vec) table; synthetic values here.
    emb = jax.random.normal(next(keys), (EMB_VOCAB, EMBEDDING_DIM),
                            jnp.float32) * 0.1

    lstm = []
    k = 1.0 / (HIDDEN_DIM ** 0.5)
    for l in range(LSTM_LAYERS):
        in_dim = EMBEDDING_DIM if l == 0 else HIDDEN_DIM
        w_ih = uni((4 * HIDDEN_DIM, in_dim), k)       # PyTorch layout
        w_hh = uni((4 * HIDDEN_DIM, HIDDEN_DIM), k)
        b_ih = uni((4 * HIDDEN_DIM,), k)
        b_hh = uni((4 * HIDDEN_DIM,), k)
        # kernel layout: (in, 4H), (H, 4H), fused bias (1, 4H)
        lstm.append((w_ih.T, w_hh.T, (b_ih + b_hh)[None, :]))

    mlp = []
    dims = (HIDDEN_DIM,) + MLP_DIMS
    for i in range(4):
        fan_in, fan_out = dims[i], dims[i + 1]
        kb = 1.0 / (fan_in ** 0.5)
        mlp.append((uni((fan_out, fan_in), kb).T,      # stored (in, out)
                    uni((fan_out,), kb)[None, :]))

    return {"embedding": emb, "lstm": tuple(lstm), "mlp": tuple(mlp)}


# ---- pure-JAX reference (for correctness check) -------------------------------
def reference_forward(params, input_ids, batchs):
    H = HIDDEN_DIM
    x = params["embedding"][input_ids]                 # (B, S, E)
    B = x.shape[0]
    h_ns, c_ns = [], []
    for (wx, wh, b) in params["lstm"]:
        def step(carry, xt, wx=wx, wh=wh, b=b):
            h, c = carry
            gates = xt @ wx + h @ wh + b[0]
            i_g = jax.nn.sigmoid(gates[:, :H])
            f_g = jax.nn.sigmoid(gates[:, H:2 * H])
            g_g = jnp.tanh(gates[:, 2 * H:3 * H])
            o_g = jax.nn.sigmoid(gates[:, 3 * H:])
            c2 = f_g * c + i_g * g_g
            h2 = o_g * jnp.tanh(c2)
            return (h2, c2), h2
        h0 = jnp.zeros((B, H), jnp.float32)
        (hT, cT), ys = jax.lax.scan(step, (h0, h0), jnp.transpose(x, (1, 0, 2)))
        x = jnp.transpose(ys, (1, 0, 2))
        h_ns.append(hT)
        c_ns.append(cT)
    (w1, b1), (w2, b2), (w3, b3), (w4, b4) = params["mlp"]
    h = jnp.tanh(x @ w1 + b1[0])
    h = jnp.tanh(h @ w2 + b2[0])
    h = jnp.tanh(h @ w3 + b3[0])
    logits = h @ w4 + b4[0]
    out = logits[jnp.arange(B), batchs - 1]
    return out, (jnp.stack(h_ns), jnp.stack(c_ns))


if __name__ == "__main__":
    key = jax.random.PRNGKey(0)
    pkey, ikey = jax.random.split(key)
    params = init_params(pkey)

    B, S = 2, 8
    input_ids = jax.random.randint(ikey, (B, S), 0, EMB_VOCAB)     # token ids
    batchs = jnp.array([S, 5], dtype=jnp.int32)                    # valid lengths

    out, (h_n, c_n) = poetry_model_forward(params, input_ids, batchs)
    jax.block_until_ready((out, h_n, c_n))

    ref_out, (ref_h, ref_c) = reference_forward(params, input_ids, batchs)
    assert out.shape == (B, VOCAB_OUT)
    assert h_n.shape == (LSTM_LAYERS, B, HIDDEN_DIM)
    assert c_n.shape == (LSTM_LAYERS, B, HIDDEN_DIM)
    assert jnp.allclose(out, ref_out, atol=1e-4, rtol=1e-4)
    assert jnp.allclose(h_n, ref_h, atol=1e-4, rtol=1e-4)
    assert jnp.allclose(c_n, ref_c, atol=1e-4, rtol=1e-4)
    print("KERNEL_OK")
</pallas_src>

<mosaic_0001>
module attributes {stable_mosaic.version = 11 : i64} {
  func.func @kernel(%arg0: i32, %arg1: memref<2xi32, #tpu.memory_space<smem>>, %arg2: memref<64x1xi32, #tpu.memory_space<vmem>>, %arg3: memref<32x128xf32, #tpu.memory_space<vmem>>, %arg4: memref<128x512xf32, #tpu.memory_space<vmem>>, %arg5: memref<128x512xf32, #tpu.memory_space<vmem>>, %arg6: memref<1x512xf32, #tpu.memory_space<vmem>>, %arg7: memref<128x512xf32, #tpu.memory_space<vmem>>, %arg8: memref<128x512xf32, #tpu.memory_space<vmem>>, %arg9: memref<1x512xf32, #tpu.memory_space<vmem>>, %arg10: memref<128x512xf32, #tpu.memory_space<vmem>>, %arg11: memref<128x512xf32, #tpu.memory_space<vmem>>, %arg12: memref<1x512xf32, #tpu.memory_space<vmem>>, %arg13: memref<128x2048xf32, #tpu.memory_space<any>>, %arg14: memref<1x2048xf32, #tpu.memory_space<vmem>>, %arg15: memref<2048x256xf32, #tpu.memory_space<any>>, %arg16: memref<1x256xf32, #tpu.memory_space<vmem>>, %arg17: memref<256x128xf32, #tpu.memory_space<vmem>>, %arg18: memref<1x128xf32, #tpu.memory_space<vmem>>, %arg19: memref<128x128xf32, #tpu.memory_space<vmem>>, %arg20: memref<1x128xf32, #tpu.memory_space<vmem>>, %arg21: memref<8x128xf32, #tpu.memory_space<vmem>>, %arg22: memref<3x8x128xf32, #tpu.memory_space<vmem>>, %arg23: memref<3x8x128xf32, #tpu.memory_space<vmem>>, %arg24: memref<64x512xf32, #tpu.memory_space<vmem>>, %arg25: memref<64x128xf32, #tpu.memory_space<vmem>>, %arg26: memref<128x2048xf32, #tpu.memory_space<vmem>>, %arg27: memref<2048x256xf32, #tpu.memory_space<vmem>>, %arg28: memref<2x!tpu.dma_semaphore, #tpu.memory_space<semaphore_mem>>) attributes {dimension_semantics = [#tpu.dimension_semantics<arbitrary>], iteration_bounds = array<i64: 1>, scalar_prefetch = 1 : i64, scratch_operands = 5 : i64, tpu.core_type = #tpu.core_type<tc>, window_params = [{pipeline_mode = #tpu.pipeline_mode<synchronous>, transform_indices = @transform_0, window_bounds = array<i64: 64, 1>}, {pipeline_mode = #tpu.pipeline_mode<synchronous>, transform_indices = @transform_1, window_bounds = array<i64: 32, 128>}, {pipeline_mode = #tpu.pipeline_mode<synchronous>, transform_indices = @transform_2, window_bounds = array<i64: 128, 512>}, {pipeline_mode = #tpu.pipeline_mode<synchronous>, transform_indices = @transform_3, window_bounds = array<i64: 128, 512>}, {pipeline_mode = #tpu.pipeline_mode<synchronous>, transform_indices = @transform_4, window_bounds = array<i64: 1, 512>}, {pipeline_mode = #tpu.pipeline_mode<synchronous>, transform_indices = @transform_5, window_bounds = array<i64: 128, 512>}, {pipeline_mode = #tpu.pipeline_mode<synchronous>, transform_indices = @transform_6, window_bounds = array<i64: 128, 512>}, {pipeline_mode = #tpu.pipeline_mode<synchronous>, transform_indices = @transform_7, window_bounds = array<i64: 1, 512>}, {pipeline_mode = #tpu.pipeline_mode<synchronous>, transform_indices = @transform_8, window_bounds = array<i64: 128, 512>}, {pipeline_mode = #tpu.pipeline_mode<synchronous>, transform_indices = @transform_9, window_bounds = array<i64: 128, 512>}, {pipeline_mode = #tpu.pipeline_mode<synchronous>, transform_indices = @transform_10, window_bounds = array<i64: 1, 512>}, {}, {pipeline_mode = #tpu.pipeline_mode<synchronous>, transform_indices = @transform_12, window_bounds = array<i64: 1, 2048>}, {}, {pipeline_mode = #tpu.pipeline_mode<synchronous>, transform_indices = @transform_14, window_bounds = array<i64: 1, 256>}, {pipeline_mode = #tpu.pipeline_mode<synchronous>, transform_indices = @transform_15, window_bounds = array<i64: 256, 128>}, {pipeline_mode = #tpu.pipeline_mode<synchronous>, transform_indices = @transform_16, window_bounds = array<i64: 1, 128>}, {pipeline_mode = #tpu.pipeline_mode<synchronous>, transform_indices = @transform_17, window_bounds = array<i64: 128, 128>}, {pipeline_mode = #tpu.pipeline_mode<synchronous>, transform_indices = @transform_18, window_bounds = array<i64: 1, 128>}, {pipeline_mode = #tpu.pipeline_mode<synchronous>, transform_indices = @transform_19, window_bounds = array<i64: 8, 128>}, {pipeline_mode = #tpu.pipeline_mode<synchronous>, transform_indices = @transform_20, window_bounds = array<i64: 3, 8, 128>}, {pipeline_mode = #tpu.pipeline_mode<synchronous>, transform_indices = @transform_21, window_bounds = array<i64: 3, 8, 128>}]} {
    %c0_i32 = arith.constant 0 : i32
    %0 = tpu.memref_slice %arg28[%c0_i32] : memref<2x!tpu.dma_semaphore, #tpu.memory_space<semaphore_mem>> -> memref<1x!tpu.dma_semaphore, #tpu.memory_space<semaphore_mem>>
    %1 = tpu.memref_squeeze %0 : memref<1x!tpu.dma_semaphore, #tpu.memory_space<semaphore_mem>> -> memref<!tpu.dma_semaphore, #tpu.memory_space<semaphore_mem>>
    tpu.enqueue_dma source(%arg13 : memref<128x2048xf32, #tpu.memory_space<any>>) target(%arg26 : memref<128x2048xf32, #tpu.memory_space<vmem>>) target_semaphore(%1 : memref<!tpu.dma_semaphore, #tpu.memory_space<semaphore_mem>>)
    %c1_i32 = arith.constant 1 : i32
    %2 = tpu.memref_slice %arg28[%c1_i32] : memref<2x!tpu.dma_semaphore, #tpu.memory_space<semaphore_mem>> -> memref<1x!tpu.dma_semaphore, #tpu.memory_space<semaphore_mem>>
    %3 = tpu.memref_squeeze %2 : memref<1x!tpu.dma_semaphore, #tpu.memory_space<semaphore_mem>> -> memref<!tpu.dma_semaphore, #tpu.memory_space<semaphore_mem>>
    tpu.enqueue_dma source(%arg15 : memref<2048x256xf32, #tpu.memory_space<any>>) target(%arg27 : memref<2048x256xf32, #tpu.memory_space<vmem>>) target_semaphore(%3 : memref<!tpu.dma_semaphore, #tpu.memory_space<semaphore_mem>>)
    %c0 = arith.constant 0 : index
    %c0_0 = arith.constant 0 : index
    %4 = vector.load %arg2[%c0, %c0_0] : memref<64x1xi32, #tpu.memory_space<vmem>>, vector<64x1xi32>
    %5 = tpu.iota {dimensions = array<i32: 1>} : vector<64x32xi32>
    %6 = vector.broadcast %4 : vector<64x1xi32> to vector<64x32xi32>
    %7 = arith.cmpi eq, %5, %6 : vector<64x32xi32>
    %cst = arith.constant 1.000000e+00 : f32
    %cst_1 = arith.constant 0.000000e+00 : f32
    %8 = vector.broadcast %cst : f32 to vector<64x32xf32>
    %9 = vector.broadcast %cst_1 : f32 to vector<64x32xf32>
    %10 = arith.select %7, %8, %9 : vector<64x32xi1>, vector<64x32xf32>
    %c0_2 = arith.constant 0 : index
    %c0_3 = arith.constant 0 : index
    %11 = vector.load %arg3[%c0_2, %c0_3] : memref<32x128xf32, #tpu.memory_space<vmem>>, vector<32x128xf32>
    %cst_4 = arith.constant dense<0.000000e+00> : vector<64x128xf32>
    %12 = tpu.matmul %10, %11, %cst_4 {dimension_numbers = #tpu.dot_dimension_numbers<[1], [0], [0], [1], [0, 0, 1, 1], [], []>} : vector<64x32xf32>, vector<32x128xf32>, vector<64x128xf32> -> vector<64x128xf32>
    %c0_5 = arith.constant 0 : index
    %c0_6 = arith.constant 0 : index
    %13 = vector.load %arg4[%c0_5, %c0_6] : memref<128x512xf32, #tpu.memory_space<vmem>>, vector<128x512xf32>
    %cst_7 = arith.constant dense<0.000000e+00> : vector<64x512xf32>
    %14 = tpu.matmul %12, %13, %cst_7 {dimension_numbers = #tpu.dot_dimension_numbers<[1], [0], [0], [1], [0, 0, 1, 1], [], []>} : vector<64x128xf32>, vector<128x512xf32>, vector<64x512xf32> -> vector<64x512xf32>
    %c0_8 = arith.constant 0 : index
    %c0_9 = arith.constant 0 : index
    %15 = vector.load %arg6[%c0_8, %c0_9] : memref<1x512xf32, #tpu.memory_space<vmem>>, vector<1x512xf32>
    %16 = vector.broadcast %15 : vector<1x512xf32> to vector<64x512xf32>
    %17 = arith.addf %14, %16 : vector<64x512xf32>
    %c0_10 = arith.constant 0 : index
    %c0_11 = arith.constant 0 : index
    %18 = vector.load %arg24[%c0_10, %c0_11] : memref<64x512xf32, #tpu.memory_space<vmem>>, vector<64x512xf32>
    tpu.vector_store %arg24[%c0_10, %c0_11], %17 {strides = array<i32>} : memref<64x512xf32, #tpu.memory_space<vmem>>, vector<64x512xf32>,
    %c0_12 = arith.constant 0 : index
    %c0_13 = arith.constant 0 : index
    %19 = vector.load %arg5[%c0_12, %c0_13] : memref<128x512xf32, #tpu.memory_space<vmem>>, vector<128x512xf32>
    %cst_14 = arith.constant 0.000000e+00 : f32
    %20 = vector.broadcast %cst_14 : f32 to vector<8x128xf32>
    %c0_i32_15 = arith.constant 0 : i32
    %c8_i32 = arith.constant 8 : i32
    %21 = arith.muli %c0_i32_15, %c8_i32 : i32
    %22 = tpu.assume_multiple %21, 8 : i32
    %23 = arith.index_cast %22 : i32 to index
    %c0_16 = arith.constant 0 : index
    %24 = vector.load %arg24[%23, %c0_16] : memref<64x512xf32, #tpu.memory_space<vmem>>, vector<8x512xf32>
    %cst_17 = arith.constant dense<0.000000e+00> : vector<8x512xf32>
    %25 = tpu.matmul %20, %19, %cst_17 {dimension_numbers = #tpu.dot_dimension_numbers<[1], [0], [0], [1], [0, 0, 1, 1], [], []>} : vector<8x128xf32>, vector<128x512xf32>, vector<8x512xf32> -> vector<8x512xf32>
    %26 = arith.addf %24, %25 : vector<8x512xf32>
    %27 = vector.extract_strided_slice %26 {offsets = [0, 0], sizes = [8, 128], strides = [1, 1]} : vector<8x512xf32> to vector<8x128xf32>
    %cst_18 = arith.constant 5.000000e-01 : f32
    %28 = vector.broadcast %cst_18 : f32 to vector<8x128xf32>
    %29 = arith.mulf %28, %27 : vector<8x128xf32>
    %30 = math.tanh %29 : vector<8x128xf32>
    %cst_19 = arith.constant 5.000000e-01 : f32
    %31 = vector.broadcast %cst_19 : f32 to vector<8x128xf32>
    %32 = arith.mulf %31, %30 : vector<8x128xf32>
    %cst_20 = arith.constant 5.000000e-01 : f32
    %33 = vector.broadcast %cst_20 : f32 to vector<8x128xf32>
    %34 = arith.addf %32, %33 : vector<8x128xf32>
    %35 = vector.extract_strided_slice %26 {offsets = [0, 128], sizes = [8, 128], strides = [1, 1]} : vector<8x512xf32> to vector<8x128xf32>
    %cst_21 = arith.constant 5.000000e-01 : f32
    %36 = vector.broadcast %cst_21 : f32 to vector<8x128xf32>
    %37 = arith.mulf %36, %35 : vector<8x128xf32>
    %38 = math.tanh %37 : vector<8x128xf32>
    %cst_22 = arith.constant 5.000000e-01 : f32
    %39 = vector.broadcast %cst_22 : f32 to vector<8x128xf32>
    %40 = arith.mulf %39, %38 : vector<8x128xf32>
    %cst_23 = arith.constant 5.000000e-01 : f32
    %41 = vector.broadcast %cst_23 : f32 to vector<8x128xf32>
    %42 = arith.addf %40, %41 : vector<8x128xf32>
    %43 = vector.extract_strided_slice %26 {offsets = [0, 256], sizes = [8, 128], strides = [1, 1]} : vector<8x512xf32> to vector<8x128xf32>
    %44 = math.tanh %43 : vector<8x128xf32>
    %45 = vector.extract_strided_slice %26 {offsets = [0, 384], sizes = [8, 128], strides = [1, 1]} : vector<8x512xf32> to vector<8x128xf32>
    %cst_24 = arith.constant 5.000000e-01 : f32
    %46 = vector.broadcast %cst_24 : f32 to vector<8x128xf32>
    %47 = arith.mulf %46, %45 : vector<8x128xf32>
    %48 = math.tanh %47 : vector<8x128xf32>
    %cst_25 = arith.constant 5.000000e-01 : f32
    %49 = vector.broadcast %cst_25 : f32 to vector<8x128xf32>
    %50 = arith.mulf %49, %48 : vector<8x128xf32>
    %cst_26 = arith.constant 5.000000e-01 : f32
    %51 = vector.broadcast %cst_26 : f32 to vector<8x128xf32>
    %52 = arith.addf %50, %51 : vector<8x128xf32>
    %53 = arith.mulf %42, %20 : vector<8x128xf32>
    %54 = arith.mulf %34, %44 : vector<8x128xf32>
    %55 = arith.addf %53, %54 : vector<8x128xf32>
    %56 = math.tanh %55 : vector<8x128xf32>
    %57 = arith.mulf %52, %56 : vector<8x128xf32>
    %58 = arith.index_cast %22 : i32 to index
    %c0_27 = arith.constant 0 : index
    %59 = vector.load %arg25[%58, %c0_27] : memref<64x128xf32, #tpu.memory_space<vmem>>, vector<8x128xf32>
    tpu.vector_store %arg25[%58, %c0_27], %57 {strides = array<i32>} : memref<64x128xf32, #tpu.memory_space<vmem>>, vector<8x128xf32>,
    %c1_i32_28 = arith.constant 1 : i32
    %c8_i32_29 = arith.constant 8 : i32
    %60 = arith.muli %c1_i32_28, %c8_i32_29 : i32
    %61 = tpu.assume_multiple %60, 8 : i32
    %62 = arith.index_cast %61 : i32 to index
    %c0_30 = arith.constant 0 : index
    %63 = vector.load %arg24[%62, %c0_30] : memref<64x512xf32, #tpu.memory_space<vmem>>, vector<8x512xf32>
    %cst_31 = arith.constant dense<0.000000e+00> : vector<8x512xf32>
    %64 = tpu.matmul %57, %19, %cst_31 {dimension_numbers = #tpu.dot_dimension_numbers<[1], [0], [0], [1], [0, 0, 1, 1], [], []>} : vector<8x128xf32>, vector<128x512xf32>, vector<8x512xf32> -> vector<8x512xf32>
    %65 = arith.addf %63, %64 : vector<8x512xf32>
    %66 = vector.extract_strided_slice %65 {offsets = [0, 0], sizes = [8, 128], strides = [1, 1]} : vector<8x512xf32> to vector<8x128xf32>
    %cst_32 = arith.constant 5.000000e-01 : f32
    %67 = vector.broadcast %cst_32 : f32 to vector<8x128xf32>
    %68 = arith.mulf %67, %66 : vector<8x128xf32>
    %69 = math.tanh %68 : vector<8x128xf32>
    %cst_33 = arith.constant 5.000000e-01 : f32
    %70 = vector.broadcast %cst_33 : f32 to vector<8x128xf32>
    %71 = arith.mulf %70, %69 : vector<8x128xf32>
    %cst_34 = arith.constant 5.000000e-01 : f32
    %72 = vector.broadcast %cst_34 : f32 to vector<8x128xf32>
    %73 = arith.addf %71, %72 : vector<8x128xf32>
    %74 = vector.extract_strided_slice %65 {offsets = [0, 128], sizes = [8, 128], strides = [1, 1]} : vector<8x512xf32> to vector<8x128xf32>
    %cst_35 = arith.constant 5.000000e-01 : f32
    %75 = vector.broadcast %cst_35 : f32 to vector<8x128xf32>
    %76 = arith.mulf %75, %74 : vector<8x128xf32>
    %77 = math.tanh %76 : vector<8x128xf32>
    %cst_36 = arith.constant 5.000000e-01 : f32
    %78 = vector.broadcast %cst_36 : f32 to vector<8x128xf32>
    %79 = arith.mulf %78, %77 : vector<8x128xf32>
    %cst_37 = arith.constant 5.000000e-01 : f32
    %80 = vector.broadcast %cst_37 : f32 to vector<8x128xf32>
    %81 = arith.addf %79, %80 : vector<8x128xf32>
    %82 = vector.extract_strided_slice %65 {offsets = [0, 256], sizes = [8, 128], strides = [1, 1]} : vector<8x512xf32> to vector<8x128xf32>
    %83 = math.tanh %82 : vector<8x128xf32>
    %84 = vector.extract_strided_slice %65 {offsets = [0, 384], sizes = [8, 128], strides = [1, 1]} : vector<8x512xf32> to vector<8x128xf32>
    %cst_38 = arith.constant 5.000000e-01 : f32
    %85 = vector.broadcast %cst_38 : f32 to vector<8x128xf32>
    %86 = arith.mulf %85, %84 : vector<8x128xf32>
    %87 = math.tanh %86 : vector<8x128xf32>
    %cst_39 = arith.constant 5.000000e-01 : f32
    %88 = vector.broadcast %cst_39 : f32 to vector<8x128xf32>
    %89 = arith.mulf %88, %87 : vector<8x128xf32>
    %cst_40 = arith.constant 5.000000e-01 : f32
    %90 = vector.broadcast %cst_40 : f32 to vector<8x128xf32>
    %91 = arith.addf %89, %90 : vector<8x128xf32>
    %92 = arith.mulf %81, %55 : vector<8x128xf32>
    %93 = arith.mulf %73, %83 : vector<8x128xf32>
    %94 = arith.addf %92, %93 : vector<8x128xf32>
    %95 = math.tanh %94 : vector<8x128xf32>
    %96 = arith.mulf %91, %95 : vector<8x128xf32>
    %97 = arith.index_cast %61 : i32 to index
    %c0_41 = arith.constant 0 : index
    %98 = vector.load %arg25[%97, %c0_41] : memref<64x128xf32, #tpu.memory_space<vmem>>, vector<8x128xf32>
    tpu.vector_store %arg25[%97, %c0_41], %96 {strides = array<i32>} : memref<64x128xf32, #tpu.memory_space<vmem>>, vector<8x128xf32>,
    %c2_i32 = arith.constant 2 : i32
    %c8_i32_42 = arith.constant 8 : i32
    %99 = arith.muli %c2_i32, %c8_i32_42 : i32
    %100 = tpu.assume_multiple %99, 8 : i32
    %101 = arith.index_cast %100 : i32 to index
    %c0_43 = arith.constant 0 : index
    %102 = vector.load %arg24[%101, %c0_43] : memref<64x512xf32, #tpu.memory_space<vmem>>, vector<8x512xf32>
    %cst_44 = arith.constant dense<0.000000e+00> : vector<8x512xf32>
    %103 = tpu.matmul %96, %19, %cst_44 {dimension_numbers = #tpu.dot_dimension_numbers<[1], [0], [0], [1], [0, 0, 1, 1], [], []>} : vector<8x128xf32>, vector<128x512xf32>, vector<8x512xf32> -> vector<8x512xf32>
    %104 = arith.addf %102, %103 : vector<8x512xf32>
    %105 = vector.extract_strided_slice %104 {offsets = [0, 0], sizes = [8, 128], strides = [1, 1]} : vector<8x512xf32> to vector<8x128xf32>
    %cst_45 = arith.constant 5.000000e-01 : f32
    %106 = vector.broadcast %cst_45 : f32 to vector<8x128xf32>
    %107 = arith.mulf %106, %105 : vector<8x128xf32>
    %108 = math.tanh %107 : vector<8x128xf32>
    %cst_46 = arith.constant 5.000000e-01 : f32
    %109 = vector.broadcast %cst_46 : f32 to vector<8x128xf32>
    %110 = arith.mulf %109, %108 : vector<8x128xf32>
    %cst_47 = arith.constant 5.000000e-01 : f32
    %111 = vector.broadcast %cst_47 : f32 to vector<8x128xf32>
    %112 = arith.addf %110, %111 : vector<8x128xf32>
    %113 = vector.extract_strided_slice %104 {offsets = [0, 128], sizes = [8, 128], strides = [1, 1]} : vector<8x512xf32> to vector<8x128xf32>
    %cst_48 = arith.constant 5.000000e-01 : f32
    %114 = vector.broadcast %cst_48 : f32 to vector<8x128xf32>
    %115 = arith.mulf %114, %113 : vector<8x128xf32>
    %116 = math.tanh %115 : vector<8x128xf32>
    %cst_49 = arith.constant 5.000000e-01 : f32
    %117 = vector.broadcast %cst_49 : f32 to vector<8x128xf32>
    %118 = arith.mulf %117, %116 : vector<8x128xf32>
    %cst_50 = arith.constant 5.000000e-01 : f32
    %119 = vector.broadcast %cst_50 : f32 to vector<8x128xf32>
    %120 = arith.addf %118, %119 : vector<8x128xf32>
    %121 = vector.extract_strided_slice %104 {offsets = [0, 256], sizes = [8, 128], strides = [1, 1]} : vector<8x512xf32> to vector<8x128xf32>
    %122 = math.tanh %121 : vector<8x128xf32>
    %123 = vector.extract_strided_slice %104 {offsets = [0, 384], sizes = [8, 128], strides = [1, 1]} : vector<8x512xf32> to vector<8x128xf32>
    %cst_51 = arith.constant 5.000000e-01 : f32
    %124 = vector.broadcast %cst_51 : f32 to vector<8x128xf32>
    %125 = arith.mulf %124, %123 : vector<8x128xf32>
    %126 = math.tanh %125 : vector<8x128xf32>
    %cst_52 = arith.constant 5.000000e-01 : f32
    %127 = vector.broadcast %cst_52 : f32 to vector<8x128xf32>
    %128 = arith.mulf %127, %126 : vector<8x128xf32>
    %cst_53 = arith.constant 5.000000e-01 : f32
    %129 = vector.broadcast %cst_53 : f32 to vector<8x128xf32>
    %130 = arith.addf %128, %129 : vector<8x128xf32>
    %131 = arith.mulf %120, %94 : vector<8x128xf32>
    %132 = arith.mulf %112, %122 : vector<8x128xf32>
    %133 = arith.addf %131, %132 : vector<8x128xf32>
    %134 = math.tanh %133 : vector<8x128xf32>
    %135 = arith.mulf %130, %134 : vector<8x128xf32>
    %136 = arith.index_cast %100 : i32 to index
    %c0_54 = arith.constant 0 : index
    %137 = vector.load %arg25[%136, %c0_54] : memref<64x128xf32, #tpu.memory_space<vmem>>, vector<8x128xf32>
    tpu.vector_store %arg25[%136, %c0_54], %135 {strides = array<i32>} : memref<64x128xf32, #tpu.memory_space<vmem>>, vector<8x128xf32>,
    %c3_i32 = arith.constant 3 : i32
    %c8_i32_55 = arith.constant 8 : i32
    %138 = arith.muli %c3_i32, %c8_i32_55 : i32
    %139 = tpu.assume_multiple %138, 8 : i32
    %140 = arith.index_cast %139 : i32 to index
    %c0_56 = arith.constant 0 : index
    %141 = vector.load %arg24[%140, %c0_56] : memref<64x512xf32, #tpu.memory_space<vmem>>, vector<8x512xf32>
    %cst_57 = arith.constant dense<0.000000e+00> : vector<8x512xf32>
    %142 = tpu.matmul %135, %19, %cst_57 {dimension_numbers = #tpu.dot_dimension_numbers<[1], [0], [0], [1], [0, 0, 1, 1], [], []>} : vector<8x128xf32>, vector<128x512xf32>, vector<8x512xf32> -> vector<8x512xf32>
    %143 = arith.addf %141, %142 : vector<8x512xf32>
    %144 = vector.extract_strided_slice %143 {offsets = [0, 0], sizes = [8, 128], strides = [1, 1]} : vector<8x512xf32> to vector<8x128xf32>
    %cst_58 = arith.constant 5.000000e-01 : f32
    %145 = vector.broadcast %cst_58 : f32 to vector<8x128xf32>
    %146 = arith.mulf %145, %144 : vector<8x128xf32>
    %147 = math.tanh %146 : vector<8x128xf32>
    %cst_59 = arith.constant 5.000000e-01 : f32
    %148 = vector.broadcast %cst_59 : f32 to vector<8x128xf32>
    %149 = arith.mulf %148, %147 : vector<8x128xf32>
    %cst_60 = arith.constant 5.000000e-01 : f32
    %150 = vector.broadcast %cst_60 : f32 to vector<8x128xf32>
    %151 = arith.addf %149, %150 : vector<8x128xf32>
    %152 = vector.extract_strided_slice %143 {offsets = [0, 128], sizes = [8, 128], strides = [1, 1]} : vector<8x512xf32> to vector<8x128xf32>
    %cst_61 = arith.constant 5.000000e-01 : f32
    %153 = vector.broadcast %cst_61 : f32 to vector<8x128xf32>
    %154 = arith.mulf %153, %152 : vector<8x128xf32>
    %155 = math.tanh %154 : vector<8x128xf32>
    %cst_62 = arith.constant 5.000000e-01 : f32
    %156 = vector.broadcast %cst_62 : f32 to vector<8x128xf32>
    %157 = arith.mulf %156, %155 : vector<8x128xf32>
    %cst_63 = arith.constant 5.000000e-01 : f32
    %158 = vector.broadcast %cst_63 : f32 to vector<8x128xf32>
    %159 = arith.addf %157, %158 : vector<8x128xf32>
    %160 = vector.extract_strided_slice %143 {offsets = [0, 256], sizes = [8, 128], strides = [1, 1]} : vector<8x512xf32> to vector<8x128xf32>
    %161 = math.tanh %160 : vector<8x128xf32>
    %162 = vector.extract_strided_slice %143 {offsets = [0, 384], sizes = [8, 128], strides = [1, 1]} : vector<8x512xf32> to vector<8x128xf32>
    %cst_64 = arith.constant 5.000000e-01 : f32
    %163 = vector.broadcast %cst_64 : f32 to vector<8x128xf32>
    %164 = arith.mulf %163, %162 : vector<8x128xf32>
    %165 = math.tanh %164 : vector<8x128xf32>
    %cst_65 = arith.constant 5.000000e-01 : f32
    %166 = vector.broadcast %cst_65 : f32 to vector<8x128xf32>
    %167 = arith.mulf %166, %165 : vector<8x128xf32>
    %cst_66 = arith.constant 5.000000e-01 : f32
    %168 = vector.broadcast %cst_66 : f32 to vector<8x128xf32>
    %169 = arith.addf %167, %168 : vector<8x128xf32>
    %170 = arith.mulf %159, %133 : vector<8x128xf32>
    %171 = arith.mulf %151, %161 : vector<8x128xf32>
    %172 = arith.addf %170, %171 : vector<8x128xf32>
    %173 = math.tanh %172 : vector<8x128xf32>
    %174 = arith.mulf %169, %173 : vector<8x128xf32>
    %175 = arith.index_cast %139 : i32 to index
    %c0_67 = arith.constant 0 : index
    %176 = vector.load %arg25[%175, %c0_67] : memref<64x128xf32, #tpu.memory_space<vmem>>, vector<8x128xf32>
    tpu.vector_store %arg25[%175, %c0_67], %174 {strides = array<i32>} : memref<64x128xf32, #tpu.memory_space<vmem>>, vector<8x128xf32>,
    %c4_i32 = arith.constant 4 : i32
    %c8_i32_68 = arith.constant 8 : i32
    %177 = arith.muli %c4_i32, %c8_i32_68 : i32
    %178 = tpu.assume_multiple %177, 8 : i32
    %179 = arith.index_cast %178 : i32 to index
    %c0_69 = arith.constant 0 : index
    %180 = vector.load %arg24[%179, %c0_69] : memref<64x512xf32, #tpu.memory_space<vmem>>, vector<8x512xf32>
    %cst_70 = arith.constant dense<0.000000e+00> : vector<8x512xf32>
    %181 = tpu.matmul %174, %19, %cst_70 {dimension_numbers = #tpu.dot_dimension_numbers<[1], [0], [0], [1], [0, 0, 1, 1], [], []>} : vector<8x128xf32>, vector<128x512xf32>, vector<8x512xf32> -> vector<8x512xf32>
    %182 = arith.addf %180, %181 : vector<8x512xf32>
    %183 = vector.extract_strided_slice %182 {offsets = [0, 0], sizes = [8, 128], strides = [1, 1]} : vector<8x512xf32> to vector<8x128xf32>
    %cst_71 = arith.constant 5.000000e-01 : f32
    %184 = vector.broadcast %cst_71 : f32 to vector<8x128xf32>
    %185 = arith.mulf %184, %183 : vector<8x128xf32>
    %186 = math.tanh %185 : vector<8x128xf32>
    %cst_72 = arith.constant 5.000000e-01 : f32
    %187 = vector.broadcast %cst_72 : f32 to vector<8x128xf32>
    %188 = arith.mulf %187, %186 : vector<8x128xf32>
    %cst_73 = arith.constant 5.000000e-01 : f32
    %189 = vector.broadcast %cst_73 : f32 to vector<8x128xf32>
    %190 = arith.addf %188, %189 : vector<8x128xf32>
    %191 = vector.extract_strided_slice %182 {offsets = [0, 128], sizes = [8, 128], strides = [1, 1]} : vector<8x512xf32> to vector<8x128xf32>
    %cst_74 = arith.constant 5.000000e-01 : f32
    %192 = vector.broadcast %cst_74 : f32 to vector<8x128xf32>
    %193 = arith.mulf %192, %191 : vector<8x128xf32>
    %194 = math.tanh %193 : vector<8x128xf32>
    %cst_75 = arith.constant 5.000000e-01 : f32
    %195 = vector.broadcast %cst_75 : f32 to vector<8x128xf32>
    %196 = arith.mulf %195, %194 : vector<8x128xf32>
    %cst_76 = arith.constant 5.000000e-01 : f32
    %197 = vector.broadcast %cst_76 : f32 to vector<8x128xf32>
    %198 = arith.addf %196, %197 : vector<8x128xf32>
    %199 = vector.extract_strided_slice %182 {offsets = [0, 256], sizes = [8, 128], strides = [1, 1]} : vector<8x512xf32> to vector<8x128xf32>
    %200 = math.tanh %199 : vector<8x128xf32>
    %201 = vector.extract_strided_slice %182 {offsets = [0, 384], sizes = [8, 128], strides = [1, 1]} : vector<8x512xf32> to vector<8x128xf32>
    %cst_77 = arith.constant 5.000000e-01 : f32
    %202 = vector.broadcast %cst_77 : f32 to vector<8x128xf32>
    %203 = arith.mulf %202, %201 : vector<8x128xf32>
    %204 = math.tanh %203 : vector<8x128xf32>
    %cst_78 = arith.constant 5.000000e-01 : f32
    %205 = vector.broadcast %cst_78 : f32 to vector<8x128xf32>
    %206 = arith.mulf %205, %204 : vector<8x128xf32>
    %cst_79 = arith.constant 5.000000e-01 : f32
    %207 = vector.broadcast %cst_79 : f32 to vector<8x128xf32>
    %208 = arith.addf %206, %207 : vector<8x128xf32>
    %209 = arith.mulf %198, %172 : vector<8x128xf32>
    %210 = arith.mulf %190, %200 : vector<8x128xf32>
    %211 = arith.addf %209, %210 : vector<8x128xf32>
    %212 = math.tanh %211 : vector<8x128xf32>
    %213 = arith.mulf %208, %212 : vector<8x128xf32>
    %214 = arith.index_cast %178 : i32 to index
    %c0_80 = arith.constant 0 : index
    %215 = vector.load %arg25[%214, %c0_80] : memref<64x128xf32, #tpu.memory_space<vmem>>, vector<8x128xf32>
    tpu.vector_store %arg25[%214, %c0_80], %213 {strides = array<i32>} : memref<64x128xf32, #tpu.memory_space<vmem>>, vector<8x128xf32>,
    %c5_i32 = arith.constant 5 : i32
    %c8_i32_81 = arith.constant 8 : i32
    %216 = arith.muli %c5_i32, %c8_i32_81 : i32
    %217 = tpu.assume_multiple %216, 8 : i32
    %218 = arith.index_cast %217 : i32 to index
    %c0_82 = arith.constant 0 : index
    %219 = vector.load %arg24[%218, %c0_82] : memref<64x512xf32, #tpu.memory_space<vmem>>, vector<8x512xf32>
    %cst_83 = arith.constant dense<0.000000e+00> : vector<8x512xf32>
    %220 = tpu.matmul %213, %19, %cst_83 {dimension_numbers = #tpu.dot_dimension_numbers<[1], [0], [0], [1], [0, 0, 1, 1], [], []>} : vector<8x128xf32>, vector<128x512xf32>, vector<8x512xf32> -> vector<8x512xf32>
    %221 = arith.addf %219, %220 : vector<8x512xf32>
    %222 = vector.extract_strided_slice %221 {offsets = [0, 0], sizes = [8, 128], strides = [1, 1]} : vector<8x512xf32> to vector<8x128xf32>
    %cst_84 = arith.constant 5.000000e-01 : f32
    %223 = vector.broadcast %cst_84 : f32 to vector<8x128xf32>
    %224 = arith.mulf %223, %222 : vector<8x128xf32>
    %225 = math.tanh %224 : vector<8x128xf32>
    %cst_85 = arith.constant 5.000000e-01 : f32
    %226 = vector.broadcast %cst_85 : f32 to vector<8x128xf32>
    %227 = arith.mulf %226, %225 : vector<8x128xf32>
    %cst_86 = arith.constant 5.000000e-01 : f32
    %228 = vector.broadcast %cst_86 : f32 to vector<8x128xf32>
    %229 = arith.addf %227, %228 : vector<8x128xf32>
    %230 = vector.extract_strided_slice %221 {offsets = [0, 128], sizes = [8, 128], strides = [1, 1]} : vector<8x512xf32> to vector<8x128xf32>
    %cst_87 = arith.constant 5.000000e-01 : f32
    %231 = vector.broadcast %cst_87 : f32 to vector<8x128xf32>
    %232 = arith.mulf %231, %230 : vector<8x128xf32>
    %233 = math.tanh %232 : vector<8x128xf32>
    %cst_88 = arith.constant 5.000000e-01 : f32
    %234 = vector.broadcast %cst_88 : f32 to vector<8x128xf32>
    %235 = arith.mulf %234, %233 : vector<8x128xf32>
    %cst_89 = arith.constant 5.000000e-01 : f32
    %236 = vector.broadcast %cst_89 : f32 to vector<8x128xf32>
    %237 = arith.addf %235, %236 : vector<8x128xf32>
    %238 = vector.extract_strided_slice %221 {offsets = [0, 256], sizes = [8, 128], strides = [1, 1]} : vector<8x512xf32> to vector<8x128xf32>
    %239 = math.tanh %238 : vector<8x128xf32>
    %240 = vector.extract_strided_slice %221 {offsets = [0, 384], sizes = [8, 128], strides = [1, 1]} : vector<8x512xf32> to vector<8x128xf32>
    %cst_90 = arith.constant 5.000000e-01 : f32
    %241 = vector.broadcast %cst_90 : f32 to vector<8x128xf32>
    %242 = arith.mulf %241, %240 : vector<8x128xf32>
    %243 = math.tanh %242 : vector<8x128xf32>
    %cst_91 = arith.constant 5.000000e-01 : f32
    %244 = vector.broadcast %cst_91 : f32 to vector<8x128xf32>
    %245 = arith.mulf %244, %243 : vector<8x128xf32>
    %cst_92 = arith.constant 5.000000e-01 : f32
    %246 = vector.broadcast %cst_92 : f32 to vector<8x128xf32>
    %247 = arith.addf %245, %246 : vector<8x128xf32>
    %248 = arith.mulf %237, %211 : vector<8x128xf32>
    %249 = arith.mulf %229, %239 : vector<8x128xf32>
    %250 = arith.addf %248, %249 : vector<8x128xf32>
    %251 = math.tanh %250 : vector<8x128xf32>
    %252 = arith.mulf %247, %251 : vector<8x128xf32>
    %253 = arith.index_cast %217 : i32 to index
    %c0_93 = arith.constant 0 : index
    %254 = vector.load %arg25[%253, %c0_93] : memref<64x128xf32, #tpu.memory_space<vmem>>, vector<8x128xf32>
    tpu.vector_store %arg25[%253, %c0_93], %252 {strides = array<i32>} : memref<64x128xf32, #tpu.memory_space<vmem>>, vector<8x128xf32>,
    %c6_i32 = arith.constant 6 : i32
    %c8_i32_94 = arith.constant 8 : i32
    %255 = arith.muli %c6_i32, %c8_i32_94 : i32
    %256 = tpu.assume_multiple %255, 8 : i32
    %257 = arith.index_cast %256 : i32 to index
    %c0_95 = arith.constant 0 : index
    %258 = vector.load %arg24[%257, %c0_95] : memref<64x512xf32, #tpu.memory_space<vmem>>, vector<8x512xf32>
    %cst_96 = arith.constant dense<0.000000e+00> : vector<8x512xf32>
    %259 = tpu.matmul %252, %19, %cst_96 {dimension_numbers = #tpu.dot_dimension_numbers<[1], [0], [0], [1], [0, 0, 1, 1], [], []>} : vector<8x128xf32>, vector<128x512xf32>, vector<8x512xf32> -> vector<8x512xf32>
    %260 = arith.addf %258, %259 : vector<8x512xf32>
    %261 = vector.extract_strided_slice %260 {offsets = [0, 0], sizes = [8, 128], strides = [1, 1]} : vector<8x512xf32> to vector<8x128xf32>
    %cst_97 = arith.constant 5.000000e-01 : f32
    %262 = vector.broadcast %cst_97 : f32 to vector<8x128xf32>
    %263 = arith.mulf %262, %261 : vector<8x128xf32>
    %264 = math.tanh %263 : vector<8x128xf32>
    %cst_98 = arith.constant 5.000000e-01 : f32
    %265 = vector.broadcast %cst_98 : f32 to vector<8x128xf32>
    %266 = arith.mulf %265, %264 : vector<8x128xf32>
    %cst_99 = arith.constant 5.000000e-01 : f32
    %267 = vector.broadcast %cst_99 : f32 to vector<8x128xf32>
    %268 = arith.addf %266, %267 : vector<8x128xf32>
    %269 = vector.extract_strided_slice %260 {offsets = [0, 128], sizes = [8, 128], strides = [1, 1]} : vector<8x512xf32> to vector<8x128xf32>
    %cst_100 = arith.constant 5.000000e-01 : f32
    %270 = vector.broadcast %cst_100 : f32 to vector<8x128xf32>
    %271 = arith.mulf %270, %269 : vector<8x128xf32>
    %272 = math.tanh %271 : vector<8x128xf32>
    %cst_101 = arith.constant 5.000000e-01 : f32
    %273 = vector.broadcast %cst_101 : f32 to vector<8x128xf32>
    %274 = arith.mulf %273, %272 : vector<8x128xf32>
    %cst_102 = arith.constant 5.000000e-01 : f32
    %275 = vector.broadcast %cst_102 : f32 to vector<8x128xf32>
    %276 = arith.addf %274, %275 : vector<8x128xf32>
    %277 = vector.extract_strided_slice %260 {offsets = [0, 256], sizes = [8, 128], strides = [1, 1]} : vector<8x512xf32> to vector<8x128xf32>
    %278 = math.tanh %277 : vector<8x128xf32>
    %279 = vector.extract_strided_slice %260 {offsets = [0, 384], sizes = [8, 128], strides = [1, 1]} : vector<8x512xf32> to vector<8x128xf32>
    %cst_103 = arith.constant 5.000000e-01 : f32
    %280 = vector.broadcast %cst_103 : f32 to vector<8x128xf32>
    %281 = arith.mulf %280, %279 : vector<8x128xf32>
    %282 = math.tanh %281 : vector<8x128xf32>
    %cst_104 = arith.constant 5.000000e-01 : f32
    %283 = vector.broadcast %cst_104 : f32 to vector<8x128xf32>
    %284 = arith.mulf %283, %282 : vector<8x128xf32>
    %cst_105 = arith.constant 5.000000e-01 : f32
    %285 = vector.broadcast %cst_105 : f32 to vector<8x128xf32>
    %286 = arith.addf %284, %285 : vector<8x128xf32>
    %287 = arith.mulf %276, %250 : vector<8x128xf32>
    %288 = arith.mulf %268, %278 : vector<8x128xf32>
    %289 = arith.addf %287, %288 : vector<8x128xf32>
    %290 = math.tanh %289 : vector<8x128xf32>
    %291 = arith.mulf %286, %290 : vector<8x128xf32>
    %292 = arith.index_cast %256 : i32 to index
    %c0_106 = arith.constant 0 : index
    %293 = vector.load %arg25[%292, %c0_106] : memref<64x128xf32, #tpu.memory_space<vmem>>, vector<8x128xf32>
    tpu.vector_store %arg25[%292, %c0_106], %291 {strides = array<i32>} : memref<64x128xf32, #tpu.memory_space<vmem>>, vector<8x128xf32>,
    %c7_i32 = arith.constant 7 : i32
    %c8_i32_107 = arith.constant 8 : i32
    %294 = arith.muli %c7_i32, %c8_i32_107 : i32
    %295 = tpu.assume_multiple %294, 8 : i32
    %296 = arith.index_cast %295 : i32 to index
    %c0_108 = arith.constant 0 : index
    %297 = vector.load %arg24[%296, %c0_108] : memref<64x512xf32, #tpu.memory_space<vmem>>, vector<8x512xf32>
    %cst_109 = arith.constant dense<0.000000e+00> : vector<8x512xf32>
    %298 = tpu.matmul %291, %19, %cst_109 {dimension_numbers = #tpu.dot_dimension_numbers<[1], [0], [0], [1], [0, 0, 1, 1], [], []>} : vector<8x128xf32>, vector<128x512xf32>, vector<8x512xf32> -> vector<8x512xf32>
    %299 = arith.addf %297, %298 : vector<8x512xf32>
    %300 = vector.extract_strided_slice %299 {offsets = [0, 0], sizes = [8, 128], strides = [1, 1]} : vector<8x512xf32> to vector<8x128xf32>
    %cst_110 = arith.constant 5.000000e-01 : f32
    %301 = vector.broadcast %cst_110 : f32 to vector<8x128xf32>
    %302 = arith.mulf %301, %300 : vector<8x128xf32>
    %303 = math.tanh %302 : vector<8x128xf32>
    %cst_111 = arith.constant 5.000000e-01 : f32
    %304 = vector.broadcast %cst_111 : f32 to vector<8x128xf32>
    %305 = arith.mulf %304, %303 : vector<8x128xf32>
    %cst_112 = arith.constant 5.000000e-01 : f32
    %306 = vector.broadcast %cst_112 : f32 to vector<8x128xf32>
    %307 = arith.addf %305, %306 : vector<8x128xf32>
    %308 = vector.extract_strided_slice %299 {offsets = [0, 128], sizes = [8, 128], strides = [1, 1]} : vector<8x512xf32> to vector<8x128xf32>
    %cst_113 = arith.constant 5.000000e-01 : f32
    %309 = vector.broadcast %cst_113 : f32 to vector<8x128xf32>
    %310 = arith.mulf %309, %308 : vector<8x128xf32>
    %311 = math.tanh %310 : vector<8x128xf32>
    %cst_114 = arith.constant 5.000000e-01 : f32
    %312 = vector.broadcast %cst_114 : f32 to vector<8x128xf32>
    %313 = arith.mulf %312, %311 : vector<8x128xf32>
    %cst_115 = arith.constant 5.000000e-01 : f32
    %314 = vector.broadcast %cst_115 : f32 to vector<8x128xf32>
    %315 = arith.addf %313, %314 : vector<8x128xf32>
    %316 = vector.extract_strided_slice %299 {offsets = [0, 256], sizes = [8, 128], strides = [1, 1]} : vector<8x512xf32> to vector<8x128xf32>
    %317 = math.tanh %316 : vector<8x128xf32>
    %318 = vector.extract_strided_slice %299 {offsets = [0, 384], sizes = [8, 128], strides = [1, 1]} : vector<8x512xf32> to vector<8x128xf32>
    %cst_116 = arith.constant 5.000000e-01 : f32
    %319 = vector.broadcast %cst_116 : f32 to vector<8x128xf32>
    %320 = arith.mulf %319, %318 : vector<8x128xf32>
    %321 = math.tanh %320 : vector<8x128xf32>
    %cst_117 = arith.constant 5.000000e-01 : f32
    %322 = vector.broadcast %cst_117 : f32 to vector<8x128xf32>
    %323 = arith.mulf %322, %321 : vector<8x128xf32>
    %cst_118 = arith.constant 5.000000e-01 : f32
    %324 = vector.broadcast %cst_118 : f32 to vector<8x128xf32>
    %325 = arith.addf %323, %324 : vector<8x128xf32>
    %326 = arith.mulf %315, %289 : vector<8x128xf32>
    %327 = arith.mulf %307, %317 : vector<8x128xf32>
    %328 = arith.addf %326, %327 : vector<8x128xf32>
    %329 = math.tanh %328 : vector<8x128xf32>
    %330 = arith.mulf %325, %329 : vector<8x128xf32>
    %331 = arith.index_cast %295 : i32 to index
    %c0_119 = arith.constant 0 : index
    %332 = vector.load %arg25[%331, %c0_119] : memref<64x128xf32, #tpu.memory_space<vmem>>, vector<8x128xf32>
    tpu.vector_store %arg25[%331, %c0_119], %330 {strides = array<i32>} : memref<64x128xf32, #tpu.memory_space<vmem>>, vector<8x128xf32>,
    %c8_i32_120 = arith.constant 8 : i32
    %c0_121 = arith.constant 0 : index
    %c0_122 = arith.constant 0 : index
    %c0_123 = arith.constant 0 : index
    %333 = vector.load %arg22[%c0_121, %c0_122, %c0_123] : memref<3x8x128xf32, #tpu.memory_space<vmem>>, vector<1x8x128xf32>
    %334 = vector.shape_cast %333 : vector<1x8x128xf32> to vector<8x128xf32>
    %335 = vector.shape_cast %330 : vector<8x128xf32> to vector<1x8x128xf32>
    tpu.vector_store %arg22[%c0_121, %c0_122, %c0_123], %335 {strides = array<i32>} : memref<3x8x128xf32, #tpu.memory_space<vmem>>, vector<1x8x128xf32>,
    %c0_124 = arith.constant 0 : index
    %c0_125 = arith.constant 0 : index
    %c0_126 = arith.constant 0 : index
    %336 = vector.load %arg23[%c0_124, %c0_125, %c0_126] : memref<3x8x128xf32, #tpu.memory_space<vmem>>, vector<1x8x128xf32>
    %337 = vector.shape_cast %336 : vector<1x8x128xf32> to vector<8x128xf32>
    %338 = vector.shape_cast %328 : vector<8x128xf32> to vector<1x8x128xf32>
    tpu.vector_store %arg23[%c0_124, %c0_125, %c0_126], %338 {strides = array<i32>} : memref<3x8x128xf32, #tpu.memory_space<vmem>>, vector<1x8x128xf32>,
    %c0_127 = arith.constant 0 : index
    %c0_128 = arith.constant 0 : index
    %339 = vector.load %arg25[%c0_127, %c0_128] : memref<64x128xf32, #tpu.memory_space<vmem>>, vector<64x128xf32>
    %c0_129 = arith.constant 0 : index
    %c0_130 = arith.constant 0 : index
    %340 = vector.load %arg7[%c0_129, %c0_130] : memref<128x512xf32, #tpu.memory_space<vmem>>, vector<128x512xf32>
    %cst_131 = arith.constant dense<0.000000e+00> : vector<64x512xf32>
    %341 = tpu.matmul %339, %340, %cst_131 {dimension_numbers = #tpu.dot_dimension_numbers<[1], [0], [0], [1], [0, 0, 1, 1], [], []>} : vector<64x128xf32>, vector<128x512xf32>, vector<64x512xf32> -> vector<64x512xf32>
    %c0_132 = arith.constant 0 : index
    %c0_133 = arith.constant 0 : index
    %342 = vector.load %arg9[%c0_132, %c0_133] : memref<1x512xf32, #tpu.memory_space<vmem>>, vector<1x512xf32>
    %343 = vector.broadcast %342 : vector<1x512xf32> to vector<64x512xf32>
    %344 = arith.addf %341, %343 : vector<64x512xf32>
    %c0_134 = arith.constant 0 : index
    %c0_135 = arith.constant 0 : index
    %345 = vector.load %arg24[%c0_134, %c0_135] : memref<64x512xf32, #tpu.memory_space<vmem>>, vector<64x512xf32>
    tpu.vector_store %arg24[%c0_134, %c0_135], %344 {strides = array<i32>} : memref<64x512xf32, #tpu.memory_space<vmem>>, vector<64x512xf32>,
    %c0_136 = arith.constant 0 : index
    %c0_137 = arith.constant 0 : index
    %346 = vector.load %arg8[%c0_136, %c0_137] : memref<128x512xf32, #tpu.memory_space<vmem>>, vector<128x512xf32>
    %cst_138 = arith.constant 0.000000e+00 : f32
    %347 = vector.broadcast %cst_138 : f32 to vector<8x128xf32>
    %c0_i32_139 = arith.constant 0 : i32
    %c8_i32_140 = arith.constant 8 : i32
    %348 = arith.muli %c0_i32_139, %c8_i32_140 : i32
    %349 = tpu.assume_multiple %348, 8 : i32
    %350 = arith.index_cast %349 : i32 to index
    %c0_141 = arith.constant 0 : index
    %351 = vector.load %arg24[%350, %c0_141] : memref<64x512xf32, #tpu.memory_space<vmem>>, vector<8x512xf32>
    %cst_142 = arith.constant dense<0.000000e+00> : vector<8x512xf32>
    %352 = tpu.matmul %347, %346, %cst_142 {dimension_numbers = #tpu.dot_dimension_numbers<[1], [0], [0], [1], [0, 0, 1, 1], [], []>} : vector<8x128xf32>, vector<128x512xf32>, vector<8x512xf32> -> vector<8x512xf32>
    %353 = arith.addf %351, %352 : vector<8x512xf32>
    %354 = vector.extract_strided_slice %353 {offsets = [0, 0], sizes = [8, 128], strides = [1, 1]} : vector<8x512xf32> to vector<8x128xf32>
    %cst_143 = arith.constant 5.000000e-01 : f32
    %355 = vector.broadcast %cst_143 : f32 to vector<8x128xf32>
    %356 = arith.mulf %355, %354 : vector<8x128xf32>
    %357 = math.tanh %356 : vector<8x128xf32>
    %cst_144 = arith.constant 5.000000e-01 : f32
    %358 = vector.broadcast %cst_144 : f32 to vector<8x128xf32>
    %359 = arith.mulf %358, %357 : vector<8x128xf32>
    %cst_145 = arith.constant 5.000000e-01 : f32
    %360 = vector.broadcast %cst_145 : f32 to vector<8x128xf32>
    %361 = arith.addf %359, %360 : vector<8x128xf32>
    %362 = vector.extract_strided_slice %353 {offsets = [0, 128], sizes = [8, 128], strides = [1, 1]} : vector<8x512xf32> to vector<8x128xf32>
    %cst_146 = arith.constant 5.000000e-01 : f32
    %363 = vector.broadcast %cst_146 : f32 to vector<8x128xf32>
    %364 = arith.mulf %363, %362 : vector<8x128xf32>
    %365 = math.tanh %364 : vector<8x128xf32>
    %cst_147 = arith.constant 5.000000e-01 : f32
    %366 = vector.broadcast %cst_147 : f32 to vector<8x128xf32>
    %367 = arith.mulf %366, %365 : vector<8x128xf32>
    %cst_148 = arith.constant 5.000000e-01 : f32
    %368 = vector.broadcast %cst_148 : f32 to vector<8x128xf32>
    %369 = arith.addf %367, %368 : vector<8x128xf32>
    %370 = vector.extract_strided_slice %353 {offsets = [0, 256], sizes = [8, 128], strides = [1, 1]} : vector<8x512xf32> to vector<8x128xf32>
    %371 = math.tanh %370 : vector<8x128xf32>
    %372 = vector.extract_strided_slice %353 {offsets = [0, 384], sizes = [8, 128], strides = [1, 1]} : vector<8x512xf32> to vector<8x128xf32>
    %cst_149 = arith.constant 5.000000e-01 : f32
    %373 = vector.broadcast %cst_149 : f32 to vector<8x128xf32>
    %374 = arith.mulf %373, %372 : vector<8x128xf32>
    %375 = math.tanh %374 : vector<8x128xf32>
    %cst_150 = arith.constant 5.000000e-01 : f32
    %376 = vector.broadcast %cst_150 : f32 to vector<8x128xf32>
    %377 = arith.mulf %376, %375 : vector<8x128xf32>
    %cst_151 = arith.constant 5.000000e-01 : f32
    %378 = vector.broadcast %cst_151 : f32 to vector<8x128xf32>
    %379 = arith.addf %377, %378 : vector<8x128xf32>
    %380 = arith.mulf %369, %347 : vector<8x128xf32>
    %381 = arith.mulf %361, %371 : vector<8x128xf32>
    %382 = arith.addf %380, %381 : vector<8x128xf32>
    %383 = math.tanh %382 : vector<8x128xf32>
    %384 = arith.mulf %379, %383 : vector<8x128xf32>
    %385 = arith.index_cast %349 : i32 to index
    %c0_152 = arith.constant 0 : index
    %386 = vector.load %arg25[%385, %c0_152] : memref<64x128xf32, #tpu.memory_space<vmem>>, vector<8x128xf32>
    tpu.vector_store %arg25[%385, %c0_152], %384 {strides = array<i32>} : memref<64x128xf32, #tpu.memory_space<vmem>>, vector<8x128xf32>,
    %c1_i32_153 = arith.constant 1 : i32
    %c8_i32_154 = arith.constant 8 : i32
    %387 = arith.muli %c1_i32_153, %c8_i32_154 : i32
    %388 = tpu.assume_multiple %387, 8 : i32
    %389 = arith.index_cast %388 : i32 to index
    %c0_155 = arith.constant 0 : index
    %390 = vector.load %arg24[%389, %c0_155] : memref<64x512xf32, #tpu.memory_space<vmem>>, vector<8x512xf32>
    %cst_156 = arith.constant dense<0.000000e+00> : vector<8x512xf32>
    %391 = tpu.matmul %384, %346, %cst_156 {dimension_numbers = #tpu.dot_dimension_numbers<[1], [0], [0], [1], [0, 0, 1, 1], [], []>} : vector<8x128xf32>, vector<128x512xf32>, vector<8x512xf32> -> vector<8x512xf32>
    %392 = arith.addf %390, %391 : vector<8x512xf32>
    %393 = vector.extract_strided_slice %392 {offsets = [0, 0], sizes = [8, 128], strides = [1, 1]} : vector<8x512xf32> to vector<8x128xf32>
    %cst_157 = arith.constant 5.000000e-01 : f32
    %394 = vector.broadcast %cst_157 : f32 to vector<8x128xf32>
    %395 = arith.mulf %394, %393 : vector<8x128xf32>
    %396 = math.tanh %395 : vector<8x128xf32>
    %cst_158 = arith.constant 5.000000e-01 : f32
    %397 = vector.broadcast %cst_158 : f32 to vector<8x128xf32>
    %398 = arith.mulf %397, %396 : vector<8x128xf32>
    %cst_159 = arith.constant 5.000000e-01 : f32
    %399 = vector.broadcast %cst_159 : f32 to vector<8x128xf32>
    %400 = arith.addf %398, %399 : vector<8x128xf32>
    %401 = vector.extract_strided_slice %392 {offsets = [0, 128], sizes = [8, 128], strides = [1, 1]} : vector<8x512xf32> to vector<8x128xf32>
    %cst_160 = arith.constant 5.000000e-01 : f32
    %402 = vector.broadcast %cst_160 : f32 to vector<8x128xf32>
    %403 = arith.mulf %402, %401 : vector<8x128xf32>
    %404 = math.tanh %403 : vector<8x128xf32>
    %cst_161 = arith.constant 5.000000e-01 : f32
    %405 = vector.broadcast %cst_161 : f32 to vector<8x128xf32>
    %406 = arith.mulf %405, %404 : vector<8x128xf32>
    %cst_162 = arith.constant 5.000000e-01 : f32
    %407 = vector.broadcast %cst_162 : f32 to vector<8x128xf32>
    %408 = arith.addf %406, %407 : vector<8x128xf32>
    %409 = vector.extract_strided_slice %392 {offsets = [0, 256], sizes = [8, 128], strides = [1, 1]} : vector<8x512xf32> to vector<8x128xf32>
    %410 = math.tanh %409 : vector<8x128xf32>
    %411 = vector.extract_strided_slice %392 {offsets = [0, 384], sizes = [8, 128], strides = [1, 1]} : vector<8x512xf32> to vector<8x128xf32>
    %cst_163 = arith.constant 5.000000e-01 : f32
    %412 = vector.broadcast %cst_163 : f32 to vector<8x128xf32>
    %413 = arith.mulf %412, %411 : vector<8x128xf32>
    %414 = math.tanh %413 : vector<8x128xf32>
    %cst_164 = arith.constant 5.000000e-01 : f32
    %415 = vector.broadcast %cst_164 : f32 to vector<8x128xf32>
    %416 = arith.mulf %415, %414 : vector<8x128xf32>
    %cst_165 = arith.constant 5.000000e-01 : f32
    %417 = vector.broadcast %cst_165 : f32 to vector<8x128xf32>
    %418 = arith.addf %416, %417 : vector<8x128xf32>
    %419 = arith.mulf %408, %382 : vector<8x128xf32>
    %420 = arith.mulf %400, %410 : vector<8x128xf32>
    %421 = arith.addf %419, %420 : vector<8x128xf32>
    %422 = math.tanh %421 : vector<8x128xf32>
    %423 = arith.mulf %418, %422 : vector<8x128xf32>
    %424 = arith.index_cast %388 : i32 to index
    %c0_166 = arith.constant 0 : index
    %425 = vector.load %arg25[%424, %c0_166] : memref<64x128xf32, #tpu.memory_space<vmem>>, vector<8x128xf32>
    tpu.vector_store %arg25[%424, %c0_166], %423 {strides = array<i32>} : memref<64x128xf32, #tpu.memory_space<vmem>>, vector<8x128xf32>,
    %c2_i32_167 = arith.constant 2 : i32
    %c8_i32_168 = arith.constant 8 : i32
    %426 = arith.muli %c2_i32_167, %c8_i32_168 : i32
    %427 = tpu.assume_multiple %426, 8 : i32
    %428 = arith.index_cast %427 : i32 to index
    %c0_169 = arith.constant 0 : index
    %429 = vector.load %arg24[%428, %c0_169] : memref<64x512xf32, #tpu.memory_space<vmem>>, vector<8x512xf32>
    %cst_170 = arith.constant dense<0.000000e+00> : vector<8x512xf32>
    %430 = tpu.matmul %423, %346, %cst_170 {dimension_numbers = #tpu.dot_dimension_numbers<[1], [0], [0], [1], [0, 0, 1, 1], [], []>} : vector<8x128xf32>, vector<128x512xf32>, vector<8x512xf32> -> vector<8x512xf32>
    %431 = arith.addf %429, %430 : vector<8x512xf32>
    %432 = vector.extract_strided_slice %431 {offsets = [0, 0], sizes = [8, 128], strides = [1, 1]} : vector<8x512xf32> to vector<8x128xf32>
    %cst_171 = arith.constant 5.000000e-01 : f32
    %433 = vector.broadcast %cst_171 : f32 to vector<8x128xf32>
    %434 = arith.mulf %433, %432 : vector<8x128xf32>
    %435 = math.tanh %434 : vector<8x128xf32>
    %cst_172 = arith.constant 5.000000e-01 : f32
    %436 = vector.broadcast %cst_172 : f32 to vector<8x128xf32>
    %437 = arith.mulf %436, %435 : vector<8x128xf32>
    %cst_173 = arith.constant 5.000000e-01 : f32
    %438 = vector.broadcast %cst_173 : f32 to vector<8x128xf32>
    %439 = arith.addf %437, %438 : vector<8x128xf32>
    %440 = vector.extract_strided_slice %431 {offsets = [0, 128], sizes = [8, 128], strides = [1, 1]} : vector<8x512xf32> to vector<8x128xf32>
    %cst_174 = arith.constant 5.000000e-01 : f32
    %441 = vector.broadcast %cst_174 : f32 to vector<8x128xf32>
    %442 = arith.mulf %441, %440 : vector<8x128xf32>
    %443 = math.tanh %442 : vector<8x128xf32>
    %cst_175 = arith.constant 5.000000e-01 : f32
    %444 = vector.broadcast %cst_175 : f32 to vector<8x128xf32>
    %445 = arith.mulf %444, %443 : vector<8x128xf32>
    %cst_176 = arith.constant 5.000000e-01 : f32
    %446 = vector.broadcast %cst_176 : f32 to vector<8x128xf32>
    %447 = arith.addf %445, %446 : vector<8x128xf32>
    %448 = vector.extract_strided_slice %431 {offsets = [0, 256], sizes = [8, 128], strides = [1, 1]} : vector<8x512xf32> to vector<8x128xf32>
    %449 = math.tanh %448 : vector<8x128xf32>
    %450 = vector.extract_strided_slice %431 {offsets = [0, 384], sizes = [8, 128], strides = [1, 1]} : vector<8x512xf32> to vector<8x128xf32>
    %cst_177 = arith.constant 5.000000e-01 : f32
    %451 = vector.broadcast %cst_177 : f32 to vector<8x128xf32>
    %452 = arith.mulf %451, %450 : vector<8x128xf32>
    %453 = math.tanh %452 : vector<8x128xf32>
    %cst_178 = arith.constant 5.000000e-01 : f32
    %454 = vector.broadcast %cst_178 : f32 to vector<8x128xf32>
    %455 = arith.mulf %454, %453 : vector<8x128xf32>
    %cst_179 = arith.constant 5.000000e-01 : f32
    %456 = vector.broadcast %cst_179 : f32 to vector<8x128xf32>
    %457 = arith.addf %455, %456 : vector<8x128xf32>
    %458 = arith.mulf %447, %421 : vector<8x128xf32>
    %459 = arith.mulf %439, %449 : vector<8x128xf32>
    %460 = arith.addf %458, %459 : vector<8x128xf32>
    %461 = math.tanh %460 : vector<8x128xf32>
    %462 = arith.mulf %457, %461 : vector<8x128xf32>
    %463 = arith.index_cast %427 : i32 to index
    %c0_180 = arith.constant 0 : index
    %464 = vector.load %arg25[%463, %c0_180] : memref<64x128xf32, #tpu.memory_space<vmem>>, vector<8x128xf32>
    tpu.vector_store %arg25[%463, %c0_180], %462 {strides = array<i32>} : memref<64x128xf32, #tpu.memory_space<vmem>>, vector<8x128xf32>,
    %c3_i32_181 = arith.constant 3 : i32
    %c8_i32_182 = arith.constant 8 : i32
    %465 = arith.muli %c3_i32_181, %c8_i32_182 : i32
    %466 = tpu.assume_multiple %465, 8 : i32
    %467 = arith.index_cast %466 : i32 to index
    %c0_183 = arith.constant 0 : index
    %468 = vector.load %arg24[%467, %c0_183] : memref<64x512xf32, #tpu.memory_space<vmem>>, vector<8x512xf32>
    %cst_184 = arith.constant dense<0.000000e+00> : vector<8x512xf32>
    %469 = tpu.matmul %462, %346, %cst_184 {dimension_numbers = #tpu.dot_dimension_numbers<[1], [0], [0], [1], [0, 0, 1, 1], [], []>} : vector<8x128xf32>, vector<128x512xf32>, vector<8x512xf32> -> vector<8x512xf32>
    %470 = arith.addf %468, %469 : vector<8x512xf32>
    %471 = vector.extract_strided_slice %470 {offsets = [0, 0], sizes = [8, 128], strides = [1, 1]} : vector<8x512xf32> to vector<8x128xf32>
    %cst_185 = arith.constant 5.000000e-01 : f32
    %472 = vector.broadcast %cst_185 : f32 to vector<8x128xf32>
    %473 = arith.mulf %472, %471 : vector<8x128xf32>
    %474 = math.tanh %473 : vector<8x128xf32>
    %cst_186 = arith.constant 5.000000e-01 : f32
    %475 = vector.broadcast %cst_186 : f32 to vector<8x128xf32>
    %476 = arith.mulf %475, %474 : vector<8x128xf32>
    %cst_187 = arith.constant 5.000000e-01 : f32
    %477 = vector.broadcast %cst_187 : f32 to vector<8x128xf32>
    %478 = arith.addf %476, %477 : vector<8x128xf32>
    %479 = vector.extract_strided_slice %470 {offsets = [0, 128], sizes = [8, 128], strides = [1, 1]} : vector<8x512xf32> to vector<8x128xf32>
    %cst_188 = arith.constant 5.000000e-01 : f32
    %480 = vector.broadcast %cst_188 : f32 to vector<8x128xf32>
    %481 = arith.mulf %480, %479 : vector<8x128xf32>
    %482 = math.tanh %481 : vector<8x128xf32>
    %cst_189 = arith.constant 5.000000e-01 : f32
    %483 = vector.broadcast %cst_189 : f32 to vector<8x128xf32>
    %484 = arith.mulf %483, %482 : vector<8x128xf32>
    %cst_190 = arith.constant 5.000000e-01 : f32
    %485 = vector.broadcast %cst_190 : f32 to vector<8x128xf32>
    %486 = arith.addf %484, %485 : vector<8x128xf32>
    %487 = vector.extract_strided_slice %470 {offsets = [0, 256], sizes = [8, 128], strides = [1, 1]} : vector<8x512xf32> to vector<8x128xf32>
    %488 = math.tanh %487 : vector<8x128xf32>
    %489 = vector.extract_strided_slice %470 {offsets = [0, 384], sizes = [8, 128], strides = [1, 1]} : vector<8x512xf32> to vector<8x128xf32>
    %cst_191 = arith.constant 5.000000e-01 : f32
    %490 = vector.broadcast %cst_191 : f32 to vector<8x128xf32>
    %491 = arith.mulf %490, %489 : vector<8x128xf32>
    %492 = math.tanh %491 : vector<8x128xf32>
    %cst_192 = arith.constant 5.000000e-01 : f32
    %493 = vector.broadcast %cst_192 : f32 to vector<8x128xf32>
    %494 = arith.mulf %493, %492 : vector<8x128xf32>
    %cst_193 = arith.constant 5.000000e-01 : f32
    %495 = vector.broadcast %cst_193 : f32 to vector<8x128xf32>
    %496 = arith.addf %494, %495 : vector<8x128xf32>
    %497 = arith.mulf %486, %460 : vector<8x128xf32>
    %498 = arith.mulf %478, %488 : vector<8x128xf32>
    %499 = arith.addf %497, %498 : vector<8x128xf32>
    %500 = math.tanh %499 : vector<8x128xf32>
    %501 = arith.mulf %496, %500 : vector<8x128xf32>
    %502 = arith.index_cast %466 : i32 to index
    %c0_194 = arith.constant 0 : index
    %503 = vector.load %arg25[%502, %c0_194] : memref<64x128xf32, #tpu.memory_space<vmem>>, vector<8x128xf32>
    tpu.vector_store %arg25[%502, %c0_194], %501 {strides = array<i32>} : memref<64x128xf32, #tpu.memory_space<vmem>>, vector<8x128xf32>,
    %c4_i32_195 = arith.constant 4 : i32
    %c8_i32_196 = arith.constant 8 : i32
    %504 = arith.muli %c4_i32_195, %c8_i32_196 : i32
    %505 = tpu.assume_multiple %504, 8 : i32
    %506 = arith.index_cast %505 : i32 to index
    %c0_197 = arith.constant 0 : index
    %507 = vector.load %arg24[%506, %c0_197] : memref<64x512xf32, #tpu.memory_space<vmem>>, vector<8x512xf32>
    %cst_198 = arith.constant dense<0.000000e+00> : vector<8x512xf32>
    %508 = tpu.matmul %501, %346, %cst_198 {dimension_numbers = #tpu.dot_dimension_numbers<[1], [0], [0], [1], [0, 0, 1, 1], [], []>} : vector<8x128xf32>, vector<128x512xf32>, vector<8x512xf32> -> vector<8x512xf32>
    %509 = arith.addf %507, %508 : vector<8x512xf32>
    %510 = vector.extract_strided_slice %509 {offsets = [0, 0], sizes = [8, 128], strides = [1, 1]} : vector<8x512xf32> to vector<8x128xf32>
    %cst_199 = arith.constant 5.000000e-01 : f32
    %511 = vector.broadcast %cst_199 : f32 to vector<8x128xf32>
    %512 = arith.mulf %511, %510 : vector<8x128xf32>
    %513 = math.tanh %512 : vector<8x128xf32>
    %cst_200 = arith.constant 5.000000e-01 : f32
    %514 = vector.broadcast %cst_200 : f32 to vector<8x128xf32>
    %515 = arith.mulf %514, %513 : vector<8x128xf32>
    %cst_201 = arith.constant 5.000000e-01 : f32
    %516 = vector.broadcast %cst_201 : f32 to vector<8x128xf32>
    %517 = arith.addf %515, %516 : vector<8x128xf32>
    %518 = vector.extract_strided_slice %509 {offsets = [0, 128], sizes = [8, 128], strides = [1, 1]} : vector<8x512xf32> to vector<8x128xf32>
    %cst_202 = arith.constant 5.000000e-01 : f32
    %519 = vector.broadcast %cst_202 : f32 to vector<8x128xf32>
    %520 = arith.mulf %519, %518 : vector<8x128xf32>
    %521 = math.tanh %520 : vector<8x128xf32>
    %cst_203 = arith.constant 5.000000e-01 : f32
    %522 = vector.broadcast %cst_203 : f32 to vector<8x128xf32>
    %523 = arith.mulf %522, %521 : vector<8x128xf32>
    %cst_204 = arith.constant 5.000000e-01 : f32
    %524 = vector.broadcast %cst_204 : f32 to vector<8x128xf32>
    %525 = arith.addf %523, %524 : vector<8x128xf32>
    %526 = vector.extract_strided_slice %509 {offsets = [0, 256], sizes = [8, 128], strides = [1, 1]} : vector<8x512xf32> to vector<8x128xf32>
    %527 = math.tanh %526 : vector<8x128xf32>
    %528 = vector.extract_strided_slice %509 {offsets = [0, 384], sizes = [8, 128], strides = [1, 1]} : vector<8x512xf32> to vector<8x128xf32>
    %cst_205 = arith.constant 5.000000e-01 : f32
    %529 = vector.broadcast %cst_205 : f32 to vector<8x128xf32>
    %530 = arith.mulf %529, %528 : vector<8x128xf32>
    %531 = math.tanh %530 : vector<8x128xf32>
    %cst_206 = arith.constant 5.000000e-01 : f32
    %532 = vector.broadcast %cst_206 : f32 to vector<8x128xf32>
    %533 = arith.mulf %532, %531 : vector<8x128xf32>
    %cst_207 = arith.constant 5.000000e-01 : f32
    %534 = vector.broadcast %cst_207 : f32 to vector<8x128xf32>
    %535 = arith.addf %533, %534 : vector<8x128xf32>
    %536 = arith.mulf %525, %499 : vector<8x128xf32>
    %537 = arith.mulf %517, %527 : vector<8x128xf32>
    %538 = arith.addf %536, %537 : vector<8x128xf32>
    %539 = math.tanh %538 : vector<8x128xf32>
    %540 = arith.mulf %535, %539 : vector<8x128xf32>
    %541 = arith.index_cast %505 : i32 to index
    %c0_208 = arith.constant 0 : index
    %542 = vector.load %arg25[%541, %c0_208] : memref<64x128xf32, #tpu.memory_space<vmem>>, vector<8x128xf32>
    tpu.vector_store %arg25[%541, %c0_208], %540 {strides = array<i32>} : memref<64x128xf32, #tpu.memory_space<vmem>>, vector<8x128xf32>,
    %c5_i32_209 = arith.constant 5 : i32
    %c8_i32_210 = arith.constant 8 : i32
    %543 = arith.muli %c5_i32_209, %c8_i32_210 : i32
    %544 = tpu.assume_multiple %543, 8 : i32
    %545 = arith.index_cast %544 : i32 to index
    %c0_211 = arith.constant 0 : index
    %546 = vector.load %arg24[%545, %c0_211] : memref<64x512xf32, #tpu.memory_space<vmem>>, vector<8x512xf32>
    %cst_212 = arith.constant dense<0.000000e+00> : vector<8x512xf32>
    %547 = tpu.matmul %540, %346, %cst_212 {dimension_numbers = #tpu.dot_dimension_numbers<[1], [0], [0], [1], [0, 0, 1, 1], [], []>} : vector<8x128xf32>, vector<128x512xf32>, vector<8x512xf32> -> vector<8x512xf32>
    %548 = arith.addf %546, %547 : vector<8x512xf32>
    %549 = vector.extract_strided_slice %548 {offsets = [0, 0], sizes = [8, 128], strides = [1, 1]} : vector<8x512xf32> to vector<8x128xf32>
    %cst_213 = arith.constant 5.000000e-01 : f32
    %550 = vector.broadcast %cst_213 : f32 to vector<8x128xf32>
    %551 = arith.mulf %550, %549 : vector<8x128xf32>
    %552 = math.tanh %551 : vector<8x128xf32>
    %cst_214 = arith.constant 5.000000e-01 : f32
    %553 = vector.broadcast %cst_214 : f32 to vector<8x128xf32>
    %554 = arith.mulf %553, %552 : vector<8x128xf32>
    %cst_215 = arith.constant 5.000000e-01 : f32
    %555 = vector.broadcast %cst_215 : f32 to vector<8x128xf32>
    %556 = arith.addf %554, %555 : vector<8x128xf32>
    %557 = vector.extract_strided_slice %548 {offsets = [0, 128], sizes = [8, 128], strides = [1, 1]} : vector<8x512xf32> to vector<8x128xf32>
    %cst_216 = arith.constant 5.000000e-01 : f32
    %558 = vector.broadcast %cst_216 : f32 to vector<8x128xf32>
    %559 = arith.mulf %558, %557 : vector<8x128xf32>
    %560 = math.tanh %559 : vector<8x128xf32>
    %cst_217 = arith.constant 5.000000e-01 : f32
    %561 = vector.broadcast %cst_217 : f32 to vector<8x128xf32>
    %562 = arith.mulf %561, %560 : vector<8x128xf32>
    %cst_218 = arith.constant 5.000000e-01 : f32
    %563 = vector.broadcast %cst_218 : f32 to vector<8x128xf32>
    %564 = arith.addf %562, %563 : vector<8x128xf32>
    %565 = vector.extract_strided_slice %548 {offsets = [0, 256], sizes = [8, 128], strides = [1, 1]} : vector<8x512xf32> to vector<8x128xf32>
    %566 = math.tanh %565 : vector<8x128xf32>
    %567 = vector.extract_strided_slice %548 {offsets = [0, 384], sizes = [8, 128], strides = [1, 1]} : vector<8x512xf32> to vector<8x128xf32>
    %cst_219 = arith.constant 5.000000e-01 : f32
    %568 = vector.broadcast %cst_219 : f32 to vector<8x128xf32>
    %569 = arith.mulf %568, %567 : vector<8x128xf32>
    %570 = math.tanh %569 : vector<8x128xf32>
    %cst_220 = arith.constant 5.000000e-01 : f32
    %571 = vector.broadcast %cst_220 : f32 to vector<8x128xf32>
    %572 = arith.mulf %571, %570 : vector<8x128xf32>
    %cst_221 = arith.constant 5.000000e-01 : f32
    %573 = vector.broadcast %cst_221 : f32 to vector<8x128xf32>
    %574 = arith.addf %572, %573 : vector<8x128xf32>
    %575 = arith.mulf %564, %538 : vector<8x128xf32>
    %576 = arith.mulf %556, %566 : vector<8x128xf32>
    %577 = arith.addf %575, %576 : vector<8x128xf32>
    %578 = math.tanh %577 : vector<8x128xf32>
    %579 = arith.mulf %574, %578 : vector<8x128xf32>
    %580 = arith.index_cast %544 : i32 to index
    %c0_222 = arith.constant 0 : index
    %581 = vector.load %arg25[%580, %c0_222] : memref<64x128xf32, #tpu.memory_space<vmem>>, vector<8x128xf32>
    tpu.vector_store %arg25[%580, %c0_222], %579 {strides = array<i32>} : memref<64x128xf32, #tpu.memory_space<vmem>>, vector<8x128xf32>,
    %c6_i32_223 = arith.constant 6 : i32
    %c8_i32_224 = arith.constant 8 : i32
    %582 = arith.muli %c6_i32_223, %c8_i32_224 : i32
    %583 = tpu.assume_multiple %582, 8 : i32
    %584 = arith.index_cast %583 : i32 to index
    %c0_225 = arith.constant 0 : index
    %585 = vector.load %arg24[%584, %c0_225] : memref<64x512xf32, #tpu.memory_space<vmem>>, vector<8x512xf32>
    %cst_226 = arith.constant dense<0.000000e+00> : vector<8x512xf32>
    %586 = tpu.matmul %579, %346, %cst_226 {dimension_numbers = #tpu.dot_dimension_numbers<[1], [0], [0], [1], [0, 0, 1, 1], [], []>} : vector<8x128xf32>, vector<128x512xf32>, vector<8x512xf32> -> vector<8x512xf32>
    %587 = arith.addf %585, %586 : vector<8x512xf32>
    %588 = vector.extract_strided_slice %587 {offsets = [0, 0], sizes = [8, 128], strides = [1, 1]} : vector<8x512xf32> to vector<8x128xf32>
    %cst_227 = arith.constant 5.000000e-01 : f32
    %589 = vector.broadcast %cst_227 : f32 to vector<8x128xf32>
    %590 = arith.mulf %589, %588 : vector<8x128xf32>
    %591 = math.tanh %590 : vector<8x128xf32>
    %cst_228 = arith.constant 5.000000e-01 : f32
    %592 = vector.broadcast %cst_228 : f32 to vector<8x128xf32>
    %593 = arith.mulf %592, %591 : vector<8x128xf32>
    %cst_229 = arith.constant 5.000000e-01 : f32
    %594 = vector.broadcast %cst_229 : f32 to vector<8x128xf32>
    %595 = arith.addf %593, %594 : vector<8x128xf32>
    %596 = vector.extract_strided_slice %587 {offsets = [0, 128], sizes = [8, 128], strides = [1, 1]} : vector<8x512xf32> to vector<8x128xf32>
    %cst_230 = arith.constant 5.000000e-01 : f32
    %597 = vector.broadcast %cst_230 : f32 to vector<8x128xf32>
    %598 = arith.mulf %597, %596 : vector<8x128xf32>
    %599 = math.tanh %598 : vector<8x128xf32>
    %cst_231 = arith.constant 5.000000e-01 : f32
    %600 = vector.broadcast %cst_231 : f32 to vector<8x128xf32>
    %601 = arith.mulf %600, %599 : vector<8x128xf32>
    %cst_232 = arith.constant 5.000000e-01 : f32
    %602 = vector.broadcast %cst_232 : f32 to vector<8x128xf32>
    %603 = arith.addf %601, %602 : vector<8x128xf32>
    %604 = vector.extract_strided_slice %587 {offsets = [0, 256], sizes = [8, 128], strides = [1, 1]} : vector<8x512xf32> to vector<8x128xf32>
    %605 = math.tanh %604 : vector<8x128xf32>
    %606 = vector.extract_strided_slice %587 {offsets = [0, 384], sizes = [8, 128], strides = [1, 1]} : vector<8x512xf32> to vector<8x128xf32>
    %cst_233 = arith.constant 5.000000e-01 : f32
    %607 = vector.broadcast %cst_233 : f32 to vector<8x128xf32>
    %608 = arith.mulf %607, %606 : vector<8x128xf32>
    %609 = math.tanh %608 : vector<8x128xf32>
    %cst_234 = arith.constant 5.000000e-01 : f32
    %610 = vector.broadcast %cst_234 : f32 to vector<8x128xf32>
    %611 = arith.mulf %610, %609 : vector<8x128xf32>
    %cst_235 = arith.constant 5.000000e-01 : f32
    %612 = vector.broadcast %cst_235 : f32 to vector<8x128xf32>
    %613 = arith.addf %611, %612 : vector<8x128xf32>
    %614 = arith.mulf %603, %577 : vector<8x128xf32>
    %615 = arith.mulf %595, %605 : vector<8x128xf32>
    %616 = arith.addf %614, %615 : vector<8x128xf32>
    %617 = math.tanh %616 : vector<8x128xf32>
    %618 = arith.mulf %613, %617 : vector<8x128xf32>
    %619 = arith.index_cast %583 : i32 to index
    %c0_236 = arith.constant 0 : index
    %620 = vector.load %arg25[%619, %c0_236] : memref<64x128xf32, #tpu.memory_space<vmem>>, vector<8x128xf32>
    tpu.vector_store %arg25[%619, %c0_236], %618 {strides = array<i32>} : memref<64x128xf32, #tpu.memory_space<vmem>>, vector<8x128xf32>,
    %c7_i32_237 = arith.constant 7 : i32
    %c8_i32_238 = arith.constant 8 : i32
    %621 = arith.muli %c7_i32_237, %c8_i32_238 : i32
    %622 = tpu.assume_multiple %621, 8 : i32
    %623 = arith.index_cast %622 : i32 to index
    %c0_239 = arith.constant 0 : index
    %624 = vector.load %arg24[%623, %c0_239] : memref<64x512xf32, #tpu.memory_space<vmem>>, vector<8x512xf32>
    %cst_240 = arith.constant dense<0.000000e+00> : vector<8x512xf32>
    %625 = tpu.matmul %618, %346, %cst_240 {dimension_numbers = #tpu.dot_dimension_numbers<[1], [0], [0], [1], [0, 0, 1, 1], [], []>} : vector<8x128xf32>, vector<128x512xf32>, vector<8x512xf32> -> vector<8x512xf32>
    %626 = arith.addf %624, %625 : vector<8x512xf32>
    %627 = vector.extract_strided_slice %626 {offsets = [0, 0], sizes = [8, 128], strides = [1, 1]} : vector<8x512xf32> to vector<8x128xf32>
    %cst_241 = arith.constant 5.000000e-01 : f32
    %628 = vector.broadcast %cst_241 : f32 to vector<8x128xf32>
    %629 = arith.mulf %628, %627 : vector<8x128xf32>
    %630 = math.tanh %629 : vector<8x128xf32>
    %cst_242 = arith.constant 5.000000e-01 : f32
    %631 = vector.broadcast %cst_242 : f32 to vector<8x128xf32>
    %632 = arith.mulf %631, %630 : vector<8x128xf32>
    %cst_243 = arith.constant 5.000000e-01 : f32
    %633 = vector.broadcast %cst_243 : f32 to vector<8x128xf32>
    %634 = arith.addf %632, %633 : vector<8x128xf32>
    %635 = vector.extract_strided_slice %626 {offsets = [0, 128], sizes = [8, 128], strides = [1, 1]} : vector<8x512xf32> to vector<8x128xf32>
    %cst_244 = arith.constant 5.000000e-01 : f32
    %636 = vector.broadcast %cst_244 : f32 to vector<8x128xf32>
    %637 = arith.mulf %636, %635 : vector<8x128xf32>
    %638 = math.tanh %637 : vector<8x128xf32>
    %cst_245 = arith.constant 5.000000e-01 : f32
    %639 = vector.broadcast %cst_245 : f32 to vector<8x128xf32>
    %640 = arith.mulf %639, %638 : vector<8x128xf32>
    %cst_246 = arith.constant 5.000000e-01 : f32
    %641 = vector.broadcast %cst_246 : f32 to vector<8x128xf32>
    %642 = arith.addf %640, %641 : vector<8x128xf32>
    %643 = vector.extract_strided_slice %626 {offsets = [0, 256], sizes = [8, 128], strides = [1, 1]} : vector<8x512xf32> to vector<8x128xf32>
    %644 = math.tanh %643 : vector<8x128xf32>
    %645 = vector.extract_strided_slice %626 {offsets = [0, 384], sizes = [8, 128], strides = [1, 1]} : vector<8x512xf32> to vector<8x128xf32>
    %cst_247 = arith.constant 5.000000e-01 : f32
    %646 = vector.broadcast %cst_247 : f32 to vector<8x128xf32>
    %647 = arith.mulf %646, %645 : vector<8x128xf32>
    %648 = math.tanh %647 : vector<8x128xf32>
    %cst_248 = arith.constant 5.000000e-01 : f32
    %649 = vector.broadcast %cst_248 : f32 to vector<8x128xf32>
    %650 = arith.mulf %649, %648 : vector<8x128xf32>
    %cst_249 = arith.constant 5.000000e-01 : f32
    %651 = vector.broadcast %cst_249 : f32 to vector<8x128xf32>
    %652 = arith.addf %650, %651 : vector<8x128xf32>
    %653 = arith.mulf %642, %616 : vector<8x128xf32>
    %654 = arith.mulf %634, %644 : vector<8x128xf32>
    %655 = arith.addf %653, %654 : vector<8x128xf32>
    %656 = math.tanh %655 : vector<8x128xf32>
    %657 = arith.mulf %652, %656 : vector<8x128xf32>
    %658 = arith.index_cast %622 : i32 to index
    %c0_250 = arith.constant 0 : index
    %659 = vector.load %arg25[%658, %c0_250] : memref<64x128xf32, #tpu.memory_space<vmem>>, vector<8x128xf32>
    tpu.vector_store %arg25[%658, %c0_250], %657 {strides = array<i32>} : memref<64x128xf32, #tpu.memory_space<vmem>>, vector<8x128xf32>,
    %c8_i32_251 = arith.constant 8 : i32
    %c1 = arith.constant 1 : index
    %c0_252 = arith.constant 0 : index
    %c0_253 = arith.constant 0 : index
    %660 = vector.load %arg22[%c1, %c0_252, %c0_253] : memref<3x8x128xf32, #tpu.memory_space<vmem>>, vector<1x8x128xf32>
    %661 = vector.shape_cast %660 : vector<1x8x128xf32> to vector<8x128xf32>
    %662 = vector.shape_cast %657 : vector<8x128xf32> to vector<1x8x128xf32>
    tpu.vector_store %arg22[%c1, %c0_252, %c0_253], %662 {strides = array<i32>} : memref<3x8x128xf32, #tpu.memory_space<vmem>>, vector<1x8x128xf32>,
    %c1_254 = arith.constant 1 : index
    %c0_255 = arith.constant 0 : index
    %c0_256 = arith.constant 0 : index
    %663 = vector.load %arg23[%c1_254, %c0_255, %c0_256] : memref<3x8x128xf32, #tpu.memory_space<vmem>>, vector<1x8x128xf32>
    %664 = vector.shape_cast %663 : vector<1x8x128xf32> to vector<8x128xf32>
    %665 = vector.shape_cast %655 : vector<8x128xf32> to vector<1x8x128xf32>
    tpu.vector_store %arg23[%c1_254, %c0_255, %c0_256], %665 {strides = array<i32>} : memref<3x8x128xf32, #tpu.memory_space<vmem>>, vector<1x8x128xf32>,
    %c0_257 = arith.constant 0 : index
    %c0_258 = arith.constant 0 : index
    %666 = vector.load %arg25[%c0_257, %c0_258] : memref<64x128xf32, #tpu.memory_space<vmem>>, vector<64x128xf32>
    %c0_259 = arith.constant 0 : index
    %c0_260 = arith.constant 0 : index
    %667 = vector.load %arg10[%c0_259, %c0_260] : memref<128x512xf32, #tpu.memory_space<vmem>>, vector<128x512xf32>
    %cst_261 = arith.constant dense<0.000000e+00> : vector<64x512xf32>
    %668 = tpu.matmul %666, %667, %cst_261 {dimension_numbers = #tpu.dot_dimension_numbers<[1], [0], [0], [1], [0, 0, 1, 1], [], []>} : vector<64x128xf32>, vector<128x512xf32>, vector<64x512xf32> -> vector<64x512xf32>
    %c0_262 = arith.constant 0 : index
    %c0_263 = arith.constant 0 : index
    %669 = vector.load %arg12[%c0_262, %c0_263] : memref<1x512xf32, #tpu.memory_space<vmem>>, vector<1x512xf32>
    %670 = vector.broadcast %669 : vector<1x512xf32> to vector<64x512xf32>
    %671 = arith.addf %668, %670 : vector<64x512xf32>
    %c0_264 = arith.constant 0 : index
    %c0_265 = arith.constant 0 : index
    %672 = vector.load %arg24[%c0_264, %c0_265] : memref<64x512xf32, #tpu.memory_space<vmem>>, vector<64x512xf32>
    tpu.vector_store %arg24[%c0_264, %c0_265], %671 {strides = array<i32>} : memref<64x512xf32, #tpu.memory_space<vmem>>, vector<64x512xf32>,
    %c0_266 = arith.constant 0 : index
    %c0_267 = arith.constant 0 : index
    %673 = vector.load %arg11[%c0_266, %c0_267] : memref<128x512xf32, #tpu.memory_space<vmem>>, vector<128x512xf32>
    %cst_268 = arith.constant 0.000000e+00 : f32
    %674 = vector.broadcast %cst_268 : f32 to vector<8x128xf32>
    %c0_i32_269 = arith.constant 0 : i32
    %c8_i32_270 = arith.constant 8 : i32
    %675 = arith.muli %c0_i32_269, %c8_i32_270 : i32
    %676 = tpu.assume_multiple %675, 8 : i32
    %677 = arith.index_cast %676 : i32 to index
    %c0_271 = arith.constant 0 : index
    %678 = vector.load %arg24[%677, %c0_271] : memref<64x512xf32, #tpu.memory_space<vmem>>, vector<8x512xf32>
    %cst_272 = arith.constant dense<0.000000e+00> : vector<8x512xf32>
    %679 = tpu.matmul %674, %673, %cst_272 {dimension_numbers = #tpu.dot_dimension_numbers<[1], [0], [0], [1], [0, 0, 1, 1], [], []>} : vector<8x128xf32>, vector<128x512xf32>, vector<8x512xf32> -> vector<8x512xf32>
    %680 = arith.addf %678, %679 : vector<8x512xf32>
    %681 = vector.extract_strided_slice %680 {offsets = [0, 0], sizes = [8, 128], strides = [1, 1]} : vector<8x512xf32> to vector<8x128xf32>
    %cst_273 = arith.constant 5.000000e-01 : f32
    %682 = vector.broadcast %cst_273 : f32 to vector<8x128xf32>
    %683 = arith.mulf %682, %681 : vector<8x128xf32>
    %684 = math.tanh %683 : vector<8x128xf32>
    %cst_274 = arith.constant 5.000000e-01 : f32
    %685 = vector.broadcast %cst_274 : f32 to vector<8x128xf32>
    %686 = arith.mulf %685, %684 : vector<8x128xf32>
    %cst_275 = arith.constant 5.000000e-01 : f32
    %687 = vector.broadcast %cst_275 : f32 to vector<8x128xf32>
    %688 = arith.addf %686, %687 : vector<8x128xf32>
    %689 = vector.extract_strided_slice %680 {offsets = [0, 128], sizes = [8, 128], strides = [1, 1]} : vector<8x512xf32> to vector<8x128xf32>
    %cst_276 = arith.constant 5.000000e-01 : f32
    %690 = vector.broadcast %cst_276 : f32 to vector<8x128xf32>
    %691 = arith.mulf %690, %689 : vector<8x128xf32>
    %692 = math.tanh %691 : vector<8x128xf32>
    %cst_277 = arith.constant 5.000000e-01 : f32
    %693 = vector.broadcast %cst_277 : f32 to vector<8x128xf32>
    %694 = arith.mulf %693, %692 : vector<8x128xf32>
    %cst_278 = arith.constant 5.000000e-01 : f32
    %695 = vector.broadcast %cst_278 : f32 to vector<8x128xf32>
    %696 = arith.addf %694, %695 : vector<8x128xf32>
    %697 = vector.extract_strided_slice %680 {offsets = [0, 256], sizes = [8, 128], strides = [1, 1]} : vector<8x512xf32> to vector<8x128xf32>
    %698 = math.tanh %697 : vector<8x128xf32>
    %699 = vector.extract_strided_slice %680 {offsets = [0, 384], sizes = [8, 128], strides = [1, 1]} : vector<8x512xf32> to vector<8x128xf32>
    %cst_279 = arith.constant 5.000000e-01 : f32
    %700 = vector.broadcast %cst_279 : f32 to vector<8x128xf32>
    %701 = arith.mulf %700, %699 : vector<8x128xf32>
    %702 = math.tanh %701 : vector<8x128xf32>
    %cst_280 = arith.constant 5.000000e-01 : f32
    %703 = vector.broadcast %cst_280 : f32 to vector<8x128xf32>
    %704 = arith.mulf %703, %702 : vector<8x128xf32>
    %cst_281 = arith.constant 5.000000e-01 : f32
    %705 = vector.broadcast %cst_281 : f32 to vector<8x128xf32>
    %706 = arith.addf %704, %705 : vector<8x128xf32>
    %707 = arith.mulf %696, %674 : vector<8x128xf32>
    %708 = arith.mulf %688, %698 : vector<8x128xf32>
    %709 = arith.addf %707, %708 : vector<8x128xf32>
    %710 = math.tanh %709 : vector<8x128xf32>
    %711 = arith.mulf %706, %710 : vector<8x128xf32>
    %712 = arith.index_cast %676 : i32 to index
    %c0_282 = arith.constant 0 : index
    %713 = vector.load %arg25[%712, %c0_282] : memref<64x128xf32, #tpu.memory_space<vmem>>, vector<8x128xf32>
    tpu.vector_store %arg25[%712, %c0_282], %711 {strides = array<i32>} : memref<64x128xf32, #tpu.memory_space<vmem>>, vector<8x128xf32>,
    %c1_i32_283 = arith.constant 1 : i32
    %c8_i32_284 = arith.constant 8 : i32
    %714 = arith.muli %c1_i32_283, %c8_i32_284 : i32
    %715 = tpu.assume_multiple %714, 8 : i32
    %716 = arith.index_cast %715 : i32 to index
    %c0_285 = arith.constant 0 : index
    %717 = vector.load %arg24[%716, %c0_285] : memref<64x512xf32, #tpu.memory_space<vmem>>, vector<8x512xf32>
    %cst_286 = arith.constant dense<0.000000e+00> : vector<8x512xf32>
    %718 = tpu.matmul %711, %673, %cst_286 {dimension_numbers = #tpu.dot_dimension_numbers<[1], [0], [0], [1], [0, 0, 1, 1], [], []>} : vector<8x128xf32>, vector<128x512xf32>, vector<8x512xf32> -> vector<8x512xf32>
    %719 = arith.addf %717, %718 : vector<8x512xf32>
    %720 = vector.extract_strided_slice %719 {offsets = [0, 0], sizes = [8, 128], strides = [1, 1]} : vector<8x512xf32> to vector<8x128xf32>
    %cst_287 = arith.constant 5.000000e-01 : f32
    %721 = vector.broadcast %cst_287 : f32 to vector<8x128xf32>
    %722 = arith.mulf %721, %720 : vector<8x128xf32>
    %723 = math.tanh %722 : vector<8x128xf32>
    %cst_288 = arith.constant 5.000000e-01 : f32
    %724 = vector.broadcast %cst_288 : f32 to vector<8x128xf32>
    %725 = arith.mulf %724, %723 : vector<8x128xf32>
    %cst_289 = arith.constant 5.000000e-01 : f32
    %726 = vector.broadcast %cst_289 : f32 to vector<8x128xf32>
    %727 = arith.addf %725, %726 : vector<8x128xf32>
    %728 = vector.extract_strided_slice %719 {offsets = [0, 128], sizes = [8, 128], strides = [1, 1]} : vector<8x512xf32> to vector<8x128xf32>
    %cst_290 = arith.constant 5.000000e-01 : f32
    %729 = vector.broadcast %cst_290 : f32 to vector<8x128xf32>
    %730 = arith.mulf %729, %728 : vector<8x128xf32>
    %731 = math.tanh %730 : vector<8x128xf32>
    %cst_291 = arith.constant 5.000000e-01 : f32
    %732 = vector.broadcast %cst_291 : f32 to vector<8x128xf32>
    %733 = arith.mulf %732, %731 : vector<8x128xf32>
    %cst_292 = arith.constant 5.000000e-01 : f32
    %734 = vector.broadcast %cst_292 : f32 to vector<8x128xf32>
    %735 = arith.addf %733, %734 : vector<8x128xf32>
    %736 = vector.extract_strided_slice %719 {offsets = [0, 256], sizes = [8, 128], strides = [1, 1]} : vector<8x512xf32> to vector<8x128xf32>
    %737 = math.tanh %736 : vector<8x128xf32>
    %738 = vector.extract_strided_slice %719 {offsets = [0, 384], sizes = [8, 128], strides = [1, 1]} : vector<8x512xf32> to vector<8x128xf32>
    %cst_293 = arith.constant 5.000000e-01 : f32
    %739 = vector.broadcast %cst_293 : f32 to vector<8x128xf32>
    %740 = arith.mulf %739, %738 : vector<8x128xf32>
    %741 = math.tanh %740 : vector<8x128xf32>
    %cst_294 = arith.constant 5.000000e-01 : f32
    %742 = vector.broadcast %cst_294 : f32 to vector<8x128xf32>
    %743 = arith.mulf %742, %741 : vector<8x128xf32>
    %cst_295 = arith.constant 5.000000e-01 : f32
    %744 = vector.broadcast %cst_295 : f32 to vector<8x128xf32>
    %745 = arith.addf %743, %744 : vector<8x128xf32>
    %746 = arith.mulf %735, %709 : vector<8x128xf32>
    %747 = arith.mulf %727, %737 : vector<8x128xf32>
    %748 = arith.addf %746, %747 : vector<8x128xf32>
    %749 = math.tanh %748 : vector<8x128xf32>
    %750 = arith.mulf %745, %749 : vector<8x128xf32>
    %751 = arith.index_cast %715 : i32 to index
    %c0_296 = arith.constant 0 : index
    %752 = vector.load %arg25[%751, %c0_296] : memref<64x128xf32, #tpu.memory_space<vmem>>, vector<8x128xf32>
    tpu.vector_store %arg25[%751, %c0_296], %750 {strides = array<i32>} : memref<64x128xf32, #tpu.memory_space<vmem>>, vector<8x128xf32>,
    %c2_i32_297 = arith.constant 2 : i32
    %c8_i32_298 = arith.constant 8 : i32
    %753 = arith.muli %c2_i32_297, %c8_i32_298 : i32
    %754 = tpu.assume_multiple %753, 8 : i32
    %755 = arith.index_cast %754 : i32 to index
    %c0_299 = arith.constant 0 : index
    %756 = vector.load %arg24[%755, %c0_299] : memref<64x512xf32, #tpu.memory_space<vmem>>, vector<8x512xf32>
    %cst_300 = arith.constant dense<0.000000e+00> : vector<8x512xf32>
    %757 = tpu.matmul %750, %673, %cst_300 {dimension_numbers = #tpu.dot_dimension_numbers<[1], [0], [0], [1], [0, 0, 1, 1], [], []>} : vector<8x128xf32>, vector<128x512xf32>, vector<8x512xf32> -> vector<8x512xf32>
    %758 = arith.addf %756, %757 : vector<8x512xf32>
    %759 = vector.extract_strided_slice %758 {offsets = [0, 0], sizes = [8, 128], strides = [1, 1]} : vector<8x512xf32> to vector<8x128xf32>
    %cst_301 = arith.constant 5.000000e-01 : f32
    %760 = vector.broadcast %cst_301 : f32 to vector<8x128xf32>
    %761 = arith.mulf %760, %759 : vector<8x128xf32>
    %762 = math.tanh %761 : vector<8x128xf32>
    %cst_302 = arith.constant 5.000000e-01 : f32
    %763 = vector.broadcast %cst_302 : f32 to vector<8x128xf32>
    %764 = arith.mulf %763, %762 : vector<8x128xf32>
    %cst_303 = arith.constant 5.000000e-01 : f32
    %765 = vector.broadcast %cst_303 : f32 to vector<8x128xf32>
    %766 = arith.addf %764, %765 : vector<8x128xf32>
    %767 = vector.extract_strided_slice %758 {offsets = [0, 128], sizes = [8, 128], strides = [1, 1]} : vector<8x512xf32> to vector<8x128xf32>
    %cst_304 = arith.constant 5.000000e-01 : f32
    %768 = vector.broadcast %cst_304 : f32 to vector<8x128xf32>
    %769 = arith.mulf %768, %767 : vector<8x128xf32>
    %770 = math.tanh %769 : vector<8x128xf32>
    %cst_305 = arith.constant 5.000000e-01 : f32
    %771 = vector.broadcast %cst_305 : f32 to vector<8x128xf32>
    %772 = arith.mulf %771, %770 : vector<8x128xf32>
    %cst_306 = arith.constant 5.000000e-01 : f32
    %773 = vector.broadcast %cst_306 : f32 to vector<8x128xf32>
    %774 = arith.addf %772, %773 : vector<8x128xf32>
    %775 = vector.extract_strided_slice %758 {offsets = [0, 256], sizes = [8, 128], strides = [1, 1]} : vector<8x512xf32> to vector<8x128xf32>
    %776 = math.tanh %775 : vector<8x128xf32>
    %777 = vector.extract_strided_slice %758 {offsets = [0, 384], sizes = [8, 128], strides = [1, 1]} : vector<8x512xf32> to vector<8x128xf32>
    %cst_307 = arith.constant 5.000000e-01 : f32
    %778 = vector.broadcast %cst_307 : f32 to vector<8x128xf32>
    %779 = arith.mulf %778, %777 : vector<8x128xf32>
    %780 = math.tanh %779 : vector<8x128xf32>
    %cst_308 = arith.constant 5.000000e-01 : f32
    %781 = vector.broadcast %cst_308 : f32 to vector<8x128xf32>
    %782 = arith.mulf %781, %780 : vector<8x128xf32>
    %cst_309 = arith.constant 5.000000e-01 : f32
    %783 = vector.broadcast %cst_309 : f32 to vector<8x128xf32>
    %784 = arith.addf %782, %783 : vector<8x128xf32>
    %785 = arith.mulf %774, %748 : vector<8x128xf32>
    %786 = arith.mulf %766, %776 : vector<8x128xf32>
    %787 = arith.addf %785, %786 : vector<8x128xf32>
    %788 = math.tanh %787 : vector<8x128xf32>
    %789 = arith.mulf %784, %788 : vector<8x128xf32>
    %790 = arith.index_cast %754 : i32 to index
    %c0_310 = arith.constant 0 : index
    %791 = vector.load %arg25[%790, %c0_310] : memref<64x128xf32, #tpu.memory_space<vmem>>, vector<8x128xf32>
    tpu.vector_store %arg25[%790, %c0_310], %789 {strides = array<i32>} : memref<64x128xf32, #tpu.memory_space<vmem>>, vector<8x128xf32>,
    %c3_i32_311 = arith.constant 3 : i32
    %c8_i32_312 = arith.constant 8 : i32
    %792 = arith.muli %c3_i32_311, %c8_i32_312 : i32
    %793 = tpu.assume_multiple %792, 8 : i32
    %794 = arith.index_cast %793 : i32 to index
    %c0_313 = arith.constant 0 : index
    %795 = vector.load %arg24[%794, %c0_313] : memref<64x512xf32, #tpu.memory_space<vmem>>, vector<8x512xf32>
    %cst_314 = arith.constant dense<0.000000e+00> : vector<8x512xf32>
    %796 = tpu.matmul %789, %673, %cst_314 {dimension_numbers = #tpu.dot_dimension_numbers<[1], [0], [0], [1], [0, 0, 1, 1], [], []>} : vector<8x128xf32>, vector<128x512xf32>, vector<8x512xf32> -> vector<8x512xf32>
    %797 = arith.addf %795, %796 : vector<8x512xf32>
    %798 = vector.extract_strided_slice %797 {offsets = [0, 0], sizes = [8, 128], strides = [1, 1]} : vector<8x512xf32> to vector<8x128xf32>
    %cst_315 = arith.constant 5.000000e-01 : f32
    %799 = vector.broadcast %cst_315 : f32 to vector<8x128xf32>
    %800 = arith.mulf %799, %798 : vector<8x128xf32>
    %801 = math.tanh %800 : vector<8x128xf32>
    %cst_316 = arith.constant 5.000000e-01 : f32
    %802 = vector.broadcast %cst_316 : f32 to vector<8x128xf32>
    %803 = arith.mulf %802, %801 : vector<8x128xf32>
    %cst_317 = arith.constant 5.000000e-01 : f32
    %804 = vector.broadcast %cst_317 : f32 to vector<8x128xf32>
    %805 = arith.addf %803, %804 : vector<8x128xf32>
    %806 = vector.extract_strided_slice %797 {offsets = [0, 128], sizes = [8, 128], strides = [1, 1]} : vector<8x512xf32> to vector<8x128xf32>
    %cst_318 = arith.constant 5.000000e-01 : f32
    %807 = vector.broadcast %cst_318 : f32 to vector<8x128xf32>
    %808 = arith.mulf %807, %806 : vector<8x128xf32>
    %809 = math.tanh %808 : vector<8x128xf32>
    %cst_319 = arith.constant 5.000000e-01 : f32
    %810 = vector.broadcast %cst_319 : f32 to vector<8x128xf32>
    %811 = arith.mulf %810, %809 : vector<8x128xf32>
    %cst_320 = arith.constant 5.000000e-01 : f32
    %812 = vector.broadcast %cst_320 : f32 to vector<8x128xf32>
    %813 = arith.addf %811, %812 : vector<8x128xf32>
    %814 = vector.extract_strided_slice %797 {offsets = [0, 256], sizes = [8, 128], strides = [1, 1]} : vector<8x512xf32> to vector<8x128xf32>
    %815 = math.tanh %814 : vector<8x128xf32>
    %816 = vector.extract_strided_slice %797 {offsets = [0, 384], sizes = [8, 128], strides = [1, 1]} : vector<8x512xf32> to vector<8x128xf32>
    %cst_321 = arith.constant 5.000000e-01 : f32
    %817 = vector.broadcast %cst_321 : f32 to vector<8x128xf32>
    %818 = arith.mulf %817, %816 : vector<8x128xf32>
    %819 = math.tanh %818 : vector<8x128xf32>
    %cst_322 = arith.constant 5.000000e-01 : f32
    %820 = vector.broadcast %cst_322 : f32 to vector<8x128xf32>
    %821 = arith.mulf %820, %819 : vector<8x128xf32>
    %cst_323 = arith.constant 5.000000e-01 : f32
    %822 = vector.broadcast %cst_323 : f32 to vector<8x128xf32>
    %823 = arith.addf %821, %822 : vector<8x128xf32>
    %824 = arith.mulf %813, %787 : vector<8x128xf32>
    %825 = arith.mulf %805, %815 : vector<8x128xf32>
    %826 = arith.addf %824, %825 : vector<8x128xf32>
    %827 = math.tanh %826 : vector<8x128xf32>
    %828 = arith.mulf %823, %827 : vector<8x128xf32>
    %829 = arith.index_cast %793 : i32 to index
    %c0_324 = arith.constant 0 : index
    %830 = vector.load %arg25[%829, %c0_324] : memref<64x128xf32, #tpu.memory_space<vmem>>, vector<8x128xf32>
    tpu.vector_store %arg25[%829, %c0_324], %828 {strides = array<i32>} : memref<64x128xf32, #tpu.memory_space<vmem>>, vector<8x128xf32>,
    %c4_i32_325 = arith.constant 4 : i32
    %c8_i32_326 = arith.constant 8 : i32
    %831 = arith.muli %c4_i32_325, %c8_i32_326 : i32
    %832 = tpu.assume_multiple %831, 8 : i32
    %833 = arith.index_cast %832 : i32 to index
    %c0_327 = arith.constant 0 : index
    %834 = vector.load %arg24[%833, %c0_327] : memref<64x512xf32, #tpu.memory_space<vmem>>, vector<8x512xf32>
    %cst_328 = arith.constant dense<0.000000e+00> : vector<8x512xf32>
    %835 = tpu.matmul %828, %673, %cst_328 {dimension_numbers = #tpu.dot_dimension_numbers<[1], [0], [0], [1], [0, 0, 1, 1], [], []>} : vector<8x128xf32>, vector<128x512xf32>, vector<8x512xf32> -> vector<8x512xf32>
    %836 = arith.addf %834, %835 : vector<8x512xf32>
    %837 = vector.extract_strided_slice %836 {offsets = [0, 0], sizes = [8, 128], strides = [1, 1]} : vector<8x512xf32> to vector<8x128xf32>
    %cst_329 = arith.constant 5.000000e-01 : f32
    %838 = vector.broadcast %cst_329 : f32 to vector<8x128xf32>
    %839 = arith.mulf %838, %837 : vector<8x128xf32>
    %840 = math.tanh %839 : vector<8x128xf32>
    %cst_330 = arith.constant 5.000000e-01 : f32
    %841 = vector.broadcast %cst_330 : f32 to vector<8x128xf32>
    %842 = arith.mulf %841, %840 : vector<8x128xf32>
    %cst_331 = arith.constant 5.000000e-01 : f32
    %843 = vector.broadcast %cst_331 : f32 to vector<8x128xf32>
    %844 = arith.addf %842, %843 : vector<8x128xf32>
    %845 = vector.extract_strided_slice %836 {offsets = [0, 128], sizes = [8, 128], strides = [1, 1]} : vector<8x512xf32> to vector<8x128xf32>
    %cst_332 = arith.constant 5.000000e-01 : f32
    %846 = vector.broadcast %cst_332 : f32 to vector<8x128xf32>
    %847 = arith.mulf %846, %845 : vector<8x128xf32>
    %848 = math.tanh %847 : vector<8x128xf32>
    %cst_333 = arith.constant 5.000000e-01 : f32
    %849 = vector.broadcast %cst_333 : f32 to vector<8x128xf32>
    %850 = arith.mulf %849, %848 : vector<8x128xf32>
    %cst_334 = arith.constant 5.000000e-01 : f32
    %851 = vector.broadcast %cst_334 : f32 to vector<8x128xf32>
    %852 = arith.addf %850, %851 : vector<8x128xf32>
    %853 = vector.extract_strided_slice %836 {offsets = [0, 256], sizes = [8, 128], strides = [1, 1]} : vector<8x512xf32> to vector<8x128xf32>
    %854 = math.tanh %853 : vector<8x128xf32>
    %855 = vector.extract_strided_slice %836 {offsets = [0, 384], sizes = [8, 128], strides = [1, 1]} : vector<8x512xf32> to vector<8x128xf32>
    %cst_335 = arith.constant 5.000000e-01 : f32
    %856 = vector.broadcast %cst_335 : f32 to vector<8x128xf32>
    %857 = arith.mulf %856, %855 : vector<8x128xf32>
    %858 = math.tanh %857 : vector<8x128xf32>
    %cst_336 = arith.constant 5.000000e-01 : f32
    %859 = vector.broadcast %cst_336 : f32 to vector<8x128xf32>
    %860 = arith.mulf %859, %858 : vector<8x128xf32>
    %cst_337 = arith.constant 5.000000e-01 : f32
    %861 = vector.broadcast %cst_337 : f32 to vector<8x128xf32>
    %862 = arith.addf %860, %861 : vector<8x128xf32>
    %863 = arith.mulf %852, %826 : vector<8x128xf32>
    %864 = arith.mulf %844, %854 : vector<8x128xf32>
    %865 = arith.addf %863, %864 : vector<8x128xf32>
    %866 = math.tanh %865 : vector<8x128xf32>
    %867 = arith.mulf %862, %866 : vector<8x128xf32>
    %868 = arith.index_cast %832 : i32 to index
    %c0_338 = arith.constant 0 : index
    %869 = vector.load %arg25[%868, %c0_338] : memref<64x128xf32, #tpu.memory_space<vmem>>, vector<8x128xf32>
    tpu.vector_store %arg25[%868, %c0_338], %867 {strides = array<i32>} : memref<64x128xf32, #tpu.memory_space<vmem>>, vector<8x128xf32>,
    %c5_i32_339 = arith.constant 5 : i32
    %c8_i32_340 = arith.constant 8 : i32
    %870 = arith.muli %c5_i32_339, %c8_i32_340 : i32
    %871 = tpu.assume_multiple %870, 8 : i32
    %872 = arith.index_cast %871 : i32 to index
    %c0_341 = arith.constant 0 : index
    %873 = vector.load %arg24[%872, %c0_341] : memref<64x512xf32, #tpu.memory_space<vmem>>, vector<8x512xf32>
    %cst_342 = arith.constant dense<0.000000e+00> : vector<8x512xf32>
    %874 = tpu.matmul %867, %673, %cst_342 {dimension_numbers = #tpu.dot_dimension_numbers<[1], [0], [0], [1], [0, 0, 1, 1], [], []>} : vector<8x128xf32>, vector<128x512xf32>, vector<8x512xf32> -> vector<8x512xf32>
    %875 = arith.addf %873, %874 : vector<8x512xf32>
    %876 = vector.extract_strided_slice %875 {offsets = [0, 0], sizes = [8, 128], strides = [1, 1]} : vector<8x512xf32> to vector<8x128xf32>
    %cst_343 = arith.constant 5.000000e-01 : f32
    %877 = vector.broadcast %cst_343 : f32 to vector<8x128xf32>
    %878 = arith.mulf %877, %876 : vector<8x128xf32>
    %879 = math.tanh %878 : vector<8x128xf32>
    %cst_344 = arith.constant 5.000000e-01 : f32
    %880 = vector.broadcast %cst_344 : f32 to vector<8x128xf32>
    %881 = arith.mulf %880, %879 : vector<8x128xf32>
    %cst_345 = arith.constant 5.000000e-01 : f32
    %882 = vector.broadcast %cst_345 : f32 to vector<8x128xf32>
    %883 = arith.addf %881, %882 : vector<8x128xf32>
    %884 = vector.extract_strided_slice %875 {offsets = [0, 128], sizes = [8, 128], strides = [1, 1]} : vector<8x512xf32> to vector<8x128xf32>
    %cst_346 = arith.constant 5.000000e-01 : f32
    %885 = vector.broadcast %cst_346 : f32 to vector<8x128xf32>
    %886 = arith.mulf %885, %884 : vector<8x128xf32>
    %887 = math.tanh %886 : vector<8x128xf32>
    %cst_347 = arith.constant 5.000000e-01 : f32
    %888 = vector.broadcast %cst_347 : f32 to vector<8x128xf32>
    %889 = arith.mulf %888, %887 : vector<8x128xf32>
    %cst_348 = arith.constant 5.000000e-01 : f32
    %890 = vector.broadcast %cst_348 : f32 to vector<8x128xf32>
    %891 = arith.addf %889, %890 : vector<8x128xf32>
    %892 = vector.extract_strided_slice %875 {offsets = [0, 256], sizes = [8, 128], strides = [1, 1]} : vector<8x512xf32> to vector<8x128xf32>
    %893 = math.tanh %892 : vector<8x128xf32>
    %894 = vector.extract_strided_slice %875 {offsets = [0, 384], sizes = [8, 128], strides = [1, 1]} : vector<8x512xf32> to vector<8x128xf32>
    %cst_349 = arith.constant 5.000000e-01 : f32
    %895 = vector.broadcast %cst_349 : f32 to vector<8x128xf32>
    %896 = arith.mulf %895, %894 : vector<8x128xf32>
    %897 = math.tanh %896 : vector<8x128xf32>
    %cst_350 = arith.constant 5.000000e-01 : f32
    %898 = vector.broadcast %cst_350 : f32 to vector<8x128xf32>
    %899 = arith.mulf %898, %897 : vector<8x128xf32>
    %cst_351 = arith.constant 5.000000e-01 : f32
    %900 = vector.broadcast %cst_351 : f32 to vector<8x128xf32>
    %901 = arith.addf %899, %900 : vector<8x128xf32>
    %902 = arith.mulf %891, %865 : vector<8x128xf32>
    %903 = arith.mulf %883, %893 : vector<8x128xf32>
    %904 = arith.addf %902, %903 : vector<8x128xf32>
    %905 = math.tanh %904 : vector<8x128xf32>
    %906 = arith.mulf %901, %905 : vector<8x128xf32>
    %907 = arith.index_cast %871 : i32 to index
    %c0_352 = arith.constant 0 : index
    %908 = vector.load %arg25[%907, %c0_352] : memref<64x128xf32, #tpu.memory_space<vmem>>, vector<8x128xf32>
    tpu.vector_store %arg25[%907, %c0_352], %906 {strides = array<i32>} : memref<64x128xf32, #tpu.memory_space<vmem>>, vector<8x128xf32>,
    %c6_i32_353 = arith.constant 6 : i32
    %c8_i32_354 = arith.constant 8 : i32
    %909 = arith.muli %c6_i32_353, %c8_i32_354 : i32
    %910 = tpu.assume_multiple %909, 8 : i32
    %911 = arith.index_cast %910 : i32 to index
    %c0_355 = arith.constant 0 : index
    %912 = vector.load %arg24[%911, %c0_355] : memref<64x512xf32, #tpu.memory_space<vmem>>, vector<8x512xf32>
    %cst_356 = arith.constant dense<0.000000e+00> : vector<8x512xf32>
    %913 = tpu.matmul %906, %673, %cst_356 {dimension_numbers = #tpu.dot_dimension_numbers<[1], [0], [0], [1], [0, 0, 1, 1], [], []>} : vector<8x128xf32>, vector<128x512xf32>, vector<8x512xf32> -> vector<8x512xf32>
    %914 = arith.addf %912, %913 : vector<8x512xf32>
    %915 = vector.extract_strided_slice %914 {offsets = [0, 0], sizes = [8, 128], strides = [1, 1]} : vector<8x512xf32> to vector<8x128xf32>
    %cst_357 = arith.constant 5.000000e-01 : f32
    %916 = vector.broadcast %cst_357 : f32 to vector<8x128xf32>
    %917 = arith.mulf %916, %915 : vector<8x128xf32>
    %918 = math.tanh %917 : vector<8x128xf32>
    %cst_358 = arith.constant 5.000000e-01 : f32
    %919 = vector.broadcast %cst_358 : f32 to vector<8x128xf32>
    %920 = arith.mulf %919, %918 : vector<8x128xf32>
    %cst_359 = arith.constant 5.000000e-01 : f32
    %921 = vector.broadcast %cst_359 : f32 to vector<8x128xf32>
    %922 = arith.addf %920, %921 : vector<8x128xf32>
    %923 = vector.extract_strided_slice %914 {offsets = [0, 128], sizes = [8, 128], strides = [1, 1]} : vector<8x512xf32> to vector<8x128xf32>
    %cst_360 = arith.constant 5.000000e-01 : f32
    %924 = vector.broadcast %cst_360 : f32 to vector<8x128xf32>
    %925 = arith.mulf %924, %923 : vector<8x128xf32>
    %926 = math.tanh %925 : vector<8x128xf32>
    %cst_361 = arith.constant 5.000000e-01 : f32
    %927 = vector.broadcast %cst_361 : f32 to vector<8x128xf32>
    %928 = arith.mulf %927, %926 : vector<8x128xf32>
    %cst_362 = arith.constant 5.000000e-01 : f32
    %929 = vector.broadcast %cst_362 : f32 to vector<8x128xf32>
    %930 = arith.addf %928, %929 : vector<8x128xf32>
    %931 = vector.extract_strided_slice %914 {offsets = [0, 256], sizes = [8, 128], strides = [1, 1]} : vector<8x512xf32> to vector<8x128xf32>
    %932 = math.tanh %931 : vector<8x128xf32>
    %933 = vector.extract_strided_slice %914 {offsets = [0, 384], sizes = [8, 128], strides = [1, 1]} : vector<8x512xf32> to vector<8x128xf32>
    %cst_363 = arith.constant 5.000000e-01 : f32
    %934 = vector.broadcast %cst_363 : f32 to vector<8x128xf32>
    %935 = arith.mulf %934, %933 : vector<8x128xf32>
    %936 = math.tanh %935 : vector<8x128xf32>
    %cst_364 = arith.constant 5.000000e-01 : f32
    %937 = vector.broadcast %cst_364 : f32 to vector<8x128xf32>
    %938 = arith.mulf %937, %936 : vector<8x128xf32>
    %cst_365 = arith.constant 5.000000e-01 : f32
    %939 = vector.broadcast %cst_365 : f32 to vector<8x128xf32>
    %940 = arith.addf %938, %939 : vector<8x128xf32>
    %941 = arith.mulf %930, %904 : vector<8x128xf32>
    %942 = arith.mulf %922, %932 : vector<8x128xf32>
    %943 = arith.addf %941, %942 : vector<8x128xf32>
    %944 = math.tanh %943 : vector<8x128xf32>
    %945 = arith.mulf %940, %944 : vector<8x128xf32>
    %946 = arith.index_cast %910 : i32 to index
    %c0_366 = arith.constant 0 : index
    %947 = vector.load %arg25[%946, %c0_366] : memref<64x128xf32, #tpu.memory_space<vmem>>, vector<8x128xf32>
    tpu.vector_store %arg25[%946, %c0_366], %945 {strides = array<i32>} : memref<64x128xf32, #tpu.memory_space<vmem>>, vector<8x128xf32>,
    %c7_i32_367 = arith.constant 7 : i32
    %c8_i32_368 = arith.constant 8 : i32
    %948 = arith.muli %c7_i32_367, %c8_i32_368 : i32
    %949 = tpu.assume_multiple %948, 8 : i32
    %950 = arith.index_cast %949 : i32 to index
    %c0_369 = arith.constant 0 : index
    %951 = vector.load %arg24[%950, %c0_369] : memref<64x512xf32, #tpu.memory_space<vmem>>, vector<8x512xf32>
    %cst_370 = arith.constant dense<0.000000e+00> : vector<8x512xf32>
    %952 = tpu.matmul %945, %673, %cst_370 {dimension_numbers = #tpu.dot_dimension_numbers<[1], [0], [0], [1], [0, 0, 1, 1], [], []>} : vector<8x128xf32>, vector<128x512xf32>, vector<8x512xf32> -> vector<8x512xf32>
    %953 = arith.addf %951, %952 : vector<8x512xf32>
    %954 = vector.extract_strided_slice %953 {offsets = [0, 0], sizes = [8, 128], strides = [1, 1]} : vector<8x512xf32> to vector<8x128xf32>
    %cst_371 = arith.constant 5.000000e-01 : f32
    %955 = vector.broadcast %cst_371 : f32 to vector<8x128xf32>
    %956 = arith.mulf %955, %954 : vector<8x128xf32>
    %957 = math.tanh %956 : vector<8x128xf32>
    %cst_372 = arith.constant 5.000000e-01 : f32
    %958 = vector.broadcast %cst_372 : f32 to vector<8x128xf32>
    %959 = arith.mulf %958, %957 : vector<8x128xf32>
    %cst_373 = arith.constant 5.000000e-01 : f32
    %960 = vector.broadcast %cst_373 : f32 to vector<8x128xf32>
    %961 = arith.addf %959, %960 : vector<8x128xf32>
    %962 = vector.extract_strided_slice %953 {offsets = [0, 128], sizes = [8, 128], strides = [1, 1]} : vector<8x512xf32> to vector<8x128xf32>
    %cst_374 = arith.constant 5.000000e-01 : f32
    %963 = vector.broadcast %cst_374 : f32 to vector<8x128xf32>
    %964 = arith.mulf %963, %962 : vector<8x128xf32>
    %965 = math.tanh %964 : vector<8x128xf32>
    %cst_375 = arith.constant 5.000000e-01 : f32
    %966 = vector.broadcast %cst_375 : f32 to vector<8x128xf32>
    %967 = arith.mulf %966, %965 : vector<8x128xf32>
    %cst_376 = arith.constant 5.000000e-01 : f32
    %968 = vector.broadcast %cst_376 : f32 to vector<8x128xf32>
    %969 = arith.addf %967, %968 : vector<8x128xf32>
    %970 = vector.extract_strided_slice %953 {offsets = [0, 256], sizes = [8, 128], strides = [1, 1]} : vector<8x512xf32> to vector<8x128xf32>
    %971 = math.tanh %970 : vector<8x128xf32>
    %972 = vector.extract_strided_slice %953 {offsets = [0, 384], sizes = [8, 128], strides = [1, 1]} : vector<8x512xf32> to vector<8x128xf32>
    %cst_377 = arith.constant 5.000000e-01 : f32
    %973 = vector.broadcast %cst_377 : f32 to vector<8x128xf32>
    %974 = arith.mulf %973, %972 : vector<8x128xf32>
    %975 = math.tanh %974 : vector<8x128xf32>
    %cst_378 = arith.constant 5.000000e-01 : f32
    %976 = vector.broadcast %cst_378 : f32 to vector<8x128xf32>
    %977 = arith.mulf %976, %975 : vector<8x128xf32>
    %cst_379 = arith.constant 5.000000e-01 : f32
    %978 = vector.broadcast %cst_379 : f32 to vector<8x128xf32>
    %979 = arith.addf %977, %978 : vector<8x128xf32>
    %980 = arith.mulf %969, %943 : vector<8x128xf32>
    %981 = arith.mulf %961, %971 : vector<8x128xf32>
    %982 = arith.addf %980, %981 : vector<8x128xf32>
    %983 = math.tanh %982 : vector<8x128xf32>
    %984 = arith.mulf %979, %983 : vector<8x128xf32>
    %985 = arith.index_cast %949 : i32 to index
    %c0_380 = arith.constant 0 : index
    %986 = vector.load %arg25[%985, %c0_380] : memref<64x128xf32, #tpu.memory_space<vmem>>, vector<8x128xf32>
    tpu.vector_store %arg25[%985, %c0_380], %984 {strides = array<i32>} : memref<64x128xf32, #tpu.memory_space<vmem>>, vector<8x128xf32>,
    %c8_i32_381 = arith.constant 8 : i32
    %c2 = arith.constant 2 : index
    %c0_382 = arith.constant 0 : index
    %c0_383 = arith.constant 0 : index
    %987 = vector.load %arg22[%c2, %c0_382, %c0_383] : memref<3x8x128xf32, #tpu.memory_space<vmem>>, vector<1x8x128xf32>
    %988 = vector.shape_cast %987 : vector<1x8x128xf32> to vector<8x128xf32>
    %989 = vector.shape_cast %984 : vector<8x128xf32> to vector<1x8x128xf32>
    tpu.vector_store %arg22[%c2, %c0_382, %c0_383], %989 {strides = array<i32>} : memref<3x8x128xf32, #tpu.memory_space<vmem>>, vector<1x8x128xf32>,
    %c2_384 = arith.constant 2 : index
    %c0_385 = arith.constant 0 : index
    %c0_386 = arith.constant 0 : index
    %990 = vector.load %arg23[%c2_384, %c0_385, %c0_386] : memref<3x8x128xf32, #tpu.memory_space<vmem>>, vector<1x8x128xf32>
    %991 = vector.shape_cast %990 : vector<1x8x128xf32> to vector<8x128xf32>
    %992 = vector.shape_cast %982 : vector<8x128xf32> to vector<1x8x128xf32>
    tpu.vector_store %arg23[%c2_384, %c0_385, %c0_386], %992 {strides = array<i32>} : memref<3x8x128xf32, #tpu.memory_space<vmem>>, vector<1x8x128xf32>,
    %c0_387 = arith.constant 0 : index
    %993 = memref.load %arg1[%c0_387] : memref<2xi32, #tpu.memory_space<smem>>
    %c8_i32_388 = arith.constant 8 : i32
    %994 = arith.muli %993, %c8_i32_388 : i32
    %c0_i32_389 = arith.constant 0 : i32
    %995 = arith.addi %994, %c0_i32_389 : i32
    %996 = arith.index_cast %995 : i32 to index
    %c0_390 = arith.constant 0 : index
    %997 = vector.load %arg25[%996, %c0_390] : memref<64x128xf32, #tpu.memory_space<vmem>>, vector<1x128xf32>
    %c1_391 = arith.constant 1 : index
    %998 = memref.load %arg1[%c1_391] : memref<2xi32, #tpu.memory_space<smem>>
    %c8_i32_392 = arith.constant 8 : i32
    %999 = arith.muli %998, %c8_i32_392 : i32
    %c1_i32_393 = arith.constant 1 : i32
    %1000 = arith.addi %999, %c1_i32_393 : i32
    %1001 = arith.index_cast %1000 : i32 to index
    %c0_394 = arith.constant 0 : index
    %1002 = vector.load %arg25[%1001, %c0_394] : memref<64x128xf32, #tpu.memory_space<vmem>>, vector<1x128xf32>
    %cst_395 = arith.constant 0.000000e+00 : f32
    %1003 = vector.broadcast %cst_395 : f32 to vector<6x128xf32>
    %1004 = tpu.concatenate %997, %1002, %1003 in 0 : vector<1x128xf32>, vector<1x128xf32>, vector<6x128xf32> -> vector<8x128xf32>
    %c0_i32_396 = arith.constant 0 : i32
    %1005 = tpu.memref_slice %arg28[%c0_i32_396] : memref<2x!tpu.dma_semaphore, #tpu.memory_space<semaphore_mem>> -> memref<1x!tpu.dma_semaphore, #tpu.memory_space<semaphore_mem>>
    %1006 = tpu.memref_squeeze %1005 : memref<1x!tpu.dma_semaphore, #tpu.memory_space<semaphore_mem>> -> memref<!tpu.dma_semaphore, #tpu.memory_space<semaphore_mem>>
    tpu.wait_dma2 semaphore(%1006 : memref<!tpu.dma_semaphore, #tpu.memory_space<semaphore_mem>>) src(%arg13 : memref<128x2048xf32, #tpu.memory_space<any>>) dst(%arg26 : memref<128x2048xf32, #tpu.memory_space<vmem>>)
    %c0_397 = arith.constant 0 : index
    %c0_398 = arith.constant 0 : index
    %1007 = vector.load %arg26[%c0_397, %c0_398] : memref<128x2048xf32, #tpu.memory_space<vmem>>, vector<128x2048xf32>
    %cst_399 = arith.constant dense<0.000000e+00> : vector<8x2048xf32>
    %1008 = tpu.matmul %1004, %1007, %cst_399 {dimension_numbers = #tpu.dot_dimension_numbers<[1], [0], [0], [1], [0, 0, 1, 1], [], []>} : vector<8x128xf32>, vector<128x2048xf32>, vector<8x2048xf32> -> vector<8x2048xf32>
    %c0_400 = arith.constant 0 : index
    %c0_401 = arith.constant 0 : index
    %1009 = vector.load %arg14[%c0_400, %c0_401] : memref<1x2048xf32, #tpu.memory_space<vmem>>, vector<1x2048xf32>
    %1010 = vector.broadcast %1009 : vector<1x2048xf32> to vector<8x2048xf32>
    %1011 = arith.addf %1008, %1010 : vector<8x2048xf32>
    %1012 = math.tanh %1011 : vector<8x2048xf32>
    %c1_i32_402 = arith.constant 1 : i32
    %1013 = tpu.memref_slice %arg28[%c1_i32_402] : memref<2x!tpu.dma_semaphore, #tpu.memory_space<semaphore_mem>> -> memref<1x!tpu.dma_semaphore, #tpu.memory_space<semaphore_mem>>
    %1014 = tpu.memref_squeeze %1013 : memref<1x!tpu.dma_semaphore, #tpu.memory_space<semaphore_mem>> -> memref<!tpu.dma_semaphore, #tpu.memory_space<semaphore_mem>>
    tpu.wait_dma2 semaphore(%1014 : memref<!tpu.dma_semaphore, #tpu.memory_space<semaphore_mem>>) src(%arg15 : memref<2048x256xf32, #tpu.memory_space<any>>) dst(%arg27 : memref<2048x256xf32, #tpu.memory_space<vmem>>)
    %c0_403 = arith.constant 0 : index
    %c0_404 = arith.constant 0 : index
    %1015 = vector.load %arg27[%c0_403, %c0_404] : memref<2048x256xf32, #tpu.memory_space<vmem>>, vector<2048x256xf32>
    %cst_405 = arith.constant dense<0.000000e+00> : vector<8x256xf32>
    %1016 = tpu.matmul %1012, %1015, %cst_405 {dimension_numbers = #tpu.dot_dimension_numbers<[1], [0], [0], [1], [0, 0, 1, 1], [], []>} : vector<8x2048xf32>, vector<2048x256xf32>, vector<8x256xf32> -> vector<8x256xf32>
    %c0_406 = arith.constant 0 : index
    %c0_407 = arith.constant 0 : index
    %1017 = vector.load %arg16[%c0_406, %c0_407] : memref<1x256xf32, #tpu.memory_space<vmem>>, vector<1x256xf32>
    %1018 = vector.broadcast %1017 : vector<1x256xf32> to vector<8x256xf32>
    %1019 = arith.addf %1016, %1018 : vector<8x256xf32>
    %1020 = math.tanh %1019 : vector<8x256xf32>
    %c0_408 = arith.constant 0 : index
    %c0_409 = arith.constant 0 : index
    %1021 = vector.load %arg17[%c0_408, %c0_409] : memref<256x128xf32, #tpu.memory_space<vmem>>, vector<256x128xf32>
    %cst_410 = arith.constant dense<0.000000e+00> : vector<8x128xf32>
    %1022 = tpu.matmul %1020, %1021, %cst_410 {dimension_numbers = #tpu.dot_dimension_numbers<[1], [0], [0], [1], [0, 0, 1, 1], [], []>} : vector<8x256xf32>, vector<256x128xf32>, vector<8x128xf32> -> vector<8x128xf32>
    %c0_411 = arith.constant 0 : index
    %c0_412 = arith.constant 0 : index
    %1023 = vector.load %arg18[%c0_411, %c0_412] : memref<1x128xf32, #tpu.memory_space<vmem>>, vector<1x128xf32>
    %1024 = vector.broadcast %1023 : vector<1x128xf32> to vector<8x128xf32>
    %1025 = arith.addf %1022, %1024 : vector<8x128xf32>
    %1026 = math.tanh %1025 : vector<8x128xf32>
    %c0_413 = arith.constant 0 : index
    %c0_414 = arith.constant 0 : index
    %1027 = vector.load %arg19[%c0_413, %c0_414] : memref<128x128xf32, #tpu.memory_space<vmem>>, vector<128x128xf32>
    %cst_415 = arith.constant dense<0.000000e+00> : vector<8x128xf32>
    %1028 = tpu.matmul %1026, %1027, %cst_415 {dimension_numbers = #tpu.dot_dimension_numbers<[1], [0], [0], [1], [0, 0, 1, 1], [], []>} : vector<8x128xf32>, vector<128x128xf32>, vector<8x128xf32> -> vector<8x128xf32>
    %c0_416 = arith.constant 0 : index
    %c0_417 = arith.constant 0 : index
    %1029 = vector.load %arg20[%c0_416, %c0_417] : memref<1x128xf32, #tpu.memory_space<vmem>>, vector<1x128xf32>
    %1030 = vector.broadcast %1029 : vector<1x128xf32> to vector<8x128xf32>
    %1031 = arith.addf %1028, %1030 : vector<8x128xf32>
    %c0_418 = arith.constant 0 : index
    %c0_419 = arith.constant 0 : index
    %1032 = vector.load %arg21[%c0_418, %c0_419] : memref<8x128xf32, #tpu.memory_space<vmem>>, vector<8x128xf32>
    tpu.vector_store %arg21[%c0_418, %c0_419], %1031 {strides = array<i32>} : memref<8x128xf32, #tpu.memory_space<vmem>>, vector<8x128xf32>,
    return
  }
  func.func @transform_0(%arg0: i32, %arg1: memref<2xi32, #tpu.memory_space<smem>>) -> (i32, i32) {
    %c0_i32 = arith.constant 0 : i32
    %c0_i32_0 = arith.constant 0 : i32
    %c0_i32_1 = arith.constant 0 : i32
    return %c0_i32, %c0_i32_0 : i32, i32
  }
  func.func @transform_1(%arg0: i32, %arg1: memref<2xi32, #tpu.memory_space<smem>>) -> (i32, i32) {
    %c0_i32 = arith.constant 0 : i32
    %c0_i32_0 = arith.constant 0 : i32
    %c0_i32_1 = arith.constant 0 : i32
    return %c0_i32, %c0_i32_0 : i32, i32
  }
  func.func @transform_2(%arg0: i32, %arg1: memref<2xi32, #tpu.memory_space<smem>>) -> (i32, i32) {
    %c0_i32 = arith.constant 0 : i32
    %c0_i32_0 = arith.constant 0 : i32
    %c0_i32_1 = arith.constant 0 : i32
    return %c0_i32, %c0_i32_0 : i32, i32
  }
  func.func @transform_3(%arg0: i32, %arg1: memref<2xi32, #tpu.memory_space<smem>>) -> (i32, i32) {
    %c0_i32 = arith.constant 0 : i32
    %c0_i32_0 = arith.constant 0 : i32
    %c0_i32_1 = arith.constant 0 : i32
    return %c0_i32, %c0_i32_0 : i32, i32
  }
  func.func @transform_4(%arg0: i32, %arg1: memref<2xi32, #tpu.memory_space<smem>>) -> (i32, i32) {
    %c0_i32 = arith.constant 0 : i32
    %c0_i32_0 = arith.constant 0 : i32
    %c0_i32_1 = arith.constant 0 : i32
    return %c0_i32, %c0_i32_0 : i32, i32
  }
  func.func @transform_5(%arg0: i32, %arg1: memref<2xi32, #tpu.memory_space<smem>>) -> (i32, i32) {
    %c0_i32 = arith.constant 0 : i32
    %c0_i32_0 = arith.constant 0 : i32
    %c0_i32_1 = arith.constant 0 : i32
    return %c0_i32, %c0_i32_0 : i32, i32
  }
  func.func @transform_6(%arg0: i32, %arg1: memref<2xi32, #tpu.memory_space<smem>>) -> (i32, i32) {
    %c0_i32 = arith.constant 0 : i32
    %c0_i32_0 = arith.constant 0 : i32
    %c0_i32_1 = arith.constant 0 : i32
    return %c0_i32, %c0_i32_0 : i32, i32
  }
  func.func @transform_7(%arg0: i32, %arg1: memref<2xi32, #tpu.memory_space<smem>>) -> (i32, i32) {
    %c0_i32 = arith.constant 0 : i32
    %c0_i32_0 = arith.constant 0 : i32
    %c0_i32_1 = arith.constant 0 : i32
    return %c0_i32, %c0_i32_0 : i32, i32
  }
  func.func @transform_8(%arg0: i32, %arg1: memref<2xi32, #tpu.memory_space<smem>>) -> (i32, i32) {
    %c0_i32 = arith.constant 0 : i32
    %c0_i32_0 = arith.constant 0 : i32
    %c0_i32_1 = arith.constant 0 : i32
    return %c0_i32, %c0_i32_0 : i32, i32
  }
  func.func @transform_9(%arg0: i32, %arg1: memref<2xi32, #tpu.memory_space<smem>>) -> (i32, i32) {
    %c0_i32 = arith.constant 0 : i32
    %c0_i32_0 = arith.constant 0 : i32
    %c0_i32_1 = arith.constant 0 : i32
    return %c0_i32, %c0_i32_0 : i32, i32
  }
  func.func @transform_10(%arg0: i32, %arg1: memref<2xi32, #tpu.memory_space<smem>>) -> (i32, i32) {
    %c0_i32 = arith.constant 0 : i32
    %c0_i32_0 = arith.constant 0 : i32
    %c0_i32_1 = arith.constant 0 : i32
    return %c0_i32, %c0_i32_0 : i32, i32
  }
  func.func @transform_12(%arg0: i32, %arg1: memref<2xi32, #tpu.memory_space<smem>>) -> (i32, i32) {
    %c0_i32 = arith.constant 0 : i32
    %c0_i32_0 = arith.constant 0 : i32
    %c0_i32_1 = arith.constant 0 : i32
    return %c0_i32, %c0_i32_0 : i32, i32
  }
  func.func @transform_14(%arg0: i32, %arg1: memref<2xi32, #tpu.memory_space<smem>>) -> (i32, i32) {
    %c0_i32 = arith.constant 0 : i32
    %c0_i32_0 = arith.constant 0 : i32
    %c0_i32_1 = arith.constant 0 : i32
    return %c0_i32, %c0_i32_0 : i32, i32
  }
  func.func @transform_15(%arg0: i32, %arg1: memref<2xi32, #tpu.memory_space<smem>>) -> (i32, i32) {
    %c0_i32 = arith.constant 0 : i32
    %c0_i32_0 = arith.constant 0 : i32
    %c0_i32_1 = arith.constant 0 : i32
    return %c0_i32, %c0_i32_0 : i32, i32
  }
  func.func @transform_16(%arg0: i32, %arg1: memref<2xi32, #tpu.memory_space<smem>>) -> (i32, i32) {
    %c0_i32 = arith.constant 0 : i32
    %c0_i32_0 = arith.constant 0 : i32
    %c0_i32_1 = arith.constant 0 : i32
    return %c0_i32, %c0_i32_0 : i32, i32
  }
  func.func @transform_17(%arg0: i32, %arg1: memref<2xi32, #tpu.memory_space<smem>>) -> (i32, i32) {
    %c0_i32 = arith.constant 0 : i32
    %c0_i32_0 = arith.constant 0 : i32
    %c0_i32_1 = arith.constant 0 : i32
    return %c0_i32, %c0_i32_0 : i32, i32
  }
  func.func @transform_18(%arg0: i32, %arg1: memref<2xi32, #tpu.memory_space<smem>>) -> (i32, i32) {
    %c0_i32 = arith.constant 0 : i32
    %c0_i32_0 = arith.constant 0 : i32
    %c0_i32_1 = arith.constant 0 : i32
    return %c0_i32, %c0_i32_0 : i32, i32
  }
  func.func @transform_19(%arg0: i32, %arg1: memref<2xi32, #tpu.memory_space<smem>>) -> (i32, i32) {
    %c0_i32 = arith.constant 0 : i32
    %c0_i32_0 = arith.constant 0 : i32
    %c0_i32_1 = arith.constant 0 : i32
    return %c0_i32, %c0_i32_0 : i32, i32
  }
  func.func @transform_20(%arg0: i32, %arg1: memref<2xi32, #tpu.memory_space<smem>>) -> (i32, i32, i32) {
    %c0_i32 = arith.constant 0 : i32
    %c0_i32_0 = arith.constant 0 : i32
    %c0_i32_1 = arith.constant 0 : i32
    %c0_i32_2 = arith.constant 0 : i32
    return %c0_i32, %c0_i32_0, %c0_i32_1 : i32, i32, i32
  }
  func.func @transform_21(%arg0: i32, %arg1: memref<2xi32, #tpu.memory_space<smem>>) -> (i32, i32, i32) {
    %c0_i32 = arith.constant 0 : i32
    %c0_i32_0 = arith.constant 0 : i32
    %c0_i32_1 = arith.constant 0 : i32
    %c0_i32_2 = arith.constant 0 : i32
    return %c0_i32, %c0_i32_0, %c0_i32_1 : i32, i32, i32
  }
}

</mosaic_0001>

<bundles_post_ra>
// kernel: tpu_custom_call.1
= control target key start
LH: loop header
LB: loop body
LE: loop exit
PB: predicated region body
PF: predicated region fallthrough
CT: control target
= control target key end

     0   :  { %s13880_s0 = inlined_call_operand.hbm [shape: s32[2], index: 0, kind: input, shape index: {}]   ;;  %s13881_s1 = inlined_call_operand.vmem [shape: s32[64,1], index: 1, kind: input, shape index: {}]   ;;  %s13882_s2 = inlined_call_operand.hbm [shape: f32[32,128], index: 2, kind: input, shape index: {}]   ;;  %s13883_s3 = inlined_call_operand.hbm [shape: f32[128,512], index: 3, kind: input, shape index: {}]   ;;  %s13884_s4 = inlined_call_operand.hbm [shape: f32[128,512], index: 4, kind: input, shape index: {}]   ;;  %s13885_s5 = inlined_call_operand.hbm [shape: f32[1,512], index: 5, kind: input, shape index: {}]   ;;  %s13886_s6 = inlined_call_operand.hbm [shape: f32[128,512], index: 6, kind: input, shape index: {}]   ;;  %s13887_s7 = inlined_call_operand.hbm [shape: f32[128,512], index: 7, kind: input, shape index: {}]   ;;  %s13888_s8 = inlined_call_operand.hbm [shape: f32[1,512], index: 8, kind: input, shape index: {}]   ;;  %s13889_s9 = inlined_call_operand.hbm [shape: f32[128,512], index: 9, kind: input, shape index: {}]   ;;  %s13890_s10 = inlined_call_operand.hbm [shape: f32[128,512], index: 10, kind: input, shape index: {}]   ;;  %s13891_s11 = inlined_call_operand.hbm [shape: f32[1,512], index: 11, kind: input, shape index: {}]   ;;  %s13892_s12 = inlined_call_operand.hbm [shape: f32[128,2048], index: 12, kind: input, shape index: {}]   ;;  %s13893_s13 = inlined_call_operand.hbm [shape: f32[1,2048], index: 13, kind: input, shape index: {}]   ;;  %s13894_s14 = inlined_call_operand.hbm [shape: f32[2048,256], index: 14, kind: input, shape index: {}]   ;;  %s13895_s15 = inlined_call_operand.hbm [shape: f32[1,256], index: 15, kind: input, shape index: {}]   ;;  %s13896_s16 = inlined_call_operand.hbm [shape: f32[256,128], index: 16, kind: input, shape index: {}]   ;;  %s13897_s17 = inlined_call_operand.hbm [shape: f32[1,128], index: 17, kind: input, shape index: {}]   ;;  %s13898_s18 = inlined_call_operand.hbm [shape: f32[128,128], index: 18, kind: input, shape index: {}]   ;;  %s13899_s19 = inlined_call_operand.hbm [shape: f32[1,128], index: 19, kind: input, shape index: {}]   ;;  %s13900_s20 = inlined_call_operand.hbm [shape: f32[8,128], index: 20, kind: output, shape index: {0}]   ;;  %s13901_s21 = inlined_call_operand.hbm [shape: f32[3,8,128], index: 21, kind: output, shape index: {1}]   ;;  %s13902_s22 = inlined_call_operand.hbm [shape: f32[3,8,128], index: 22, kind: output, shape index: {2}]  }
   0x1   :  { %13925 = sst [smem:[#allocation67_spill]] %s13880_s0 }
   0x2   :  { %13926 = sst [smem:[#allocation68_spill]] %s13881_s1  ;;  %s13935_s29 = sld [smem:[#allocation67_spill]] }
   0x3   :  { %13927 = sst [smem:[#allocation69_spill]] %s13882_s2 }
   0x4   :  { %13928 = sst [smem:[#allocation70_spill]] %s13883_s3 }
   0x5   :  { %13929 = sst [smem:[#allocation71_spill]] %s13884_s4 }
   0x6   :  { %13930 = sst [smem:[#allocation72_spill]] %s13885_s5 }
   0x7   :  { %13931 = sst [smem:[#allocation73_spill]] %s13886_s6 }
   0x8   :  { %13932 = sst [smem:[#allocation74_spill]] %s13894_s14  ;;  %s11361_s14 = scalar_lea.hbm %s13935_s29, 16 }
   0x9   :  { %13933 = sst [smem:[#allocation75_spill]] %s13900_s20  ;;  %p11362_p0 = scmp.ne.s32.totalorder %s13935_s29, %s11361_s14 }
   0xa   :  { %13934 = sst [smem:[#allocation76_spill]] %s13902_s22  ;;  %p11365_p1 = scmp.lt.u32.totalorder %s11361_s14, %s13935_s29 }
   0xc   :  { %p11367_p2 = pnand %p11365_p1, %p11362_p0 }
   0xe   :  { %11370 = shalt.err (!%p11367_p2)  }
   0xf   :  { %s11861_s1 = smov [#allocation8]  }
  0x10   :  { %29 = dma.hbm_to_smem %s13935_s29, 16, %s11861_s1, [#allocation7] }
  0x11   :  { %11833 = dma.done.wait [#allocation7], 16 }
  0x12   :  { %11834 = vsyncadd [#allocation7], 4294967280 }
  0x13   :  { %31 = sfence }
  0x14   :  { %32 = vsyncpa [#allocation10], 0 }
  0x15   :  { %33 = vsyncpa [#allocation13], 0 }
  0x16   :  { %34 = vsyncpa [#allocation16], 0 }
  0x17   :  { %35 = vsyncpa [#allocation19], 0 }
  0x18   :  { %36 = vsyncpa [#allocation22], 0 }
  0x19   :  { %37 = vsyncpa [#allocation25], 0 }
  0x1a   :  { %38 = vsyncpa [#allocation28], 0 }
  0x1b   :  { %39 = vsyncpa [#allocation31], 0 }
  0x1c   :  { %40 = vsyncpa [#allocation34], 0 }
  0x1d   :  { %41 = vsyncpa [#allocation11], 0 }
  0x1e   :  { %42 = vsyncpa [#allocation37], 0  ;;  %s11862_s14 = smov [#allocation12]   ;;  %s13936_s2 = sld [smem:[#allocation70_spill]] }
  0x1f   :  { %s62_s6 = sshll.u32 %s11862_s14, 4  ;;  %s63_s6 = int_to_ptr.vmem [resolvable:$true] %s62_s6 }
  0x24   :  { %s11371_s27 = scalar_lea.hbm %s13936_s2, 8192 }
  0x25   :  { %p11372_p3 = scmp.ne.s32.totalorder %s13936_s2, %s11371_s27  ;;  %p11375_p4 = scmp.lt.u32.totalorder %s11371_s27, %s13936_s2 }
  0x27   :  { %p11377_p5 = pnand %p11375_p4, %p11372_p3 }
  0x29   :  { %11380 = shalt.err (!%p11377_p5)
}
  0x2a   :  { %s11381_s4 = scalar_lea.vmem %s63_s6, 8192  ;;  %p11386_p7 = scmp.lt.s32.totalorder %s63_s6, %s63_s6 }
  0x2b   :  { %p11382_p6 = scmp.ne.s32.totalorder %s63_s6, %s11381_s4  ;;  %p11387_p8 = scmp.lt.s32.totalorder %s11381_s4, %s11381_s4 }
  0x2d   :  { %p11388_p9 = por %p11387_p8, %p11386_p7 }
  0x2f   :  { %p11389_p10 = pnand %p11388_p9, %p11382_p6 }
  0x31   :  { %11392 = shalt.err (!%p11389_p10)
}
  0x32   :  { %s11863_s0 = smov 512   ;;  %s11864_s23 = smov 32  }
  0x33   :  { %68 = dma.hbm_to_vmem [thread:$0]  %s13936_s2, 8192, %s63_s6, [#allocation13], %s11863_s0, %s11863_s0, %s11864_s23  }
  0x34   :  { %s11865_s24 = smov [#allocation15]   ;;  %s11866_s25 = smov [#allocation18]  }
  0x35   :  { %s87_s14 = sshll.u32 %s11865_s24, 4  ;;  %s108_s26 = sshll.u32 %s11866_s25, 4  ;;  %s88_s14 = int_to_ptr.vmem [resolvable:$true] %s87_s14  ;;  %s109_s26 = int_to_ptr.vmem [resolvable:$true] %s108_s26 }
  0x36   :  { %s13937_s28 = sld [smem:[#allocation72_spill]] }
  0x3c   :  { %s11393_s29 = scalar_lea.hbm %s13937_s28, 64 }
  0x3d   :  { %p11394_p11 = scmp.ne.s32.totalorder %s13937_s28, %s11393_s29  ;;  %p11397_p12 = scmp.lt.u32.totalorder %s11393_s29, %s13937_s28 }
  0x3f   :  { %p11399_p13 = pnand %p11397_p12, %p11394_p11 }
  0x41   :  { %11402 = shalt.err (!%p11399_p13)
}
  0x42   :  { %s11403_s6 = scalar_lea.vmem %s88_s14, 64  ;;  %p11408_p1 = scmp.lt.s32.totalorder %s88_s14, %s88_s14 }
  0x43   :  { %p11404_p0 = scmp.ne.s32.totalorder %s88_s14, %s11403_s6  ;;  %p11409_p2 = scmp.lt.s32.totalorder %s11403_s6, %s11403_s6 }
  0x45   :  { %p11410_p3 = por %p11409_p2, %p11408_p1 }
  0x47   :  { %p11411_p4 = pnand %p11410_p3, %p11404_p0 }
  0x49   :  { %11414 = shalt.err (!%p11411_p4)
}
  0x4a   :  { %90 = dma.hbm_to_vmem [thread:$0]  %s13937_s28, 64, %s88_s14, [#allocation16]  }
  0x4b   :  { %s11415_s25 = scalar_lea.hbm %s13887_s7, 8192 }
  0x4c   :  { %p11416_p5 = scmp.ne.s32.totalorder %s13887_s7, %s11415_s25  ;;  %p11419_p6 = scmp.lt.u32.totalorder %s11415_s25, %s13887_s7 }
  0x4e   :  { %p11421_p7 = pnand %p11419_p6, %p11416_p5 }
  0x50   :  { %11424 = shalt.err (!%p11421_p7)
}
  0x51   :  { %s11425_s29 = scalar_lea.vmem %s109_s26, 8192  ;;  %p11430_p9 = scmp.lt.s32.totalorder %s109_s26, %s109_s26 }
  0x52   :  { %p11426_p8 = scmp.ne.s32.totalorder %s109_s26, %s11425_s29  ;;  %p11431_p10 = scmp.lt.s32.totalorder %s11425_s29, %s11425_s29 }
  0x54   :  { %p11432_p11 = por %p11431_p10, %p11430_p9 }
  0x56   :  { %p11433_p12 = pnand %p11432_p11, %p11426_p8 }
  0x58   :  { %11436 = shalt.err (!%p11433_p12)
}
  0x59   :  { %114 = dma.hbm_to_vmem [thread:$0]  %s13887_s7, 8192, %s109_s26, [#allocation19], %s11863_s0, %s11863_s0, %s11864_s23  }
  0x5a   :  { %s11867_s30 = smov [#allocation21]   ;;  %s11868_s6 = smov [#allocation24]  }
  0x5b   :  { %s130_s4 = sshll.u32 %s11867_s30, 4  ;;  %s155_s2 = sshll.u32 %s11868_s6, 4  ;;  %s131_s4 = int_to_ptr.vmem [resolvable:$true] %s130_s4  ;;  %s156_s2 = int_to_ptr.vmem [resolvable:$true] %s155_s2 }
  0x5c   :  { %s11437_s24 = scalar_lea.hbm %s13889_s9, 8192 }
  0x5d   :  { %p11438_p13 = scmp.ne.s32.totalorder %s13889_s9, %s11437_s24  ;;  %p11441_p0 = scmp.lt.u32.totalorder %s11437_s24, %s13889_s9 }
  0x5f   :  { %p11443_p1 = pnand %p11441_p0, %p11438_p13 }
  0x61   :  { %11446 = shalt.err (!%p11443_p1)
}
  0x62   :  { %s11447_s7 = scalar_lea.vmem %s131_s4, 8192  ;;  %p11452_p3 = scmp.lt.s32.totalorder %s131_s4, %s131_s4 }
  0x63   :  { %p11448_p2 = scmp.ne.s32.totalorder %s131_s4, %s11447_s7  ;;  %p11453_p4 = scmp.lt.s32.totalorder %s11447_s7, %s11447_s7 }
  0x65   :  { %p11454_p5 = por %p11453_p4, %p11452_p3 }
  0x67   :  { %p11455_p6 = pnand %p11454_p5, %p11448_p2 }
  0x69   :  { %11458 = shalt.err (!%p11455_p6)
}
  0x6a   :  { %136 = dma.hbm_to_vmem [thread:$0]  %s13889_s9, 8192, %s131_s4, [#allocation22], %s11863_s0, %s11863_s0, %s11864_s23  }
  0x6b   :  { %s11459_s28 = scalar_lea.hbm %s13891_s11, 64 }
  0x6c   :  { %p11460_p7 = scmp.ne.s32.totalorder %s13891_s11, %s11459_s28  ;;  %p11463_p8 = scmp.lt.u32.totalorder %s11459_s28, %s13891_s11 }
  0x6e   :  { %p11465_p9 = pnand %p11463_p8, %p11460_p7 }
  0x70   :  { %11468 = shalt.err (!%p11465_p9)
}
  0x71   :  { %s11469_s24 = scalar_lea.vmem %s156_s2, 64  ;;  %p11474_p11 = scmp.lt.s32.totalorder %s156_s2, %s156_s2 }
  0x72   :  { %p11470_p10 = scmp.ne.s32.totalorder %s156_s2, %s11469_s24  ;;  %p11475_p12 = scmp.lt.s32.totalorder %s11469_s24, %s11469_s24 }
  0x74   :  { %p11476_p13 = por %p11475_p12, %p11474_p11 }
  0x76   :  { %p11477_p0 = pnand %p11476_p13, %p11470_p10 }
  0x78   :  { %11480 = shalt.err (!%p11477_p0)
}
  0x79   :  { %158 = dma.hbm_to_vmem [thread:$0]  %s13891_s11, 64, %s156_s2, [#allocation25]  }
  0x7a   :  { %s11869_s25 = smov [#allocation27]   ;;  %s11870_s22 = smov [#allocation30]  }
  0x7b   :  { %s175_s20 = sshll.u32 %s11869_s25, 4  ;;  %s197_s27 = sshll.u32 %s11870_s22, 4  ;;  %s176_s20 = int_to_ptr.vmem [resolvable:$true] %s175_s20  ;;  %s198_s27 = int_to_ptr.vmem [resolvable:$true] %s197_s27 }
  0x7c   :  { %s11481_s3 = scalar_lea.hbm %s13895_s15, 32 }
  0x7d   :  { %p11482_p1 = scmp.ne.s32.totalorder %s13895_s15, %s11481_s3  ;;  %p11485_p2 = scmp.lt.u32.totalorder %s11481_s3, %s13895_s15 }
  0x7f   :  { %p11487_p3 = pnand %p11485_p2, %p11482_p1 }
  0x81   :  { %11490 = shalt.err (!%p11487_p3)
}
  0x82   :  { %s11491_s11 = scalar_lea.vmem %s176_s20, 32  ;;  %p11496_p5 = scmp.lt.s32.totalorder %s176_s20, %s176_s20 }
  0x83   :  { %p11492_p4 = scmp.ne.s32.totalorder %s176_s20, %s11491_s11  ;;  %p11497_p6 = scmp.lt.s32.totalorder %s11491_s11, %s11491_s11 }
  0x85   :  { %p11498_p7 = por %p11497_p6, %p11496_p5 }
  0x87   :  { %p11499_p8 = pnand %p11498_p7, %p11492_p4 }
  0x89   :  { %11502 = shalt.err (!%p11499_p8)
}
  0x8a   :  { %178 = dma.hbm_to_vmem [thread:$0]  %s13895_s15, 32, %s176_s20, [#allocation28]  }
  0x8b   :  { %s11503_s24 = scalar_lea.hbm %s13897_s17, 16 }
  0x8c   :  { %p11504_p9 = scmp.ne.s32.totalorder %s13897_s17, %s11503_s24  ;;  %p11507_p10 = scmp.lt.u32.totalorder %s11503_s24, %s13897_s17 }
  0x8e   :  { %p11509_p11 = pnand %p11507_p10, %p11504_p9 }
  0x90   :  { %11512 = shalt.err (!%p11509_p11)
}
  0x91   :  { %s11513_s7 = scalar_lea.vmem %s198_s27, 16  ;;  %s11517_s26 = scalar_lea.vmem %s198_s27, 32 }
  0x92   :  { %p11514_p12 = scmp.ne.s32.totalorder %s198_s27, %s11513_s7  ;;  %p11518_p13 = scmp.lt.s32.totalorder %s198_s27, %s198_s27 }
  0x93   :  { %p11519_p0 = scmp.lt.s32.totalorder %s11517_s26, %s11513_s7 }
  0x95   :  { %p11520_p1 = por %p11519_p0, %p11518_p13 }
  0x97   :  { %p11521_p2 = pnand %p11520_p1, %p11514_p12 }
  0x99   :  { %11524 = shalt.err (!%p11521_p2)
}
  0x9a   :  { %200 = dma.hbm_to_vmem [thread:$0]  %s13897_s17, 16, %s198_s27, [#allocation31]  }
  0x9b   :  { %s11871_s3 = smov [#allocation9]   ;;  %s13938_s30 = sld [smem:[#allocation69_spill]] }
  0x9c   :  { %s50_s29 = sshll.u32 %s11871_s3, 4  ;;  %s51_s29 = int_to_ptr.vmem [resolvable:$true] %s50_s29 }
  0xa1   :  { %s11525_s11 = scalar_lea.hbm %s13938_s30, 512 }
  0xa2   :  { %p11526_p3 = scmp.ne.s32.totalorder %s13938_s30, %s11525_s11  ;;  %p11529_p4 = scmp.lt.u32.totalorder %s11525_s11, %s13938_s30 }
  0xa4   :  { %p11531_p5 = pnand %p11529_p4, %p11526_p3 }
  0xa6   :  { %11534 = shalt.err (!%p11531_p5)
}
  0xa7   :  { %s11535_s24 = scalar_lea.vmem %s51_s29, 512  ;;  %p11540_p7 = scmp.lt.s32.totalorder %s51_s29, %s51_s29 }
  0xa8   :  { %p11536_p6 = scmp.ne.s32.totalorder %s51_s29, %s11535_s24  ;;  %p11541_p8 = scmp.lt.s32.totalorder %s11535_s24, %s11535_s24 }
  0xaa   :  { %p11542_p9 = por %p11541_p8, %p11540_p7 }
  0xac   :  { %p11543_p10 = pnand %p11542_p9, %p11536_p6 }
  0xae   :  { %11546 = shalt.err (!%p11543_p10)
}
  0xaf   :  { %s11872_s17 = smov 128   ;;  %s11873_s27 = smov 8  }
  0xb0   :  { %56 = dma.hbm_to_vmem [thread:$0]  %s13938_s30, 512, %s51_s29, [#allocation10], %s11872_s17, %s11872_s17, %s11873_s27  }
  0xb1   :  { %s11874_s25 = smov [#allocation14]   ;;  %s11875_s7 = smov [#allocation17]  }
  0xb2   :  { %s74_s22 = sshll.u32 %s11874_s25, 4  ;;  %s96_s26 = sshll.u32 %s11875_s7, 4  ;;  %s75_s22 = int_to_ptr.vmem [resolvable:$true] %s74_s22  ;;  %s12126_s26 = int_to_ptr.vmem [resolvable:$true] %s96_s26 }
  0xb3   :  { %s13939_s3 = sld [smem:[#allocation71_spill]] }
  0xb9   :  { %s11547_s14 = scalar_lea.hbm %s13939_s3, 8192 }
  0xba   :  { %p11548_p11 = scmp.ne.s32.totalorder %s13939_s3, %s11547_s14  ;;  %p11551_p12 = scmp.lt.u32.totalorder %s11547_s14, %s13939_s3 }
  0xbc   :  { %p11553_p13 = pnand %p11551_p12, %p11548_p11 }
  0xbe   :  { %11556 = shalt.err (!%p11553_p13)
}
  0xbf   :  { %s11557_s29 = scalar_lea.vmem %s75_s22, 8192  ;;  %p11562_p1 = scmp.lt.s32.totalorder %s75_s22, %s75_s22 }
  0xc0   :  { %p11558_p0 = scmp.ne.s32.totalorder %s75_s22, %s11557_s29  ;;  %p11563_p2 = scmp.lt.s32.totalorder %s11557_s29, %s11557_s29 }
  0xc2   :  { %p11564_p3 = por %p11563_p2, %p11562_p1 }
  0xc4   :  { %p11565_p4 = pnand %p11564_p3, %p11558_p0 }
  0xc6   :  { %11568 = shalt.err (!%p11565_p4)
}
  0xc7   :  { %80 = dma.hbm_to_vmem [thread:$0]  %s13939_s3, 8192, %s75_s22, [#allocation13], %s11863_s0, %s11863_s0, %s11864_s23  }
  0xc8   :  { %s13940_s9 = sld [smem:[#allocation73_spill]] }
  0xce   :  { %s11569_s4 = scalar_lea.hbm %s13940_s9, 8192 }
  0xcf   :  { %p11570_p5 = scmp.ne.s32.totalorder %s13940_s9, %s11569_s4  ;;  %p11573_p6 = scmp.lt.u32.totalorder %s11569_s4, %s13940_s9 }
  0xd1   :  { %p11575_p7 = pnand %p11573_p6, %p11570_p5 }
  0xd3   :  { %11578 = shalt.err (!%p11575_p7)
}
  0xd4   :  { %s11579_s14 = scalar_lea.vmem %s12126_s26, 8192  ;;  %p11584_p9 = scmp.lt.s32.totalorder %s12126_s26, %s12126_s26 }
  0xd5   :  { %p11580_p8 = scmp.ne.s32.totalorder %s12126_s26, %s11579_s14  ;;  %p11585_p10 = scmp.lt.s32.totalorder %s11579_s14, %s11579_s14 }
  0xd7   :  { %p11586_p11 = por %p11585_p10, %p11584_p9 }
  0xd9   :  { %p11587_p12 = pnand %p11586_p11, %p11580_p8 }
  0xdb   :  { %11590 = shalt.err (!%p11587_p12)
}
  0xdc   :  { %102 = dma.hbm_to_vmem [thread:$0]  %s13940_s9, 8192, %s12126_s26, [#allocation16], %s11863_s0, %s11863_s0, %s11864_s23  }
  0xdd   :  { %s11876_s28 = smov [#allocation20]   ;;  %s11877_s2 = smov [#allocation23]  }
  0xde   :  { %s121_s11 = sshll.u32 %s11876_s28, 4  ;;  %s142_s6 = sshll.u32 %s11877_s2, 4  ;;  %s122_s11 = int_to_ptr.vmem [resolvable:$true] %s121_s11  ;;  %s12163_s6 = int_to_ptr.vmem [resolvable:$true] %s142_s6 }
  0xdf   :  { %s11591_s1 = scalar_lea.hbm %s13888_s8, 64 }
  0xe0   :  { %p11592_p13 = scmp.ne.s32.totalorder %s13888_s8, %s11591_s1  ;;  %p11595_p0 = scmp.lt.u32.totalorder %s11591_s1, %s13888_s8 }
  0xe2   :  { %p11597_p1 = pnand %p11595_p0, %p11592_p13 }
  0xe4   :  { %11600 = shalt.err (!%p11597_p1)
}
  0xe5   :  { %s11601_s26 = scalar_lea.vmem %s122_s11, 64  ;;  %p11606_p3 = scmp.lt.s32.totalorder %s122_s11, %s122_s11 }
  0xe6   :  { %p11602_p2 = scmp.ne.s32.totalorder %s122_s11, %s11601_s26  ;;  %p11607_p4 = scmp.lt.s32.totalorder %s11601_s26, %s11601_s26 }
  0xe8   :  { %p11608_p5 = por %p11607_p4, %p11606_p3 }
  0xea   :  { %p11609_p6 = pnand %p11608_p5, %p11602_p2 }
  0xec   :  { %11612 = shalt.err (!%p11609_p6)
}
  0xed   :  { %124 = dma.hbm_to_vmem [thread:$0]  %s13888_s8, 64, %s122_s11, [#allocation19]  }
  0xee   :  { %s11613_s14 = scalar_lea.hbm %s13890_s10, 8192 }
  0xef   :  { %p11614_p7 = scmp.ne.s32.totalorder %s13890_s10, %s11613_s14  ;;  %p11617_p8 = scmp.lt.u32.totalorder %s11613_s14, %s13890_s10 }
  0xf1   :  { %p11619_p9 = pnand %p11617_p8, %p11614_p7 }
  0xf3   :  { %11622 = shalt.err (!%p11619_p9)
}
  0xf4   :  { %s11623_s29 = scalar_lea.vmem %s12163_s6, 8192  ;;  %p11628_p11 = scmp.lt.s32.totalorder %s12163_s6, %s12163_s6 }
  0xf5   :  { %p11624_p10 = scmp.ne.s32.totalorder %s12163_s6, %s11623_s29  ;;  %p11629_p12 = scmp.lt.s32.totalorder %s11623_s29, %s11623_s29 }
  0xf7   :  { %p11630_p13 = por %p11629_p12, %p11628_p11 }
  0xf9   :  { %p11631_p0 = pnand %p11630_p13, %p11624_p10 }
  0xfb   :  { %11634 = shalt.err (!%p11631_p0)
}
  0xfc   :  { %148 = dma.hbm_to_vmem [thread:$0]  %s13890_s10, 8192, %s12163_s6, [#allocation22], %s11863_s0, %s11863_s0, %s11864_s23  }
  0xfd   :  { %s11878_s30 = smov [#allocation26]   ;;  %s11879_s5 = smov [#allocation29]  }
  0xfe   :  { %s165_s1 = sshll.u32 %s11878_s30, 4  ;;  %s184_s24 = sshll.u32 %s11879_s5, 4  ;;  %s166_s1 = int_to_ptr.vmem [resolvable:$true] %s165_s1  ;;  %s12197_s24 = int_to_ptr.vmem [resolvable:$true] %s184_s24 }
  0xff   :  { %s11635_s26 = scalar_lea.hbm %s13893_s13, 256 }
 0x100   :  { %p11636_p1 = scmp.ne.s32.totalorder %s13893_s13, %s11635_s26  ;;  %p11639_p2 = scmp.lt.u32.totalorder %s11635_s26, %s13893_s13 }
 0x102   :  { %p11641_p3 = pnand %p11639_p2, %p11636_p1 }
 0x104   :  { %11644 = shalt.err (!%p11641_p3)
}
 0x105   :  { %s11645_s10 = scalar_lea.vmem %s166_s1, 256  ;;  %p11650_p5 = scmp.lt.s32.totalorder %s166_s1, %s166_s1 }
 0x106   :  { %p11646_p4 = scmp.ne.s32.totalorder %s166_s1, %s11645_s10  ;;  %p11651_p6 = scmp.lt.s32.totalorder %s11645_s10, %s11645_s10 }
 0x108   :  { %p11652_p7 = por %p11651_p6, %p11650_p5 }
 0x10a   :  { %p11653_p8 = pnand %p11652_p7, %p11646_p4 }
 0x10c   :  { %11656 = shalt.err (!%p11653_p8)
}
 0x10d   :  { %168 = dma.hbm_to_vmem [thread:$0]  %s13893_s13, 256, %s166_s1, [#allocation25]  }
 0x10e   :  { %s11657_s22 = scalar_lea.hbm %s13896_s16, 4096 }
 0x10f   :  { %p11658_p9 = scmp.ne.s32.totalorder %s13896_s16, %s11657_s22  ;;  %p11661_p10 = scmp.lt.u32.totalorder %s11657_s22, %s13896_s16 }
 0x111   :  { %p11663_p11 = pnand %p11661_p10, %p11658_p9 }
 0x113   :  { %11666 = shalt.err (!%p11663_p11)
}
 0x114   :  { %s11667_s8 = scalar_lea.vmem %s12197_s24, 4096  ;;  %p11672_p13 = scmp.lt.s32.totalorder %s12197_s24, %s12197_s24 }
 0x115   :  { %p11668_p12 = scmp.ne.s32.totalorder %s12197_s24, %s11667_s8  ;;  %p11673_p0 = scmp.lt.s32.totalorder %s11667_s8, %s11667_s8 }
 0x117   :  { %p11674_p1 = por %p11673_p0, %p11672_p13 }
 0x119   :  { %p11675_p2 = pnand %p11674_p1, %p11668_p12 }
 0x11b   :  { %11678 = shalt.err (!%p11675_p2)
}
 0x11c   :  { %190 = dma.hbm_to_vmem [thread:$0]  %s13896_s16, 4096, %s12197_s24, [#allocation28], %s11872_s17, %s11872_s17, %s11873_s27  }
 0x11d   :  { %s11880_s30 = smov [#allocation32]   ;;  %s11881_s5 = smov [#allocation33]  }
 0x11e   :  { %s206_s1 = sshll.u32 %s11880_s30, 4  ;;  %s219_s4 = sshll.u32 %s11881_s5, 4  ;;  %s207_s1 = int_to_ptr.vmem [resolvable:$true] %s206_s1  ;;  %s220_s4 = int_to_ptr.vmem [resolvable:$true] %s219_s4 }
 0x11f   :  { %s11679_s9 = scalar_lea.hbm %s13898_s18, 2048 }
 0x120   :  { %p11680_p3 = scmp.ne.s32.totalorder %s13898_s18, %s11679_s9  ;;  %p11683_p4 = scmp.lt.u32.totalorder %s11679_s9, %s13898_s18 }
 0x122   :  { %p11685_p5 = pnand %p11683_p4, %p11680_p3 }
 0x124   :  { %11688 = shalt.err (!%p11685_p5)
}
 0x125   :  { %s11689_s16 = scalar_lea.vmem %s207_s1, 2048  ;;  %p11694_p7 = scmp.lt.s32.totalorder %s207_s1, %s207_s1 }
 0x126   :  { %p11690_p6 = scmp.ne.s32.totalorder %s207_s1, %s11689_s16  ;;  %p11695_p8 = scmp.lt.s32.totalorder %s11689_s16, %s11689_s16 }
 0x128   :  { %p11696_p9 = por %p11695_p8, %p11694_p7 }
 0x12a   :  { %p11697_p10 = pnand %p11696_p9, %p11690_p6 }
 0x12c   :  { %11700 = shalt.err (!%p11697_p10)
}
 0x12d   :  { %212 = dma.hbm_to_vmem [thread:$0]  %s13898_s18, 2048, %s207_s1, [#allocation31], %s11872_s17, %s11872_s17, %s11873_s27  }
 0x12e   :  { %s11701_s14 = scalar_lea.hbm %s13899_s19, 16 }
 0x12f   :  { %p11702_p11 = scmp.ne.s32.totalorder %s13899_s19, %s11701_s14  ;;  %p11705_p12 = scmp.lt.u32.totalorder %s11701_s14, %s13899_s19 }
 0x131   :  { %p11707_p13 = pnand %p11705_p12, %p11702_p11 }
 0x133   :  { %11710 = shalt.err (!%p11707_p13)
}
 0x134   :  { %s11711_s29 = scalar_lea.vmem %s220_s4, 16  ;;  %s11715_s8 = scalar_lea.vmem %s220_s4, 32 }
 0x135   :  { %p11712_p0 = scmp.ne.s32.totalorder %s220_s4, %s11711_s29  ;;  %p11716_p1 = scmp.lt.s32.totalorder %s220_s4, %s220_s4 }
 0x136   :  { %p11717_p2 = scmp.lt.s32.totalorder %s11715_s8, %s11711_s29 }
 0x138   :  { %p11718_p3 = por %p11717_p2, %p11716_p1 }
 0x13a   :  { %p11719_p4 = pnand %p11718_p3, %p11712_p0 }
 0x13c   :  { %11722 = shalt.err (!%p11719_p4)
}
 0x13d   :  { %222 = dma.hbm_to_vmem [thread:$0]  %s13899_s19, 16, %s220_s4, [#allocation34]  }
 0x13e   :  { %11835 = dma.done.wait [#allocation10], 512  }
 0x13f   :  { %11836 = vsyncadd [#allocation10], 4294966784 }
 0x140   :  { %11837 = dma.done.wait [#allocation13], 16384  }
 0x141   :  { %11838 = vsyncadd [#allocation13], 4294950912 }
 0x142   :  { %11839 = dma.done.wait [#allocation16], 8256  }
 0x143   :  { %11840 = vsyncadd [#allocation16], 4294959040 }
 0x144   :  { %11841 = dma.done.wait [#allocation19], 8256  }
 0x145   :  { %11842 = vsyncadd [#allocation19], 4294959040 }
 0x146   :  { %11843 = dma.done.wait [#allocation22], 16384  }
 0x147   :  { %11844 = vsyncadd [#allocation22], 4294950912 }
 0x148   :  { %11845 = dma.done.wait [#allocation25], 320  }
 0x149   :  { %11846 = vsyncadd [#allocation25], 4294966976 }
 0x14a   :  { %11847 = dma.done.wait [#allocation28], 4128  }
 0x14b   :  { %11848 = vsyncadd [#allocation28], 4294963168 }
 0x14c   :  { %11849 = dma.done.wait [#allocation31], 2064  }
 0x14d   :  { %11850 = vsyncadd [#allocation31], 4294965232 }
 0x14e   :  { %11851 = dma.done.wait [#allocation34], 16  }
 0x14f   :  { %11852 = vsyncadd [#allocation34], 4294967280  ;;  %v11882_v0 = vmov 0   ;;  %v13913_v1 = vmov 0.0   ;;  %s13941_s30 = sld [smem:[#allocation68_spill]]  ;;  %v344_v6 = vld [vmem:[#allocation9] sm:$0xff]  ;;  %v302_v61 = vlaneseq }
 0x150   :  { %11082 = vset.pattern.permute.xlu1 %v11882_v0  ;;  %11081 = vset.pattern.permute.xlu0 %v11882_v0  ;;  %v345_v7 = vld [vmem:[#allocation9 + $0x8] sm:$0xff]  ;;  %v346_v8 = vld [vmem:[#allocation9 + $0x10] sm:$0xff]  ;;  %v347_v9 = vld [vmem:[#allocation9 + $0x18] sm:$0xff]  ;;  %vm348_vm0 = vcmask 261120   ;;  %s11884_s6 = smov [#allocation4]   ;;  %s11885_s22 = smov [#allocation5]  }
 0x151   :  { %957 = vmatprep.mubr.f32.mxu1 %v13913_v1  ;;  %v8283_v10 = vpack.c.bf16 %v345_v7, %v344_v6  ;;  %v8287_v11 = vpack.c.bf16 %v347_v9, %v346_v8  ;;  %v479_v16 = vld [vmem:[#allocation12 + $0x8] sm:$0xff]  ;;  %v822_v22 = vld [vmem:[#allocation14] sm:$0xff]  ;;  %v12326_v62 = vand.u32 127, %v302_v61  ;;  %s278_s14 = sshll.u32 %s11884_s6, 4  ;;  %s290_s3 = sshll.u32 %s11885_s22, 4  ;;  %vm5829_vm9 = vcmask 1041408   ;;  %s279_s14 = int_to_ptr.vmem [resolvable:$true] %s278_s14  ;;  %s291_s3 = int_to_ptr.vmem [resolvable:$true] %s290_s3 }
 0x152   :  { %v483_v17 = vld [vmem:[#allocation12 + $0x28] sm:$0xff]  ;;  %v826_v23 = vld [vmem:[#allocation14 + $0x20] sm:$0xff]  ;;  %s11723_s29 = scalar_lea.hbm %s13892_s12, 32768 }
 0x153   :  { %8284 = vmatprep.subr.bf16.mxu0 %v8283_v10  ;;  %v8291_v18 = vpack.c.bf16 %v483_v17, %v479_v16  ;;  %v823_v19 = vld [vmem:[#allocation14 + $0x8] sm:$0xff]  ;;  %v12286_v24 = vpack.c.bf16 %v826_v23, %v822_v22  ;;  %v830_v28 = vld [vmem:[#allocation14 + $0x40] sm:$0xff]  ;;  %p11724_p5 = scmp.ne.s32.totalorder %s13892_s12, %s11723_s29  ;;  %p11727_p6 = scmp.lt.u32.totalorder %s11723_s29, %s13892_s12 }
 0x154   :  { %8286 = vmatpush3.bf16.msra.mxu0 %v8283_v10  ;;  %v827_v20 = vld [vmem:[#allocation14 + $0x28] sm:$0xff]  ;;  %v834_v29 = vld [vmem:[#allocation14 + $0x60] sm:$0xff] }
 0x155   :  { %v296_v2 = vld [vmem:[%s13941_s30 + $0x10] sm:$0xff]  ;;  %v294_v3 = vld [vmem:[%s13941_s30] sm:$0xff]  ;;  %v297_v4 = vld [vmem:[%s13941_s30 + $0x18] sm:$0xff]  ;;  %8288 = vmatprep.subr.bf16.mxu0 %v8287_v11  ;;  %v12283_v21 = vpack.c.bf16 %v827_v20, %v823_v19  ;;  %v12291_v30 = vpack.c.bf16 %v834_v29, %v830_v28  ;;  %p11729_p7 = pnand %p11727_p6, %p11724_p5 }
 0x156   :  { %311 = vperm.xlu1 %11082, %v296_v2   ;;  %305 = vperm.xlu0 %11081, %v294_v3   ;;  %v295_v5 = vld [vmem:[%s13941_s30 + $0x8] sm:$0xff]  ;;  %v298_v13 = vld [vmem:[%s13941_s30 + $0x20] sm:$0xff]  ;;  %v301_v14 = vld [vmem:[%s13941_s30 + $0x38] sm:$0xff] }
 0x157   :  { %v299_v12 = vld [vmem:[%s13941_s30 + $0x28] sm:$0xff]  ;;  %v300_v15 = vld [vmem:[%s13941_s30 + $0x30] sm:$0xff]  ;;  %8356 = vmatprep.subr.bf16.mxu1 %v12283_v21  ;;  %v838_v34 = vld [vmem:[#allocation14 + $0x80] sm:$0xff] }
 0x158   :  { %8290 = vmatpush3.bf16.msra.mxu0 %v8287_v11  ;;  %v831_v25 = vld [vmem:[#allocation14 + $0x48] sm:$0xff]  ;;  %8358 = vmatpush1.bf16.msra.mxu1 %v12286_v24  ;;  %v842_v35 = vld [vmem:[#allocation14 + $0xa0] sm:$0xff] }
 0x159   :  { %8292 = vmatprep.subr.bf16.mxu0 %v8291_v18  ;;  %v835_v26 = vld [vmem:[#allocation14 + $0x68] sm:$0xff]  ;;  %v12297_v38 = vpack.c.bf16 %v842_v35, %v838_v34  ;;  %v846_v40 = vld [vmem:[#allocation14 + $0xc0] sm:$0xff] }
 0x15a   :  { %314 = vperm.xlu1 %11082, %v297_v4   ;;  %308 = vperm.xlu0 %11081, %v295_v5   ;;  %v12288_v27 = vpack.c.bf16 %v835_v26, %v831_v25  ;;  %v839_v31 = vld [vmem:[#allocation14 + $0x88] sm:$0xff]  ;;  %v850_v41 = vld [vmem:[#allocation14 + $0xe0] sm:$0xff] }
 0x15b   :  { %v843_v32 = vld [vmem:[#allocation14 + $0xa8] sm:$0xff]  ;;  %v12303_v44 = vpack.c.bf16 %v850_v41, %v846_v40  ;;  %v854_v46 = vld [vmem:[#allocation14 + $0x100] sm:$0xff] }
 0x15c   :  { %8360 = vmatprep.subr.bf16.mxu1 %v12288_v27  ;;  %v12294_v33 = vpack.c.bf16 %v843_v32, %v839_v31  ;;  %v847_v36 = vld [vmem:[#allocation14 + $0xc8] sm:$0xff]  ;;  %v858_v47 = vld [vmem:[#allocation14 + $0x120] sm:$0xff] }
 0x15d   :  { %v851_v37 = vld [vmem:[#allocation14 + $0xe8] sm:$0xff]  ;;  %8362 = vmatpush1.bf16.msra.mxu1 %v12291_v30  ;;  %v12309_v50 = vpack.c.bf16 %v858_v47, %v854_v46  ;;  %v862_v52 = vld [vmem:[#allocation14 + $0x140] sm:$0xff] }
 0x15e   :  { %320 = vperm.xlu1 %11082, %v299_v12   ;;  %317 = vperm.xlu0 %11081, %v298_v13   ;;  %v12300_v39 = vpack.c.bf16 %v851_v37, %v847_v36  ;;  %v855_v42 = vld [vmem:[#allocation14 + $0x108] sm:$0xff]  ;;  %v866_v53 = vld [vmem:[#allocation14 + $0x160] sm:$0xff] }
 0x15f   :  { %8364 = vmatprep.subr.bf16.mxu1 %v12294_v33  ;;  %v859_v43 = vld [vmem:[#allocation14 + $0x128] sm:$0xff]  ;;  %v12315_v56 = vpack.c.bf16 %v866_v53, %v862_v52  ;;  %v870_v58 = vld [vmem:[#allocation14 + $0x180] sm:$0xff] }
 0x160   :  { %v12306_v45 = vpack.c.bf16 %v859_v43, %v855_v42  ;;  %v863_v48 = vld [vmem:[#allocation14 + $0x148] sm:$0xff]  ;;  %v874_v59 = vld [vmem:[#allocation14 + $0x1a0] sm:$0xff] }
 0x161   :  { %8366 = vmatpush1.bf16.msra.mxu1 %v12297_v38  ;;  %v867_v49 = vld [vmem:[#allocation14 + $0x168] sm:$0xff]  ;;  %v12321_v60 = vpack.c.bf16 %v874_v59, %v870_v58  ;;  %v478_v2 = vld [vmem:[#allocation12] sm:$0xff] }
 0x162   :  { %326 = vperm.xlu1 %11082, %v301_v14   ;;  %323 = vperm.xlu0 %11081, %v300_v15   ;;  %v12312_v51 = vpack.c.bf16 %v867_v49, %v863_v48  ;;  %v871_v54 = vld [vmem:[#allocation14 + $0x188] sm:$0xff]  ;;  %v482_v3 = vld [vmem:[#allocation12 + $0x20] sm:$0xff] }
 0x163   :  { %8368 = vmatprep.subr.bf16.mxu1 %v12300_v39  ;;  %v875_v55 = vld [vmem:[#allocation14 + $0x1a8] sm:$0xff]  ;;  %v8293_v9 = vpack.c.bf16 %v482_v3, %v478_v2  ;;  %v486_v12 = vld [vmem:[#allocation12 + $0x40] sm:$0xff] }
 0x164   :  { %v12318_v57 = vpack.c.bf16 %v875_v55, %v871_v54  ;;  %v487_v5 = vld [vmem:[#allocation12 + $0x48] sm:$0xff]  ;;  %v490_v13 = vld [vmem:[#allocation12 + $0x60] sm:$0xff] }
 0x165   :  { %8370 = vmatpush1.bf16.msra.mxu1 %v12303_v44  ;;  %v491_v6 = vld [vmem:[#allocation12 + $0x68] sm:$0xff]  ;;  %v8297_v20 = vpack.c.bf16 %v490_v13, %v486_v12  ;;  %v494_v23 = vld [vmem:[#allocation12 + $0x80] sm:$0xff] }
 0x166   :  { %8372 = vmatprep.subr.bf16.mxu1 %v12306_v45  ;;  %v8295_v11 = vpack.c.bf16 %v491_v6, %v487_v5  ;;  %v495_v15 = vld [vmem:[#allocation12 + $0x88] sm:$0xff]  ;;  %v498_v25 = vld [vmem:[#allocation12 + $0xa0] sm:$0xff] }
 0x167   :  { %v499_v16 = vld [vmem:[#allocation12 + $0xa8] sm:$0xff]  ;;  %v8301_v34 = vpack.c.bf16 %v498_v25, %v494_v23  ;;  %v502_v36 = vld [vmem:[#allocation12 + $0xc0] sm:$0xff]  ;;  %v480_v23 = vld [vmem:[#allocation12 + $0x10] sm:$0xff] }
 0x168   :  { %v8299_v22 = vpack.c.bf16 %v499_v16, %v495_v15  ;;  %v503_v28 = vld [vmem:[#allocation12 + $0xc8] sm:$0xff]  ;;  %v506_v37 = vld [vmem:[#allocation12 + $0xe0] sm:$0xff]  ;;  %v484_v25 = vld [vmem:[#allocation12 + $0x30] sm:$0xff] }
 0x169   :  { %8374 = vmatpush1.bf16.msra.mxu1 %v12309_v50  ;;  %v507_v29 = vld [vmem:[#allocation12 + $0xe8] sm:$0xff]  ;;  %v8305_v46 = vpack.c.bf16 %v506_v37, %v502_v36  ;;  %v510_v48 = vld [vmem:[#allocation12 + $0x100] sm:$0xff]  ;;  %v497_v37 = vld [vmem:[#allocation12 + $0x98] sm:$0xff] }
 0x16a   :  { %8376 = vmatprep.subr.bf16.mxu1 %v12312_v51  ;;  %v8303_v35 = vpack.c.bf16 %v507_v29, %v503_v28  ;;  %v511_v42 = vld [vmem:[#allocation12 + $0x108] sm:$0xff]  ;;  %v514_v49 = vld [vmem:[#allocation12 + $0x120] sm:$0xff]  ;;  %v493_v28 = vld [vmem:[#allocation12 + $0x78] sm:$0xff]  ;;  %v8325_v29 = vpack.c.bf16 %v484_v25, %v480_v23 }
 0x16b   :  { %v515_v43 = vld [vmem:[#allocation12 + $0x128] sm:$0xff]  ;;  %v8309_v55 = vpack.c.bf16 %v514_v49, %v510_v48  ;;  %v518_v59 = vld [vmem:[#allocation12 + $0x140] sm:$0xff]  ;;  %v505_v49 = vld [vmem:[#allocation12 + $0xd8] sm:$0xff] }
 0x16c   :  { %v8307_v47 = vpack.c.bf16 %v515_v43, %v511_v42  ;;  %v519_v53 = vld [vmem:[#allocation12 + $0x148] sm:$0xff]  ;;  %v530_v5 = vld [vmem:[#allocation12 + $0x1a0] sm:$0xff]  ;;  %v537_v23 = vld [vmem:[#allocation12 + $0x1d8] sm:$0xff] }
 0x16d   :  { %8378 = vmatpush1.bf16.msra.mxu1 %v12315_v56  ;;  %v523_v54 = vld [vmem:[#allocation12 + $0x168] sm:$0xff]  ;;  %v878_v16 = vld [vmem:[#allocation14 + $0x1c0] sm:$0xff]  ;;  %v541_v25 = vld [vmem:[#allocation12 + $0x1f8] sm:$0xff] }
 0x16e   :  { %8380 = vmatprep.subr.bf16.mxu1 %v12318_v57  ;;  %v8311_v58 = vpack.c.bf16 %v523_v54, %v519_v53  ;;  %v535_v6 = vld [vmem:[#allocation12 + $0x1c8] sm:$0xff] }
 0x16f   :  { %v879_v13 = vld [vmem:[#allocation14 + $0x1c8] sm:$0xff] }
 0x171   :  { %8382 = vmatpush1.bf16.msra.mxu1 %v12321_v60 }
 0x1d5   :  { %v312_v63 = vpop.permute.xlu1 %311  ;;  %v306_v0 = vpop.permute.xlu0 %305 }
 0x1d6   :  { %vm328_vm1 = vcmp.eq.s32.totalorder %v12326_v62, %v306_v0  ;;  %vm330_vm2 = vcmp.eq.s32.totalorder %v12326_v62, %v312_v63  ;;  %v527_v63 = vld [vmem:[#allocation12 + $0x188] sm:$0xff] }
 0x1d7   :  { %v336_v4 = vsel %vm328_vm1, 1.0, %v13913_v1  ;;  %v338_v10 = vsel %vm330_vm2, 1.0, %v13913_v1  ;;  %v531_v0 = vld [vmem:[#allocation12 + $0x1a8] sm:$0xff] }
 0x1d8   :  { %8236 = vmatprep.mubr.msk.f32.mxu0 %vm348_vm0, %v336_v4  ;;  %v8315_v3 = vpack.c.bf16 %v531_v0, %v527_v63  ;;  %v526_v4 = vld [vmem:[#allocation12 + $0x180] sm:$0xff]  ;;  %v513_v63 = vld [vmem:[#allocation12 + $0x118] sm:$0xff] }
 0x1d9   :  { %v315_v7 = vpop.permute.xlu1 %314  ;;  %v309_v8 = vpop.permute.xlu0 %308  ;;  %v517_v0 = vld [vmem:[#allocation12 + $0x138] sm:$0xff] }
 0x1da   :  { %vm331_vm3 = vcmp.eq.s32.totalorder %v12326_v62, %v315_v7  ;;  %vm329_vm4 = vcmp.eq.s32.totalorder %v12326_v62, %v309_v8  ;;  %v539_v7 = vld [vmem:[#allocation12 + $0x1e8] sm:$0xff]  ;;  %v8317_v8 = vpack.c.bf16 %v530_v5, %v526_v4  ;;  %v8339_v4 = vpack.c.bf16 %v517_v0, %v513_v63  ;;  %v512_v5 = vld [vmem:[#allocation12 + $0x110] sm:$0xff] }
 0x1db   :  { %v337_v14 = vsel %vm329_vm4, 1.0, %v13913_v1  ;;  %v339_v17 = vsel %vm331_vm3, 1.0, %v13913_v1 }
 0x1dc   :  { %8237 = vmatmul.mubr.msk.f32.vlgmr.msra.gmra.mrb[0].mxu0 %vm348_vm0, %v337_v14  ;;  %v883_v14 = vld [vmem:[#allocation14 + $0x1e8] sm:$0xff] }
 0x1dd   :  { %v321_v18 = vpop.permute.xlu1 %320  ;;  %v318_v19 = vpop.permute.xlu0 %317  ;;  %8239 = vmatprep.mubr.msk.f32.mxu0 %vm348_vm0, %v338_v10  ;;  %8294 = vmatpush1.bf16.msra.mxu0 %v8293_v9  ;;  %v8319_v9 = vpack.c.bf16 %v539_v7, %v535_v6  ;;  %v534_v10 = vld [vmem:[#allocation12 + $0x1c0] sm:$0xff]  ;;  %v12353_v15 = vpack.c.bf16 %v883_v14, %v879_v13  ;;  %v516_v6 = vld [vmem:[#allocation12 + $0x130] sm:$0xff]  ;;  %v529_v14 = vld [vmem:[#allocation12 + $0x198] sm:$0xff] }
 0x1de   :  { %vm332_vm5 = vcmp.eq.s32.totalorder %v12326_v62, %v318_v19  ;;  %8296 = vmatprep.subr.bf16.mxu0 %v8295_v11  ;;  %vm333_vm6 = vcmp.eq.s32.totalorder %v12326_v62, %v321_v18  ;;  %v538_v11 = vld [vmem:[#allocation12 + $0x1e0] sm:$0xff]  ;;  %v481_v18 = vld [vmem:[#allocation12 + $0x18] sm:$0xff]  ;;  %v524_v13 = vld [vmem:[#allocation12 + $0x170] sm:$0xff] }
 0x1df   :  { %v340_v26 = vsel %vm332_vm5, 1.0, %v13913_v1  ;;  %v341_v40 = vsel %vm333_vm6, 1.0, %v13913_v1  ;;  %v8321_v12 = vpack.c.bf16 %v538_v11, %v534_v10  ;;  %v485_v19 = vld [vmem:[#allocation12 + $0x38] sm:$0xff]  ;;  %8384 = vmatprep.subr.bf16.mxu1 %v12353_v15  ;;  %v8341_v10 = vpack.c.bf16 %v516_v6, %v512_v5 }
 0x1e0   :  { %8240 = vmatmul.mubr.msk.f32.gmra.mrb[2].mxu0 %vm348_vm0, %v339_v17  ;;  %v882_v17 = vld [vmem:[#allocation14 + $0x1e0] sm:$0xff]  ;;  %v849_v5 = vld [vmem:[#allocation14 + $0xd8] sm:$0xff] }
 0x1e1   :  { %v327_v31 = vpop.permute.xlu1 %326  ;;  %8242 = vmatprep.mubr.msk.f32.mxu0 %vm348_vm0, %v340_v26  ;;  %v324_v32 = vpop.permute.xlu0 %323  ;;  %8298 = vmatpush1.bf16.msra.mxu0 %v8297_v20  ;;  %v12355_v20 = vpack.c.bf16 %v882_v17, %v878_v16  ;;  %v489_v26 = vld [vmem:[#allocation12 + $0x58] sm:$0xff] }
 0x1e2   :  { %vm334_vm7 = vcmp.eq.s32.totalorder %v12326_v62, %v324_v32  ;;  %8300 = vmatprep.subr.bf16.mxu0 %v8299_v22  ;;  %vm335_vm8 = vcmp.eq.s32.totalorder %v12326_v62, %v327_v31  ;;  %v522_v62 = vld [vmem:[#allocation12 + $0x160] sm:$0xff]  ;;  %v8323_v22 = vpack.c.bf16 %v485_v19, %v481_v18  ;;  %v8327_v32 = vpack.c.bf16 %v493_v28, %v489_v26  ;;  %v533_v16 = vld [vmem:[#allocation12 + $0x1b8] sm:$0xff]  ;;  %v528_v19 = vld [vmem:[#allocation12 + $0x190] sm:$0xff] }
 0x1e3   :  { %v342_v41 = vsel %vm334_vm7, 1.0, %v13913_v1  ;;  %v343_v52 = vsel %vm335_vm8, 1.0, %v13913_v1  ;;  %v8313_v2 = vpack.c.bf16 %v522_v62, %v518_v59  ;;  %8386 = vmatpush1.bf16.msra.mxu1 %v12355_v20  ;;  %v508_v59 = vld [vmem:[#allocation12 + $0xf0] sm:$0xff]  ;;  %v8347_v18 = vpack.c.bf16 %v533_v16, %v529_v14  ;;  %v853_v6 = vld [vmem:[#allocation14 + $0xf8] sm:$0xff] }
 0x1e4   :  { %8243 = vmatmul.mubr.msk.f32.gmra.mrb[4].mxu0 %vm348_vm0, %v341_v40  ;;  %8420 = vmatprep.subr.bf16.mxu1 %v12283_v21  ;;  %v501_v40 = vld [vmem:[#allocation12 + $0xb8] sm:$0xff]  ;;  %v8351_v28 = vpack.c.bf16 %v541_v25, %v537_v23  ;;  %v856_v14 = vld [vmem:[#allocation14 + $0x110] sm:$0xff] }
 0x1e5   :  { %8245 = vmatprep.mubr.msk.f32.mxu0 %vm348_vm0, %v342_v41  ;;  %8302 = vmatpush1.bf16.msra.mxu0 %v8301_v34  ;;  %v488_v34 = vld [vmem:[#allocation12 + $0x50] sm:$0xff]  ;;  %v8331_v43 = vpack.c.bf16 %v501_v40, %v497_v37  ;;  %v873_v25 = vld [vmem:[#allocation14 + $0x198] sm:$0xff] }
 0x1e6   :  { %8304 = vmatprep.subr.bf16.mxu0 %v8303_v35  ;;  %958 = vmatmul.mubr.f32.vlgmr.msra.gmra.mrb[0].mxu1 %v13913_v1  ;;  %v492_v35 = vld [vmem:[#allocation12 + $0x70] sm:$0xff] }
 0x1e7   :  { %8422 = vmatpush1.bf16.msra.mxu1 %v12286_v24  ;;  %1129 = vmatprep.mubr.f32.mxu1 %v13913_v1  ;;  %v8329_v41 = vpack.c.bf16 %v492_v35, %v488_v34  ;;  %v825_v34 = vld [vmem:[#allocation14 + $0x18] sm:$0xff]  ;;  %v860_v16 = vld [vmem:[#allocation14 + $0x130] sm:$0xff] }
 0x1e8   :  { %8246 = vmatmul.mubr.msk.f32.gmra.mrb[6].mxu0 %vm348_vm0, %v343_v52  ;;  %8424 = vmatprep.subr.bf16.mxu1 %v12288_v27  ;;  %v509_v52 = vld [vmem:[#allocation12 + $0xf8] sm:$0xff]  ;;  %v868_v23 = vld [vmem:[#allocation14 + $0x170] sm:$0xff] }
 0x1e9   :  { %8306 = vmatpush1.bf16.msra.mxu0 %v8305_v46  ;;  %628 = vmatprep.mubr.f32.mxu0 %v13913_v1  ;;  %v496_v46 = vld [vmem:[#allocation12 + $0x90] sm:$0xff]  ;;  %v829_v35 = vld [vmem:[#allocation14 + $0x38] sm:$0xff] }
 0x1ea   :  { %8308 = vmatprep.subr.bf16.mxu0 %v8307_v47  ;;  %v500_v47 = vld [vmem:[#allocation12 + $0xb0] sm:$0xff]  ;;  %v12408_v40 = vpack.c.bf16 %v829_v35, %v825_v34  ;;  %v881_v34 = vld [vmem:[#allocation14 + $0x1d8] sm:$0xff] }
 0x1eb   :  { %8426 = vmatpush1.bf16.msra.mxu1 %v12291_v30  ;;  %v8333_v53 = vpack.c.bf16 %v500_v47, %v496_v46  ;;  %v833_v46 = vld [vmem:[#allocation14 + $0x58] sm:$0xff] }
 0x1ec   :  { %8428 = vmatprep.subr.bf16.mxu1 %v12294_v33  ;;  %v837_v47 = vld [vmem:[#allocation14 + $0x78] sm:$0xff] }
 0x1ed   :  { %8310 = vmatpush1.bf16.msra.mxu0 %v8309_v55  ;;  %v8335_v55 = vpack.c.bf16 %v509_v52, %v505_v49  ;;  %v12415_v52 = vpack.c.bf16 %v837_v47, %v833_v46  ;;  %v885_v35 = vld [vmem:[#allocation14 + $0x1f8] sm:$0xff] }
 0x1ee   :  { %8312 = vmatprep.subr.bf16.mxu0 %v8311_v58  ;;  %v504_v58 = vld [vmem:[#allocation12 + $0xd0] sm:$0xff] }
 0x1ef   :  { %8430 = vmatpush1.bf16.msra.mxu1 %v12297_v38 }
 0x1f0   :  { %8432 = vmatprep.subr.bf16.mxu1 %v12300_v39 }
 0x1f1   :  { %8314 = vmatpush1.bf16.msra.mxu0 %v8313_v2  ;;  %v8337_v2 = vpack.c.bf16 %v508_v59, %v504_v58  ;;  %v841_v58 = vld [vmem:[#allocation14 + $0x98] sm:$0xff] }
 0x1f2   :  { %8316 = vmatprep.subr.bf16.mxu0 %v8315_v3  ;;  %v845_v59 = vld [vmem:[#allocation14 + $0xb8] sm:$0xff] }
 0x1f3   :  { %8434 = vmatpush1.bf16.msra.mxu1 %v12303_v44  ;;  %v12423_v0 = vpack.c.bf16 %v845_v59, %v841_v58 }
 0x1f4   :  { %8436 = vmatprep.subr.bf16.mxu1 %v12306_v45 }
 0x1f5   :  { %8318 = vmatpush1.bf16.msra.mxu0 %v8317_v8  ;;  %v521_v8 = vld [vmem:[#allocation12 + $0x158] sm:$0xff] }
 0x1f6   :  { %8320 = vmatprep.subr.bf16.mxu0 %v8319_v9  ;;  %v525_v9 = vld [vmem:[#allocation12 + $0x178] sm:$0xff] }
 0x1f7   :  { %8438 = vmatpush1.bf16.msra.mxu1 %v12309_v50  ;;  %v8343_v11 = vpack.c.bf16 %v525_v9, %v521_v8  ;;  %v12431_v8 = vpack.c.bf16 %v853_v6, %v849_v5  ;;  %v848_v9 = vld [vmem:[#allocation14 + $0xd0] sm:$0xff] }
 0x1f8   :  { %8440 = vmatprep.subr.bf16.mxu1 %v12312_v51 }
 0x1f9   :  { %8322 = vmatpush1.bf16.msra.mxu0 %v8321_v12  ;;  %v520_v12 = vld [vmem:[#allocation12 + $0x150] sm:$0xff] }
 0x1fa   :  { %8324 = vmatprep.subr.bf16.mxu0 %v8323_v22  ;;  %v8345_v17 = vpack.c.bf16 %v524_v13, %v520_v12  ;;  %v532_v22 = vld [vmem:[#allocation12 + $0x1b0] sm:$0xff]  ;;  %v861_v12 = vld [vmem:[#allocation14 + $0x138] sm:$0xff] }
 0x1fb   :  { %8442 = vmatpush1.bf16.msra.mxu1 %v12315_v56  ;;  %v8349_v26 = vpack.c.bf16 %v532_v22, %v528_v19  ;;  %v864_v22 = vld [vmem:[#allocation14 + $0x150] sm:$0xff] }
 0x1fc   :  { %8444 = vmatprep.subr.bf16.mxu1 %v12318_v57 }
 0x1ff   :  { %8446 = vmatpush1.bf16.msra.mxu1 %v12321_v60 }
 0x200   :  { %8448 = vmatprep.subr.bf16.mxu1 %v12353_v15 }
 0x203   :  { %8450 = vmatpush1.bf16.msra.mxu1 %v12355_v20 }
 0x204   :  { %8484 = vmatprep.subr.bf16.mxu1 %v12283_v21 }
 0x2af   :  { %v12378_v31 = vpop.f32.mrb[0].mxu0 }
 0x2b0   :  { %v12380_v36 = vpop.f32.mrb[1].mxu0 }
 0x2b1   :  { %629 = vmatmul.mubr.f32.vlgmr.msra.gmra.mrb[8].mxu0 %v12380_v36 }
 0x2b2   :  { %8326 = vmatpush1.bf16.msra.mxu0 %v8325_v29  ;;  %634 = vmatprep.mubr.f32.mxu0 %v13913_v1  ;;  %v536_v29 = vld [vmem:[#allocation12 + $0x1d0] sm:$0xff] }
 0x2b3   :  { %v12384_v42 = vpop.f32.mrb[2].mxu0  ;;  %8328 = vmatprep.subr.bf16.mxu0 %v8327_v32  ;;  %v540_v32 = vld [vmem:[#allocation12 + $0x1f0] sm:$0xff] }
 0x2b4   :  { %v12386_v48 = vpop.f32.mrb[3].mxu0  ;;  %v8353_v37 = vpack.c.bf16 %v540_v32, %v536_v29  ;;  %v872_v29 = vld [vmem:[#allocation14 + $0x190] sm:$0xff] }
 0x2b5   :  { %635 = vmatmul.mubr.f32.gmra.mrb[10].mxu0 %v12378_v31  ;;  %v876_v32 = vld [vmem:[#allocation14 + $0x1b0] sm:$0xff] }
 0x2b6   :  { %8330 = vmatpush1.bf16.msra.mxu0 %v8329_v41  ;;  %640 = vmatprep.mubr.f32.mxu0 %v13913_v1  ;;  %v824_v41 = vld [vmem:[#allocation14 + $0x10] sm:$0xff] }
 0x2b7   :  { %v12390_v54 = vpop.f32.mrb[4].mxu0  ;;  %8332 = vmatprep.subr.bf16.mxu0 %v8331_v43  ;;  %v828_v43 = vld [vmem:[#allocation14 + $0x30] sm:$0xff] }
 0x2b8   :  { %v12392_v62 = vpop.f32.mrb[5].mxu0  ;;  %v12412_v49 = vpack.c.bf16 %v828_v43, %v824_v41  ;;  %v880_v41 = vld [vmem:[#allocation14 + $0x1d0] sm:$0xff] }
 0x2b9   :  { %641 = vmatmul.mubr.f32.gmra.mrb[12].mxu0 %v12386_v48  ;;  %v884_v43 = vld [vmem:[#allocation14 + $0x1f0] sm:$0xff] }
 0x2ba   :  { %8334 = vmatpush1.bf16.msra.mxu0 %v8333_v53  ;;  %646 = vmatprep.mubr.f32.mxu0 %v13913_v1  ;;  %v832_v53 = vld [vmem:[#allocation14 + $0x50] sm:$0xff]  ;;  %v12468_v46 = vpack.c.bf16 %v884_v43, %v880_v41 }
 0x2bb   :  { %v12396_v3 = vpop.f32.mrb[6].mxu0  ;;  %8336 = vmatprep.subr.bf16.mxu0 %v8335_v55  ;;  %v836_v55 = vld [vmem:[#allocation14 + $0x70] sm:$0xff] }
 0x2bc   :  { %v12398_v7 = vpop.f32.mrb[7].mxu0  ;;  %v12420_v63 = vpack.c.bf16 %v836_v55, %v832_v53  ;;  %v542_v53 = vld [vmem:[#allocation15] sm:$0xf] }
 0x2bd   :  { %647 = vmatmul.mubr.f32.gmra.mrb[14].mxu0 %v12384_v42 }
 0x2be   :  { %8338 = vmatpush1.bf16.msra.mxu0 %v8337_v2  ;;  %652 = vmatprep.mubr.f32.mxu0 %v13913_v1  ;;  %v840_v2 = vld [vmem:[#allocation14 + $0x90] sm:$0xff] }
 0x2bf   :  { %8340 = vmatprep.subr.bf16.mxu0 %v8339_v4  ;;  %v844_v4 = vld [vmem:[#allocation14 + $0xb0] sm:$0xff] }
 0x2c1   :  { %653 = vmatmul.mubr.f32.gmra.mrb[16].mxu0 %v12392_v62 }
 0x2c2   :  { %8342 = vmatpush1.bf16.msra.mxu0 %v8341_v10  ;;  %658 = vmatprep.mubr.f32.mxu0 %v13913_v1  ;;  %v852_v10 = vld [vmem:[#allocation14 + $0xf0] sm:$0xff] }
 0x2c3   :  { %8344 = vmatprep.subr.bf16.mxu0 %v8343_v11  ;;  %v857_v11 = vld [vmem:[#allocation14 + $0x118] sm:$0xff] }
 0x2c4   :  { %v12439_v13 = vpack.c.bf16 %v861_v12, %v857_v11 }
 0x2c5   :  { %659 = vmatmul.mubr.f32.gmra.mrb[18].mxu0 %v12390_v54 }
 0x2c6   :  { %8346 = vmatpush1.bf16.msra.mxu0 %v8345_v17  ;;  %664 = vmatprep.mubr.f32.mxu0 %v13913_v1  ;;  %v865_v17 = vld [vmem:[#allocation14 + $0x158] sm:$0xff] }
 0x2c7   :  { %8348 = vmatprep.subr.bf16.mxu0 %v8347_v18  ;;  %v869_v18 = vld [vmem:[#allocation14 + $0x178] sm:$0xff] }
 0x2c8   :  { %v12447_v19 = vpack.c.bf16 %v869_v18, %v865_v17 }
 0x2c9   :  { %665 = vmatmul.mubr.f32.gmra.mrb[20].mxu0 %v12398_v7 }
 0x2ca   :  { %8350 = vmatpush1.bf16.msra.mxu0 %v8349_v26  ;;  %670 = vmatprep.mubr.f32.mxu0 %v13913_v1  ;;  %v877_v26 = vld [vmem:[#allocation14 + $0x1b8] sm:$0xff] }
 0x2cb   :  { %8352 = vmatprep.subr.bf16.mxu0 %v8351_v28  ;;  %v12455_v28 = vpack.c.bf16 %v877_v26, %v873_v25 }
 0x2cd   :  { %671 = vmatmul.mubr.f32.gmra.mrb[22].mxu0 %v12396_v3 }
 0x2ce   :  { %8354 = vmatpush1.bf16.msra.mxu0 %v8353_v37  ;;  %741 = vmatprep.mubr.f32.mxu0 %v13913_v1  ;;  %v12463_v37 = vpack.c.bf16 %v885_v35, %v881_v34 }
 0x2cf   :  { %8388 = vmatprep.subr.bf16.mxu0 %v12408_v40 }
 0x2d1   :  { %742 = vmatmul.mubr.f32.vlgmr.msra.gmra.mrb[24].mxu0 %v12380_v36  ;;  %v12428_v36 = vpack.c.bf16 %v844_v4, %v840_v2 }
 0x2d2   :  { %8390 = vmatpush1.bf16.msra.mxu0 %v12412_v49  ;;  %747 = vmatprep.mubr.f32.mxu0 %v13913_v1 }
 0x2d3   :  { %8392 = vmatprep.subr.bf16.mxu0 %v12415_v52 }
 0x2d5   :  { %748 = vmatmul.mubr.f32.gmra.mrb[26].mxu0 %v12378_v31  ;;  %v12436_v31 = vpack.c.bf16 %v852_v10, %v848_v9 }
 0x2d6   :  { %8394 = vmatpush1.bf16.msra.mxu0 %v12420_v63  ;;  %753 = vmatprep.mubr.f32.mxu0 %v13913_v1 }
 0x2d7   :  { %8396 = vmatprep.subr.bf16.mxu0 %v12423_v0 }
 0x2d9   :  { %754 = vmatmul.mubr.f32.gmra.mrb[28].mxu0 %v12386_v48  ;;  %v12444_v48 = vpack.c.bf16 %v860_v16, %v856_v14 }
 0x2da   :  { %8398 = vmatpush1.bf16.msra.mxu0 %v12428_v36  ;;  %759 = vmatprep.mubr.f32.mxu0 %v13913_v1 }
 0x2db   :  { %8400 = vmatprep.subr.bf16.mxu0 %v12431_v8 }
 0x2dd   :  { %760 = vmatmul.mubr.f32.gmra.mrb[30].mxu0 %v12384_v42  ;;  %v12452_v42 = vpack.c.bf16 %v868_v23, %v864_v22 }
 0x2de   :  { %8402 = vmatpush1.bf16.msra.mxu0 %v12436_v31  ;;  %765 = vmatprep.mubr.f32.mxu0 %v13913_v1 }
 0x2df   :  { %8404 = vmatprep.subr.bf16.mxu0 %v12439_v13 }
 0x2e1   :  { %766 = vmatmul.mubr.f32.gmra.mrb[32].mxu0 %v12392_v62  ;;  %v12460_v62 = vpack.c.bf16 %v876_v32, %v872_v29 }
 0x2e2   :  { %8406 = vmatpush1.bf16.msra.mxu0 %v12444_v48  ;;  %771 = vmatprep.mubr.f32.mxu0 %v13913_v1 }
 0x2e3   :  { %8408 = vmatprep.subr.bf16.mxu0 %v12447_v19 }
 0x2e5   :  { %772 = vmatmul.mubr.f32.gmra.mrb[34].mxu0 %v12390_v54  ;;  %v959_v54 = vpop.f32.mrb[0].mxu1 }
 0x2e6   :  { %8410 = vmatpush1.bf16.msra.mxu0 %v12452_v42  ;;  %777 = vmatprep.mubr.f32.mxu0 %v13913_v1 }
 0x2e7   :  { %8412 = vmatprep.subr.bf16.mxu0 %v12455_v28 }
 0x2e9   :  { %778 = vmatmul.mubr.f32.gmra.mrb[36].mxu0 %v12398_v7  ;;  %v12494_v7 = vshrl.u32 %v302_v61, 7 }
 0x2ea   :  { %8414 = vmatpush1.bf16.msra.mxu0 %v12460_v62  ;;  %783 = vmatprep.mubr.f32.mxu0 %v13913_v1 }
 0x2eb   :  { %8416 = vmatprep.subr.bf16.mxu0 %v12463_v37  ;;  %13942 = vst [vmem:[#allocation59_spill] sm:$0xff] %v12494_v7  ;;  %v12497_v47 = vsub.s32 0, %v12494_v7  ;;  %v12500_v55 = vsub.s32 1, %v12494_v7 }
 0x2ed   :  { %784 = vmatmul.mubr.f32.gmra.mrb[38].mxu0 %v12396_v3  ;;  %v961_v3 = vpop.f32.mrb[1].mxu1  ;;  %13943 = vst [vmem:[#allocation60_spill] sm:$0xff] %v12497_v47  ;;  %13944 = vst [vmem:[#allocation61_spill] sm:$0xff] %v12500_v55  ;;  %v547_v58 = vrot.slane %v542_v53, %v12497_v47  ;;  %v551_v59 = vrot.slane %v542_v53, %v12500_v55 }
 0x2ee   :  { %8418 = vmatpush1.bf16.msra.mxu0 %v12468_v46  ;;  %1028 = vmatprep.mubr.f32.mxu0 %v13913_v1 }
 0x2ef   :  { %8452 = vmatprep.subr.bf16.mxu0 %v12408_v40 }
 0x2f1   :  { %1029 = vmatmul.mubr.f32.vlgmr.msra.gmra.mrb[24].mxu0 %v13913_v1 }
 0x2f2   :  { %8454 = vmatpush1.bf16.msra.mxu0 %v12412_v49  ;;  %1200 = vmatprep.mubr.f32.mxu0 %v13913_v1 }
 0x2f3   :  { %8456 = vmatprep.subr.bf16.mxu0 %v12415_v52 }
 0x2f6   :  { %8458 = vmatpush1.bf16.msra.mxu0 %v12420_v63 }
 0x2f7   :  { %8460 = vmatprep.subr.bf16.mxu0 %v12423_v0 }
 0x2fa   :  { %8462 = vmatpush1.bf16.msra.mxu0 %v12428_v36 }
 0x2fb   :  { %8464 = vmatprep.subr.bf16.mxu0 %v12431_v8 }
 0x2fe   :  { %8466 = vmatpush1.bf16.msra.mxu0 %v12436_v31 }
 0x2ff   :  { %8468 = vmatprep.subr.bf16.mxu0 %v12439_v13 }
 0x302   :  { %8470 = vmatpush1.bf16.msra.mxu0 %v12444_v48 }
 0x303   :  { %8472 = vmatprep.subr.bf16.mxu0 %v12447_v19 }
 0x306   :  { %8474 = vmatpush1.bf16.msra.mxu0 %v12452_v42 }
 0x307   :  { %8476 = vmatprep.subr.bf16.mxu0 %v12455_v28 }
 0x30a   :  { %8478 = vmatpush1.bf16.msra.mxu0 %v12460_v62 }
 0x30b   :  { %8480 = vmatprep.subr.bf16.mxu0 %v12463_v37 }
 0x30e   :  { %8482 = vmatpush1.bf16.msra.mxu0 %v12468_v46 }
 0x30f   :  { %8516 = vmatprep.subr.bf16.mxu0 %v12408_v40 }
 0x384   :  { %v630_v2 = vpop.f32.mrb[8].mxu0 }
 0x385   :  { %v631_v4 = vadd.f32 %v630_v2, %v547_v58  ;;  %v632_v5 = vpop.f32.mrb[9].mxu0 }
 0x386   :  { %v633_v6 = vadd.f32 %v632_v5, %v551_v59 }
 0x387   :  { %v1035_v9 = vadd.f32 %v959_v54, %v631_v4 }
 0x388   :  { %v1036_v10 = vadd.f32 %v961_v3, %v633_v6  ;;  %v636_v11 = vpop.f32.mrb[10].mxu0 }
 0x389   :  { %v12504_v61 = vadd.f32 %v636_v11, %v547_v58  ;;  %v638_v12 = vpop.f32.mrb[11].mxu0 }
 0x38a   :  { %v12506_v14 = vadd.f32 %v638_v12, %v551_v59 }
 0x38c   :  { %v642_v16 = vpop.f32.mrb[12].mxu0 }
 0x38d   :  { %v12508_v17 = vadd.f32 %v642_v16, %v547_v58  ;;  %v644_v18 = vpop.f32.mrb[13].mxu0 }
 0x38e   :  { %v12510_v22 = vadd.f32 %v644_v18, %v551_v59 }
 0x390   :  { %v648_v23 = vpop.f32.mrb[14].mxu0 }
 0x391   :  { %v12512_v25 = vadd.f32 %v648_v23, %v547_v58  ;;  %v650_v26 = vpop.f32.mrb[15].mxu0 }
 0x392   :  { %v12514_v29 = vadd.f32 %v650_v26, %v551_v59  ;;  %v1043_v26 = vmul.f32 0.5, %v1036_v10 }
 0x394   :  { %v654_v32 = vpop.f32.mrb[16].mxu0  ;;  %11083 = vtanh.f32 %v1043_v26 }
 0x395   :  { %v12516_v34 = vadd.f32 %v654_v32, %v547_v58  ;;  %v656_v35 = vpop.f32.mrb[17].mxu0  ;;  %v1039_v32 = vmul.f32 0.5, %v1035_v9 }
 0x396   :  { %v12518_v41 = vadd.f32 %v656_v35, %v551_v59  ;;  %v12533_v35 = vsub.s32 2, %v12494_v7 }
 0x397   :  { %11085 = vtanh.f32 %v1039_v32 }
 0x398   :  { %v660_v43 = vpop.f32.mrb[18].mxu0  ;;  %13948 = vst [vmem:[#allocation65_spill] sm:$0xff] %v12533_v35 }
 0x399   :  { %v12520_v54 = vadd.f32 %v660_v43, %v547_v58  ;;  %v662_v3 = vpop.f32.mrb[19].mxu0  ;;  %v12536_v43 = vsub.s32 3, %v12494_v7 }
 0x39a   :  { %v12522_v2 = vadd.f32 %v662_v3, %v551_v59  ;;  %v12539_v3 = vrot.slane %v542_v53, %v12533_v35 }
 0x39b   :  { %13949 = vst [vmem:[#allocation66_spill] sm:$0xff] %v12536_v43 }
 0x39c   :  { %v666_v4 = vpop.f32.mrb[20].mxu0 }
 0x39d   :  { %v12524_v5 = vadd.f32 %v666_v4, %v547_v58  ;;  %v668_v6 = vpop.f32.mrb[21].mxu0  ;;  %v12542_v4 = vrot.slane %v542_v53, %v12536_v43 }
 0x39e   :  { %v12526_v11 = vadd.f32 %v668_v6, %v551_v59  ;;  %v11084_v10 = vpop.eup %11083 }
 0x3a0   :  { %13945 = vst [vmem:[#allocation62_spill] sm:$0xff] %v12526_v11  ;;  %v672_v12 = vpop.f32.mrb[22].mxu0 }
 0x3a1   :  { %v12528_v16 = vadd.f32 %v672_v12, %v547_v58  ;;  %v674_v18 = vpop.f32.mrb[23].mxu0  ;;  %v11086_v12 = vpop.eup %11085 }
 0x3a2   :  { %v12530_v23 = vadd.f32 %v674_v18, %v551_v59  ;;  %v1045_v18 = vmul.f32 0.5, %v11084_v10  ;;  %v1041_v1 = vmul.f32 0.5, %v11086_v12 }
 0x3a3   :  { %13946 = vst [vmem:[#allocation63_spill] sm:$0xff] %v12528_v16 }
 0x3a4   :  { %13947 = vst [vmem:[#allocation64_spill] sm:$0xff] %v12530_v23  ;;  %v1046_v7 = vadd.f32 0.5, %v1045_v18  ;;  %v1042_v32 = vadd.f32 0.5, %v1041_v1  ;;  %v13950_v1 = vmov 0.0  }
 0x3a6   :  { %v1052_v55 = vmul.f32 0.0, %v1046_v7 }
 0x3c4   :  { %v1030_v58 = vpop.f32.mrb[24].mxu0 }
 0x3c5   :  { %v10875_v59 = vadd.f32 %v1030_v58, %v12539_v3  ;;  %v1032_v6 = vpop.f32.mrb[25].mxu0 }
 0x3c6   :  { %v10876_v9 = vadd.f32 %v1032_v6, %v12542_v4 }
 0x3c7   :  { %11087 = vtanh.f32 %v10875_v59 }
 0x3c8   :  { %v1048_v26 = vmul.f32 0.5, %v10876_v9 }
 0x3ca   :  { %11089 = vtanh.f32 %v1048_v26 }
 0x3d1   :  { %v11088_v35 = vpop.eup %11087 }
 0x3d2   :  { %v1053_v47 = vmul.f32 %v11088_v35, %v1042_v32 }
 0x3d4   :  { %v12546_v53 = vadd.f32 %v1053_v47, %v1052_v55  ;;  %v11090_v58 = vpop.eup %11089 }
 0x3d5   :  { %v1050_v43 = vmul.f32 0.5, %v11090_v58 }
 0x3d6   :  { %11091 = vtanh.f32 %v12546_v53 }
 0x3d7   :  { %v1051_v23 = vadd.f32 0.5, %v1050_v43 }
 0x3e0   :  { %v11092_v6 = vpop.eup %11091 }
 0x3e1   :  { %v1056_v16 = vmul.f32 %v11092_v6, %v1051_v23 }
 0x3e3   :  { %1057 = vst [vmem:[#allocation3] sm:$0xff] %v1056_v16  ;;  %1130 = vmatmul.mubr.f32.vlgmr.msra.gmra.mrb[2].mxu1 %v1056_v16  ;;  %1201 = vmatmul.mubr.f32.vlgmr.msra.gmra.mrb[26].mxu0 %v1056_v16 }
 0x3e4   :  { %8486 = vmatpush1.bf16.msra.mxu1 %v12286_v24  ;;  %8518 = vmatpush1.bf16.msra.mxu0 %v12412_v49 }
 0x3e5   :  { %8488 = vmatprep.subr.bf16.mxu1 %v12288_v27  ;;  %8520 = vmatprep.subr.bf16.mxu0 %v12415_v52 }
 0x3e6   :  { %1302 = vmatprep.mubr.f32.mxu1 %v13950_v1  ;;  %1373 = vmatprep.mubr.f32.mxu0 %v13950_v1 }
 0x3e8   :  { %8490 = vmatpush1.bf16.msra.mxu1 %v12291_v30  ;;  %8522 = vmatpush1.bf16.msra.mxu0 %v12420_v63 }
 0x3e9   :  { %8492 = vmatprep.subr.bf16.mxu1 %v12294_v33  ;;  %8524 = vmatprep.subr.bf16.mxu0 %v12423_v0 }
 0x3ec   :  { %8494 = vmatpush1.bf16.msra.mxu1 %v12297_v38  ;;  %8526 = vmatpush1.bf16.msra.mxu0 %v12428_v36 }
 0x3ed   :  { %8496 = vmatprep.subr.bf16.mxu1 %v12300_v39  ;;  %8528 = vmatprep.subr.bf16.mxu0 %v12431_v8 }
 0x3f0   :  { %8498 = vmatpush1.bf16.msra.mxu1 %v12303_v44  ;;  %8530 = vmatpush1.bf16.msra.mxu0 %v12436_v31 }
 0x3f1   :  { %8500 = vmatprep.subr.bf16.mxu1 %v12306_v45  ;;  %8532 = vmatprep.subr.bf16.mxu0 %v12439_v13 }
 0x3f4   :  { %8502 = vmatpush1.bf16.msra.mxu1 %v12309_v50  ;;  %8534 = vmatpush1.bf16.msra.mxu0 %v12444_v48 }
 0x3f5   :  { %8504 = vmatprep.subr.bf16.mxu1 %v12312_v51  ;;  %8536 = vmatprep.subr.bf16.mxu0 %v12447_v19 }
 0x3f8   :  { %8506 = vmatpush1.bf16.msra.mxu1 %v12315_v56  ;;  %8538 = vmatpush1.bf16.msra.mxu0 %v12452_v42 }
 0x3f9   :  { %8508 = vmatprep.subr.bf16.mxu1 %v12318_v57  ;;  %8540 = vmatprep.subr.bf16.mxu0 %v12455_v28 }
 0x3fc   :  { %8510 = vmatpush1.bf16.msra.mxu1 %v12321_v60  ;;  %8542 = vmatpush1.bf16.msra.mxu0 %v12460_v62 }
 0x3fd   :  { %8512 = vmatprep.subr.bf16.mxu1 %v12353_v15  ;;  %8544 = vmatprep.subr.bf16.mxu0 %v12463_v37 }
 0x400   :  { %8514 = vmatpush1.bf16.msra.mxu1 %v12355_v20  ;;  %8546 = vmatpush1.bf16.msra.mxu0 %v12468_v46 }
 0x401   :  { %8548 = vmatprep.subr.bf16.mxu1 %v12283_v21  ;;  %8580 = vmatprep.subr.bf16.mxu0 %v12408_v40 }
 0x4b6   :  { %v1131_v7 = vpop.f32.mrb[2].mxu1  ;;  %v1202_v47 = vpop.f32.mrb[26].mxu0 }
 0x4b7   :  { %v1207_v55 = vadd.f32 %v1131_v7, %v12504_v61  ;;  %v1133_v16 = vpop.f32.mrb[3].mxu1  ;;  %v1204_v23 = vpop.f32.mrb[27].mxu0  ;;  %v10877_v9 = vadd.f32 %v1202_v47, %v12539_v3 }
 0x4b8   :  { %v1208_v35 = vadd.f32 %v1133_v16, %v12506_v14  ;;  %v10878_v10 = vadd.f32 %v1204_v23, %v12542_v4 }
 0x4b9   :  { %v1211_v43 = vmul.f32 0.5, %v1207_v55 }
 0x4ba   :  { %v1215_v59 = vmul.f32 0.5, %v1208_v35  ;;  %v1220_v12 = vmul.f32 0.5, %v10878_v10 }
 0x4bb   :  { %11093 = vtanh.f32 %v1211_v43 }
 0x4bc   :  { %11095 = vtanh.f32 %v1215_v59 }
 0x4bd   :  { %11097 = vtanh.f32 %v10877_v9 }
 0x4be   :  { %11099 = vtanh.f32 %v1220_v12 }
 0x4c5   :  { %v11094_v18 = vpop.eup %11093 }
 0x4c6   :  { %v11096_v26 = vpop.eup %11095  ;;  %v1213_v32 = vmul.f32 0.5, %v11094_v18 }
 0x4c7   :  { %v1217_v58 = vmul.f32 0.5, %v11096_v26  ;;  %v11098_v6 = vpop.eup %11097 }
 0x4c8   :  { %v1214_v61 = vadd.f32 0.5, %v1213_v32  ;;  %v11100_v47 = vpop.eup %11099 }
 0x4c9   :  { %v1218_v7 = vadd.f32 0.5, %v1217_v58  ;;  %v1222_v16 = vmul.f32 0.5, %v11100_v47 }
 0x4ca   :  { %v1225_v11 = vmul.f32 %v11098_v6, %v1214_v61 }
 0x4cb   :  { %v1224_v14 = vmul.f32 %v1218_v7, %v12546_v53  ;;  %v1223_v35 = vadd.f32 0.5, %v1222_v16 }
 0x4cd   :  { %v12588_v55 = vadd.f32 %v1225_v11, %v1224_v14 }
 0x4cf   :  { %11101 = vtanh.f32 %v12588_v55 }
 0x4d9   :  { %v11102_v23 = vpop.eup %11101 }
 0x4da   :  { %v12591_v43 = vmul.f32 %v11102_v23, %v1223_v35 }
 0x4dc   :  { %1303 = vmatmul.mubr.f32.vlgmr.msra.gmra.mrb[4].mxu1 %v12591_v43  ;;  %1374 = vmatmul.mubr.f32.vlgmr.msra.gmra.mrb[28].mxu0 %v12591_v43 }
 0x4dd   :  { %8550 = vmatpush1.bf16.msra.mxu1 %v12286_v24  ;;  %8582 = vmatpush1.bf16.msra.mxu0 %v12412_v49 }
 0x4de   :  { %8552 = vmatprep.subr.bf16.mxu1 %v12288_v27  ;;  %8584 = vmatprep.subr.bf16.mxu0 %v12415_v52 }
 0x4df   :  { %1475 = vmatprep.mubr.f32.mxu1 %v13950_v1  ;;  %1546 = vmatprep.mubr.f32.mxu0 %v13950_v1 }
 0x4e1   :  { %8554 = vmatpush1.bf16.msra.mxu1 %v12291_v30  ;;  %8586 = vmatpush1.bf16.msra.mxu0 %v12420_v63 }
 0x4e2   :  { %8556 = vmatprep.subr.bf16.mxu1 %v12294_v33  ;;  %8588 = vmatprep.subr.bf16.mxu0 %v12423_v0 }
 0x4e5   :  { %8558 = vmatpush1.bf16.msra.mxu1 %v12297_v38  ;;  %8590 = vmatpush1.bf16.msra.mxu0 %v12428_v36 }
 0x4e6   :  { %8560 = vmatprep.subr.bf16.mxu1 %v12300_v39  ;;  %8592 = vmatprep.subr.bf16.mxu0 %v12431_v8 }
 0x4e9   :  { %8562 = vmatpush1.bf16.msra.mxu1 %v12303_v44  ;;  %8594 = vmatpush1.bf16.msra.mxu0 %v12436_v31 }
 0x4ea   :  { %8564 = vmatprep.subr.bf16.mxu1 %v12306_v45  ;;  %8596 = vmatprep.subr.bf16.mxu0 %v12439_v13 }
 0x4ed   :  { %8566 = vmatpush1.bf16.msra.mxu1 %v12309_v50  ;;  %8598 = vmatpush1.bf16.msra.mxu0 %v12444_v48 }
 0x4ee   :  { %8568 = vmatprep.subr.bf16.mxu1 %v12312_v51  ;;  %8600 = vmatprep.subr.bf16.mxu0 %v12447_v19 }
 0x4f1   :  { %8570 = vmatpush1.bf16.msra.mxu1 %v12315_v56  ;;  %8602 = vmatpush1.bf16.msra.mxu0 %v12452_v42 }
 0x4f2   :  { %8572 = vmatprep.subr.bf16.mxu1 %v12318_v57  ;;  %8604 = vmatprep.subr.bf16.mxu0 %v12455_v28 }
 0x4f5   :  { %8574 = vmatpush1.bf16.msra.mxu1 %v12321_v60  ;;  %8606 = vmatpush1.bf16.msra.mxu0 %v12460_v62 }
 0x4f6   :  { %8576 = vmatprep.subr.bf16.mxu1 %v12353_v15  ;;  %8608 = vmatprep.subr.bf16.mxu0 %v12463_v37 }
 0x4f9   :  { %8578 = vmatpush1.bf16.msra.mxu1 %v12355_v20  ;;  %8610 = vmatpush1.bf16.msra.mxu0 %v12468_v46 }
 0x4fa   :  { %8612 = vmatprep.subr.bf16.mxu1 %v12283_v21  ;;  %8644 = vmatprep.subr.bf16.mxu0 %v12408_v40 }
 0x5af   :  { %v1304_v11 = vpop.f32.mrb[4].mxu1  ;;  %v1375_v53 = vpop.f32.mrb[28].mxu0 }
 0x5b0   :  { %v1380_v59 = vadd.f32 %v1304_v11, %v12508_v17  ;;  %v1306_v9 = vpop.f32.mrb[5].mxu1  ;;  %v1377_v10 = vpop.f32.mrb[29].mxu0  ;;  %v10879_v32 = vadd.f32 %v1375_v53, %v12539_v3 }
 0x5b1   :  { %v1381_v12 = vadd.f32 %v1306_v9, %v12510_v22  ;;  %v10880_v58 = vadd.f32 %v1377_v10, %v12542_v4 }
 0x5b2   :  { %v1384_v18 = vmul.f32 0.5, %v1380_v59 }
 0x5b3   :  { %v1388_v26 = vmul.f32 0.5, %v1381_v12  ;;  %v1393_v61 = vmul.f32 0.5, %v10880_v58 }
 0x5b4   :  { %11103 = vtanh.f32 %v1384_v18 }
 0x5b5   :  { %11105 = vtanh.f32 %v1388_v26 }
 0x5b6   :  { %11107 = vtanh.f32 %v10879_v32 }
 0x5b7   :  { %11109 = vtanh.f32 %v1393_v61 }
 0x5be   :  { %v11104_v6 = vpop.eup %11103 }
 0x5bf   :  { %v11106_v7 = vpop.eup %11105  ;;  %v1386_v14 = vmul.f32 0.5, %v11104_v6 }
 0x5c0   :  { %v1390_v47 = vmul.f32 0.5, %v11106_v7  ;;  %v11108_v16 = vpop.eup %11107 }
 0x5c1   :  { %v1387_v17 = vadd.f32 0.5, %v1386_v14  ;;  %v11110_v53 = vpop.eup %11109 }
 0x5c2   :  { %v1391_v35 = vadd.f32 0.5, %v1390_v47  ;;  %v1395_v59 = vmul.f32 0.5, %v11110_v53 }
 0x5c3   :  { %v1398_v23 = vmul.f32 %v11108_v16, %v1387_v17 }
 0x5c4   :  { %v1397_v22 = vmul.f32 %v1391_v35, %v12588_v55  ;;  %v1396_v9 = vadd.f32 0.5, %v1395_v59 }
 0x5c6   :  { %v12634_v11 = vadd.f32 %v1398_v23, %v1397_v22 }
 0x5c8   :  { %11111 = vtanh.f32 %v12634_v11 }
 0x5d2   :  { %v11112_v10 = vpop.eup %11111 }
 0x5d3   :  { %v12637_v12 = vmul.f32 %v11112_v10, %v1396_v9 }
 0x5d5   :  { %1476 = vmatmul.mubr.f32.vlgmr.msra.gmra.mrb[6].mxu1 %v12637_v12  ;;  %1547 = vmatmul.mubr.f32.vlgmr.msra.gmra.mrb[30].mxu0 %v12637_v12 }
 0x5d6   :  { %8614 = vmatpush1.bf16.msra.mxu1 %v12286_v24  ;;  %8646 = vmatpush1.bf16.msra.mxu0 %v12412_v49 }
 0x5d7   :  { %8616 = vmatprep.subr.bf16.mxu1 %v12288_v27  ;;  %8648 = vmatprep.subr.bf16.mxu0 %v12415_v52 }
 0x5d8   :  { %1648 = vmatprep.mubr.f32.mxu1 %v13950_v1  ;;  %1719 = vmatprep.mubr.f32.mxu0 %v13950_v1 }
 0x5da   :  { %8618 = vmatpush1.bf16.msra.mxu1 %v12291_v30  ;;  %8650 = vmatpush1.bf16.msra.mxu0 %v12420_v63 }
 0x5db   :  { %8620 = vmatprep.subr.bf16.mxu1 %v12294_v33  ;;  %8652 = vmatprep.subr.bf16.mxu0 %v12423_v0 }
 0x5de   :  { %8622 = vmatpush1.bf16.msra.mxu1 %v12297_v38  ;;  %8654 = vmatpush1.bf16.msra.mxu0 %v12428_v36 }
 0x5df   :  { %8624 = vmatprep.subr.bf16.mxu1 %v12300_v39  ;;  %8656 = vmatprep.subr.bf16.mxu0 %v12431_v8 }
 0x5e2   :  { %8626 = vmatpush1.bf16.msra.mxu1 %v12303_v44  ;;  %8658 = vmatpush1.bf16.msra.mxu0 %v12436_v31 }
 0x5e3   :  { %8628 = vmatprep.subr.bf16.mxu1 %v12306_v45  ;;  %8660 = vmatprep.subr.bf16.mxu0 %v12439_v13 }
 0x5e6   :  { %8630 = vmatpush1.bf16.msra.mxu1 %v12309_v50  ;;  %8662 = vmatpush1.bf16.msra.mxu0 %v12444_v48 }
 0x5e7   :  { %8632 = vmatprep.subr.bf16.mxu1 %v12312_v51  ;;  %8664 = vmatprep.subr.bf16.mxu0 %v12447_v19 }
 0x5ea   :  { %8634 = vmatpush1.bf16.msra.mxu1 %v12315_v56  ;;  %8666 = vmatpush1.bf16.msra.mxu0 %v12452_v42 }
 0x5eb   :  { %8636 = vmatprep.subr.bf16.mxu1 %v12318_v57  ;;  %8668 = vmatprep.subr.bf16.mxu0 %v12455_v28 }
 0x5ee   :  { %8638 = vmatpush1.bf16.msra.mxu1 %v12321_v60  ;;  %8670 = vmatpush1.bf16.msra.mxu0 %v12460_v62 }
 0x5ef   :  { %8640 = vmatprep.subr.bf16.mxu1 %v12353_v15  ;;  %8672 = vmatprep.subr.bf16.mxu0 %v12463_v37 }
 0x5f2   :  { %8642 = vmatpush1.bf16.msra.mxu1 %v12355_v20  ;;  %8674 = vmatpush1.bf16.msra.mxu0 %v12468_v46 }
 0x5f3   :  { %8676 = vmatprep.subr.bf16.mxu1 %v12283_v21  ;;  %8708 = vmatprep.subr.bf16.mxu0 %v12408_v40 }
 0x6a8   :  { %v1477_v55 = vpop.f32.mrb[6].mxu1  ;;  %v1548_v18 = vpop.f32.mrb[30].mxu0 }
 0x6a9   :  { %v1553_v26 = vadd.f32 %v1477_v55, %v12512_v25  ;;  %v1479_v32 = vpop.f32.mrb[7].mxu1  ;;  %v1550_v58 = vpop.f32.mrb[31].mxu0  ;;  %v10881_v14 = vadd.f32 %v1548_v18, %v12539_v3 }
 0x6aa   :  { %v1554_v61 = vadd.f32 %v1479_v32, %v12514_v29  ;;  %v10882_v47 = vadd.f32 %v1550_v58, %v12542_v4 }
 0x6ab   :  { %v1557_v6 = vmul.f32 0.5, %v1553_v26 }
 0x6ac   :  { %v1561_v7 = vmul.f32 0.5, %v1554_v61  ;;  %v1566_v17 = vmul.f32 0.5, %v10882_v47 }
 0x6ad   :  { %11113 = vtanh.f32 %v1557_v6 }
 0x6ae   :  { %11115 = vtanh.f32 %v1561_v7 }
 0x6af   :  { %11117 = vtanh.f32 %v10881_v14 }
 0x6b0   :  { %11119 = vtanh.f32 %v1566_v17 }
 0x6b7   :  { %v11114_v16 = vpop.eup %11113 }
 0x6b8   :  { %v11116_v35 = vpop.eup %11115  ;;  %v1559_v23 = vmul.f32 0.5, %v11114_v16 }
 0x6b9   :  { %v1563_v22 = vmul.f32 0.5, %v11116_v35  ;;  %v11118_v53 = vpop.eup %11117 }
 0x6ba   :  { %v1560_v25 = vadd.f32 0.5, %v1559_v23  ;;  %v11120_v55 = vpop.eup %11119 }
 0x6bb   :  { %v1564_v59 = vadd.f32 0.5, %v1563_v22  ;;  %v1568_v18 = vmul.f32 0.5, %v11120_v55 }
 0x6bc   :  { %v1571_v9 = vmul.f32 %v11118_v53, %v1560_v25 }
 0x6bd   :  { %v1570_v29 = vmul.f32 %v1564_v59, %v12634_v11  ;;  %v1569_v26 = vadd.f32 0.5, %v1568_v18 }
 0x6bf   :  { %v12680_v10 = vadd.f32 %v1571_v9, %v1570_v29 }
 0x6c1   :  { %11121 = vtanh.f32 %v12680_v10 }
 0x6cb   :  { %v11122_v32 = vpop.eup %11121 }
 0x6cc   :  { %v12683_v58 = vmul.f32 %v11122_v32, %v1569_v26 }
 0x6ce   :  { %1649 = vmatmul.mubr.f32.vlgmr.msra.gmra.mrb[8].mxu1 %v12683_v58  ;;  %1720 = vmatmul.mubr.f32.vlgmr.msra.gmra.mrb[32].mxu0 %v12683_v58 }
 0x6cf   :  { %8678 = vmatpush1.bf16.msra.mxu1 %v12286_v24  ;;  %8710 = vmatpush1.bf16.msra.mxu0 %v12412_v49 }
 0x6d0   :  { %8680 = vmatprep.subr.bf16.mxu1 %v12288_v27  ;;  %8712 = vmatprep.subr.bf16.mxu0 %v12415_v52 }
 0x6d1   :  { %1821 = vmatprep.mubr.f32.mxu1 %v13950_v1  ;;  %1892 = vmatprep.mubr.f32.mxu0 %v13950_v1 }
 0x6d3   :  { %8682 = vmatpush1.bf16.msra.mxu1 %v12291_v30  ;;  %8714 = vmatpush1.bf16.msra.mxu0 %v12420_v63 }
 0x6d4   :  { %8684 = vmatprep.subr.bf16.mxu1 %v12294_v33  ;;  %8716 = vmatprep.subr.bf16.mxu0 %v12423_v0 }
 0x6d7   :  { %8686 = vmatpush1.bf16.msra.mxu1 %v12297_v38  ;;  %8718 = vmatpush1.bf16.msra.mxu0 %v12428_v36 }
 0x6d8   :  { %8688 = vmatprep.subr.bf16.mxu1 %v12300_v39  ;;  %8720 = vmatprep.subr.bf16.mxu0 %v12431_v8 }
 0x6db   :  { %8690 = vmatpush1.bf16.msra.mxu1 %v12303_v44  ;;  %8722 = vmatpush1.bf16.msra.mxu0 %v12436_v31 }
 0x6dc   :  { %8692 = vmatprep.subr.bf16.mxu1 %v12306_v45  ;;  %8724 = vmatprep.subr.bf16.mxu0 %v12439_v13 }
 0x6df   :  { %8694 = vmatpush1.bf16.msra.mxu1 %v12309_v50  ;;  %8726 = vmatpush1.bf16.msra.mxu0 %v12444_v48 }
 0x6e0   :  { %8696 = vmatprep.subr.bf16.mxu1 %v12312_v51  ;;  %8728 = vmatprep.subr.bf16.mxu0 %v12447_v19 }
 0x6e3   :  { %8698 = vmatpush1.bf16.msra.mxu1 %v12315_v56  ;;  %8730 = vmatpush1.bf16.msra.mxu0 %v12452_v42 }
 0x6e4   :  { %8700 = vmatprep.subr.bf16.mxu1 %v12318_v57  ;;  %8732 = vmatprep.subr.bf16.mxu0 %v12455_v28 }
 0x6e7   :  { %8702 = vmatpush1.bf16.msra.mxu1 %v12321_v60  ;;  %8734 = vmatpush1.bf16.msra.mxu0 %v12460_v62 }
 0x6e8   :  { %8704 = vmatprep.subr.bf16.mxu1 %v12353_v15  ;;  %8736 = vmatprep.subr.bf16.mxu0 %v12463_v37 }
 0x6eb   :  { %8706 = vmatpush1.bf16.msra.mxu1 %v12355_v20  ;;  %8738 = vmatpush1.bf16.msra.mxu0 %v12468_v46 }
 0x6ec   :  { %8740 = vmatprep.subr.bf16.mxu1 %v12283_v21  ;;  %8772 = vmatprep.subr.bf16.mxu0 %v12408_v40 }
 0x7a1   :  { %v1650_v11 = vpop.f32.mrb[8].mxu1  ;;  %v1721_v61 = vpop.f32.mrb[32].mxu0 }
 0x7a2   :  { %v1726_v6 = vadd.f32 %v1650_v11, %v12516_v34  ;;  %v1652_v7 = vpop.f32.mrb[9].mxu1  ;;  %v1723_v14 = vpop.f32.mrb[33].mxu0  ;;  %v10883_v35 = vadd.f32 %v1721_v61, %v12539_v3 }
 0x7a3   :  { %v1727_v47 = vadd.f32 %v1652_v7, %v12518_v41  ;;  %v10884_v23 = vadd.f32 %v1723_v14, %v12542_v4 }
 0x7a4   :  { %v1730_v17 = vmul.f32 0.5, %v1726_v6 }
 0x7a5   :  { %v1734_v16 = vmul.f32 0.5, %v1727_v47  ;;  %v1739_v22 = vmul.f32 0.5, %v10884_v23 }
 0x7a6   :  { %11123 = vtanh.f32 %v1730_v17 }
 0x7a7   :  { %11125 = vtanh.f32 %v1734_v16 }
 0x7a8   :  { %11127 = vtanh.f32 %v10883_v35 }
 0x7a9   :  { %11129 = vtanh.f32 %v1739_v22 }
 0x7b0   :  { %v11124_v25 = vpop.eup %11123 }
 0x7b1   :  { %v11126_v53 = vpop.eup %11125  ;;  %v1732_v59 = vmul.f32 0.5, %v11124_v25 }
 0x7b2   :  { %v1736_v9 = vmul.f32 0.5, %v11126_v53  ;;  %v11128_v29 = vpop.eup %11127 }
 0x7b3   :  { %v1733_v34 = vadd.f32 0.5, %v1732_v59  ;;  %v11130_v32 = vpop.eup %11129 }
 0x7b4   :  { %v1737_v55 = vadd.f32 0.5, %v1736_v9  ;;  %v1741_v11 = vmul.f32 0.5, %v11130_v32 }
 0x7b5   :  { %v1744_v18 = vmul.f32 %v11128_v29, %v1733_v34 }
 0x7b6   :  { %v1743_v41 = vmul.f32 %v1737_v55, %v12680_v10  ;;  %v1742_v61 = vadd.f32 0.5, %v1741_v11 }
 0x7b8   :  { %v12726_v26 = vadd.f32 %v1744_v18, %v1743_v41 }
 0x7ba   :  { %11131 = vtanh.f32 %v12726_v26 }
 0x7c4   :  { %v11132_v6 = vpop.eup %11131 }
 0x7c5   :  { %v12729_v7 = vmul.f32 %v11132_v6, %v1742_v61 }
 0x7c7   :  { %1822 = vmatmul.mubr.f32.vlgmr.msra.gmra.mrb[10].mxu1 %v12729_v7  ;;  %1893 = vmatmul.mubr.f32.vlgmr.msra.gmra.mrb[34].mxu0 %v12729_v7 }
 0x7c8   :  { %8742 = vmatpush1.bf16.msra.mxu1 %v12286_v24  ;;  %8774 = vmatpush1.bf16.msra.mxu0 %v12412_v49 }
 0x7c9   :  { %8744 = vmatprep.subr.bf16.mxu1 %v12288_v27  ;;  %8776 = vmatprep.subr.bf16.mxu0 %v12415_v52 }
 0x7ca   :  { %1994 = vmatprep.mubr.f32.mxu1 %v13950_v1  ;;  %2065 = vmatprep.mubr.f32.mxu0 %v13950_v1 }
 0x7cc   :  { %8746 = vmatpush1.bf16.msra.mxu1 %v12291_v30  ;;  %8778 = vmatpush1.bf16.msra.mxu0 %v12420_v63 }
 0x7cd   :  { %8748 = vmatprep.subr.bf16.mxu1 %v12294_v33  ;;  %8780 = vmatprep.subr.bf16.mxu0 %v12423_v0 }
 0x7d0   :  { %8750 = vmatpush1.bf16.msra.mxu1 %v12297_v38  ;;  %8782 = vmatpush1.bf16.msra.mxu0 %v12428_v36 }
 0x7d1   :  { %8752 = vmatprep.subr.bf16.mxu1 %v12300_v39  ;;  %8784 = vmatprep.subr.bf16.mxu0 %v12431_v8 }
 0x7d4   :  { %8754 = vmatpush1.bf16.msra.mxu1 %v12303_v44  ;;  %8786 = vmatpush1.bf16.msra.mxu0 %v12436_v31 }
 0x7d5   :  { %8756 = vmatprep.subr.bf16.mxu1 %v12306_v45  ;;  %8788 = vmatprep.subr.bf16.mxu0 %v12439_v13 }
 0x7d8   :  { %8758 = vmatpush1.bf16.msra.mxu1 %v12309_v50  ;;  %8790 = vmatpush1.bf16.msra.mxu0 %v12444_v48 }
 0x7d9   :  { %8760 = vmatprep.subr.bf16.mxu1 %v12312_v51  ;;  %8792 = vmatprep.subr.bf16.mxu0 %v12447_v19 }
 0x7dc   :  { %8762 = vmatpush1.bf16.msra.mxu1 %v12315_v56  ;;  %8794 = vmatpush1.bf16.msra.mxu0 %v12452_v42 }
 0x7dd   :  { %8764 = vmatprep.subr.bf16.mxu1 %v12318_v57  ;;  %8796 = vmatprep.subr.bf16.mxu0 %v12455_v28 }
 0x7e0   :  { %8766 = vmatpush1.bf16.msra.mxu1 %v12321_v60  ;;  %8798 = vmatpush1.bf16.msra.mxu0 %v12460_v62 }
 0x7e1   :  { %8768 = vmatprep.subr.bf16.mxu1 %v12353_v15  ;;  %8800 = vmatprep.subr.bf16.mxu0 %v12463_v37 }
 0x7e4   :  { %8770 = vmatpush1.bf16.msra.mxu1 %v12355_v20  ;;  %8802 = vmatpush1.bf16.msra.mxu0 %v12468_v46 }
 0x7e5   :  { %8804 = vmatprep.subr.bf16.mxu1 %v12283_v21  ;;  %8836 = vmatprep.subr.bf16.mxu0 %v12408_v40 }
 0x89a   :  { %v1823_v10 = vpop.f32.mrb[10].mxu1  ;;  %v1894_v14 = vpop.f32.mrb[34].mxu0 }
 0x89b   :  { %v1899_v47 = vadd.f32 %v1823_v10, %v12520_v54  ;;  %v1825_v17 = vpop.f32.mrb[11].mxu1  ;;  %v1896_v16 = vpop.f32.mrb[35].mxu0  ;;  %v10885_v25 = vadd.f32 %v1894_v14, %v12539_v3  ;;  %v2281_v14 = vld [vmem:[#allocation17 + $0x10] sm:$0xff] }
 0x89c   :  { %v1900_v35 = vadd.f32 %v1825_v17, %v12522_v2  ;;  %v10886_v53 = vadd.f32 %v1896_v16, %v12542_v4  ;;  %v2288_v17 = vld [vmem:[#allocation17 + $0x48] sm:$0xff] }
 0x89d   :  { %v1903_v23 = vmul.f32 0.5, %v1899_v47  ;;  %v2285_v47 = vld [vmem:[#allocation17 + $0x30] sm:$0xff]  ;;  %v2292_v16 = vld [vmem:[#allocation17 + $0x68] sm:$0xff] }
 0x89e   :  { %v1907_v22 = vmul.f32 0.5, %v1900_v35  ;;  %v1912_v21 = vmul.f32 0.5, %v10886_v53  ;;  %v2290_v35 = vld [vmem:[#allocation17 + $0x58] sm:$0xff] }
 0x89f   :  { %11133 = vtanh.f32 %v1903_v23  ;;  %v2294_v23 = vld [vmem:[#allocation17 + $0x78] sm:$0xff] }
 0x8a0   :  { %11135 = vtanh.f32 %v1907_v22 }
 0x8a1   :  { %11137 = vtanh.f32 %v10885_v25 }
 0x8a2   :  { %11139 = vtanh.f32 %v1912_v21  ;;  %v8901_v21 = vpack.c.bf16 %v2285_v47, %v2281_v14  ;;  %v2322_v14 = vld [vmem:[#allocation17 + $0x158] sm:$0xff] }
 0x8a3   :  { %v2326_v47 = vld [vmem:[#allocation17 + $0x178] sm:$0xff] }
 0x8a9   :  { %v11134_v59 = vpop.eup %11133 }
 0x8aa   :  { %v11136_v40 = vpop.eup %11135  ;;  %v1905_v9 = vmul.f32 0.5, %v11134_v59  ;;  %v2287_v59 = vld [vmem:[#allocation17 + $0x40] sm:$0xff] }
 0x8ab   :  { %v1909_v34 = vmul.f32 0.5, %v11136_v40  ;;  %v11138_v29 = vpop.eup %11137  ;;  %v2291_v40 = vld [vmem:[#allocation17 + $0x60] sm:$0xff] }
 0x8ac   :  { %v1906_v54 = vadd.f32 0.5, %v1905_v9  ;;  %v11140_v32 = vpop.eup %11139 }
 0x8ad   :  { %v1910_v55 = vadd.f32 0.5, %v1909_v34  ;;  %v1914_v11 = vmul.f32 0.5, %v11140_v32  ;;  %v8871_v34 = vpack.c.bf16 %v2292_v16, %v2288_v17  ;;  %v2302_v32 = vld [vmem:[#allocation17 + $0xb8] sm:$0xff] }
 0x8ae   :  { %v1917_v18 = vmul.f32 %v11138_v29, %v1906_v54  ;;  %v8903_v54 = vpack.c.bf16 %v2294_v23, %v2290_v35  ;;  %v2289_v29 = vld [vmem:[#allocation17 + $0x50] sm:$0xff]  ;;  %v2319_v35 = vld [vmem:[#allocation17 + $0x140] sm:$0xff] }
 0x8af   :  { %v1916_v2 = vmul.f32 %v1910_v55, %v12726_v26  ;;  %v1915_v61 = vadd.f32 0.5, %v1914_v11  ;;  %v2283_v26 = vld [vmem:[#allocation17 + $0x20] sm:$0xff]  ;;  %v2293_v55 = vld [vmem:[#allocation17 + $0x70] sm:$0xff]  ;;  %v8873_v11 = vpack.c.bf16 %v2291_v40, %v2287_v59  ;;  %v2328_v59 = vld [vmem:[#allocation17 + $0x188] sm:$0xff] }
 0x8b0   :  { %v2323_v23 = vld [vmem:[#allocation17 + $0x160] sm:$0xff]  ;;  %v2332_v40 = vld [vmem:[#allocation17 + $0x1a8] sm:$0xff] }
 0x8b1   :  { %v12772_v41 = vadd.f32 %v1917_v18, %v1916_v2  ;;  %v2296_v18 = vld [vmem:[#allocation17 + $0x88] sm:$0xff] }
 0x8b2   :  { %v2300_v2 = vld [vmem:[#allocation17 + $0xa8] sm:$0xff] }
 0x8b3   :  { %11141 = vtanh.f32 %v12772_v41 }
 0x8bd   :  { %v11142_v6 = vpop.eup %11141 }
 0x8be   :  { %v12775_v10 = vmul.f32 %v11142_v6, %v1915_v61  ;;  %v8905_v61 = vpack.c.bf16 %v2293_v55, %v2289_v29  ;;  %v2295_v6 = vld [vmem:[#allocation17 + $0x80] sm:$0xff]  ;;  %v8889_v29 = vpack.c.bf16 %v2323_v23, %v2319_v35 }
 0x8bf   :  { %v2639_v23 = vld [vmem:[#allocation18 + $0x80] sm:$0xff] }
 0x8c0   :  { %1995 = vmatmul.mubr.f32.vlgmr.msra.gmra.mrb[12].mxu1 %v12775_v10  ;;  %2066 = vmatmul.mubr.f32.vlgmr.msra.gmra.mrb[36].mxu0 %v12775_v10 }
 0x8c1   :  { %8806 = vmatpush1.bf16.msra.mxu1 %v12286_v24  ;;  %8838 = vmatpush1.bf16.msra.mxu0 %v12412_v49  ;;  %v2280_v24 = vld [vmem:[#allocation17 + $0x8] sm:$0xff] }
 0x8c2   :  { %8808 = vmatprep.subr.bf16.mxu1 %v12288_v27  ;;  %8840 = vmatprep.subr.bf16.mxu0 %v12415_v52  ;;  %v2284_v27 = vld [vmem:[#allocation17 + $0x28] sm:$0xff] }
 0x8c3   :  { %2167 = vmatprep.mubr.f32.mxu1 %v13950_v1  ;;  %2238 = vmatprep.mubr.f32.mxu0 %v13950_v1 }
 0x8c5   :  { %8810 = vmatpush1.bf16.msra.mxu1 %v12291_v30  ;;  %8842 = vmatpush1.bf16.msra.mxu0 %v12420_v63  ;;  %v2282_v30 = vld [vmem:[#allocation17 + $0x18] sm:$0xff] }
 0x8c6   :  { %8812 = vmatprep.subr.bf16.mxu1 %v12294_v33  ;;  %8844 = vmatprep.subr.bf16.mxu0 %v12423_v0  ;;  %v8867_v33 = vpack.c.bf16 %v2284_v27, %v2280_v24  ;;  %v2299_v24 = vld [vmem:[#allocation17 + $0xa0] sm:$0xff]  ;;  %v8875_v27 = vpack.c.bf16 %v2300_v2, %v2296_v18 }
 0x8c7   :  { %v2327_v18 = vld [vmem:[#allocation17 + $0x180] sm:$0xff] }
 0x8c8   :  { %v2331_v2 = vld [vmem:[#allocation17 + $0x1a0] sm:$0xff] }
 0x8c9   :  { %8814 = vmatpush1.bf16.msra.mxu1 %v12297_v38  ;;  %8846 = vmatpush1.bf16.msra.mxu0 %v12428_v36  ;;  %v2286_v38 = vld [vmem:[#allocation17 + $0x38] sm:$0xff] }
 0x8ca   :  { %8816 = vmatprep.subr.bf16.mxu1 %v12300_v39  ;;  %8848 = vmatprep.subr.bf16.mxu0 %v12431_v8  ;;  %v8899_v39 = vpack.c.bf16 %v2286_v38, %v2282_v30  ;;  %v2301_v38 = vld [vmem:[#allocation17 + $0xb0] sm:$0xff] }
 0x8cd   :  { %8818 = vmatpush1.bf16.msra.mxu1 %v12303_v44  ;;  %8850 = vmatpush1.bf16.msra.mxu0 %v12436_v31 }
 0x8ce   :  { %8820 = vmatprep.subr.bf16.mxu1 %v12306_v45  ;;  %8852 = vmatprep.subr.bf16.mxu0 %v12439_v13 }
 0x8d1   :  { %8822 = vmatpush1.bf16.msra.mxu1 %v12309_v50  ;;  %8854 = vmatpush1.bf16.msra.mxu0 %v12444_v48 }
 0x8d2   :  { %8824 = vmatprep.subr.bf16.mxu1 %v12312_v51  ;;  %8856 = vmatprep.subr.bf16.mxu0 %v12447_v19 }
 0x8d5   :  { %8826 = vmatpush1.bf16.msra.mxu1 %v12315_v56  ;;  %8858 = vmatpush1.bf16.msra.mxu0 %v12452_v42 }
 0x8d6   :  { %8828 = vmatprep.subr.bf16.mxu1 %v12318_v57  ;;  %8860 = vmatprep.subr.bf16.mxu0 %v12455_v28  ;;  %v13951_v57 = vld [vmem:[#allocation62_spill] sm:$0xff] }
 0x8d9   :  { %8830 = vmatpush1.bf16.msra.mxu1 %v12321_v60  ;;  %8862 = vmatpush1.bf16.msra.mxu0 %v12460_v62 }
 0x8da   :  { %8832 = vmatprep.subr.bf16.mxu1 %v12353_v15  ;;  %8864 = vmatprep.subr.bf16.mxu0 %v12463_v37 }
 0x8dd   :  { %8834 = vmatpush1.bf16.msra.mxu1 %v12355_v20  ;;  %8866 = vmatpush1.bf16.msra.mxu0 %v12468_v46 }
 0x8de   :  { %8868 = vmatprep.subr.bf16.mxu1 %v8867_v33  ;;  %8900 = vmatprep.subr.bf16.mxu0 %v8899_v39  ;;  %v2297_v33 = vld [vmem:[#allocation17 + $0x90] sm:$0xff]  ;;  %v2304_v39 = vld [vmem:[#allocation17 + $0xc8] sm:$0xff] }
 0x993   :  { %v1996_v44 = vpop.f32.mrb[12].mxu1  ;;  %v2067_v45 = vpop.f32.mrb[36].mxu0 }
 0x994   :  { %v2072_v50 = vadd.f32 %v1996_v44, %v12524_v5  ;;  %v1998_v51 = vpop.f32.mrb[13].mxu1  ;;  %v2069_v56 = vpop.f32.mrb[37].mxu0  ;;  %v10887_v49 = vadd.f32 %v2067_v45, %v12539_v3  ;;  %v2279_v5 = vld [vmem:[#allocation17] sm:$0xff]  ;;  %v2308_v44 = vld [vmem:[#allocation17 + $0xe8] sm:$0xff]  ;;  %v2306_v45 = vld [vmem:[#allocation17 + $0xd8] sm:$0xff] }
 0x995   :  { %v2073_v60 = vadd.f32 %v1998_v51, %v13951_v57  ;;  %v10888_v52 = vadd.f32 %v2069_v56, %v12542_v4  ;;  %v8869_v53 = vpack.c.bf16 %v2283_v26, %v2279_v5  ;;  %v8877_v51 = vpack.c.bf16 %v2299_v24, %v2295_v6  ;;  %v2303_v57 = vld [vmem:[#allocation17 + $0xc0] sm:$0xff]  ;;  %v2320_v5 = vld [vmem:[#allocation17 + $0x148] sm:$0xff] }
 0x996   :  { %v2076_v15 = vmul.f32 0.5, %v2072_v50  ;;  %v2310_v50 = vld [vmem:[#allocation17 + $0xf8] sm:$0xff]  ;;  %v8909_v56 = vpack.c.bf16 %v2301_v38, %v2297_v33  ;;  %v2324_v26 = vld [vmem:[#allocation17 + $0x168] sm:$0xff]  ;;  %v8893_v33 = vpack.c.bf16 %v2331_v2, %v2327_v18  ;;  %v2647_v2 = vld [vmem:[#allocation18 + $0xc0] sm:$0xff] }
 0x997   :  { %v2080_v20 = vmul.f32 0.5, %v2073_v60  ;;  %v2085_v63 = vmul.f32 0.5, %v10888_v52  ;;  %v2307_v60 = vld [vmem:[#allocation17 + $0xe0] sm:$0xff]  ;;  %v2309_v52 = vld [vmem:[#allocation17 + $0xf0] sm:$0xff]  ;;  %v2336_v6 = vld [vmem:[#allocation17 + $0x1c8] sm:$0xff] }
 0x998   :  { %11143 = vtanh.f32 %v2076_v15  ;;  %v8879_v15 = vpack.c.bf16 %v2308_v44, %v2304_v39  ;;  %v2340_v24 = vld [vmem:[#allocation17 + $0x1e8] sm:$0xff]  ;;  %v2335_v39 = vld [vmem:[#allocation17 + $0x1c0] sm:$0xff] }
 0x999   :  { %11145 = vtanh.f32 %v2080_v20  ;;  %v8911_v20 = vpack.c.bf16 %v2310_v50, %v2306_v45  ;;  %v8895_v44 = vpack.c.bf16 %v2340_v24, %v2336_v6  ;;  %v2339_v50 = vld [vmem:[#allocation17 + $0x1e0] sm:$0xff]  ;;  %v2649_v6 = vld [vmem:[#allocation18 + $0xd0] sm:$0xff] }
 0x99a   :  { %11147 = vtanh.f32 %v10887_v49  ;;  %v2305_v49 = vld [vmem:[#allocation17 + $0xd0] sm:$0xff] }
 0x99b   :  { %11149 = vtanh.f32 %v2085_v63  ;;  %v2312_v63 = vld [vmem:[#allocation17 + $0x108] sm:$0xff]  ;;  %v2653_v24 = vld [vmem:[#allocation18 + $0xf0] sm:$0xff] }
 0x9a2   :  { %v11144_v0 = vpop.eup %11143 }
 0x9a3   :  { %v11146_v36 = vpop.eup %11145  ;;  %v2078_v8 = vmul.f32 0.5, %v11144_v0  ;;  %v2316_v0 = vld [vmem:[#allocation17 + $0x128] sm:$0xff] }
 0x9a4   :  { %v2082_v31 = vmul.f32 0.5, %v11146_v36  ;;  %v11148_v48 = vpop.eup %11147  ;;  %v2314_v36 = vld [vmem:[#allocation17 + $0x118] sm:$0xff] }
 0x9a5   :  { %v2079_v13 = vadd.f32 0.5, %v2078_v8  ;;  %v11150_v37 = vpop.eup %11149  ;;  %v2318_v8 = vld [vmem:[#allocation17 + $0x138] sm:$0xff] }
 0x9a6   :  { %v2083_v19 = vadd.f32 0.5, %v2082_v31  ;;  %v2087_v46 = vmul.f32 0.5, %v11150_v37  ;;  %v8881_v31 = vpack.c.bf16 %v2307_v60, %v2303_v57  ;;  %v2313_v37 = vld [vmem:[#allocation17 + $0x110] sm:$0xff]  ;;  %v8897_v57 = vpack.c.bf16 %v2339_v50, %v2335_v39  ;;  %v2662_v50 = vld [vmem:[#allocation18 + $0x138] sm:$0xff] }
 0x9a7   :  { %v2090_v42 = vmul.f32 %v11148_v48, %v2079_v13  ;;  %v8913_v13 = vpack.c.bf16 %v2309_v52, %v2305_v49  ;;  %v2311_v48 = vld [vmem:[#allocation17 + $0x100] sm:$0xff] }
 0x9a8   :  { %v2089_v28 = vmul.f32 %v2083_v19, %v12772_v41  ;;  %v2088_v22 = vadd.f32 0.5, %v2087_v46  ;;  %v2298_v41 = vld [vmem:[#allocation17 + $0x98] sm:$0xff]  ;;  %v2315_v19 = vld [vmem:[#allocation17 + $0x120] sm:$0xff]  ;;  %v2317_v46 = vld [vmem:[#allocation17 + $0x130] sm:$0xff] }
 0x9a9   :  { %v8907_v30 = vpack.c.bf16 %v2302_v32, %v2298_v41  ;;  %v8885_v17 = vpack.c.bf16 %v2315_v19, %v2311_v48  ;;  %v8917_v16 = vpack.c.bf16 %v2317_v46, %v2313_v37  ;;  %v8891_v41 = vpack.c.bf16 %v2332_v40, %v2328_v59  ;;  %v2627_v49 = vld [vmem:[#allocation18 + $0x20] sm:$0xff]  ;;  %v2641_v59 = vld [vmem:[#allocation18 + $0x90] sm:$0xff] }
 0x9aa   :  { %v12816_v62 = vadd.f32 %v2090_v42, %v2089_v28  ;;  %v8883_v42 = vpack.c.bf16 %v2316_v0, %v2312_v63  ;;  %v8915_v28 = vpack.c.bf16 %v2318_v8, %v2314_v36  ;;  %v2625_v0 = vld [vmem:[#allocation18 + $0x10] sm:$0xff]  ;;  %v2632_v8 = vld [vmem:[#allocation18 + $0x48] sm:$0xff]  ;;  %v2631_v19 = vld [vmem:[#allocation18 + $0x40] sm:$0xff] }
 0x9ab   :  { %v2629_v36 = vld [vmem:[#allocation18 + $0x30] sm:$0xff] }
 0x9ac   :  { %11151 = vtanh.f32 %v12816_v62  ;;  %v2645_v40 = vld [vmem:[#allocation18 + $0xb0] sm:$0xff] }
 0x9b6   :  { %v11152_v25 = vpop.eup %11151 }
 0x9b7   :  { %v12819_v9 = vmul.f32 %v11152_v25, %v2088_v22  ;;  %v8887_v22 = vpack.c.bf16 %v2324_v26, %v2320_v5  ;;  %v8919_v25 = vpack.c.bf16 %v2326_v47, %v2322_v14  ;;  %v2633_v5 = vld [vmem:[#allocation18 + $0x50] sm:$0xff]  ;;  %v2640_v47 = vld [vmem:[#allocation18 + $0x88] sm:$0xff] }
 0x9b8   :  { %v2637_v26 = vld [vmem:[#allocation18 + $0x70] sm:$0xff] }
 0x9b9   :  { %2168 = vmatmul.mubr.f32.vlgmr.msra.gmra.mrb[14].mxu1 %v12819_v9  ;;  %2239 = vmatmul.mubr.f32.vlgmr.msra.gmra.mrb[38].mxu0 %v12819_v9  ;;  %v12870_v14 = vpack.c.bf16 %v2637_v26, %v2633_v5  ;;  %v2674_v5 = vld [vmem:[#allocation18 + $0x198] sm:$0xff] }
 0x9ba   :  { %8870 = vmatpush1.bf16.msra.mxu1 %v8869_v53  ;;  %8902 = vmatpush1.bf16.msra.mxu0 %v8901_v21  ;;  %v2321_v53 = vld [vmem:[#allocation17 + $0x150] sm:$0xff] }
 0x9bb   :  { %8872 = vmatprep.subr.bf16.mxu1 %v8871_v34  ;;  %8904 = vmatprep.subr.bf16.mxu0 %v8903_v54  ;;  %v2325_v21 = vld [vmem:[#allocation17 + $0x170] sm:$0xff]  ;;  %v2330_v34 = vld [vmem:[#allocation17 + $0x198] sm:$0xff] }
 0x9bc   :  { %2429 = vmatprep.mubr.f32.mxu1 %v13950_v1  ;;  %2542 = vmatprep.mubr.f32.mxu0 %v13950_v1  ;;  %v2334_v54 = vld [vmem:[#allocation17 + $0x1b8] sm:$0xff]  ;;  %v8921_v55 = vpack.c.bf16 %v2325_v21, %v2321_v53 }
 0x9bd   :  { %v8923_v32 = vpack.c.bf16 %v2334_v54, %v2330_v34  ;;  %v12882_v34 = vpack.c.bf16 %v2645_v40, %v2641_v59  ;;  %v2648_v54 = vld [vmem:[#allocation18 + $0xc8] sm:$0xff]  ;;  %v2677_v59 = vld [vmem:[#allocation18 + $0x1b0] sm:$0xff] }
 0x9be   :  { %8874 = vmatpush1.bf16.msra.mxu1 %v8873_v11  ;;  %8906 = vmatpush1.bf16.msra.mxu0 %v8905_v61  ;;  %v2329_v11 = vld [vmem:[#allocation17 + $0x190] sm:$0xff] }
 0x9bf   :  { %8876 = vmatprep.subr.bf16.mxu1 %v8875_v27  ;;  %8908 = vmatprep.subr.bf16.mxu0 %v8907_v30  ;;  %v2333_v61 = vld [vmem:[#allocation17 + $0x1b0] sm:$0xff]  ;;  %v2338_v27 = vld [vmem:[#allocation17 + $0x1d8] sm:$0xff] }
 0x9c0   :  { %v2342_v30 = vld [vmem:[#allocation17 + $0x1f8] sm:$0xff]  ;;  %v8925_v38 = vpack.c.bf16 %v2333_v61, %v2329_v11 }
 0x9c1   :  { %v8927_v45 = vpack.c.bf16 %v2342_v30, %v2338_v27  ;;  %v12894_v27 = vpack.c.bf16 %v2653_v24, %v2649_v6  ;;  %v2656_v30 = vld [vmem:[#allocation18 + $0x108] sm:$0xff]  ;;  %v2686_v6 = vld [vmem:[#allocation18 + $0x1f8] sm:$0xff] }
 0x9c2   :  { %8878 = vmatpush1.bf16.msra.mxu1 %v8877_v51  ;;  %8910 = vmatpush1.bf16.msra.mxu0 %v8909_v56  ;;  %v2337_v51 = vld [vmem:[#allocation17 + $0x1d0] sm:$0xff] }
 0x9c3   :  { %8880 = vmatprep.subr.bf16.mxu1 %v8879_v15  ;;  %8912 = vmatprep.subr.bf16.mxu0 %v8911_v20  ;;  %v2341_v56 = vld [vmem:[#allocation17 + $0x1f0] sm:$0xff]  ;;  %v2271_v15 = vld [vmem:[#allocation3] sm:$0xff] }
 0x9c4   :  { %v8929_v60 = vpack.c.bf16 %v2341_v56, %v2337_v51  ;;  %v2623_v20 = vld [vmem:[#allocation18] sm:$0xff] }
 0x9c5   :  { %v12853_v52 = vpack.c.bf16 %v2627_v49, %v2623_v20  ;;  %v2663_v49 = vld [vmem:[#allocation18 + $0x140] sm:$0xff] }
 0x9c6   :  { %8882 = vmatpush1.bf16.msra.mxu1 %v8881_v31  ;;  %8914 = vmatpush1.bf16.msra.mxu0 %v8913_v13  ;;  %v2636_v31 = vld [vmem:[#allocation18 + $0x68] sm:$0xff]  ;;  %v2634_v13 = vld [vmem:[#allocation18 + $0x58] sm:$0xff] }
 0x9c7   :  { %8884 = vmatprep.subr.bf16.mxu1 %v8883_v42  ;;  %8916 = vmatprep.subr.bf16.mxu0 %v8915_v28  ;;  %v12863_v48 = vpack.c.bf16 %v2636_v31, %v2632_v8  ;;  %v2635_v42 = vld [vmem:[#allocation18 + $0x60] sm:$0xff]  ;;  %v2638_v28 = vld [vmem:[#allocation18 + $0x78] sm:$0xff]  ;;  %v2665_v31 = vld [vmem:[#allocation18 + $0x150] sm:$0xff] }
 0x9c8   :  { %v12865_v37 = vpack.c.bf16 %v2635_v42, %v2631_v19  ;;  %v12867_v46 = vpack.c.bf16 %v2638_v28, %v2634_v13  ;;  %v2669_v13 = vld [vmem:[#allocation18 + $0x170] sm:$0xff]  ;;  %v2672_v42 = vld [vmem:[#allocation18 + $0x188] sm:$0xff] }
 0x9c9   :  { %v12918_v19 = vpack.c.bf16 %v2669_v13, %v2665_v31  ;;  %v2676_v28 = vld [vmem:[#allocation18 + $0x1a8] sm:$0xff] }
 0x9ca   :  { %8886 = vmatpush1.bf16.msra.mxu1 %v8885_v17  ;;  %8918 = vmatpush1.bf16.msra.mxu0 %v8917_v16  ;;  %v2644_v17 = vld [vmem:[#allocation18 + $0xa8] sm:$0xff]  ;;  %v2642_v16 = vld [vmem:[#allocation18 + $0x98] sm:$0xff]  ;;  %v12923_v26 = vpack.c.bf16 %v2676_v28, %v2672_v42 }
 0x9cb   :  { %8888 = vmatprep.subr.bf16.mxu1 %v8887_v22  ;;  %8920 = vmatprep.subr.bf16.mxu0 %v8919_v25  ;;  %v12875_v35 = vpack.c.bf16 %v2644_v17, %v2640_v47  ;;  %v2643_v22 = vld [vmem:[#allocation18 + $0xa0] sm:$0xff]  ;;  %v2646_v25 = vld [vmem:[#allocation18 + $0xb8] sm:$0xff] }
 0x9cc   :  { %v12877_v53 = vpack.c.bf16 %v2643_v22, %v2639_v23  ;;  %v12879_v21 = vpack.c.bf16 %v2646_v25, %v2642_v16  ;;  %v2671_v47 = vld [vmem:[#allocation18 + $0x180] sm:$0xff]  ;;  %v2678_v16 = vld [vmem:[#allocation18 + $0x1b8] sm:$0xff]  ;;  %v2673_v25 = vld [vmem:[#allocation18 + $0x190] sm:$0xff] }
 0x9cd   :  { %v2675_v17 = vld [vmem:[#allocation18 + $0x1a0] sm:$0xff]  ;;  %v12927_v22 = vpack.c.bf16 %v2678_v16, %v2674_v5  ;;  %v12930_v40 = vpack.c.bf16 %v2677_v59, %v2673_v25 }
 0x9ce   :  { %8890 = vmatpush1.bf16.msra.mxu1 %v8889_v29  ;;  %8922 = vmatpush1.bf16.msra.mxu0 %v8921_v55  ;;  %v2652_v29 = vld [vmem:[#allocation18 + $0xe8] sm:$0xff]  ;;  %v2650_v55 = vld [vmem:[#allocation18 + $0xd8] sm:$0xff]  ;;  %v12925_v23 = vpack.c.bf16 %v2675_v17, %v2671_v47 }
 0x9cf   :  { %8892 = vmatprep.subr.bf16.mxu1 %v8891_v41  ;;  %8924 = vmatprep.subr.bf16.mxu0 %v8923_v32  ;;  %v12887_v18 = vpack.c.bf16 %v2652_v29, %v2648_v54  ;;  %v2651_v41 = vld [vmem:[#allocation18 + $0xe0] sm:$0xff]  ;;  %v2654_v32 = vld [vmem:[#allocation18 + $0xf8] sm:$0xff]  ;;  %v2680_v54 = vld [vmem:[#allocation18 + $0x1c8] sm:$0xff] }
 0x9d0   :  { %v12889_v11 = vpack.c.bf16 %v2651_v41, %v2647_v2  ;;  %v12891_v61 = vpack.c.bf16 %v2654_v32, %v2650_v55  ;;  %v2684_v29 = vld [vmem:[#allocation18 + $0x1e8] sm:$0xff]  ;;  %v2682_v55 = vld [vmem:[#allocation18 + $0x1d8] sm:$0xff]  ;;  %v2679_v41 = vld [vmem:[#allocation18 + $0x1c0] sm:$0xff] }
 0x9d1   :  { %v12935_v2 = vpack.c.bf16 %v2684_v29, %v2680_v54  ;;  %v2683_v32 = vld [vmem:[#allocation18 + $0x1e0] sm:$0xff] }
 0x9d2   :  { %8894 = vmatpush1.bf16.msra.mxu1 %v8893_v33  ;;  %8926 = vmatpush1.bf16.msra.mxu0 %v8925_v38  ;;  %v2660_v33 = vld [vmem:[#allocation18 + $0x128] sm:$0xff]  ;;  %v2658_v38 = vld [vmem:[#allocation18 + $0x118] sm:$0xff]  ;;  %v12937_v24 = vpack.c.bf16 %v2683_v32, %v2679_v41 }
 0x9d3   :  { %8896 = vmatprep.subr.bf16.mxu1 %v8895_v44  ;;  %8928 = vmatprep.subr.bf16.mxu0 %v8927_v45  ;;  %v12899_v39 = vpack.c.bf16 %v2660_v33, %v2656_v30  ;;  %v2655_v44 = vld [vmem:[#allocation18 + $0x100] sm:$0xff]  ;;  %v12903_v56 = vpack.c.bf16 %v2662_v50, %v2658_v38  ;;  %v12939_v30 = vpack.c.bf16 %v2686_v6, %v2682_v55  ;;  %v2681_v33 = vld [vmem:[#allocation18 + $0x1d0] sm:$0xff] }
 0x9d4   :  { %v2659_v45 = vld [vmem:[#allocation18 + $0x120] sm:$0xff]  ;;  %v2685_v38 = vld [vmem:[#allocation18 + $0x1f0] sm:$0xff] }
 0x9d5   :  { %v12901_v51 = vpack.c.bf16 %v2659_v45, %v2655_v44  ;;  %v12942_v44 = vpack.c.bf16 %v2685_v38, %v2681_v33  ;;  %v13954_v33 = vld [vmem:[#allocation60_spill] sm:$0xff] }
 0x9d6   :  { %8898 = vmatpush1.bf16.msra.mxu1 %v8897_v57  ;;  %8930 = vmatpush1.bf16.msra.mxu0 %v8929_v60  ;;  %v2657_v57 = vld [vmem:[#allocation18 + $0x110] sm:$0xff] }
 0x9d7   :  { %v2661_v60 = vld [vmem:[#allocation18 + $0x130] sm:$0xff] }
 0x9d9   :  { %2430 = vmatmul.mubr.f32.vlgmr.msra.gmra.mrb[16].mxu1 %v2271_v15  ;;  %2543 = vmatmul.mubr.f32.vlgmr.msra.gmra.mrb[40].mxu0 %v2271_v15  ;;  %v12906_v15 = vpack.c.bf16 %v2661_v60, %v2657_v57  ;;  %v13952_v57 = vld [vmem:[#allocation63_spill] sm:$0xff] }
 0x9da   :  { %2435 = vmatprep.mubr.f32.mxu1 %v13950_v1  ;;  %2548 = vmatprep.mubr.f32.mxu0 %v13950_v1 }
 0x9dd   :  { %2436 = vmatmul.mubr.f32.gmra.mrb[18].mxu1 %v12591_v43  ;;  %2549 = vmatmul.mubr.f32.gmra.mrb[42].mxu0 %v12591_v43  ;;  %v2624_v43 = vld [vmem:[#allocation18 + $0x8] sm:$0xff] }
 0x9de   :  { %2441 = vmatprep.mubr.f32.mxu1 %v13950_v1  ;;  %2554 = vmatprep.mubr.f32.mxu0 %v13950_v1 }
 0x9e1   :  { %2442 = vmatmul.mubr.f32.gmra.mrb[20].mxu1 %v12637_v12  ;;  %2555 = vmatmul.mubr.f32.gmra.mrb[44].mxu0 %v12637_v12  ;;  %v2628_v12 = vld [vmem:[#allocation18 + $0x28] sm:$0xff] }
 0x9e2   :  { %2447 = vmatprep.mubr.f32.mxu1 %v13950_v1  ;;  %2560 = vmatprep.mubr.f32.mxu0 %v13950_v1 }
 0x9e5   :  { %2448 = vmatmul.mubr.f32.gmra.mrb[22].mxu1 %v12683_v58  ;;  %2561 = vmatmul.mubr.f32.gmra.mrb[46].mxu0 %v12683_v58  ;;  %v2626_v58 = vld [vmem:[#allocation18 + $0x18] sm:$0xff] }
 0x9e6   :  { %2453 = vmatprep.mubr.f32.mxu1 %v13950_v1  ;;  %2566 = vmatprep.mubr.f32.mxu0 %v13950_v1 }
 0x9e9   :  { %2454 = vmatmul.mubr.f32.gmra.mrb[24].mxu1 %v12729_v7  ;;  %2567 = vmatmul.mubr.f32.gmra.mrb[48].mxu0 %v12729_v7  ;;  %v12851_v7 = vpack.c.bf16 %v2628_v12, %v2624_v43  ;;  %v2664_v43 = vld [vmem:[#allocation18 + $0x148] sm:$0xff] }
 0x9ea   :  { %2459 = vmatprep.mubr.f32.mxu1 %v13950_v1  ;;  %2572 = vmatprep.mubr.f32.mxu0 %v13950_v1  ;;  %v2668_v12 = vld [vmem:[#allocation18 + $0x168] sm:$0xff] }
 0x9eb   :  { %8932 = vmatprep.subr.bf16.mxu1 %v12851_v7  ;;  %v12911_v20 = vpack.c.bf16 %v2668_v12, %v2664_v43 }
 0x9ec   :  { %8934 = vmatpush1.bf16.msra.mxu1 %v12853_v52 }
 0x9ed   :  { %2460 = vmatmul.mubr.f32.gmra.mrb[26].mxu1 %v12775_v10  ;;  %2573 = vmatmul.mubr.f32.gmra.mrb[50].mxu0 %v12775_v10  ;;  %v2630_v10 = vld [vmem:[#allocation18 + $0x38] sm:$0xff] }
 0x9ee   :  { %2465 = vmatprep.mubr.f32.mxu1 %v13950_v1  ;;  %2578 = vmatprep.mubr.f32.mxu0 %v13950_v1  ;;  %v12855_v63 = vpack.c.bf16 %v2630_v10, %v2626_v58  ;;  %v2666_v58 = vld [vmem:[#allocation18 + $0x158] sm:$0xff]  ;;  %v2667_v10 = vld [vmem:[#allocation18 + $0x160] sm:$0xff] }
 0x9ef   :  { %8936 = vmatprep.subr.bf16.mxu1 %v12863_v48 }
 0x9f0   :  { %8964 = vmatprep.subr.bf16.mxu0 %v12855_v63  ;;  %8938 = vmatpush1.bf16.msra.mxu1 %v12865_v37 }
 0x9f1   :  { %2466 = vmatmul.mubr.f32.gmra.mrb[28].mxu1 %v12819_v9  ;;  %2579 = vmatmul.mubr.f32.gmra.mrb[52].mxu0 %v12819_v9  ;;  %v12858_v9 = vpack.c.bf16 %v2629_v36, %v2625_v0  ;;  %v2670_v0 = vld [vmem:[#allocation18 + $0x178] sm:$0xff]  ;;  %v12913_v36 = vpack.c.bf16 %v2667_v10, %v2663_v49 }
 0x9f2   :  { %2471 = vmatprep.mubr.f32.mxu1 %v13950_v1  ;;  %2584 = vmatprep.mubr.f32.mxu0 %v13950_v1  ;;  %v12915_v8 = vpack.c.bf16 %v2670_v0, %v2666_v58  ;;  %v13953_v58 = vld [vmem:[#allocation64_spill] sm:$0xff] }
 0x9f3   :  { %8966 = vmatpush1.bf16.msra.mxu0 %v12858_v9  ;;  %8940 = vmatprep.subr.bf16.mxu1 %v12875_v35 }
 0x9f4   :  { %8968 = vmatprep.subr.bf16.mxu0 %v12867_v46  ;;  %8942 = vmatpush1.bf16.msra.mxu1 %v12877_v53 }
 0x9f5   :  { %8944 = vmatprep.subr.bf16.mxu1 %v12887_v18 }
 0x9f7   :  { %8970 = vmatpush1.bf16.msra.mxu0 %v12870_v14 }
 0x9f8   :  { %8972 = vmatprep.subr.bf16.mxu0 %v12879_v21  ;;  %8946 = vmatpush1.bf16.msra.mxu1 %v12889_v11 }
 0x9f9   :  { %8948 = vmatprep.subr.bf16.mxu1 %v12899_v39 }
 0x9fb   :  { %8974 = vmatpush1.bf16.msra.mxu0 %v12882_v34 }
 0x9fc   :  { %8976 = vmatprep.subr.bf16.mxu0 %v12891_v61  ;;  %8950 = vmatpush1.bf16.msra.mxu1 %v12901_v51 }
 0x9fd   :  { %8952 = vmatprep.subr.bf16.mxu1 %v12911_v20 }
 0x9ff   :  { %8978 = vmatpush1.bf16.msra.mxu0 %v12894_v27 }
 0xa00   :  { %8980 = vmatprep.subr.bf16.mxu0 %v12903_v56  ;;  %8954 = vmatpush1.bf16.msra.mxu1 %v12913_v36 }
 0xa01   :  { %8956 = vmatprep.subr.bf16.mxu1 %v12923_v26 }
 0xa03   :  { %8982 = vmatpush1.bf16.msra.mxu0 %v12906_v15 }
 0xa04   :  { %8984 = vmatprep.subr.bf16.mxu0 %v12915_v8  ;;  %8958 = vmatpush1.bf16.msra.mxu1 %v12925_v23 }
 0xa05   :  { %8960 = vmatprep.subr.bf16.mxu1 %v12935_v2 }
 0xa07   :  { %8986 = vmatpush1.bf16.msra.mxu0 %v12918_v19 }
 0xa08   :  { %8988 = vmatprep.subr.bf16.mxu0 %v12927_v22  ;;  %8962 = vmatpush1.bf16.msra.mxu1 %v12937_v24 }
 0xa09   :  { %8996 = vmatprep.subr.bf16.mxu1 %v12851_v7 }
 0xa0b   :  { %8990 = vmatpush1.bf16.msra.mxu0 %v12930_v40 }
 0xa0c   :  { %8992 = vmatprep.subr.bf16.mxu0 %v12939_v30 }
 0xa0f   :  { %8994 = vmatpush1.bf16.msra.mxu0 %v12942_v44 }
 0xa10   :  { %9028 = vmatprep.subr.bf16.mxu0 %v12855_v63 }
 0xa8c   :  { %v2169_v45 = vpop.f32.mrb[14].mxu1  ;;  %v2240_v50 = vpop.f32.mrb[38].mxu0 }
 0xa8d   :  { %v2245_v60 = vadd.f32 %v2169_v45, %v13952_v57  ;;  %v2171_v43 = vpop.f32.mrb[15].mxu1  ;;  %v2242_v12 = vpop.f32.mrb[39].mxu0  ;;  %v10889_v31 = vadd.f32 %v2240_v50, %v12539_v3  ;;  %v13955_v45 = vld [vmem:[#allocation61_spill] sm:$0xff] }
 0xa8e   :  { %v2246_v49 = vadd.f32 %v2171_v43, %v13953_v58  ;;  %v10890_v13 = vadd.f32 %v2242_v12, %v12542_v4  ;;  %v13956_v12 = vld [vmem:[#allocation65_spill] sm:$0xff] }
 0xa8f   :  { %v2249_v10 = vmul.f32 0.5, %v2245_v60 }
 0xa90   :  { %v2253_v0 = vmul.f32 0.5, %v2246_v49  ;;  %v2258_v42 = vmul.f32 0.5, %v10890_v13 }
 0xa91   :  { %11153 = vtanh.f32 %v2249_v10 }
 0xa92   :  { %11155 = vtanh.f32 %v2253_v0 }
 0xa93   :  { %11157 = vtanh.f32 %v10889_v31 }
 0xa94   :  { %11159 = vtanh.f32 %v2258_v42 }
 0xa9b   :  { %v11154_v28 = vpop.eup %11153 }
 0xa9c   :  { %v11156_v5 = vpop.eup %11155  ;;  %v2251_v47 = vmul.f32 0.5, %v11154_v28  ;;  %v13957_v28 = vld [vmem:[#allocation66_spill] sm:$0xff] }
 0xa9d   :  { %v2255_v17 = vmul.f32 0.5, %v11156_v5  ;;  %v11158_v25 = vpop.eup %11157 }
 0xa9e   :  { %v2252_v16 = vadd.f32 0.5, %v2251_v47  ;;  %v11160_v3 = vpop.eup %11159 }
 0xa9f   :  { %v2256_v59 = vadd.f32 0.5, %v2255_v17  ;;  %v2260_v41 = vmul.f32 0.5, %v11160_v3 }
 0xaa0   :  { %v2263_v54 = vmul.f32 %v11158_v25, %v2252_v16 }
 0xaa1   :  { %v2262_v29 = vmul.f32 %v2256_v59, %v12816_v62  ;;  %v2261_v32 = vadd.f32 0.5, %v2260_v41  ;;  %v2343_v62 = vld [vmem:[#allocation20] sm:$0xf] }
 0xaa2   :  { %v12993_v38 = vrot.slane %v2343_v62, %v13954_v33  ;;  %v12996_v50 = vrot.slane %v2343_v62, %v13955_v45  ;;  %v13000_v58 = vrot.slane %v2343_v62, %v13956_v12  ;;  %v13005_v5 = vrot.slane %v2343_v62, %v13957_v28 }
 0xaa3   :  { %v2264_v55 = vadd.f32 %v2263_v54, %v2262_v29 }
 0xaa5   :  { %11161 = vtanh.f32 %v2264_v55  ;;  %2270 = vst [vmem:[#allocation38] sm:$0xff] %v2264_v55 }
 0xaaf   :  { %v11162_v6 = vpop.eup %11161 }
 0xab0   :  { %v2266_v4 = vmul.f32 %v11162_v6, %v2261_v32 }
 0xab2   :  { %2269 = vst [vmem:[#allocation36] sm:$0xff] %v2266_v4  ;;  %2472 = vmatmul.mubr.f32.gmra.mrb[30].mxu1 %v2266_v4  ;;  %2585 = vmatmul.mubr.f32.gmra.mrb[54].mxu0 %v2266_v4 }
 0xab3   :  { %2755 = vmatprep.mubr.f32.mxu1 %v13950_v1  ;;  %2826 = vmatprep.mubr.f32.mxu0 %v13950_v1 }
 0xab6   :  { %2756 = vmatmul.mubr.f32.vlgmr.msra.gmra.mrb[16].mxu1 %v13950_v1  ;;  %2827 = vmatmul.mubr.f32.vlgmr.msra.gmra.mrb[40].mxu0 %v13950_v1 }
 0xab7   :  { %8998 = vmatpush1.bf16.msra.mxu1 %v12853_v52  ;;  %9030 = vmatpush1.bf16.msra.mxu0 %v12858_v9 }
 0xab8   :  { %9000 = vmatprep.subr.bf16.mxu1 %v12863_v48  ;;  %9032 = vmatprep.subr.bf16.mxu0 %v12867_v46 }
 0xab9   :  { %2924 = vmatprep.mubr.f32.mxu1 %v13950_v1  ;;  %2995 = vmatprep.mubr.f32.mxu0 %v13950_v1 }
 0xabb   :  { %9002 = vmatpush1.bf16.msra.mxu1 %v12865_v37  ;;  %9034 = vmatpush1.bf16.msra.mxu0 %v12870_v14 }
 0xabc   :  { %9004 = vmatprep.subr.bf16.mxu1 %v12875_v35  ;;  %9036 = vmatprep.subr.bf16.mxu0 %v12879_v21 }
 0xabf   :  { %9006 = vmatpush1.bf16.msra.mxu1 %v12877_v53  ;;  %9038 = vmatpush1.bf16.msra.mxu0 %v12882_v34 }
 0xac0   :  { %9008 = vmatprep.subr.bf16.mxu1 %v12887_v18  ;;  %9040 = vmatprep.subr.bf16.mxu0 %v12891_v61 }
 0xac3   :  { %9010 = vmatpush1.bf16.msra.mxu1 %v12889_v11  ;;  %9042 = vmatpush1.bf16.msra.mxu0 %v12894_v27 }
 0xac4   :  { %9012 = vmatprep.subr.bf16.mxu1 %v12899_v39  ;;  %9044 = vmatprep.subr.bf16.mxu0 %v12903_v56 }
 0xac7   :  { %9014 = vmatpush1.bf16.msra.mxu1 %v12901_v51  ;;  %9046 = vmatpush1.bf16.msra.mxu0 %v12906_v15 }
 0xac8   :  { %9016 = vmatprep.subr.bf16.mxu1 %v12911_v20  ;;  %9048 = vmatprep.subr.bf16.mxu0 %v12915_v8 }
 0xacb   :  { %9018 = vmatpush1.bf16.msra.mxu1 %v12913_v36  ;;  %9050 = vmatpush1.bf16.msra.mxu0 %v12918_v19 }
 0xacc   :  { %9020 = vmatprep.subr.bf16.mxu1 %v12923_v26  ;;  %9052 = vmatprep.subr.bf16.mxu0 %v12927_v22 }
 0xacf   :  { %9022 = vmatpush1.bf16.msra.mxu1 %v12925_v23  ;;  %9054 = vmatpush1.bf16.msra.mxu0 %v12930_v40 }
 0xad0   :  { %9024 = vmatprep.subr.bf16.mxu1 %v12935_v2  ;;  %9056 = vmatprep.subr.bf16.mxu0 %v12939_v30 }
 0xad3   :  { %9026 = vmatpush1.bf16.msra.mxu1 %v12937_v24  ;;  %9058 = vmatpush1.bf16.msra.mxu0 %v12942_v44 }
 0xad4   :  { %9060 = vmatprep.subr.bf16.mxu1 %v12851_v7  ;;  %9092 = vmatprep.subr.bf16.mxu0 %v12855_v63 }
 0xb89   :  { %v2757_v57 = vpop.f32.mrb[16].mxu1  ;;  %v2828_v60 = vpop.f32.mrb[40].mxu0 }
 0xb8a   :  { %v10891_v43 = vadd.f32 %v2757_v57, %v12993_v38  ;;  %v2759_v49 = vpop.f32.mrb[17].mxu1  ;;  %v2830_v10 = vpop.f32.mrb[41].mxu0  ;;  %v10907_v42 = vadd.f32 %v2828_v60, %v13000_v58 }
 0xb8b   :  { %v10892_v0 = vadd.f32 %v2759_v49, %v12996_v50  ;;  %v10908_v47 = vadd.f32 %v2830_v10, %v13005_v5 }
 0xb8c   :  { %v2837_v31 = vmul.f32 0.5, %v10891_v43 }
 0xb8d   :  { %v2841_v13 = vmul.f32 0.5, %v10892_v0  ;;  %v2846_v17 = vmul.f32 0.5, %v10908_v47 }
 0xb8e   :  { %11163 = vtanh.f32 %v2837_v31 }
 0xb8f   :  { %11165 = vtanh.f32 %v2841_v13 }
 0xb90   :  { %11167 = vtanh.f32 %v10907_v42 }
 0xb91   :  { %11169 = vtanh.f32 %v2846_v17 }
 0xb98   :  { %v11164_v16 = vpop.eup %11163 }
 0xb99   :  { %v11166_v25 = vpop.eup %11165  ;;  %v2839_v59 = vmul.f32 0.5, %v11164_v16 }
 0xb9a   :  { %v2843_v54 = vmul.f32 0.5, %v11166_v25  ;;  %v11168_v55 = vpop.eup %11167 }
 0xb9b   :  { %v2840_v29 = vadd.f32 0.5, %v2839_v59  ;;  %v11170_v4 = vpop.eup %11169 }
 0xb9c   :  { %v2844_v3 = vadd.f32 0.5, %v2843_v54  ;;  %v2848_v62 = vmul.f32 0.5, %v11170_v4 }
 0xb9d   :  { %v2851_v41 = vmul.f32 %v11168_v55, %v2840_v29 }
 0xb9e   :  { %v2850_v32 = vmul.f32 0.0, %v2844_v3  ;;  %v2849_v57 = vadd.f32 0.5, %v2848_v62 }
 0xba0   :  { %v13008_v6 = vadd.f32 %v2851_v41, %v2850_v32 }
 0xba2   :  { %11171 = vtanh.f32 %v13008_v6 }
 0xbac   :  { %v11172_v60 = vpop.eup %11171 }
 0xbad   :  { %v2854_v43 = vmul.f32 %v11172_v60, %v2849_v57 }
 0xbaf   :  { %2855 = vst [vmem:[#allocation3] sm:$0xff] %v2854_v43  ;;  %2925 = vmatmul.mubr.f32.vlgmr.msra.gmra.mrb[18].mxu1 %v2854_v43  ;;  %2996 = vmatmul.mubr.f32.vlgmr.msra.gmra.mrb[42].mxu0 %v2854_v43 }
 0xbb0   :  { %9062 = vmatpush1.bf16.msra.mxu1 %v12853_v52  ;;  %9094 = vmatpush1.bf16.msra.mxu0 %v12858_v9 }
 0xbb1   :  { %9064 = vmatprep.subr.bf16.mxu1 %v12863_v48  ;;  %9096 = vmatprep.subr.bf16.mxu0 %v12867_v46 }
 0xbb2   :  { %3093 = vmatprep.mubr.f32.mxu1 %v13950_v1  ;;  %3164 = vmatprep.mubr.f32.mxu0 %v13950_v1 }
 0xbb4   :  { %9066 = vmatpush1.bf16.msra.mxu1 %v12865_v37  ;;  %9098 = vmatpush1.bf16.msra.mxu0 %v12870_v14 }
 0xbb5   :  { %9068 = vmatprep.subr.bf16.mxu1 %v12875_v35  ;;  %9100 = vmatprep.subr.bf16.mxu0 %v12879_v21 }
 0xbb8   :  { %9070 = vmatpush1.bf16.msra.mxu1 %v12877_v53  ;;  %9102 = vmatpush1.bf16.msra.mxu0 %v12882_v34 }
 0xbb9   :  { %9072 = vmatprep.subr.bf16.mxu1 %v12887_v18  ;;  %9104 = vmatprep.subr.bf16.mxu0 %v12891_v61 }
 0xbbc   :  { %9074 = vmatpush1.bf16.msra.mxu1 %v12889_v11  ;;  %9106 = vmatpush1.bf16.msra.mxu0 %v12894_v27 }
 0xbbd   :  { %9076 = vmatprep.subr.bf16.mxu1 %v12899_v39  ;;  %9108 = vmatprep.subr.bf16.mxu0 %v12903_v56 }
 0xbc0   :  { %9078 = vmatpush1.bf16.msra.mxu1 %v12901_v51  ;;  %9110 = vmatpush1.bf16.msra.mxu0 %v12906_v15 }
 0xbc1   :  { %9080 = vmatprep.subr.bf16.mxu1 %v12911_v20  ;;  %9112 = vmatprep.subr.bf16.mxu0 %v12915_v8 }
 0xbc4   :  { %9082 = vmatpush1.bf16.msra.mxu1 %v12913_v36  ;;  %9114 = vmatpush1.bf16.msra.mxu0 %v12918_v19 }
 0xbc5   :  { %9084 = vmatprep.subr.bf16.mxu1 %v12923_v26  ;;  %9116 = vmatprep.subr.bf16.mxu0 %v12927_v22 }
 0xbc8   :  { %9086 = vmatpush1.bf16.msra.mxu1 %v12925_v23  ;;  %9118 = vmatpush1.bf16.msra.mxu0 %v12930_v40 }
 0xbc9   :  { %9088 = vmatprep.subr.bf16.mxu1 %v12935_v2  ;;  %9120 = vmatprep.subr.bf16.mxu0 %v12939_v30 }
 0xbcc   :  { %9090 = vmatpush1.bf16.msra.mxu1 %v12937_v24  ;;  %9122 = vmatpush1.bf16.msra.mxu0 %v12942_v44 }
 0xbcd   :  { %9124 = vmatprep.subr.bf16.mxu1 %v12851_v7  ;;  %9156 = vmatprep.subr.bf16.mxu0 %v12855_v63 }
 0xc82   :  { %v2926_v49 = vpop.f32.mrb[18].mxu1  ;;  %v2997_v10 = vpop.f32.mrb[42].mxu0 }
 0xc83   :  { %v10893_v0 = vadd.f32 %v2926_v49, %v12993_v38  ;;  %v2928_v31 = vpop.f32.mrb[19].mxu1  ;;  %v2999_v13 = vpop.f32.mrb[43].mxu0  ;;  %v10909_v16 = vadd.f32 %v2997_v10, %v13000_v58 }
 0xc84   :  { %v10894_v42 = vadd.f32 %v2928_v31, %v12996_v50  ;;  %v10910_v25 = vadd.f32 %v2999_v13, %v13005_v5 }
 0xc85   :  { %v3006_v47 = vmul.f32 0.5, %v10893_v0 }
 0xc86   :  { %v3010_v17 = vmul.f32 0.5, %v10894_v42  ;;  %v3015_v59 = vmul.f32 0.5, %v10910_v25 }
 0xc87   :  { %11173 = vtanh.f32 %v3006_v47 }
 0xc88   :  { %11175 = vtanh.f32 %v3010_v17 }
 0xc89   :  { %11177 = vtanh.f32 %v10909_v16 }
 0xc8a   :  { %11179 = vtanh.f32 %v3015_v59 }
 0xc91   :  { %v11174_v54 = vpop.eup %11173 }
 0xc92   :  { %v11176_v29 = vpop.eup %11175  ;;  %v3008_v55 = vmul.f32 0.5, %v11174_v54 }
 0xc93   :  { %v3012_v3 = vmul.f32 0.5, %v11176_v29  ;;  %v11178_v32 = vpop.eup %11177 }
 0xc94   :  { %v3009_v41 = vadd.f32 0.5, %v3008_v55  ;;  %v11180_v43 = vpop.eup %11179 }
 0xc95   :  { %v3013_v4 = vadd.f32 0.5, %v3012_v3  ;;  %v3017_v49 = vmul.f32 0.5, %v11180_v43 }
 0xc96   :  { %v3020_v62 = vmul.f32 %v11178_v32, %v3009_v41 }
 0xc97   :  { %v3019_v57 = vmul.f32 %v3013_v4, %v13008_v6  ;;  %v3018_v10 = vadd.f32 0.5, %v3017_v49 }
 0xc99   :  { %v13050_v60 = vadd.f32 %v3020_v62, %v3019_v57 }
 0xc9b   :  { %11181 = vtanh.f32 %v13050_v60 }
 0xca5   :  { %v11182_v0 = vpop.eup %11181 }
 0xca6   :  { %v13053_v31 = vmul.f32 %v11182_v0, %v3018_v10 }
 0xca8   :  { %3094 = vmatmul.mubr.f32.vlgmr.msra.gmra.mrb[20].mxu1 %v13053_v31  ;;  %3165 = vmatmul.mubr.f32.vlgmr.msra.gmra.mrb[44].mxu0 %v13053_v31 }
 0xca9   :  { %9126 = vmatpush1.bf16.msra.mxu1 %v12853_v52  ;;  %9158 = vmatpush1.bf16.msra.mxu0 %v12858_v9 }
 0xcaa   :  { %9128 = vmatprep.subr.bf16.mxu1 %v12863_v48  ;;  %9160 = vmatprep.subr.bf16.mxu0 %v12867_v46 }
 0xcab   :  { %3262 = vmatprep.mubr.f32.mxu1 %v13950_v1  ;;  %3333 = vmatprep.mubr.f32.mxu0 %v13950_v1 }
 0xcad   :  { %9130 = vmatpush1.bf16.msra.mxu1 %v12865_v37  ;;  %9162 = vmatpush1.bf16.msra.mxu0 %v12870_v14 }
 0xcae   :  { %9132 = vmatprep.subr.bf16.mxu1 %v12875_v35  ;;  %9164 = vmatprep.subr.bf16.mxu0 %v12879_v21 }
 0xcb1   :  { %9134 = vmatpush1.bf16.msra.mxu1 %v12877_v53  ;;  %9166 = vmatpush1.bf16.msra.mxu0 %v12882_v34 }
 0xcb2   :  { %9136 = vmatprep.subr.bf16.mxu1 %v12887_v18  ;;  %9168 = vmatprep.subr.bf16.mxu0 %v12891_v61 }
 0xcb5   :  { %9138 = vmatpush1.bf16.msra.mxu1 %v12889_v11  ;;  %9170 = vmatpush1.bf16.msra.mxu0 %v12894_v27 }
 0xcb6   :  { %9140 = vmatprep.subr.bf16.mxu1 %v12899_v39  ;;  %9172 = vmatprep.subr.bf16.mxu0 %v12903_v56 }
 0xcb9   :  { %9142 = vmatpush1.bf16.msra.mxu1 %v12901_v51  ;;  %9174 = vmatpush1.bf16.msra.mxu0 %v12906_v15 }
 0xcba   :  { %9144 = vmatprep.subr.bf16.mxu1 %v12911_v20  ;;  %9176 = vmatprep.subr.bf16.mxu0 %v12915_v8 }
 0xcbd   :  { %9146 = vmatpush1.bf16.msra.mxu1 %v12913_v36  ;;  %9178 = vmatpush1.bf16.msra.mxu0 %v12918_v19 }
 0xcbe   :  { %9148 = vmatprep.subr.bf16.mxu1 %v12923_v26  ;;  %9180 = vmatprep.subr.bf16.mxu0 %v12927_v22 }
 0xcc1   :  { %9150 = vmatpush1.bf16.msra.mxu1 %v12925_v23  ;;  %9182 = vmatpush1.bf16.msra.mxu0 %v12930_v40 }
 0xcc2   :  { %9152 = vmatprep.subr.bf16.mxu1 %v12935_v2  ;;  %9184 = vmatprep.subr.bf16.mxu0 %v12939_v30 }
 0xcc5   :  { %9154 = vmatpush1.bf16.msra.mxu1 %v12937_v24  ;;  %9186 = vmatpush1.bf16.msra.mxu0 %v12942_v44 }
 0xcc6   :  { %9188 = vmatprep.subr.bf16.mxu1 %v12851_v7  ;;  %9220 = vmatprep.subr.bf16.mxu0 %v12855_v63 }
 0xd7b   :  { %v3095_v6 = vpop.f32.mrb[20].mxu1  ;;  %v3166_v13 = vpop.f32.mrb[44].mxu0 }
 0xd7c   :  { %v10895_v42 = vadd.f32 %v3095_v6, %v12993_v38  ;;  %v3097_v47 = vpop.f32.mrb[21].mxu1  ;;  %v3168_v17 = vpop.f32.mrb[45].mxu0  ;;  %v10911_v54 = vadd.f32 %v3166_v13, %v13000_v58 }
 0xd7d   :  { %v10896_v16 = vadd.f32 %v3097_v47, %v12996_v50  ;;  %v10912_v29 = vadd.f32 %v3168_v17, %v13005_v5 }
 0xd7e   :  { %v3175_v25 = vmul.f32 0.5, %v10895_v42 }
 0xd7f   :  { %v3179_v59 = vmul.f32 0.5, %v10896_v16  ;;  %v3184_v55 = vmul.f32 0.5, %v10912_v29 }
 0xd80   :  { %11183 = vtanh.f32 %v3175_v25 }
 0xd81   :  { %11185 = vtanh.f32 %v3179_v59 }
 0xd82   :  { %11187 = vtanh.f32 %v10911_v54 }
 0xd83   :  { %11189 = vtanh.f32 %v3184_v55 }
 0xd8a   :  { %v11184_v3 = vpop.eup %11183 }
 0xd8b   :  { %v11186_v41 = vpop.eup %11185  ;;  %v3177_v32 = vmul.f32 0.5, %v11184_v3 }
 0xd8c   :  { %v3181_v4 = vmul.f32 0.5, %v11186_v41  ;;  %v11188_v57 = vpop.eup %11187 }
 0xd8d   :  { %v3178_v62 = vadd.f32 0.5, %v3177_v32  ;;  %v11190_v6 = vpop.eup %11189 }
 0xd8e   :  { %v3182_v43 = vadd.f32 0.5, %v3181_v4  ;;  %v3186_v13 = vmul.f32 0.5, %v11190_v6 }
 0xd8f   :  { %v3189_v49 = vmul.f32 %v11188_v57, %v3178_v62 }
 0xd90   :  { %v3188_v10 = vmul.f32 %v3182_v43, %v13050_v60  ;;  %v3187_v42 = vadd.f32 0.5, %v3186_v13 }
 0xd92   :  { %v13096_v0 = vadd.f32 %v3189_v49, %v3188_v10 }
 0xd94   :  { %11191 = vtanh.f32 %v13096_v0 }
 0xd9e   :  { %v11192_v47 = vpop.eup %11191 }
 0xd9f   :  { %v13099_v17 = vmul.f32 %v11192_v47, %v3187_v42 }
 0xda1   :  { %3263 = vmatmul.mubr.f32.vlgmr.msra.gmra.mrb[22].mxu1 %v13099_v17  ;;  %3334 = vmatmul.mubr.f32.vlgmr.msra.gmra.mrb[46].mxu0 %v13099_v17 }
 0xda2   :  { %9190 = vmatpush1.bf16.msra.mxu1 %v12853_v52  ;;  %9222 = vmatpush1.bf16.msra.mxu0 %v12858_v9 }
 0xda3   :  { %9192 = vmatprep.subr.bf16.mxu1 %v12863_v48  ;;  %9224 = vmatprep.subr.bf16.mxu0 %v12867_v46 }
 0xda4   :  { %3431 = vmatprep.mubr.f32.mxu1 %v13950_v1  ;;  %3502 = vmatprep.mubr.f32.mxu0 %v13950_v1 }
 0xda6   :  { %9194 = vmatpush1.bf16.msra.mxu1 %v12865_v37  ;;  %9226 = vmatpush1.bf16.msra.mxu0 %v12870_v14 }
 0xda7   :  { %9196 = vmatprep.subr.bf16.mxu1 %v12875_v35  ;;  %9228 = vmatprep.subr.bf16.mxu0 %v12879_v21 }
 0xdaa   :  { %9198 = vmatpush1.bf16.msra.mxu1 %v12877_v53  ;;  %9230 = vmatpush1.bf16.msra.mxu0 %v12882_v34 }
 0xdab   :  { %9200 = vmatprep.subr.bf16.mxu1 %v12887_v18  ;;  %9232 = vmatprep.subr.bf16.mxu0 %v12891_v61 }
 0xdae   :  { %9202 = vmatpush1.bf16.msra.mxu1 %v12889_v11  ;;  %9234 = vmatpush1.bf16.msra.mxu0 %v12894_v27 }
 0xdaf   :  { %9204 = vmatprep.subr.bf16.mxu1 %v12899_v39  ;;  %9236 = vmatprep.subr.bf16.mxu0 %v12903_v56 }
 0xdb2   :  { %9206 = vmatpush1.bf16.msra.mxu1 %v12901_v51  ;;  %9238 = vmatpush1.bf16.msra.mxu0 %v12906_v15 }
 0xdb3   :  { %9208 = vmatprep.subr.bf16.mxu1 %v12911_v20  ;;  %9240 = vmatprep.subr.bf16.mxu0 %v12915_v8 }
 0xdb6   :  { %9210 = vmatpush1.bf16.msra.mxu1 %v12913_v36  ;;  %9242 = vmatpush1.bf16.msra.mxu0 %v12918_v19 }
 0xdb7   :  { %9212 = vmatprep.subr.bf16.mxu1 %v12923_v26  ;;  %9244 = vmatprep.subr.bf16.mxu0 %v12927_v22 }
 0xdba   :  { %9214 = vmatpush1.bf16.msra.mxu1 %v12925_v23  ;;  %9246 = vmatpush1.bf16.msra.mxu0 %v12930_v40 }
 0xdbb   :  { %9216 = vmatprep.subr.bf16.mxu1 %v12935_v2  ;;  %9248 = vmatprep.subr.bf16.mxu0 %v12939_v30 }
 0xdbe   :  { %9218 = vmatpush1.bf16.msra.mxu1 %v12937_v24  ;;  %9250 = vmatpush1.bf16.msra.mxu0 %v12942_v44 }
 0xdbf   :  { %9252 = vmatprep.subr.bf16.mxu1 %v12851_v7  ;;  %9284 = vmatprep.subr.bf16.mxu0 %v12855_v63 }
 0xe74   :  { %v3264_v60 = vpop.f32.mrb[22].mxu1  ;;  %v3335_v16 = vpop.f32.mrb[46].mxu0 }
 0xe75   :  { %v10897_v25 = vadd.f32 %v3264_v60, %v12993_v38  ;;  %v3266_v59 = vpop.f32.mrb[23].mxu1  ;;  %v3337_v54 = vpop.f32.mrb[47].mxu0  ;;  %v10913_v41 = vadd.f32 %v3335_v16, %v13000_v58 }
 0xe76   :  { %v10898_v29 = vadd.f32 %v3266_v59, %v12996_v50  ;;  %v10914_v32 = vadd.f32 %v3337_v54, %v13005_v5 }
 0xe77   :  { %v3344_v55 = vmul.f32 0.5, %v10897_v25 }
 0xe78   :  { %v3348_v3 = vmul.f32 0.5, %v10898_v29  ;;  %v3353_v4 = vmul.f32 0.5, %v10914_v32 }
 0xe79   :  { %11193 = vtanh.f32 %v3344_v55 }
 0xe7a   :  { %11195 = vtanh.f32 %v3348_v3 }
 0xe7b   :  { %11197 = vtanh.f32 %v10913_v41 }
 0xe7c   :  { %11199 = vtanh.f32 %v3353_v4 }
 0xe83   :  { %v11194_v62 = vpop.eup %11193 }
 0xe84   :  { %v11196_v57 = vpop.eup %11195  ;;  %v3346_v43 = vmul.f32 0.5, %v11194_v62 }
 0xe85   :  { %v3350_v49 = vmul.f32 0.5, %v11196_v57  ;;  %v11198_v6 = vpop.eup %11197 }
 0xe86   :  { %v3347_v10 = vadd.f32 0.5, %v3346_v43  ;;  %v11200_v16 = vpop.eup %11199 }
 0xe87   :  { %v3351_v13 = vadd.f32 0.5, %v3350_v49  ;;  %v3355_v25 = vmul.f32 0.5, %v11200_v16 }
 0xe88   :  { %v3358_v42 = vmul.f32 %v11198_v6, %v3347_v10 }
 0xe89   :  { %v3357_v47 = vmul.f32 %v3351_v13, %v13096_v0  ;;  %v3356_v59 = vadd.f32 0.5, %v3355_v25 }
 0xe8b   :  { %v13142_v60 = vadd.f32 %v3358_v42, %v3357_v47 }
 0xe8d   :  { %11201 = vtanh.f32 %v13142_v60 }
 0xe97   :  { %v11202_v54 = vpop.eup %11201 }
 0xe98   :  { %v13145_v29 = vmul.f32 %v11202_v54, %v3356_v59 }
 0xe9a   :  { %3432 = vmatmul.mubr.f32.vlgmr.msra.gmra.mrb[24].mxu1 %v13145_v29  ;;  %3503 = vmatmul.mubr.f32.vlgmr.msra.gmra.mrb[48].mxu0 %v13145_v29 }
 0xe9b   :  { %9254 = vmatpush1.bf16.msra.mxu1 %v12853_v52  ;;  %9286 = vmatpush1.bf16.msra.mxu0 %v12858_v9 }
 0xe9c   :  { %9256 = vmatprep.subr.bf16.mxu1 %v12863_v48  ;;  %9288 = vmatprep.subr.bf16.mxu0 %v12867_v46 }
 0xe9d   :  { %3600 = vmatprep.mubr.f32.mxu1 %v13950_v1  ;;  %3671 = vmatprep.mubr.f32.mxu0 %v13950_v1 }
 0xe9f   :  { %9258 = vmatpush1.bf16.msra.mxu1 %v12865_v37  ;;  %9290 = vmatpush1.bf16.msra.mxu0 %v12870_v14 }
 0xea0   :  { %9260 = vmatprep.subr.bf16.mxu1 %v12875_v35  ;;  %9292 = vmatprep.subr.bf16.mxu0 %v12879_v21 }
 0xea3   :  { %9262 = vmatpush1.bf16.msra.mxu1 %v12877_v53  ;;  %9294 = vmatpush1.bf16.msra.mxu0 %v12882_v34 }
 0xea4   :  { %9264 = vmatprep.subr.bf16.mxu1 %v12887_v18  ;;  %9296 = vmatprep.subr.bf16.mxu0 %v12891_v61 }
 0xea7   :  { %9266 = vmatpush1.bf16.msra.mxu1 %v12889_v11  ;;  %9298 = vmatpush1.bf16.msra.mxu0 %v12894_v27 }
 0xea8   :  { %9268 = vmatprep.subr.bf16.mxu1 %v12899_v39  ;;  %9300 = vmatprep.subr.bf16.mxu0 %v12903_v56 }
 0xeab   :  { %9270 = vmatpush1.bf16.msra.mxu1 %v12901_v51  ;;  %9302 = vmatpush1.bf16.msra.mxu0 %v12906_v15 }
 0xeac   :  { %9272 = vmatprep.subr.bf16.mxu1 %v12911_v20  ;;  %9304 = vmatprep.subr.bf16.mxu0 %v12915_v8 }
 0xeaf   :  { %9274 = vmatpush1.bf16.msra.mxu1 %v12913_v36  ;;  %9306 = vmatpush1.bf16.msra.mxu0 %v12918_v19 }
 0xeb0   :  { %9276 = vmatprep.subr.bf16.mxu1 %v12923_v26  ;;  %9308 = vmatprep.subr.bf16.mxu0 %v12927_v22 }
 0xeb3   :  { %9278 = vmatpush1.bf16.msra.mxu1 %v12925_v23  ;;  %9310 = vmatpush1.bf16.msra.mxu0 %v12930_v40 }
 0xeb4   :  { %9280 = vmatprep.subr.bf16.mxu1 %v12935_v2  ;;  %9312 = vmatprep.subr.bf16.mxu0 %v12939_v30 }
 0xeb7   :  { %9282 = vmatpush1.bf16.msra.mxu1 %v12937_v24  ;;  %9314 = vmatpush1.bf16.msra.mxu0 %v12942_v44 }
 0xeb8   :  { %9316 = vmatprep.subr.bf16.mxu1 %v12851_v7  ;;  %9348 = vmatprep.subr.bf16.mxu0 %v12855_v63 }
 0xf6d   :  { %v3433_v0 = vpop.f32.mrb[24].mxu1  ;;  %v3504_v55 = vpop.f32.mrb[48].mxu0 }
 0xf6e   :  { %v10899_v3 = vadd.f32 %v3433_v0, %v12993_v38  ;;  %v3435_v41 = vpop.f32.mrb[25].mxu1  ;;  %v3506_v32 = vpop.f32.mrb[49].mxu0  ;;  %v10915_v43 = vadd.f32 %v3504_v55, %v13000_v58 }
 0xf6f   :  { %v10900_v4 = vadd.f32 %v3435_v41, %v12996_v50  ;;  %v10916_v49 = vadd.f32 %v3506_v32, %v13005_v5 }
 0xf70   :  { %v3513_v62 = vmul.f32 0.5, %v10899_v3 }
 0xf71   :  { %v3517_v57 = vmul.f32 0.5, %v10900_v4  ;;  %v3522_v10 = vmul.f32 0.5, %v10916_v49 }
 0xf72   :  { %11203 = vtanh.f32 %v3513_v62 }
 0xf73   :  { %11205 = vtanh.f32 %v3517_v57 }
 0xf74   :  { %11207 = vtanh.f32 %v10915_v43 }
 0xf75   :  { %11209 = vtanh.f32 %v3522_v10 }
 0xf7c   :  { %v11204_v6 = vpop.eup %11203 }
 0xf7d   :  { %v11206_v13 = vpop.eup %11205  ;;  %v3515_v42 = vmul.f32 0.5, %v11204_v6 }
 0xf7e   :  { %v3519_v47 = vmul.f32 0.5, %v11206_v13  ;;  %v11208_v25 = vpop.eup %11207 }
 0xf7f   :  { %v3516_v16 = vadd.f32 0.5, %v3515_v42  ;;  %v11210_v55 = vpop.eup %11209 }
 0xf80   :  { %v3520_v59 = vadd.f32 0.5, %v3519_v47  ;;  %v3524_v41 = vmul.f32 0.5, %v11210_v55 }
 0xf81   :  { %v3527_v54 = vmul.f32 %v11208_v25, %v3516_v16 }
 0xf82   :  { %v3526_v0 = vmul.f32 %v3520_v59, %v13142_v60  ;;  %v3525_v4 = vadd.f32 0.5, %v3524_v41 }
 0xf84   :  { %v13188_v3 = vadd.f32 %v3527_v54, %v3526_v0 }
 0xf86   :  { %11211 = vtanh.f32 %v13188_v3 }
 0xf90   :  { %v11212_v32 = vpop.eup %11211 }
 0xf91   :  { %v13191_v62 = vmul.f32 %v11212_v32, %v3525_v4 }
 0xf93   :  { %3601 = vmatmul.mubr.f32.vlgmr.msra.gmra.mrb[26].mxu1 %v13191_v62  ;;  %3672 = vmatmul.mubr.f32.vlgmr.msra.gmra.mrb[50].mxu0 %v13191_v62 }
 0xf94   :  { %9318 = vmatpush1.bf16.msra.mxu1 %v12853_v52  ;;  %9350 = vmatpush1.bf16.msra.mxu0 %v12858_v9 }
 0xf95   :  { %9320 = vmatprep.subr.bf16.mxu1 %v12863_v48  ;;  %9352 = vmatprep.subr.bf16.mxu0 %v12867_v46 }
 0xf96   :  { %3769 = vmatprep.mubr.f32.mxu1 %v13950_v1  ;;  %3840 = vmatprep.mubr.f32.mxu0 %v13950_v1 }
 0xf98   :  { %9322 = vmatpush1.bf16.msra.mxu1 %v12865_v37  ;;  %9354 = vmatpush1.bf16.msra.mxu0 %v12870_v14 }
 0xf99   :  { %9324 = vmatprep.subr.bf16.mxu1 %v12875_v35  ;;  %9356 = vmatprep.subr.bf16.mxu0 %v12879_v21 }
 0xf9c   :  { %9326 = vmatpush1.bf16.msra.mxu1 %v12877_v53  ;;  %9358 = vmatpush1.bf16.msra.mxu0 %v12882_v34 }
 0xf9d   :  { %9328 = vmatprep.subr.bf16.mxu1 %v12887_v18  ;;  %9360 = vmatprep.subr.bf16.mxu0 %v12891_v61 }
 0xfa0   :  { %9330 = vmatpush1.bf16.msra.mxu1 %v12889_v11  ;;  %9362 = vmatpush1.bf16.msra.mxu0 %v12894_v27 }
 0xfa1   :  { %9332 = vmatprep.subr.bf16.mxu1 %v12899_v39  ;;  %9364 = vmatprep.subr.bf16.mxu0 %v12903_v56 }
 0xfa4   :  { %9334 = vmatpush1.bf16.msra.mxu1 %v12901_v51  ;;  %9366 = vmatpush1.bf16.msra.mxu0 %v12906_v15 }
 0xfa5   :  { %9336 = vmatprep.subr.bf16.mxu1 %v12911_v20  ;;  %9368 = vmatprep.subr.bf16.mxu0 %v12915_v8 }
 0xfa8   :  { %9338 = vmatpush1.bf16.msra.mxu1 %v12913_v36  ;;  %9370 = vmatpush1.bf16.msra.mxu0 %v12918_v19 }
 0xfa9   :  { %9340 = vmatprep.subr.bf16.mxu1 %v12923_v26  ;;  %9372 = vmatprep.subr.bf16.mxu0 %v12927_v22 }
 0xfac   :  { %9342 = vmatpush1.bf16.msra.mxu1 %v12925_v23  ;;  %9374 = vmatpush1.bf16.msra.mxu0 %v12930_v40 }
 0xfad   :  { %9344 = vmatprep.subr.bf16.mxu1 %v12935_v2  ;;  %9376 = vmatprep.subr.bf16.mxu0 %v12939_v30 }
 0xfb0   :  { %9346 = vmatpush1.bf16.msra.mxu1 %v12937_v24  ;;  %9378 = vmatpush1.bf16.msra.mxu0 %v12942_v44 }
 0xfb1   :  { %9380 = vmatprep.subr.bf16.mxu1 %v12851_v7  ;;  %9412 = vmatprep.subr.bf16.mxu0 %v12855_v63 }
0x1066   :  { %v3602_v60 = vpop.f32.mrb[26].mxu1  ;;  %v3673_v57 = vpop.f32.mrb[50].mxu0 }
0x1067   :  { %v10901_v43 = vadd.f32 %v3602_v60, %v12993_v38  ;;  %v3604_v49 = vpop.f32.mrb[27].mxu1  ;;  %v3675_v10 = vpop.f32.mrb[51].mxu0  ;;  %v10917_v47 = vadd.f32 %v3673_v57, %v13000_v58 }
0x1068   :  { %v10902_v6 = vadd.f32 %v3604_v49, %v12996_v50  ;;  %v10918_v16 = vadd.f32 %v3675_v10, %v13005_v5 }
0x1069   :  { %v3682_v13 = vmul.f32 0.5, %v10901_v43 }
0x106a   :  { %v3686_v42 = vmul.f32 0.5, %v10902_v6  ;;  %v3691_v7 = vmul.f32 0.5, %v10918_v16  ;;  %v4064_v16 = vld [vmem:[#allocation21 + $0x68] sm:$0xff] }
0x106b   :  { %11213 = vtanh.f32 %v3682_v13  ;;  %v4053_v13 = vld [vmem:[#allocation21 + $0x10] sm:$0xff] }
0x106c   :  { %11215 = vtanh.f32 %v3686_v42  ;;  %v4057_v42 = vld [vmem:[#allocation21 + $0x30] sm:$0xff] }
0x106d   :  { %11217 = vtanh.f32 %v10917_v47  ;;  %v4060_v47 = vld [vmem:[#allocation21 + $0x48] sm:$0xff] }
0x106e   :  { %11219 = vtanh.f32 %v3691_v7  ;;  %v4062_v7 = vld [vmem:[#allocation21 + $0x58] sm:$0xff] }
0x1075   :  { %v11214_v25 = vpop.eup %11213 }
0x1076   :  { %v11216_v63 = vpop.eup %11215  ;;  %v3684_v59 = vmul.f32 0.5, %v11214_v25  ;;  %v4066_v25 = vld [vmem:[#allocation21 + $0x78] sm:$0xff] }
0x1077   :  { %v3688_v54 = vmul.f32 0.5, %v11216_v63  ;;  %v11218_v55 = vpop.eup %11217 }
0x1078   :  { %v3685_v0 = vadd.f32 0.5, %v3684_v59  ;;  %v11220_v57 = vpop.eup %11219 }
0x1079   :  { %v3689_v41 = vadd.f32 0.5, %v3688_v54  ;;  %v3693_v43 = vmul.f32 0.5, %v11220_v57  ;;  %v4061_v57 = vld [vmem:[#allocation21 + $0x50] sm:$0xff] }
0x107a   :  { %v3696_v4 = vmul.f32 %v11218_v55, %v3685_v0  ;;  %v9477_v0 = vpack.c.bf16 %v4057_v42, %v4053_v13  ;;  %v4059_v55 = vld [vmem:[#allocation21 + $0x40] sm:$0xff] }
0x107b   :  { %v3695_v32 = vmul.f32 %v3689_v41, %v13188_v3  ;;  %v3694_v49 = vadd.f32 0.5, %v3693_v43  ;;  %v4055_v3 = vld [vmem:[#allocation21 + $0x20] sm:$0xff]  ;;  %v4065_v43 = vld [vmem:[#allocation21 + $0x70] sm:$0xff] }
0x107c   :  { %v4063_v41 = vld [vmem:[#allocation21 + $0x60] sm:$0xff] }
0x107d   :  { %v13234_v60 = vadd.f32 %v3696_v4, %v3695_v32  ;;  %v9447_v32 = vpack.c.bf16 %v4064_v16, %v4060_v47  ;;  %v4085_v47 = vld [vmem:[#allocation21 + $0x110] sm:$0xff] }
0x107e   :  { %v4089_v16 = vld [vmem:[#allocation21 + $0x130] sm:$0xff] }
0x107f   :  { %11221 = vtanh.f32 %v13234_v60 }
0x1089   :  { %v11222_v10 = vpop.eup %11221 }
0x108a   :  { %v13237_v6 = vmul.f32 %v11222_v10, %v3694_v49  ;;  %v4068_v49 = vld [vmem:[#allocation21 + $0x88] sm:$0xff] }
0x108b   :  { %v4072_v10 = vld [vmem:[#allocation21 + $0xa8] sm:$0xff] }
0x108c   :  { %3770 = vmatmul.mubr.f32.vlgmr.msra.gmra.mrb[28].mxu1 %v13237_v6  ;;  %3841 = vmatmul.mubr.f32.vlgmr.msra.gmra.mrb[52].mxu0 %v13237_v6 }
0x108d   :  { %9382 = vmatpush1.bf16.msra.mxu1 %v12853_v52  ;;  %9414 = vmatpush1.bf16.msra.mxu0 %v12858_v9  ;;  %v4052_v52 = vld [vmem:[#allocation21 + $0x8] sm:$0xff] }
0x108e   :  { %9384 = vmatprep.subr.bf16.mxu1 %v12863_v48  ;;  %9416 = vmatprep.subr.bf16.mxu0 %v12867_v46  ;;  %v4056_v9 = vld [vmem:[#allocation21 + $0x28] sm:$0xff]  ;;  %v4054_v48 = vld [vmem:[#allocation21 + $0x18] sm:$0xff] }
0x108f   :  { %3938 = vmatprep.mubr.f32.mxu1 %v13950_v1  ;;  %4009 = vmatprep.mubr.f32.mxu0 %v13950_v1  ;;  %v4058_v46 = vld [vmem:[#allocation21 + $0x38] sm:$0xff] }
0x1091   :  { %9386 = vmatpush1.bf16.msra.mxu1 %v12865_v37  ;;  %9418 = vmatpush1.bf16.msra.mxu0 %v12870_v14  ;;  %v9443_v37 = vpack.c.bf16 %v4056_v9, %v4052_v52  ;;  %v9475_v14 = vpack.c.bf16 %v4058_v46, %v4054_v48  ;;  %v4070_v52 = vld [vmem:[#allocation21 + $0x98] sm:$0xff]  ;;  %v9449_v48 = vpack.c.bf16 %v4063_v41, %v4059_v55  ;;  %v4067_v46 = vld [vmem:[#allocation21 + $0x80] sm:$0xff] }
0x1092   :  { %9388 = vmatprep.subr.bf16.mxu1 %v12875_v35  ;;  %9420 = vmatprep.subr.bf16.mxu0 %v12879_v21  ;;  %v4074_v9 = vld [vmem:[#allocation21 + $0xb8] sm:$0xff]  ;;  %v4091_v55 = vld [vmem:[#allocation21 + $0x140] sm:$0xff] }
0x1093   :  { %v4095_v41 = vld [vmem:[#allocation21 + $0x160] sm:$0xff] }
0x1095   :  { %9390 = vmatpush1.bf16.msra.mxu1 %v12877_v53  ;;  %9422 = vmatpush1.bf16.msra.mxu0 %v12882_v34 }
0x1096   :  { %9392 = vmatprep.subr.bf16.mxu1 %v12887_v18  ;;  %9424 = vmatprep.subr.bf16.mxu0 %v12891_v61 }
0x1099   :  { %9394 = vmatpush1.bf16.msra.mxu1 %v12889_v11  ;;  %9426 = vmatpush1.bf16.msra.mxu0 %v12894_v27 }
0x109a   :  { %9396 = vmatprep.subr.bf16.mxu1 %v12899_v39  ;;  %9428 = vmatprep.subr.bf16.mxu0 %v12903_v56 }
0x109d   :  { %9398 = vmatpush1.bf16.msra.mxu1 %v12901_v51  ;;  %9430 = vmatpush1.bf16.msra.mxu0 %v12906_v15 }
0x109e   :  { %9400 = vmatprep.subr.bf16.mxu1 %v12911_v20  ;;  %9432 = vmatprep.subr.bf16.mxu0 %v12915_v8 }
0x10a1   :  { %9402 = vmatpush1.bf16.msra.mxu1 %v12913_v36  ;;  %9434 = vmatpush1.bf16.msra.mxu0 %v12918_v19 }
0x10a2   :  { %9404 = vmatprep.subr.bf16.mxu1 %v12923_v26  ;;  %9436 = vmatprep.subr.bf16.mxu0 %v12927_v22 }
0x10a5   :  { %9406 = vmatpush1.bf16.msra.mxu1 %v12925_v23  ;;  %9438 = vmatpush1.bf16.msra.mxu0 %v12930_v40 }
0x10a6   :  { %9408 = vmatprep.subr.bf16.mxu1 %v12935_v2  ;;  %9440 = vmatprep.subr.bf16.mxu0 %v12939_v30 }
0x10a9   :  { %9410 = vmatpush1.bf16.msra.mxu1 %v12937_v24  ;;  %9442 = vmatpush1.bf16.msra.mxu0 %v12942_v44  ;;  %v4051_v44 = vld [vmem:[#allocation21] sm:$0xff] }
0x10aa   :  { %9444 = vmatprep.subr.bf16.mxu1 %v9443_v37  ;;  %9476 = vmatprep.subr.bf16.mxu0 %v9475_v14  ;;  %v9445_v54 = vpack.c.bf16 %v4055_v3, %v4051_v44  ;;  %v9481_v37 = vpack.c.bf16 %v4065_v43, %v4061_v57  ;;  %v4071_v14 = vld [vmem:[#allocation21 + $0xa0] sm:$0xff]  ;;  %v4093_v57 = vld [vmem:[#allocation21 + $0x150] sm:$0xff] }
0x10ab   :  { %v4083_v44 = vld [vmem:[#allocation21 + $0x100] sm:$0xff]  ;;  %v4097_v43 = vld [vmem:[#allocation21 + $0x170] sm:$0xff] }
0x10ac   :  { %v4087_v3 = vld [vmem:[#allocation21 + $0x120] sm:$0xff] }
0x115f   :  { %v3771_v35 = vpop.f32.mrb[28].mxu1  ;;  %v3842_v53 = vpop.f32.mrb[52].mxu0 }
0x1160   :  { %v10903_v21 = vadd.f32 %v3771_v35, %v12993_v38  ;;  %v3773_v34 = vpop.f32.mrb[29].mxu1  ;;  %v3844_v18 = vpop.f32.mrb[53].mxu0  ;;  %v10919_v39 = vadd.f32 %v3842_v53, %v13000_v58  ;;  %v9451_v35 = vpack.c.bf16 %v4072_v10, %v4068_v49  ;;  %v9483_v53 = vpack.c.bf16 %v4074_v9, %v4070_v52  ;;  %v4100_v49 = vld [vmem:[#allocation21 + $0x188] sm:$0xff]  ;;  %v4102_v52 = vld [vmem:[#allocation21 + $0x198] sm:$0xff] }
0x1161   :  { %v10904_v11 = vadd.f32 %v3773_v34, %v12996_v50  ;;  %v10920_v51 = vadd.f32 %v3844_v18, %v13005_v5  ;;  %v4073_v34 = vld [vmem:[#allocation21 + $0xb0] sm:$0xff]  ;;  %v4076_v18 = vld [vmem:[#allocation21 + $0xc8] sm:$0xff]  ;;  %v4106_v9 = vld [vmem:[#allocation21 + $0x1b8] sm:$0xff] }
0x1162   :  { %v3851_v61 = vmul.f32 0.5, %v10903_v21  ;;  %v4069_v21 = vld [vmem:[#allocation21 + $0x90] sm:$0xff]  ;;  %v4104_v10 = vld [vmem:[#allocation21 + $0x1a8] sm:$0xff] }
0x1163   :  { %v3855_v27 = vmul.f32 0.5, %v10904_v11  ;;  %v3860_v56 = vmul.f32 0.5, %v10920_v51  ;;  %v4080_v11 = vld [vmem:[#allocation21 + $0xe8] sm:$0xff]  ;;  %v9485_v51 = vpack.c.bf16 %v4073_v34, %v4069_v21  ;;  %v4101_v21 = vld [vmem:[#allocation21 + $0x190] sm:$0xff] }
0x1164   :  { %11223 = vtanh.f32 %v3851_v61  ;;  %v4078_v61 = vld [vmem:[#allocation21 + $0xd8] sm:$0xff]  ;;  %v4105_v34 = vld [vmem:[#allocation21 + $0x1b0] sm:$0xff] }
0x1165   :  { %11225 = vtanh.f32 %v3855_v27  ;;  %v4082_v27 = vld [vmem:[#allocation21 + $0xf8] sm:$0xff] }
0x1166   :  { %11227 = vtanh.f32 %v10919_v39  ;;  %v9453_v39 = vpack.c.bf16 %v4071_v14, %v4067_v46  ;;  %v4099_v46 = vld [vmem:[#allocation21 + $0x180] sm:$0xff] }
0x1167   :  { %11229 = vtanh.f32 %v3860_v56  ;;  %v4075_v56 = vld [vmem:[#allocation21 + $0xc0] sm:$0xff] }
0x1168   :  { %v4103_v14 = vld [vmem:[#allocation21 + $0x1a0] sm:$0xff] }
0x116e   :  { %v11224_v15 = vpop.eup %11223 }
0x116f   :  { %v11226_v20 = vpop.eup %11225  ;;  %v3853_v36 = vmul.f32 0.5, %v11224_v15  ;;  %v4079_v15 = vld [vmem:[#allocation21 + $0xe0] sm:$0xff] }
0x1170   :  { %v3857_v8 = vmul.f32 0.5, %v11226_v20  ;;  %v11228_v26 = vpop.eup %11227  ;;  %v9455_v20 = vpack.c.bf16 %v4080_v11, %v4076_v18  ;;  %v4108_v18 = vld [vmem:[#allocation21 + $0x1c8] sm:$0xff] }
0x1171   :  { %v3854_v19 = vadd.f32 0.5, %v3853_v36  ;;  %v11230_v24 = vpop.eup %11229  ;;  %v9487_v36 = vpack.c.bf16 %v4082_v27, %v4078_v61  ;;  %v4112_v11 = vld [vmem:[#allocation21 + $0x1e8] sm:$0xff]  ;;  %v4110_v61 = vld [vmem:[#allocation21 + $0x1d8] sm:$0xff] }
0x1172   :  { %v3858_v23 = vadd.f32 0.5, %v3857_v8  ;;  %v3862_v30 = vmul.f32 0.5, %v11230_v24  ;;  %v4077_v8 = vld [vmem:[#allocation21 + $0xd0] sm:$0xff]  ;;  %v9457_v24 = vpack.c.bf16 %v4079_v15, %v4075_v56  ;;  %v4114_v27 = vld [vmem:[#allocation21 + $0x1f8] sm:$0xff]  ;;  %v4107_v56 = vld [vmem:[#allocation21 + $0x1c0] sm:$0xff]  ;;  %v9471_v15 = vpack.c.bf16 %v4112_v11, %v4108_v18 }
0x1173   :  { %v3865_v22 = vmul.f32 %v11228_v26, %v3854_v19  ;;  %v4081_v19 = vld [vmem:[#allocation21 + $0xf0] sm:$0xff]  ;;  %v4084_v26 = vld [vmem:[#allocation21 + $0x108] sm:$0xff]  ;;  %v4419_v11 = vld [vmem:[#allocation23 + $0xc0] sm:$0xff] }
0x1174   :  { %v3864_v40 = vmul.f32 %v3858_v23, %v13234_v60  ;;  %v3863_v63 = vadd.f32 0.5, %v3862_v30  ;;  %v9479_v60 = vpack.c.bf16 %v4066_v25, %v4062_v7  ;;  %v4088_v23 = vld [vmem:[#allocation21 + $0x128] sm:$0xff]  ;;  %v9489_v30 = vpack.c.bf16 %v4081_v19, %v4077_v8  ;;  %v4109_v8 = vld [vmem:[#allocation21 + $0x1d0] sm:$0xff] }
0x1175   :  { %v9459_v13 = vpack.c.bf16 %v4088_v23, %v4084_v26  ;;  %v4092_v7 = vld [vmem:[#allocation21 + $0x148] sm:$0xff]  ;;  %v4113_v19 = vld [vmem:[#allocation21 + $0x1f0] sm:$0xff] }
0x1176   :  { %v13278_v2 = vadd.f32 %v3865_v22, %v3864_v40  ;;  %v4086_v22 = vld [vmem:[#allocation21 + $0x118] sm:$0xff]  ;;  %v4096_v25 = vld [vmem:[#allocation21 + $0x168] sm:$0xff]  ;;  %v9505_v23 = vpack.c.bf16 %v4113_v19, %v4109_v8 }
0x1177   :  { %v4090_v40 = vld [vmem:[#allocation21 + $0x138] sm:$0xff]  ;;  %v4432_v8 = vld [vmem:[#allocation23 + $0x128] sm:$0xff] }
0x1178   :  { %11231 = vtanh.f32 %v13278_v2  ;;  %v9491_v42 = vpack.c.bf16 %v4090_v40, %v4086_v22  ;;  %v4043_v22 = vld [vmem:[#allocation3] sm:$0xff]  ;;  %v4395_v40 = vld [vmem:[#allocation23] sm:$0xff] }
0x1179   :  { %v4430_v19 = vld [vmem:[#allocation23 + $0x118] sm:$0xff] }
0x1182   :  { %v11232_v59 = vpop.eup %11231 }
0x1183   :  { %v13281_v4 = vmul.f32 %v11232_v59, %v3863_v63  ;;  %v4094_v63 = vld [vmem:[#allocation21 + $0x158] sm:$0xff] }
0x1184   :  { %v4098_v59 = vld [vmem:[#allocation21 + $0x178] sm:$0xff] }
0x1185   :  { %3939 = vmatmul.mubr.f32.vlgmr.msra.gmra.mrb[30].mxu1 %v13281_v4  ;;  %4010 = vmatmul.mubr.f32.vlgmr.msra.gmra.mrb[54].mxu0 %v13281_v4 }
0x1186   :  { %9446 = vmatpush1.bf16.msra.mxu1 %v9445_v54  ;;  %9478 = vmatpush1.bf16.msra.mxu0 %v9477_v0  ;;  %v9461_v54 = vpack.c.bf16 %v4087_v3, %v4083_v44  ;;  %v9493_v0 = vpack.c.bf16 %v4089_v16, %v4085_v47  ;;  %v4397_v3 = vld [vmem:[#allocation23 + $0x10] sm:$0xff]  ;;  %v4408_v47 = vld [vmem:[#allocation23 + $0x68] sm:$0xff]  ;;  %v4406_v16 = vld [vmem:[#allocation23 + $0x58] sm:$0xff] }
0x1187   :  { %9448 = vmatprep.subr.bf16.mxu1 %v9447_v32  ;;  %9480 = vmatprep.subr.bf16.mxu0 %v9479_v60  ;;  %v9463_v32 = vpack.c.bf16 %v4096_v25, %v4092_v7  ;;  %v9495_v60 = vpack.c.bf16 %v4098_v59, %v4094_v63  ;;  %v4403_v25 = vld [vmem:[#allocation23 + $0x40] sm:$0xff]  ;;  %v4410_v59 = vld [vmem:[#allocation23 + $0x78] sm:$0xff] }
0x1188   :  { %4201 = vmatprep.mubr.f32.mxu1 %v13950_v1  ;;  %4314 = vmatprep.mubr.f32.mxu0 %v13950_v1  ;;  %v4407_v63 = vld [vmem:[#allocation23 + $0x60] sm:$0xff] }
0x118a   :  { %9450 = vmatpush1.bf16.msra.mxu1 %v9449_v48  ;;  %9482 = vmatpush1.bf16.msra.mxu0 %v9481_v37  ;;  %v9465_v48 = vpack.c.bf16 %v4095_v41, %v4091_v55  ;;  %v9497_v37 = vpack.c.bf16 %v4097_v43, %v4093_v57  ;;  %v4405_v55 = vld [vmem:[#allocation23 + $0x50] sm:$0xff]  ;;  %v4416_v57 = vld [vmem:[#allocation23 + $0xa8] sm:$0xff]  ;;  %v4414_v43 = vld [vmem:[#allocation23 + $0x98] sm:$0xff] }
0x118b   :  { %9452 = vmatprep.subr.bf16.mxu1 %v9451_v35  ;;  %9484 = vmatprep.subr.bf16.mxu0 %v9483_v53  ;;  %v9467_v35 = vpack.c.bf16 %v4104_v10, %v4100_v49  ;;  %v9499_v53 = vpack.c.bf16 %v4106_v9, %v4102_v52  ;;  %v4409_v41 = vld [vmem:[#allocation23 + $0x70] sm:$0xff]  ;;  %v4411_v10 = vld [vmem:[#allocation23 + $0x80] sm:$0xff]  ;;  %v4418_v9 = vld [vmem:[#allocation23 + $0xb8] sm:$0xff] }
0x118c   :  { %v4415_v52 = vld [vmem:[#allocation23 + $0xa0] sm:$0xff] }
0x118e   :  { %9454 = vmatpush1.bf16.msra.mxu1 %v9453_v39  ;;  %9486 = vmatpush1.bf16.msra.mxu0 %v9485_v51  ;;  %v9469_v39 = vpack.c.bf16 %v4103_v14, %v4099_v46  ;;  %v9501_v51 = vpack.c.bf16 %v4105_v34, %v4101_v21  ;;  %v4413_v46 = vld [vmem:[#allocation23 + $0x90] sm:$0xff]  ;;  %v4424_v21 = vld [vmem:[#allocation23 + $0xe8] sm:$0xff]  ;;  %v4422_v34 = vld [vmem:[#allocation23 + $0xd8] sm:$0xff] }
0x118f   :  { %9456 = vmatprep.subr.bf16.mxu1 %v9455_v20  ;;  %9488 = vmatprep.subr.bf16.mxu0 %v9487_v36  ;;  %v9503_v20 = vpack.c.bf16 %v4114_v27, %v4110_v61  ;;  %v4111_v36 = vld [vmem:[#allocation21 + $0x1e0] sm:$0xff]  ;;  %v4417_v14 = vld [vmem:[#allocation23 + $0xb0] sm:$0xff]  ;;  %v4426_v27 = vld [vmem:[#allocation23 + $0xf8] sm:$0xff] }
0x1190   :  { %v9473_v26 = vpack.c.bf16 %v4111_v36, %v4107_v56  ;;  %v4423_v61 = vld [vmem:[#allocation23 + $0xe0] sm:$0xff]  ;;  %v4421_v56 = vld [vmem:[#allocation23 + $0xd0] sm:$0xff]  ;;  %v4428_v36 = vld [vmem:[#allocation23 + $0x108] sm:$0xff] }
0x1192   :  { %9458 = vmatpush1.bf16.msra.mxu1 %v9457_v24  ;;  %9490 = vmatpush1.bf16.msra.mxu0 %v9489_v30  ;;  %v4399_v24 = vld [vmem:[#allocation23 + $0x20] sm:$0xff] }
0x1193   :  { %9460 = vmatprep.subr.bf16.mxu1 %v9459_v13  ;;  %9492 = vmatprep.subr.bf16.mxu0 %v9491_v42  ;;  %v13315_v30 = vpack.c.bf16 %v4399_v24, %v4395_v40  ;;  %v4401_v13 = vld [vmem:[#allocation23 + $0x30] sm:$0xff]  ;;  %v4404_v42 = vld [vmem:[#allocation23 + $0x48] sm:$0xff] }
0x1194   :  { %v13325_v7 = vpack.c.bf16 %v4408_v47, %v4404_v42  ;;  %v4429_v40 = vld [vmem:[#allocation23 + $0x110] sm:$0xff]  ;;  %v4438_v42 = vld [vmem:[#allocation23 + $0x158] sm:$0xff] }
0x1195   :  { %v4433_v24 = vld [vmem:[#allocation23 + $0x130] sm:$0xff] }
0x1196   :  { %9462 = vmatpush1.bf16.msra.mxu1 %v9461_v54  ;;  %9494 = vmatpush1.bf16.msra.mxu0 %v9493_v0  ;;  %v13327_v54 = vpack.c.bf16 %v4407_v63, %v4403_v25  ;;  %v13329_v0 = vpack.c.bf16 %v4410_v59, %v4406_v16  ;;  %v4435_v16 = vld [vmem:[#allocation23 + $0x140] sm:$0xff]  ;;  %v4442_v63 = vld [vmem:[#allocation23 + $0x178] sm:$0xff] }
0x1197   :  { %9464 = vmatprep.subr.bf16.mxu1 %v9463_v32  ;;  %9496 = vmatprep.subr.bf16.mxu0 %v9495_v60  ;;  %v13332_v32 = vpack.c.bf16 %v4409_v41, %v4405_v55  ;;  %v4412_v60 = vld [vmem:[#allocation23 + $0x88] sm:$0xff]  ;;  %v4439_v25 = vld [vmem:[#allocation23 + $0x160] sm:$0xff]  ;;  %v13377_v55 = vpack.c.bf16 %v4442_v63, %v4438_v42  ;;  %v4437_v41 = vld [vmem:[#allocation23 + $0x150] sm:$0xff] }
0x1198   :  { %v13337_v49 = vpack.c.bf16 %v4416_v57, %v4412_v60  ;;  %v13375_v59 = vpack.c.bf16 %v4439_v25, %v4435_v16  ;;  %v4441_v60 = vld [vmem:[#allocation23 + $0x170] sm:$0xff] }
0x1199   :  { %v13380_v57 = vpack.c.bf16 %v4441_v60, %v4437_v41 }
0x119a   :  { %9466 = vmatpush1.bf16.msra.mxu1 %v9465_v48  ;;  %9498 = vmatpush1.bf16.msra.mxu0 %v9497_v37  ;;  %v13339_v48 = vpack.c.bf16 %v4415_v52, %v4411_v10  ;;  %v13341_v37 = vpack.c.bf16 %v4418_v9, %v4414_v43  ;;  %v4444_v43 = vld [vmem:[#allocation23 + $0x188] sm:$0xff]  ;;  %v4446_v52 = vld [vmem:[#allocation23 + $0x198] sm:$0xff] }
0x119b   :  { %9468 = vmatprep.subr.bf16.mxu1 %v9467_v35  ;;  %9500 = vmatprep.subr.bf16.mxu0 %v9499_v53  ;;  %v13344_v35 = vpack.c.bf16 %v4417_v14, %v4413_v46  ;;  %v4420_v53 = vld [vmem:[#allocation23 + $0xc8] sm:$0xff]  ;;  %v4443_v46 = vld [vmem:[#allocation23 + $0x180] sm:$0xff] }
0x119c   :  { %v13349_v18 = vpack.c.bf16 %v4424_v21, %v4420_v53  ;;  %v4448_v10 = vld [vmem:[#allocation23 + $0x1a8] sm:$0xff]  ;;  %v4447_v14 = vld [vmem:[#allocation23 + $0x1a0] sm:$0xff]  ;;  %v4450_v53 = vld [vmem:[#allocation23 + $0x1b8] sm:$0xff] }
0x119d   :  { %v13385_v9 = vpack.c.bf16 %v4448_v10, %v4444_v43  ;;  %v13387_v21 = vpack.c.bf16 %v4447_v14, %v4443_v46 }
0x119e   :  { %9470 = vmatpush1.bf16.msra.mxu1 %v9469_v39  ;;  %9502 = vmatpush1.bf16.msra.mxu0 %v9501_v51  ;;  %v13351_v39 = vpack.c.bf16 %v4423_v61, %v4419_v11  ;;  %v13353_v51 = vpack.c.bf16 %v4426_v27, %v4422_v34  ;;  %v13389_v34 = vpack.c.bf16 %v4450_v53, %v4446_v52  ;;  %v4445_v11 = vld [vmem:[#allocation23 + $0x190] sm:$0xff] }
0x119f   :  { %9472 = vmatprep.subr.bf16.mxu1 %v9471_v15  ;;  %9504 = vmatprep.subr.bf16.mxu0 %v9503_v20  ;;  %v4425_v15 = vld [vmem:[#allocation23 + $0xf0] sm:$0xff] }
0x11a0   :  { %v13356_v20 = vpack.c.bf16 %v4425_v15, %v4421_v56  ;;  %v4449_v61 = vld [vmem:[#allocation23 + $0x1b0] sm:$0xff]  ;;  %v4452_v56 = vld [vmem:[#allocation23 + $0x1c8] sm:$0xff] }
0x11a1   :  { %v13392_v27 = vpack.c.bf16 %v4449_v61, %v4445_v11  ;;  %v4456_v15 = vld [vmem:[#allocation23 + $0x1e8] sm:$0xff] }
0x11a2   :  { %9474 = vmatpush1.bf16.msra.mxu1 %v9473_v26  ;;  %9506 = vmatpush1.bf16.msra.mxu0 %v9505_v23  ;;  %v13361_v26 = vpack.c.bf16 %v4432_v8, %v4428_v36  ;;  %v4427_v23 = vld [vmem:[#allocation23 + $0x100] sm:$0xff]  ;;  %v4454_v36 = vld [vmem:[#allocation23 + $0x1d8] sm:$0xff]  ;;  %v13397_v8 = vpack.c.bf16 %v4456_v15, %v4452_v56 }
0x11a5   :  { %4202 = vmatmul.mubr.f32.vlgmr.msra.gmra.mrb[32].mxu1 %v4043_v22  ;;  %4315 = vmatmul.mubr.f32.vlgmr.msra.gmra.mrb[56].mxu0 %v4043_v22  ;;  %v4431_v22 = vld [vmem:[#allocation23 + $0x120] sm:$0xff] }
0x11a6   :  { %4207 = vmatprep.mubr.f32.mxu1 %v13950_v1  ;;  %4320 = vmatprep.mubr.f32.mxu0 %v13950_v1 }
0x11a9   :  { %4208 = vmatmul.mubr.f32.gmra.mrb[34].mxu1 %v13053_v31  ;;  %4321 = vmatmul.mubr.f32.gmra.mrb[58].mxu0 %v13053_v31  ;;  %v4396_v31 = vld [vmem:[#allocation23 + $0x8] sm:$0xff] }
0x11aa   :  { %4213 = vmatprep.mubr.f32.mxu1 %v13950_v1  ;;  %4326 = vmatprep.mubr.f32.mxu0 %v13950_v1 }
0x11ad   :  { %4214 = vmatmul.mubr.f32.gmra.mrb[36].mxu1 %v13099_v17  ;;  %4327 = vmatmul.mubr.f32.gmra.mrb[60].mxu0 %v13099_v17  ;;  %v4400_v17 = vld [vmem:[#allocation23 + $0x28] sm:$0xff] }
0x11ae   :  { %4219 = vmatprep.mubr.f32.mxu1 %v13950_v1  ;;  %4332 = vmatprep.mubr.f32.mxu0 %v13950_v1 }
0x11b1   :  { %4220 = vmatmul.mubr.f32.gmra.mrb[38].mxu1 %v13145_v29  ;;  %4333 = vmatmul.mubr.f32.gmra.mrb[62].mxu0 %v13145_v29  ;;  %v4398_v29 = vld [vmem:[#allocation23 + $0x18] sm:$0xff] }
0x11b2   :  { %4225 = vmatprep.mubr.f32.mxu1 %v13950_v1  ;;  %4338 = vmatprep.mubr.f32.mxu0 %v13950_v1 }
0x11b5   :  { %4226 = vmatmul.mubr.f32.gmra.mrb[40].mxu1 %v13191_v62  ;;  %4339 = vmatmul.mubr.f32.gmra.mrb[64].mxu0 %v13191_v62  ;;  %v13313_v62 = vpack.c.bf16 %v4400_v17, %v4396_v31  ;;  %v4434_v31 = vld [vmem:[#allocation23 + $0x138] sm:$0xff]  ;;  %v13363_v17 = vpack.c.bf16 %v4431_v22, %v4427_v23  ;;  %v4455_v23 = vld [vmem:[#allocation23 + $0x1e0] sm:$0xff] }
0x11b6   :  { %4231 = vmatprep.mubr.f32.mxu1 %v13950_v1  ;;  %4344 = vmatprep.mubr.f32.mxu0 %v13950_v1  ;;  %v4458_v22 = vld [vmem:[#allocation23 + $0x1f8] sm:$0xff] }
0x11b7   :  { %9508 = vmatprep.subr.bf16.mxu1 %v13313_v62 }
0x11b8   :  { %9510 = vmatpush1.bf16.msra.mxu1 %v13315_v30 }
0x11b9   :  { %4232 = vmatmul.mubr.f32.gmra.mrb[42].mxu1 %v13237_v6  ;;  %4345 = vmatmul.mubr.f32.gmra.mrb[66].mxu0 %v13237_v6  ;;  %v4402_v6 = vld [vmem:[#allocation23 + $0x38] sm:$0xff] }
0x11ba   :  { %4237 = vmatprep.mubr.f32.mxu1 %v13950_v1  ;;  %4350 = vmatprep.mubr.f32.mxu0 %v13950_v1  ;;  %v13317_v44 = vpack.c.bf16 %v4402_v6, %v4398_v29  ;;  %v13365_v29 = vpack.c.bf16 %v4434_v31, %v4430_v19  ;;  %v13368_v6 = vpack.c.bf16 %v4433_v24, %v4429_v40  ;;  %v4451_v19 = vld [vmem:[#allocation23 + $0x1c0] sm:$0xff]  ;;  %v4453_v24 = vld [vmem:[#allocation23 + $0x1d0] sm:$0xff] }
0x11bb   :  { %9512 = vmatprep.subr.bf16.mxu1 %v13325_v7  ;;  %v13399_v31 = vpack.c.bf16 %v4455_v23, %v4451_v19  ;;  %v13401_v40 = vpack.c.bf16 %v4458_v22, %v4454_v36 }
0x11bc   :  { %9540 = vmatprep.subr.bf16.mxu0 %v13317_v44  ;;  %9514 = vmatpush1.bf16.msra.mxu1 %v13327_v54 }
0x11bd   :  { %4238 = vmatmul.mubr.f32.gmra.mrb[44].mxu1 %v13281_v4  ;;  %4351 = vmatmul.mubr.f32.gmra.mrb[68].mxu0 %v13281_v4  ;;  %v13320_v4 = vpack.c.bf16 %v4401_v13, %v4397_v3  ;;  %v4436_v3 = vld [vmem:[#allocation23 + $0x148] sm:$0xff] }
0x11be   :  { %4243 = vmatprep.mubr.f32.mxu1 %v13950_v1  ;;  %4356 = vmatprep.mubr.f32.mxu0 %v13950_v1  ;;  %v4440_v13 = vld [vmem:[#allocation23 + $0x168] sm:$0xff] }
0x11bf   :  { %9542 = vmatpush1.bf16.msra.mxu0 %v13320_v4  ;;  %9516 = vmatprep.subr.bf16.mxu1 %v13337_v49  ;;  %v13373_v47 = vpack.c.bf16 %v4440_v13, %v4436_v3  ;;  %v4457_v3 = vld [vmem:[#allocation23 + $0x1f0] sm:$0xff] }
0x11c0   :  { %9544 = vmatprep.subr.bf16.mxu0 %v13329_v0  ;;  %9518 = vmatpush1.bf16.msra.mxu1 %v13339_v48  ;;  %v13404_v13 = vpack.c.bf16 %v4457_v3, %v4453_v24 }
0x11c1   :  { %9520 = vmatprep.subr.bf16.mxu1 %v13349_v18 }
0x11c3   :  { %9546 = vmatpush1.bf16.msra.mxu0 %v13332_v32 }
0x11c4   :  { %9548 = vmatprep.subr.bf16.mxu0 %v13341_v37  ;;  %9522 = vmatpush1.bf16.msra.mxu1 %v13351_v39 }
0x11c5   :  { %9524 = vmatprep.subr.bf16.mxu1 %v13361_v26 }
0x11c7   :  { %9550 = vmatpush1.bf16.msra.mxu0 %v13344_v35 }
0x11c8   :  { %9552 = vmatprep.subr.bf16.mxu0 %v13353_v51  ;;  %9526 = vmatpush1.bf16.msra.mxu1 %v13363_v17 }
0x11c9   :  { %9528 = vmatprep.subr.bf16.mxu1 %v13373_v47 }
0x11cb   :  { %9554 = vmatpush1.bf16.msra.mxu0 %v13356_v20 }
0x11cc   :  { %9556 = vmatprep.subr.bf16.mxu0 %v13365_v29  ;;  %9530 = vmatpush1.bf16.msra.mxu1 %v13375_v59 }
0x11cd   :  { %9532 = vmatprep.subr.bf16.mxu1 %v13385_v9 }
0x11cf   :  { %9558 = vmatpush1.bf16.msra.mxu0 %v13368_v6 }
0x11d0   :  { %9560 = vmatprep.subr.bf16.mxu0 %v13377_v55  ;;  %9534 = vmatpush1.bf16.msra.mxu1 %v13387_v21 }
0x11d1   :  { %9536 = vmatprep.subr.bf16.mxu1 %v13397_v8 }
0x11d3   :  { %9562 = vmatpush1.bf16.msra.mxu0 %v13380_v57 }
0x11d4   :  { %9564 = vmatprep.subr.bf16.mxu0 %v13389_v34  ;;  %9538 = vmatpush1.bf16.msra.mxu1 %v13399_v31 }
0x11d5   :  { %9572 = vmatprep.subr.bf16.mxu1 %v13313_v62 }
0x11d7   :  { %9566 = vmatpush1.bf16.msra.mxu0 %v13392_v27 }
0x11d8   :  { %9568 = vmatprep.subr.bf16.mxu0 %v13401_v40 }
0x11db   :  { %9570 = vmatpush1.bf16.msra.mxu0 %v13404_v13 }
0x11dc   :  { %9604 = vmatprep.subr.bf16.mxu0 %v13317_v44 }
0x1258   :  { %v3940_v42 = vpop.f32.mrb[30].mxu1  ;;  %v4011_v16 = vpop.f32.mrb[54].mxu0 }
0x1259   :  { %v10905_v25 = vadd.f32 %v3940_v42, %v12993_v38  ;;  %v3942_v63 = vpop.f32.mrb[31].mxu1  ;;  %v4013_v41 = vpop.f32.mrb[55].mxu0  ;;  %v10921_v52 = vadd.f32 %v4011_v16, %v13000_v58 }
0x125a   :  { %v10906_v60 = vadd.f32 %v3942_v63, %v12996_v50  ;;  %v10922_v46 = vadd.f32 %v4013_v41, %v13005_v5 }
0x125b   :  { %v4020_v43 = vmul.f32 0.5, %v10905_v25 }
0x125c   :  { %v4024_v10 = vmul.f32 0.5, %v10906_v60  ;;  %v4029_v14 = vmul.f32 0.5, %v10922_v46 }
0x125d   :  { %11233 = vtanh.f32 %v4020_v43 }
0x125e   :  { %11235 = vtanh.f32 %v4024_v10 }
0x125f   :  { %11237 = vtanh.f32 %v10921_v52 }
0x1260   :  { %11239 = vtanh.f32 %v4029_v14 }
0x1267   :  { %v11234_v53 = vpop.eup %11233 }
0x1268   :  { %v11236_v11 = vpop.eup %11235  ;;  %v4022_v61 = vmul.f32 0.5, %v11234_v53 }
0x1269   :  { %v4026_v56 = vmul.f32 0.5, %v11236_v11  ;;  %v11238_v15 = vpop.eup %11237 }
0x126a   :  { %v4023_v38 = vadd.f32 0.5, %v4022_v61  ;;  %v11240_v58 = vpop.eup %11239 }
0x126b   :  { %v4027_v36 = vadd.f32 0.5, %v4026_v56  ;;  %v4031_v22 = vmul.f32 0.5, %v11240_v58 }
0x126c   :  { %v4034_v19 = vmul.f32 %v11238_v15, %v4023_v38 }
0x126d   :  { %v4033_v50 = vmul.f32 %v4027_v36, %v13278_v2  ;;  %v4032_v24 = vadd.f32 0.5, %v4031_v22  ;;  %v4115_v2 = vld [vmem:[#allocation24] sm:$0xf] }
0x126e   :  { %v13455_v42 = vrot.slane %v4115_v2, %v13954_v33  ;;  %v13458_v16 = vrot.slane %v4115_v2, %v13955_v45  ;;  %v13462_v60 = vrot.slane %v4115_v2, %v13956_v12  ;;  %v13467_v11 = vrot.slane %v4115_v2, %v13957_v28 }
0x126f   :  { %v4035_v23 = vadd.f32 %v4034_v19, %v4033_v50 }
0x1271   :  { %11241 = vtanh.f32 %v4035_v23  ;;  %4042 = vst [vmem:[#allocation38 + $0x8] sm:$0xff] %v4035_v23 }
0x127b   :  { %v11242_v3 = vpop.eup %11241 }
0x127c   :  { %v4037_v5 = vmul.f32 %v11242_v3, %v4032_v24 }
0x127e   :  { %4040 = vst [vmem:[#allocation36 + $0x8] sm:$0xff] %v4037_v5  ;;  %4244 = vmatmul.mubr.f32.gmra.mrb[46].mxu1 %v4037_v5  ;;  %4357 = vmatmul.mubr.f32.gmra.mrb[70].mxu0 %v4037_v5 }
0x127f   :  { %4527 = vmatprep.mubr.f32.mxu1 %v13950_v1  ;;  %4598 = vmatprep.mubr.f32.mxu0 %v13950_v1 }
0x1282   :  { %4528 = vmatmul.mubr.f32.vlgmr.msra.gmra.mrb[32].mxu1 %v13950_v1  ;;  %4599 = vmatmul.mubr.f32.vlgmr.msra.gmra.mrb[56].mxu0 %v13950_v1 }
0x1283   :  { %9574 = vmatpush1.bf16.msra.mxu1 %v13315_v30  ;;  %9606 = vmatpush1.bf16.msra.mxu0 %v13320_v4 }
0x1284   :  { %9576 = vmatprep.subr.bf16.mxu1 %v13325_v7  ;;  %9608 = vmatprep.subr.bf16.mxu0 %v13329_v0 }
0x1285   :  { %4696 = vmatprep.mubr.f32.mxu1 %v13950_v1  ;;  %4767 = vmatprep.mubr.f32.mxu0 %v13950_v1 }
0x1287   :  { %9578 = vmatpush1.bf16.msra.mxu1 %v13327_v54  ;;  %9610 = vmatpush1.bf16.msra.mxu0 %v13332_v32 }
0x1288   :  { %9580 = vmatprep.subr.bf16.mxu1 %v13337_v49  ;;  %9612 = vmatprep.subr.bf16.mxu0 %v13341_v37 }
0x128b   :  { %9582 = vmatpush1.bf16.msra.mxu1 %v13339_v48  ;;  %9614 = vmatpush1.bf16.msra.mxu0 %v13344_v35 }
0x128c   :  { %9584 = vmatprep.subr.bf16.mxu1 %v13349_v18  ;;  %9616 = vmatprep.subr.bf16.mxu0 %v13353_v51 }
0x128f   :  { %9586 = vmatpush1.bf16.msra.mxu1 %v13351_v39  ;;  %9618 = vmatpush1.bf16.msra.mxu0 %v13356_v20 }
0x1290   :  { %9588 = vmatprep.subr.bf16.mxu1 %v13361_v26  ;;  %9620 = vmatprep.subr.bf16.mxu0 %v13365_v29 }
0x1293   :  { %9590 = vmatpush1.bf16.msra.mxu1 %v13363_v17  ;;  %9622 = vmatpush1.bf16.msra.mxu0 %v13368_v6 }
0x1294   :  { %9592 = vmatprep.subr.bf16.mxu1 %v13373_v47  ;;  %9624 = vmatprep.subr.bf16.mxu0 %v13377_v55 }
0x1297   :  { %9594 = vmatpush1.bf16.msra.mxu1 %v13375_v59  ;;  %9626 = vmatpush1.bf16.msra.mxu0 %v13380_v57 }
0x1298   :  { %9596 = vmatprep.subr.bf16.mxu1 %v13385_v9  ;;  %9628 = vmatprep.subr.bf16.mxu0 %v13389_v34 }
0x129b   :  { %9598 = vmatpush1.bf16.msra.mxu1 %v13387_v21  ;;  %9630 = vmatpush1.bf16.msra.mxu0 %v13392_v27 }
0x129c   :  { %9600 = vmatprep.subr.bf16.mxu1 %v13397_v8  ;;  %9632 = vmatprep.subr.bf16.mxu0 %v13401_v40 }
0x129f   :  { %9602 = vmatpush1.bf16.msra.mxu1 %v13399_v31  ;;  %9634 = vmatpush1.bf16.msra.mxu0 %v13404_v13 }
0x12a0   :  { %9636 = vmatprep.subr.bf16.mxu1 %v13313_v62  ;;  %9668 = vmatprep.subr.bf16.mxu0 %v13317_v44 }
0x1355   :  { %v4529_v25 = vpop.f32.mrb[32].mxu1  ;;  %v4600_v63 = vpop.f32.mrb[56].mxu0 }
0x1356   :  { %v10923_v41 = vadd.f32 %v4529_v25, %v13455_v42  ;;  %v4531_v43 = vpop.f32.mrb[33].mxu1  ;;  %v4602_v10 = vpop.f32.mrb[57].mxu0  ;;  %v10939_v53 = vadd.f32 %v4600_v63, %v13462_v60 }
0x1357   :  { %v10924_v52 = vadd.f32 %v4531_v43, %v13458_v16  ;;  %v10940_v61 = vadd.f32 %v4602_v10, %v13467_v11 }
0x1358   :  { %v4609_v46 = vmul.f32 0.5, %v10923_v41 }
0x1359   :  { %v4613_v14 = vmul.f32 0.5, %v10924_v52  ;;  %v4618_v56 = vmul.f32 0.5, %v10940_v61 }
0x135a   :  { %11243 = vtanh.f32 %v4609_v46 }
0x135b   :  { %11245 = vtanh.f32 %v4613_v14 }
0x135c   :  { %11247 = vtanh.f32 %v10939_v53 }
0x135d   :  { %11249 = vtanh.f32 %v4618_v56 }
0x1364   :  { %v11244_v38 = vpop.eup %11243 }
0x1365   :  { %v11246_v15 = vpop.eup %11245  ;;  %v4611_v36 = vmul.f32 0.5, %v11244_v38 }
0x1366   :  { %v4615_v19 = vmul.f32 0.5, %v11246_v15  ;;  %v11248_v23 = vpop.eup %11247 }
0x1367   :  { %v4612_v50 = vadd.f32 0.5, %v4611_v36  ;;  %v11250_v5 = vpop.eup %11249 }
0x1368   :  { %v4616_v58 = vadd.f32 0.5, %v4615_v19  ;;  %v4620_v2 = vmul.f32 0.5, %v11250_v5 }
0x1369   :  { %v4623_v22 = vmul.f32 %v11248_v23, %v4612_v50 }
0x136a   :  { %v4622_v24 = vmul.f32 0.0, %v4616_v58  ;;  %v4621_v25 = vadd.f32 0.5, %v4620_v2 }
0x136c   :  { %v13470_v3 = vadd.f32 %v4623_v22, %v4622_v24 }
0x136e   :  { %11251 = vtanh.f32 %v13470_v3 }
0x1378   :  { %v11252_v63 = vpop.eup %11251 }
0x1379   :  { %v4626_v41 = vmul.f32 %v11252_v63, %v4621_v25 }
0x137b   :  { %4627 = vst [vmem:[#allocation3] sm:$0xff] %v4626_v41  ;;  %4697 = vmatmul.mubr.f32.vlgmr.msra.gmra.mrb[34].mxu1 %v4626_v41  ;;  %4768 = vmatmul.mubr.f32.vlgmr.msra.gmra.mrb[58].mxu0 %v4626_v41 }
0x137c   :  { %9638 = vmatpush1.bf16.msra.mxu1 %v13315_v30  ;;  %9670 = vmatpush1.bf16.msra.mxu0 %v13320_v4 }
0x137d   :  { %9640 = vmatprep.subr.bf16.mxu1 %v13325_v7  ;;  %9672 = vmatprep.subr.bf16.mxu0 %v13329_v0 }
0x137e   :  { %4865 = vmatprep.mubr.f32.mxu1 %v13950_v1  ;;  %4936 = vmatprep.mubr.f32.mxu0 %v13950_v1 }
0x1380   :  { %9642 = vmatpush1.bf16.msra.mxu1 %v13327_v54  ;;  %9674 = vmatpush1.bf16.msra.mxu0 %v13332_v32 }
0x1381   :  { %9644 = vmatprep.subr.bf16.mxu1 %v13337_v49  ;;  %9676 = vmatprep.subr.bf16.mxu0 %v13341_v37 }
0x1384   :  { %9646 = vmatpush1.bf16.msra.mxu1 %v13339_v48  ;;  %9678 = vmatpush1.bf16.msra.mxu0 %v13344_v35 }
0x1385   :  { %9648 = vmatprep.subr.bf16.mxu1 %v13349_v18  ;;  %9680 = vmatprep.subr.bf16.mxu0 %v13353_v51 }
0x1388   :  { %9650 = vmatpush1.bf16.msra.mxu1 %v13351_v39  ;;  %9682 = vmatpush1.bf16.msra.mxu0 %v13356_v20 }
0x1389   :  { %9652 = vmatprep.subr.bf16.mxu1 %v13361_v26  ;;  %9684 = vmatprep.subr.bf16.mxu0 %v13365_v29 }
0x138c   :  { %9654 = vmatpush1.bf16.msra.mxu1 %v13363_v17  ;;  %9686 = vmatpush1.bf16.msra.mxu0 %v13368_v6 }
0x138d   :  { %9656 = vmatprep.subr.bf16.mxu1 %v13373_v47  ;;  %9688 = vmatprep.subr.bf16.mxu0 %v13377_v55 }
0x1390   :  { %9658 = vmatpush1.bf16.msra.mxu1 %v13375_v59  ;;  %9690 = vmatpush1.bf16.msra.mxu0 %v13380_v57 }
0x1391   :  { %9660 = vmatprep.subr.bf16.mxu1 %v13385_v9  ;;  %9692 = vmatprep.subr.bf16.mxu0 %v13389_v34 }
0x1394   :  { %9662 = vmatpush1.bf16.msra.mxu1 %v13387_v21  ;;  %9694 = vmatpush1.bf16.msra.mxu0 %v13392_v27 }
0x1395   :  { %9664 = vmatprep.subr.bf16.mxu1 %v13397_v8  ;;  %9696 = vmatprep.subr.bf16.mxu0 %v13401_v40 }
0x1398   :  { %9666 = vmatpush1.bf16.msra.mxu1 %v13399_v31  ;;  %9698 = vmatpush1.bf16.msra.mxu0 %v13404_v13 }
0x1399   :  { %9700 = vmatprep.subr.bf16.mxu1 %v13313_v62  ;;  %9732 = vmatprep.subr.bf16.mxu0 %v13317_v44 }
0x144e   :  { %v4698_v43 = vpop.f32.mrb[34].mxu1  ;;  %v4769_v10 = vpop.f32.mrb[58].mxu0 }
0x144f   :  { %v10925_v52 = vadd.f32 %v4698_v43, %v13455_v42  ;;  %v4700_v46 = vpop.f32.mrb[35].mxu1  ;;  %v4771_v14 = vpop.f32.mrb[59].mxu0  ;;  %v10941_v38 = vadd.f32 %v4769_v10, %v13462_v60 }
0x1450   :  { %v10926_v53 = vadd.f32 %v4700_v46, %v13458_v16  ;;  %v10942_v15 = vadd.f32 %v4771_v14, %v13467_v11 }
0x1451   :  { %v4778_v61 = vmul.f32 0.5, %v10925_v52 }
0x1452   :  { %v4782_v56 = vmul.f32 0.5, %v10926_v53  ;;  %v4787_v36 = vmul.f32 0.5, %v10942_v15 }
0x1453   :  { %11253 = vtanh.f32 %v4778_v61 }
0x1454   :  { %11255 = vtanh.f32 %v4782_v56 }
0x1455   :  { %11257 = vtanh.f32 %v10941_v38 }
0x1456   :  { %11259 = vtanh.f32 %v4787_v36 }
0x145d   :  { %v11254_v19 = vpop.eup %11253 }
0x145e   :  { %v11256_v50 = vpop.eup %11255  ;;  %v4780_v23 = vmul.f32 0.5, %v11254_v19 }
0x145f   :  { %v4784_v58 = vmul.f32 0.5, %v11256_v50  ;;  %v11258_v24 = vpop.eup %11257 }
0x1460   :  { %v4781_v22 = vadd.f32 0.5, %v4780_v23  ;;  %v11260_v41 = vpop.eup %11259 }
0x1461   :  { %v4785_v5 = vadd.f32 0.5, %v4784_v58  ;;  %v4789_v43 = vmul.f32 0.5, %v11260_v41 }
0x1462   :  { %v4792_v2 = vmul.f32 %v11258_v24, %v4781_v22 }
0x1463   :  { %v4791_v25 = vmul.f32 %v4785_v5, %v13470_v3  ;;  %v4790_v10 = vadd.f32 0.5, %v4789_v43 }
0x1465   :  { %v13512_v63 = vadd.f32 %v4792_v2, %v4791_v25 }
0x1467   :  { %11261 = vtanh.f32 %v13512_v63 }
0x1471   :  { %v11262_v52 = vpop.eup %11261 }
0x1472   :  { %v4795_v46 = vmul.f32 %v11262_v52, %v4790_v10 }
0x1474   :  { %4796 = vst [vmem:[#allocation3 + $0x8] sm:$0xff] %v4795_v46  ;;  %4866 = vmatmul.mubr.f32.vlgmr.msra.gmra.mrb[36].mxu1 %v4795_v46  ;;  %4937 = vmatmul.mubr.f32.vlgmr.msra.gmra.mrb[60].mxu0 %v4795_v46 }
0x1475   :  { %9702 = vmatpush1.bf16.msra.mxu1 %v13315_v30  ;;  %9734 = vmatpush1.bf16.msra.mxu0 %v13320_v4 }
0x1476   :  { %9704 = vmatprep.subr.bf16.mxu1 %v13325_v7  ;;  %9736 = vmatprep.subr.bf16.mxu0 %v13329_v0 }
0x1477   :  { %5034 = vmatprep.mubr.f32.mxu1 %v13950_v1  ;;  %5105 = vmatprep.mubr.f32.mxu0 %v13950_v1 }
0x1479   :  { %9706 = vmatpush1.bf16.msra.mxu1 %v13327_v54  ;;  %9738 = vmatpush1.bf16.msra.mxu0 %v13332_v32 }
0x147a   :  { %9708 = vmatprep.subr.bf16.mxu1 %v13337_v49  ;;  %9740 = vmatprep.subr.bf16.mxu0 %v13341_v37 }
0x147d   :  { %9710 = vmatpush1.bf16.msra.mxu1 %v13339_v48  ;;  %9742 = vmatpush1.bf16.msra.mxu0 %v13344_v35 }
0x147e   :  { %9712 = vmatprep.subr.bf16.mxu1 %v13349_v18  ;;  %9744 = vmatprep.subr.bf16.mxu0 %v13353_v51 }
0x1481   :  { %9714 = vmatpush1.bf16.msra.mxu1 %v13351_v39  ;;  %9746 = vmatpush1.bf16.msra.mxu0 %v13356_v20 }
0x1482   :  { %9716 = vmatprep.subr.bf16.mxu1 %v13361_v26  ;;  %9748 = vmatprep.subr.bf16.mxu0 %v13365_v29 }
0x1485   :  { %9718 = vmatpush1.bf16.msra.mxu1 %v13363_v17  ;;  %9750 = vmatpush1.bf16.msra.mxu0 %v13368_v6 }
0x1486   :  { %9720 = vmatprep.subr.bf16.mxu1 %v13373_v47  ;;  %9752 = vmatprep.subr.bf16.mxu0 %v13377_v55 }
0x1489   :  { %9722 = vmatpush1.bf16.msra.mxu1 %v13375_v59  ;;  %9754 = vmatpush1.bf16.msra.mxu0 %v13380_v57 }
0x148a   :  { %9724 = vmatprep.subr.bf16.mxu1 %v13385_v9  ;;  %9756 = vmatprep.subr.bf16.mxu0 %v13389_v34 }
0x148d   :  { %9726 = vmatpush1.bf16.msra.mxu1 %v13387_v21  ;;  %9758 = vmatpush1.bf16.msra.mxu0 %v13392_v27 }
0x148e   :  { %9728 = vmatprep.subr.bf16.mxu1 %v13397_v8  ;;  %9760 = vmatprep.subr.bf16.mxu0 %v13401_v40 }
0x1491   :  { %9730 = vmatpush1.bf16.msra.mxu1 %v13399_v31  ;;  %9762 = vmatpush1.bf16.msra.mxu0 %v13404_v13 }
0x1492   :  { %9764 = vmatprep.subr.bf16.mxu1 %v13313_v62  ;;  %9796 = vmatprep.subr.bf16.mxu0 %v13317_v44 }
0x1547   :  { %v4867_v3 = vpop.f32.mrb[36].mxu1  ;;  %v4938_v14 = vpop.f32.mrb[60].mxu0 }
0x1548   :  { %v10927_v53 = vadd.f32 %v4867_v3, %v13455_v42  ;;  %v4869_v61 = vpop.f32.mrb[37].mxu1  ;;  %v4940_v56 = vpop.f32.mrb[61].mxu0  ;;  %v10943_v19 = vadd.f32 %v4938_v14, %v13462_v60 }
0x1549   :  { %v10928_v38 = vadd.f32 %v4869_v61, %v13458_v16  ;;  %v10944_v50 = vadd.f32 %v4940_v56, %v13467_v11 }
0x154a   :  { %v4947_v15 = vmul.f32 0.5, %v10927_v53 }
0x154b   :  { %v4951_v36 = vmul.f32 0.5, %v10928_v38  ;;  %v4956_v23 = vmul.f32 0.5, %v10944_v50 }
0x154c   :  { %11263 = vtanh.f32 %v4947_v15 }
0x154d   :  { %11265 = vtanh.f32 %v4951_v36 }
0x154e   :  { %11267 = vtanh.f32 %v10943_v19 }
0x154f   :  { %11269 = vtanh.f32 %v4956_v23 }
0x1556   :  { %v11264_v58 = vpop.eup %11263 }
0x1557   :  { %v11266_v22 = vpop.eup %11265  ;;  %v4949_v24 = vmul.f32 0.5, %v11264_v58 }
0x1558   :  { %v4953_v5 = vmul.f32 0.5, %v11266_v22  ;;  %v11268_v25 = vpop.eup %11267 }
0x1559   :  { %v4950_v2 = vadd.f32 0.5, %v4949_v24  ;;  %v11270_v46 = vpop.eup %11269 }
0x155a   :  { %v4954_v41 = vadd.f32 0.5, %v4953_v5  ;;  %v4958_v3 = vmul.f32 0.5, %v11270_v46 }
0x155b   :  { %v4961_v43 = vmul.f32 %v11268_v25, %v4950_v2 }
0x155c   :  { %v4960_v10 = vmul.f32 %v4954_v41, %v13512_v63  ;;  %v4959_v14 = vadd.f32 0.5, %v4958_v3 }
0x155e   :  { %v13554_v52 = vadd.f32 %v4961_v43, %v4960_v10 }
0x1560   :  { %11271 = vtanh.f32 %v13554_v52 }
0x156a   :  { %v11272_v53 = vpop.eup %11271 }
0x156b   :  { %v4964_v61 = vmul.f32 %v11272_v53, %v4959_v14 }
0x156d   :  { %4965 = vst [vmem:[#allocation3 + $0x10] sm:$0xff] %v4964_v61  ;;  %5035 = vmatmul.mubr.f32.vlgmr.msra.gmra.mrb[38].mxu1 %v4964_v61  ;;  %5106 = vmatmul.mubr.f32.vlgmr.msra.gmra.mrb[62].mxu0 %v4964_v61 }
0x156e   :  { %9766 = vmatpush1.bf16.msra.mxu1 %v13315_v30  ;;  %9798 = vmatpush1.bf16.msra.mxu0 %v13320_v4 }
0x156f   :  { %9768 = vmatprep.subr.bf16.mxu1 %v13325_v7  ;;  %9800 = vmatprep.subr.bf16.mxu0 %v13329_v0 }
0x1570   :  { %5203 = vmatprep.mubr.f32.mxu1 %v13950_v1  ;;  %5274 = vmatprep.mubr.f32.mxu0 %v13950_v1 }
0x1572   :  { %9770 = vmatpush1.bf16.msra.mxu1 %v13327_v54  ;;  %9802 = vmatpush1.bf16.msra.mxu0 %v13332_v32 }
0x1573   :  { %9772 = vmatprep.subr.bf16.mxu1 %v13337_v49  ;;  %9804 = vmatprep.subr.bf16.mxu0 %v13341_v37 }
0x1576   :  { %9774 = vmatpush1.bf16.msra.mxu1 %v13339_v48  ;;  %9806 = vmatpush1.bf16.msra.mxu0 %v13344_v35 }
0x1577   :  { %9776 = vmatprep.subr.bf16.mxu1 %v13349_v18  ;;  %9808 = vmatprep.subr.bf16.mxu0 %v13353_v51 }
0x157a   :  { %9778 = vmatpush1.bf16.msra.mxu1 %v13351_v39  ;;  %9810 = vmatpush1.bf16.msra.mxu0 %v13356_v20 }
0x157b   :  { %9780 = vmatprep.subr.bf16.mxu1 %v13361_v26  ;;  %9812 = vmatprep.subr.bf16.mxu0 %v13365_v29 }
0x157e   :  { %9782 = vmatpush1.bf16.msra.mxu1 %v13363_v17  ;;  %9814 = vmatpush1.bf16.msra.mxu0 %v13368_v6 }
0x157f   :  { %9784 = vmatprep.subr.bf16.mxu1 %v13373_v47  ;;  %9816 = vmatprep.subr.bf16.mxu0 %v13377_v55 }
0x1582   :  { %9786 = vmatpush1.bf16.msra.mxu1 %v13375_v59  ;;  %9818 = vmatpush1.bf16.msra.mxu0 %v13380_v57 }
0x1583   :  { %9788 = vmatprep.subr.bf16.mxu1 %v13385_v9  ;;  %9820 = vmatprep.subr.bf16.mxu0 %v13389_v34 }
0x1586   :  { %9790 = vmatpush1.bf16.msra.mxu1 %v13387_v21  ;;  %9822 = vmatpush1.bf16.msra.mxu0 %v13392_v27 }
0x1587   :  { %9792 = vmatprep.subr.bf16.mxu1 %v13397_v8  ;;  %9824 = vmatprep.subr.bf16.mxu0 %v13401_v40 }
0x158a   :  { %9794 = vmatpush1.bf16.msra.mxu1 %v13399_v31  ;;  %9826 = vmatpush1.bf16.msra.mxu0 %v13404_v13 }
0x158b   :  { %9828 = vmatprep.subr.bf16.mxu1 %v13313_v62  ;;  %9860 = vmatprep.subr.bf16.mxu0 %v13317_v44 }
0x1640   :  { %v5036_v63 = vpop.f32.mrb[38].mxu1  ;;  %v5107_v56 = vpop.f32.mrb[62].mxu0 }
0x1641   :  { %v10929_v38 = vadd.f32 %v5036_v63, %v13455_v42  ;;  %v5038_v15 = vpop.f32.mrb[39].mxu1  ;;  %v5109_v36 = vpop.f32.mrb[63].mxu0  ;;  %v10945_v58 = vadd.f32 %v5107_v56, %v13462_v60 }
0x1642   :  { %v10930_v19 = vadd.f32 %v5038_v15, %v13458_v16  ;;  %v10946_v22 = vadd.f32 %v5109_v36, %v13467_v11 }
0x1643   :  { %v5116_v50 = vmul.f32 0.5, %v10929_v38 }
0x1644   :  { %v5120_v23 = vmul.f32 0.5, %v10930_v19  ;;  %v5125_v24 = vmul.f32 0.5, %v10946_v22 }
0x1645   :  { %11273 = vtanh.f32 %v5116_v50 }
0x1646   :  { %11275 = vtanh.f32 %v5120_v23 }
0x1647   :  { %11277 = vtanh.f32 %v10945_v58 }
0x1648   :  { %11279 = vtanh.f32 %v5125_v24 }
0x164f   :  { %v11274_v5 = vpop.eup %11273 }
0x1650   :  { %v11276_v2 = vpop.eup %11275  ;;  %v5118_v25 = vmul.f32 0.5, %v11274_v5 }
0x1651   :  { %v5122_v41 = vmul.f32 0.5, %v11276_v2  ;;  %v11278_v10 = vpop.eup %11277 }
0x1652   :  { %v5119_v43 = vadd.f32 0.5, %v5118_v25  ;;  %v11280_v61 = vpop.eup %11279 }
0x1653   :  { %v5123_v46 = vadd.f32 0.5, %v5122_v41  ;;  %v5127_v63 = vmul.f32 0.5, %v11280_v61 }
0x1654   :  { %v5130_v3 = vmul.f32 %v11278_v10, %v5119_v43 }
0x1655   :  { %v5129_v14 = vmul.f32 %v5123_v46, %v13554_v52  ;;  %v5128_v56 = vadd.f32 0.5, %v5127_v63 }
0x1657   :  { %v13596_v53 = vadd.f32 %v5130_v3, %v5129_v14 }
0x1659   :  { %11281 = vtanh.f32 %v13596_v53 }
0x1663   :  { %v11282_v38 = vpop.eup %11281 }
0x1664   :  { %v5133_v15 = vmul.f32 %v11282_v38, %v5128_v56 }
0x1666   :  { %5134 = vst [vmem:[#allocation3 + $0x18] sm:$0xff] %v5133_v15  ;;  %5204 = vmatmul.mubr.f32.vlgmr.msra.gmra.mrb[40].mxu1 %v5133_v15  ;;  %5275 = vmatmul.mubr.f32.vlgmr.msra.gmra.mrb[64].mxu0 %v5133_v15 }
0x1667   :  { %9830 = vmatpush1.bf16.msra.mxu1 %v13315_v30  ;;  %9862 = vmatpush1.bf16.msra.mxu0 %v13320_v4 }
0x1668   :  { %9832 = vmatprep.subr.bf16.mxu1 %v13325_v7  ;;  %9864 = vmatprep.subr.bf16.mxu0 %v13329_v0 }
0x1669   :  { %5372 = vmatprep.mubr.f32.mxu1 %v13950_v1  ;;  %5443 = vmatprep.mubr.f32.mxu0 %v13950_v1 }
0x166b   :  { %9834 = vmatpush1.bf16.msra.mxu1 %v13327_v54  ;;  %9866 = vmatpush1.bf16.msra.mxu0 %v13332_v32 }
0x166c   :  { %9836 = vmatprep.subr.bf16.mxu1 %v13337_v49  ;;  %9868 = vmatprep.subr.bf16.mxu0 %v13341_v37 }
0x166f   :  { %9838 = vmatpush1.bf16.msra.mxu1 %v13339_v48  ;;  %9870 = vmatpush1.bf16.msra.mxu0 %v13344_v35 }
0x1670   :  { %9840 = vmatprep.subr.bf16.mxu1 %v13349_v18  ;;  %9872 = vmatprep.subr.bf16.mxu0 %v13353_v51 }
0x1673   :  { %9842 = vmatpush1.bf16.msra.mxu1 %v13351_v39  ;;  %9874 = vmatpush1.bf16.msra.mxu0 %v13356_v20 }
0x1674   :  { %9844 = vmatprep.subr.bf16.mxu1 %v13361_v26  ;;  %9876 = vmatprep.subr.bf16.mxu0 %v13365_v29 }
0x1677   :  { %9846 = vmatpush1.bf16.msra.mxu1 %v13363_v17  ;;  %9878 = vmatpush1.bf16.msra.mxu0 %v13368_v6 }
0x1678   :  { %9848 = vmatprep.subr.bf16.mxu1 %v13373_v47  ;;  %9880 = vmatprep.subr.bf16.mxu0 %v13377_v55 }
0x167b   :  { %9850 = vmatpush1.bf16.msra.mxu1 %v13375_v59  ;;  %9882 = vmatpush1.bf16.msra.mxu0 %v13380_v57 }
0x167c   :  { %9852 = vmatprep.subr.bf16.mxu1 %v13385_v9  ;;  %9884 = vmatprep.subr.bf16.mxu0 %v13389_v34 }
0x167f   :  { %9854 = vmatpush1.bf16.msra.mxu1 %v13387_v21  ;;  %9886 = vmatpush1.bf16.msra.mxu0 %v13392_v27 }
0x1680   :  { %9856 = vmatprep.subr.bf16.mxu1 %v13397_v8  ;;  %9888 = vmatprep.subr.bf16.mxu0 %v13401_v40 }
0x1683   :  { %9858 = vmatpush1.bf16.msra.mxu1 %v13399_v31  ;;  %9890 = vmatpush1.bf16.msra.mxu0 %v13404_v13 }
0x1684   :  { %9892 = vmatprep.subr.bf16.mxu1 %v13313_v62  ;;  %9924 = vmatprep.subr.bf16.mxu0 %v13317_v44 }
0x1739   :  { %v5205_v52 = vpop.f32.mrb[40].mxu1  ;;  %v5276_v36 = vpop.f32.mrb[64].mxu0 }
0x173a   :  { %v10931_v19 = vadd.f32 %v5205_v52, %v13455_v42  ;;  %v5207_v50 = vpop.f32.mrb[41].mxu1  ;;  %v5278_v23 = vpop.f32.mrb[65].mxu0  ;;  %v10947_v5 = vadd.f32 %v5276_v36, %v13462_v60 }
0x173b   :  { %v10932_v58 = vadd.f32 %v5207_v50, %v13458_v16  ;;  %v10948_v2 = vadd.f32 %v5278_v23, %v13467_v11 }
0x173c   :  { %v5285_v22 = vmul.f32 0.5, %v10931_v19 }
0x173d   :  { %v5289_v24 = vmul.f32 0.5, %v10932_v58  ;;  %v5294_v25 = vmul.f32 0.5, %v10948_v2 }
0x173e   :  { %11283 = vtanh.f32 %v5285_v22 }
0x173f   :  { %11285 = vtanh.f32 %v5289_v24 }
0x1740   :  { %11287 = vtanh.f32 %v10947_v5 }
0x1741   :  { %11289 = vtanh.f32 %v5294_v25 }
0x1748   :  { %v11284_v41 = vpop.eup %11283 }
0x1749   :  { %v11286_v43 = vpop.eup %11285  ;;  %v5287_v10 = vmul.f32 0.5, %v11284_v41 }
0x174a   :  { %v5291_v46 = vmul.f32 0.5, %v11286_v43  ;;  %v11288_v14 = vpop.eup %11287 }
0x174b   :  { %v5288_v3 = vadd.f32 0.5, %v5287_v10  ;;  %v11290_v15 = vpop.eup %11289 }
0x174c   :  { %v5292_v61 = vadd.f32 0.5, %v5291_v46  ;;  %v5296_v52 = vmul.f32 0.5, %v11290_v15 }
0x174d   :  { %v5299_v63 = vmul.f32 %v11288_v14, %v5288_v3 }
0x174e   :  { %v5298_v56 = vmul.f32 %v5292_v61, %v13596_v53  ;;  %v5297_v36 = vadd.f32 0.5, %v5296_v52 }
0x1750   :  { %v13638_v38 = vadd.f32 %v5299_v63, %v5298_v56 }
0x1752   :  { %11291 = vtanh.f32 %v13638_v38 }
0x175c   :  { %v11292_v19 = vpop.eup %11291 }
0x175d   :  { %v5302_v50 = vmul.f32 %v11292_v19, %v5297_v36 }
0x175f   :  { %5303 = vst [vmem:[#allocation3 + $0x20] sm:$0xff] %v5302_v50  ;;  %5373 = vmatmul.mubr.f32.vlgmr.msra.gmra.mrb[42].mxu1 %v5302_v50  ;;  %5444 = vmatmul.mubr.f32.vlgmr.msra.gmra.mrb[66].mxu0 %v5302_v50 }
0x1760   :  { %9894 = vmatpush1.bf16.msra.mxu1 %v13315_v30  ;;  %9926 = vmatpush1.bf16.msra.mxu0 %v13320_v4 }
0x1761   :  { %9896 = vmatprep.subr.bf16.mxu1 %v13325_v7  ;;  %9928 = vmatprep.subr.bf16.mxu0 %v13329_v0 }
0x1762   :  { %5541 = vmatprep.mubr.f32.mxu1 %v13950_v1  ;;  %5612 = vmatprep.mubr.f32.mxu0 %v13950_v1 }
0x1764   :  { %9898 = vmatpush1.bf16.msra.mxu1 %v13327_v54  ;;  %9930 = vmatpush1.bf16.msra.mxu0 %v13332_v32 }
0x1765   :  { %9900 = vmatprep.subr.bf16.mxu1 %v13337_v49  ;;  %9932 = vmatprep.subr.bf16.mxu0 %v13341_v37 }
0x1768   :  { %9902 = vmatpush1.bf16.msra.mxu1 %v13339_v48  ;;  %9934 = vmatpush1.bf16.msra.mxu0 %v13344_v35 }
0x1769   :  { %9904 = vmatprep.subr.bf16.mxu1 %v13349_v18  ;;  %9936 = vmatprep.subr.bf16.mxu0 %v13353_v51 }
0x176c   :  { %9906 = vmatpush1.bf16.msra.mxu1 %v13351_v39  ;;  %9938 = vmatpush1.bf16.msra.mxu0 %v13356_v20 }
0x176d   :  { %9908 = vmatprep.subr.bf16.mxu1 %v13361_v26  ;;  %9940 = vmatprep.subr.bf16.mxu0 %v13365_v29 }
0x1770   :  { %9910 = vmatpush1.bf16.msra.mxu1 %v13363_v17  ;;  %9942 = vmatpush1.bf16.msra.mxu0 %v13368_v6 }
0x1771   :  { %9912 = vmatprep.subr.bf16.mxu1 %v13373_v47  ;;  %9944 = vmatprep.subr.bf16.mxu0 %v13377_v55 }
0x1774   :  { %9914 = vmatpush1.bf16.msra.mxu1 %v13375_v59  ;;  %9946 = vmatpush1.bf16.msra.mxu0 %v13380_v57 }
0x1775   :  { %9916 = vmatprep.subr.bf16.mxu1 %v13385_v9  ;;  %9948 = vmatprep.subr.bf16.mxu0 %v13389_v34 }
0x1778   :  { %9918 = vmatpush1.bf16.msra.mxu1 %v13387_v21  ;;  %9950 = vmatpush1.bf16.msra.mxu0 %v13392_v27 }
0x1779   :  { %9920 = vmatprep.subr.bf16.mxu1 %v13397_v8  ;;  %9952 = vmatprep.subr.bf16.mxu0 %v13401_v40 }
0x177c   :  { %9922 = vmatpush1.bf16.msra.mxu1 %v13399_v31  ;;  %9954 = vmatpush1.bf16.msra.mxu0 %v13404_v13 }
0x177d   :  { %9956 = vmatprep.subr.bf16.mxu1 %v13313_v62  ;;  %9988 = vmatprep.subr.bf16.mxu0 %v13317_v44 }
0x1832   :  { %v5374_v53 = vpop.f32.mrb[42].mxu1  ;;  %v5445_v23 = vpop.f32.mrb[66].mxu0 }
0x1833   :  { %v10933_v58 = vadd.f32 %v5374_v53, %v13455_v42  ;;  %v5376_v22 = vpop.f32.mrb[43].mxu1  ;;  %v5447_v24 = vpop.f32.mrb[67].mxu0  ;;  %v10949_v41 = vadd.f32 %v5445_v23, %v13462_v60 }
0x1834   :  { %v10934_v5 = vadd.f32 %v5376_v22, %v13458_v16  ;;  %v10950_v43 = vadd.f32 %v5447_v24, %v13467_v11 }
0x1835   :  { %v5454_v2 = vmul.f32 0.5, %v10933_v58 }
0x1836   :  { %v5458_v25 = vmul.f32 0.5, %v10934_v5  ;;  %v5463_v62 = vmul.f32 0.5, %v10950_v43 }
0x1837   :  { %11293 = vtanh.f32 %v5454_v2 }
0x1838   :  { %11295 = vtanh.f32 %v5458_v25 }
0x1839   :  { %11297 = vtanh.f32 %v10949_v41 }
0x183a   :  { %11299 = vtanh.f32 %v5463_v62 }
0x1841   :  { %v11294_v10 = vpop.eup %11293 }
0x1842   :  { %v11296_v44 = vpop.eup %11295  ;;  %v5456_v46 = vmul.f32 0.5, %v11294_v10 }
0x1843   :  { %v5460_v3 = vmul.f32 0.5, %v11296_v44  ;;  %v11298_v61 = vpop.eup %11297 }
0x1844   :  { %v5457_v14 = vadd.f32 0.5, %v5456_v46  ;;  %v11300_v36 = vpop.eup %11299 }
0x1845   :  { %v5461_v63 = vadd.f32 0.5, %v5460_v3  ;;  %v5465_v19 = vmul.f32 0.5, %v11300_v36 }
0x1846   :  { %v5468_v56 = vmul.f32 %v11298_v61, %v5457_v14 }
0x1847   :  { %v5467_v15 = vmul.f32 %v5461_v63, %v13638_v38  ;;  %v5466_v50 = vadd.f32 0.5, %v5465_v19 }
0x1849   :  { %v13680_v52 = vadd.f32 %v5468_v56, %v5467_v15 }
0x184b   :  { %11301 = vtanh.f32 %v13680_v52 }
0x1855   :  { %v11302_v53 = vpop.eup %11301 }
0x1856   :  { %v5471_v23 = vmul.f32 %v11302_v53, %v5466_v50 }
0x1858   :  { %5472 = vst [vmem:[#allocation3 + $0x28] sm:$0xff] %v5471_v23  ;;  %5542 = vmatmul.mubr.f32.vlgmr.msra.gmra.mrb[44].mxu1 %v5471_v23  ;;  %5613 = vmatmul.mubr.f32.vlgmr.msra.gmra.mrb[68].mxu0 %v5471_v23 }
0x1859   :  { %9958 = vmatpush1.bf16.msra.mxu1 %v13315_v30  ;;  %9990 = vmatpush1.bf16.msra.mxu0 %v13320_v4 }
0x185a   :  { %9960 = vmatprep.subr.bf16.mxu1 %v13325_v7  ;;  %9992 = vmatprep.subr.bf16.mxu0 %v13329_v0 }
0x185b   :  { %5710 = vmatprep.mubr.f32.mxu1 %v13950_v1  ;;  %5781 = vmatprep.mubr.f32.mxu0 %v13950_v1 }
0x185d   :  { %9962 = vmatpush1.bf16.msra.mxu1 %v13327_v54  ;;  %9994 = vmatpush1.bf16.msra.mxu0 %v13332_v32 }
0x185e   :  { %9964 = vmatprep.subr.bf16.mxu1 %v13337_v49  ;;  %9996 = vmatprep.subr.bf16.mxu0 %v13341_v37 }
0x1861   :  { %9966 = vmatpush1.bf16.msra.mxu1 %v13339_v48  ;;  %9998 = vmatpush1.bf16.msra.mxu0 %v13344_v35 }
0x1862   :  { %9968 = vmatprep.subr.bf16.mxu1 %v13349_v18  ;;  %10000 = vmatprep.subr.bf16.mxu0 %v13353_v51 }
0x1865   :  { %9970 = vmatpush1.bf16.msra.mxu1 %v13351_v39  ;;  %10002 = vmatpush1.bf16.msra.mxu0 %v13356_v20 }
0x1866   :  { %9972 = vmatprep.subr.bf16.mxu1 %v13361_v26  ;;  %10004 = vmatprep.subr.bf16.mxu0 %v13365_v29 }
0x1869   :  { %9974 = vmatpush1.bf16.msra.mxu1 %v13363_v17  ;;  %10006 = vmatpush1.bf16.msra.mxu0 %v13368_v6 }
0x186a   :  { %9976 = vmatprep.subr.bf16.mxu1 %v13373_v47  ;;  %10008 = vmatprep.subr.bf16.mxu0 %v13377_v55 }
0x186d   :  { %9978 = vmatpush1.bf16.msra.mxu1 %v13375_v59  ;;  %10010 = vmatpush1.bf16.msra.mxu0 %v13380_v57 }
0x186e   :  { %9980 = vmatprep.subr.bf16.mxu1 %v13385_v9  ;;  %10012 = vmatprep.subr.bf16.mxu0 %v13389_v34 }
0x1871   :  { %9982 = vmatpush1.bf16.msra.mxu1 %v13387_v21  ;;  %10014 = vmatpush1.bf16.msra.mxu0 %v13392_v27 }
0x1872   :  { %9984 = vmatprep.subr.bf16.mxu1 %v13397_v8  ;;  %10016 = vmatprep.subr.bf16.mxu0 %v13401_v40 }
0x1875   :  { %9986 = vmatpush1.bf16.msra.mxu1 %v13399_v31  ;;  %10018 = vmatpush1.bf16.msra.mxu0 %v13404_v13 }
0x192b   :  { %v5543_v30 = vpop.f32.mrb[44].mxu1  ;;  %v5614_v4 = vpop.f32.mrb[68].mxu0 }
0x192c   :  { %v10935_v7 = vadd.f32 %v5543_v30, %v13455_v42  ;;  %v5545_v54 = vpop.f32.mrb[45].mxu1  ;;  %v5616_v0 = vpop.f32.mrb[69].mxu0  ;;  %v10951_v37 = vadd.f32 %v5614_v4, %v13462_v60 }
0x192d   :  { %v10936_v32 = vadd.f32 %v5545_v54, %v13458_v16  ;;  %v10952_v35 = vadd.f32 %v5616_v0, %v13467_v11 }
0x192e   :  { %v5623_v49 = vmul.f32 0.5, %v10935_v7 }
0x192f   :  { %v5627_v48 = vmul.f32 0.5, %v10936_v32  ;;  %v5632_v18 = vmul.f32 0.5, %v10952_v35 }
0x1930   :  { %11303 = vtanh.f32 %v5623_v49 }
0x1931   :  { %11305 = vtanh.f32 %v5627_v48 }
0x1932   :  { %11307 = vtanh.f32 %v10951_v37 }
0x1933   :  { %11309 = vtanh.f32 %v5632_v18 }
0x193a   :  { %v11304_v39 = vpop.eup %11303 }
0x193b   :  { %v11306_v51 = vpop.eup %11305  ;;  %v5625_v20 = vmul.f32 0.5, %v11304_v39 }
0x193c   :  { %v5629_v26 = vmul.f32 0.5, %v11306_v51  ;;  %v11308_v29 = vpop.eup %11307 }
0x193d   :  { %v5626_v17 = vadd.f32 0.5, %v5625_v20  ;;  %v11310_v57 = vpop.eup %11309 }
0x193e   :  { %v5630_v6 = vadd.f32 0.5, %v5629_v26  ;;  %v5634_v9 = vmul.f32 0.5, %v11310_v57 }
0x193f   :  { %v5637_v47 = vmul.f32 %v11308_v29, %v5626_v17 }
0x1940   :  { %v5636_v59 = vmul.f32 %v5630_v6, %v13680_v52  ;;  %v5635_v21 = vadd.f32 0.5, %v5634_v9 }
0x1942   :  { %v13720_v55 = vadd.f32 %v5637_v47, %v5636_v59 }
0x1944   :  { %11311 = vtanh.f32 %v13720_v55 }
0x194e   :  { %v11312_v34 = vpop.eup %11311 }
0x194f   :  { %v5640_v27 = vmul.f32 %v11312_v34, %v5635_v21 }
0x1951   :  { %5641 = vst [vmem:[#allocation3 + $0x30] sm:$0xff] %v5640_v27  ;;  %5711 = vmatmul.mubr.f32.vlgmr.msra.gmra.mrb[46].mxu1 %v5640_v27  ;;  %5782 = vmatmul.mubr.f32.vlgmr.msra.gmra.mrb[70].mxu0 %v5640_v27 }
0x1952   :  { %11732 = shalt.err (!%p11729_p7)  }
0x1953   :  { %s11733_s11 = scalar_lea.vmem %s279_s14, 32768  ;;  %p11738_p9 = scmp.lt.s32.totalorder %s279_s14, %s279_s14 }
0x1954   :  { %p11734_p8 = scmp.ne.s32.totalorder %s279_s14, %s11733_s11  ;;  %p11739_p10 = scmp.lt.s32.totalorder %s11733_s11, %s11733_s11 }
0x1956   :  { %p11740_p11 = por %p11739_p10, %p11738_p9 }
0x1958   :  { %p11741_p12 = pnand %p11740_p11, %p11734_p8 }
0x195a   :  { %11744 = shalt.err (!%p11741_p12)  }
0x195b   :  { %281 = dma.hbm_to_vmem [thread:$0]  %s13892_s12, 32768, %s279_s14, [#allocation6] }
0x195c   :  { %s13958_s25 = sld [smem:[#allocation74_spill]] }
0x1962   :  { %s11745_s26 = scalar_lea.hbm %s13958_s25, 65536 }
0x1963   :  { %p11746_p13 = scmp.ne.s32.totalorder %s13958_s25, %s11745_s26  ;;  %p11749_p0 = scmp.lt.u32.totalorder %s11745_s26, %s13958_s25 }
0x1965   :  { %p11751_p1 = pnand %p11749_p0, %p11746_p13 }
0x1967   :  { %11754 = shalt.err (!%p11751_p1)  }
0x1968   :  { %s11755_s10 = scalar_lea.vmem %s291_s3, 65536  ;;  %p11760_p3 = scmp.lt.s32.totalorder %s291_s3, %s291_s3 }
0x1969   :  { %p11756_p2 = scmp.ne.s32.totalorder %s291_s3, %s11755_s10  ;;  %p11761_p4 = scmp.lt.s32.totalorder %s11755_s10, %s11755_s10 }
0x196b   :  { %p11762_p5 = por %p11761_p4, %p11760_p3 }
0x196d   :  { %p11763_p6 = pnand %p11762_p5, %p11756_p2 }
0x196f   :  { %11766 = shalt.err (!%p11763_p6)  }
0x1970   :  { %293 = dma.hbm_to_vmem [thread:$0]  %s13958_s25, 65536, %s291_s3, [#allocation6 + $0x1]  ;;  %vm5827_vm10 = vcmask 1040384  }
0x1971   :  { %s8149_s24 = sld [smem:[#allocation8 + $0x1]]  ;;  %s5815_s0 = sld [smem:[#allocation8]] }
0x1977   :  { %s8150_s23 = sshll.u32 %s8149_s24, 3  ;;  %s8148_s6 = sshll.u32 %s5815_s0, 3 }
0x1978   :  { %s8138_s14 = scalar_lea.vmem [#allocation3], %s8150_s23  ;;  %s5817_s22 = scalar_lea.vmem [#allocation3], %s8148_s6 }
0x1a24   :  { %v5712_v8 = vpop.f32.mrb[46].mxu1  ;;  %v5783_v31 = vpop.f32.mrb[70].mxu0 }
0x1a25   :  { %v10937_v40 = vadd.f32 %v5712_v8, %v13455_v42  ;;  %v5714_v13 = vpop.f32.mrb[47].mxu1  ;;  %v5785_v38 = vpop.f32.mrb[71].mxu0  ;;  %v10953_v5 = vadd.f32 %v5783_v31, %v13462_v60 }
0x1a26   :  { %v10938_v58 = vadd.f32 %v5714_v13, %v13458_v16  ;;  %v10954_v2 = vadd.f32 %v5785_v38, %v13467_v11 }
0x1a27   :  { %v5792_v22 = vmul.f32 0.5, %v10937_v40 }
0x1a28   :  { %v5796_v24 = vmul.f32 0.5, %v10938_v58  ;;  %v5801_v25 = vmul.f32 0.5, %v10954_v2 }
0x1a29   :  { %11313 = vtanh.f32 %v5792_v22 }
0x1a2a   :  { %11315 = vtanh.f32 %v5796_v24 }
0x1a2b   :  { %11317 = vtanh.f32 %v10953_v5 }
0x1a2c   :  { %11319 = vtanh.f32 %v5801_v25 }
0x1a33   :  { %v11314_v41 = vpop.eup %11313 }
0x1a34   :  { %v11316_v43 = vpop.eup %11315  ;;  %v5794_v62 = vmul.f32 0.5, %v11314_v41 }
0x1a35   :  { %v5798_v10 = vmul.f32 0.5, %v11316_v43  ;;  %v11318_v44 = vpop.eup %11317 }
0x1a36   :  { %v5795_v42 = vadd.f32 0.5, %v5794_v62  ;;  %v11320_v60 = vpop.eup %11319 }
0x1a37   :  { %v5799_v46 = vadd.f32 0.5, %v5798_v10  ;;  %v5803_v61 = vmul.f32 0.5, %v11320_v60 }
0x1a38   :  { %v5806_v3 = vmul.f32 %v11318_v44, %v5795_v42 }
0x1a39   :  { %v5805_v16 = vmul.f32 %v5799_v46, %v13720_v55  ;;  %v5804_v11 = vadd.f32 0.5, %v5803_v61 }
0x1a3b   :  { %v5807_v14 = vadd.f32 %v5806_v3, %v5805_v16 }
0x1a3d   :  { %11321 = vtanh.f32 %v5807_v14  ;;  %5814 = vst [vmem:[#allocation38 + $0x10] sm:$0xff] %v5807_v14 }
0x1a47   :  { %v11322_v63 = vpop.eup %11321 }
0x1a48   :  { %v5809_v56 = vmul.f32 %v11322_v63, %v5804_v11 }
0x1a4a   :  { %5810 = vst [vmem:[#allocation3 + $0x38] sm:$0xff] %v5809_v56  ;;  %5812 = vst [vmem:[#allocation36 + $0x10] sm:$0xff] %v5809_v56 }
0x1a51   :  { %v8151_v15 = vld [vmem:[%s8138_s14 + $0x1] sm:$0x1]  ;;  %v5818_v36 = vld [vmem:[%s5817_s22] sm:$0x1] }
0x1a52   :  { %v5825_v52 = vrot.slane %v8151_v15, 7 }
0x1a54   :  { %v13752_v19 = vsel %vm5827_vm10, %v5818_v36, %v5825_v52 }
0x1a55   :  { %11853 = dma.done.wait [#allocation6], 32768 }
0x1a56   :  { %11854 = vsyncadd [#allocation6], 4294934528  ;;  %6239 = vmatprep.mubr.f32.mxu1 %v13950_v1  ;;  %6310 = vmatprep.mubr.f32.mxu0 %v13950_v1  ;;  %v5836_v50 = vld [vmem:[#allocation4 + $0x8] sm:$0xff]  ;;  %v5838_v23 = vld [vmem:[#allocation4 + $0x18] sm:$0xff] }
0x1a57   :  { %v5852_v53 = vld [vmem:[#allocation4 + $0x88] sm:$0xff]  ;;  %v5854_v4 = vld [vmem:[#allocation4 + $0x98] sm:$0xff]  ;;  %v5835_v7 = vld [vmem:[#allocation4] sm:$0xff] }
0x1a58   :  { %v10019_v30 = vpack.c.bf16 %v5852_v53, %v5836_v50  ;;  %v5851_v54 = vld [vmem:[#allocation4 + $0x80] sm:$0xff]  ;;  %v10051_v0 = vpack.c.bf16 %v5854_v4, %v5838_v23  ;;  %v5837_v49 = vld [vmem:[#allocation4 + $0x10] sm:$0xff]  ;;  %v5868_v37 = vld [vmem:[#allocation4 + $0x108] sm:$0xff] }
0x1a59   :  { %v10021_v32 = vpack.c.bf16 %v5851_v54, %v5835_v7  ;;  %v5853_v48 = vld [vmem:[#allocation4 + $0x90] sm:$0xff]  ;;  %v5884_v18 = vld [vmem:[#allocation4 + $0x188] sm:$0xff]  ;;  %v5870_v39 = vld [vmem:[#allocation4 + $0x118] sm:$0xff] }
0x1a5a   :  { %10020 = vmatprep.subr.bf16.mxu1 %v10019_v30  ;;  %v10053_v35 = vpack.c.bf16 %v5853_v48, %v5837_v49  ;;  %v5886_v51 = vld [vmem:[#allocation4 + $0x198] sm:$0xff]  ;;  %10052 = vmatprep.subr.bf16.mxu0 %v10051_v0  ;;  %v10023_v20 = vpack.c.bf16 %v5884_v18, %v5868_v37  ;;  %v5867_v17 = vld [vmem:[#allocation4 + $0x100] sm:$0xff]  ;;  %v5869_v6 = vld [vmem:[#allocation4 + $0x110] sm:$0xff] }
0x1a5b   :  { %10022 = vmatpush1.bf16.msra.mxu1 %v10021_v32  ;;  %v10055_v26 = vpack.c.bf16 %v5886_v51, %v5870_v39  ;;  %v5883_v29 = vld [vmem:[#allocation4 + $0x180] sm:$0xff]  ;;  %v5885_v59 = vld [vmem:[#allocation4 + $0x190] sm:$0xff]  ;;  %v5900_v55 = vld [vmem:[#allocation4 + $0x208] sm:$0xff] }
0x1a5c   :  { %10054 = vmatpush1.bf16.msra.mxu0 %v10053_v35  ;;  %v10025_v47 = vpack.c.bf16 %v5883_v29, %v5867_v17  ;;  %v5916_v57 = vld [vmem:[#allocation4 + $0x288] sm:$0xff]  ;;  %10024 = vmatprep.subr.bf16.mxu1 %v10023_v20  ;;  %v10057_v9 = vpack.c.bf16 %v5885_v59, %v5869_v6  ;;  %v5902_v34 = vld [vmem:[#allocation4 + $0x218] sm:$0xff]  ;;  %v5899_v8 = vld [vmem:[#allocation4 + $0x200] sm:$0xff] }
0x1a5d   :  { %10056 = vmatprep.subr.bf16.mxu0 %v10055_v26  ;;  %v10027_v21 = vpack.c.bf16 %v5916_v57, %v5900_v55  ;;  %v5918_v27 = vld [vmem:[#allocation4 + $0x298] sm:$0xff]  ;;  %v5915_v40 = vld [vmem:[#allocation4 + $0x280] sm:$0xff]  ;;  %v5901_v13 = vld [vmem:[#allocation4 + $0x210] sm:$0xff] }
0x1a5e   :  { %v10059_v31 = vpack.c.bf16 %v5918_v27, %v5902_v34  ;;  %v5917_v38 = vld [vmem:[#allocation4 + $0x290] sm:$0xff]  ;;  %v10029_v58 = vpack.c.bf16 %v5915_v40, %v5899_v8  ;;  %v5932_v22 = vld [vmem:[#allocation4 + $0x308] sm:$0xff]  ;;  %v5934_v5 = vld [vmem:[#allocation4 + $0x318] sm:$0xff] }
0x1a5f   :  { %10026 = vmatpush1.bf16.msra.mxu1 %v10025_v47  ;;  %v5948_v24 = vld [vmem:[#allocation4 + $0x388] sm:$0xff]  ;;  %v10061_v2 = vpack.c.bf16 %v5917_v38, %v5901_v13  ;;  %v5950_v41 = vld [vmem:[#allocation4 + $0x398] sm:$0xff]  ;;  %v5931_v43 = vld [vmem:[#allocation4 + $0x300] sm:$0xff] }
0x1a60   :  { %10058 = vmatpush1.bf16.msra.mxu0 %v10057_v9  ;;  %10028 = vmatprep.subr.bf16.mxu1 %v10027_v21  ;;  %v10031_v25 = vpack.c.bf16 %v5948_v24, %v5932_v22  ;;  %v5947_v62 = vld [vmem:[#allocation4 + $0x380] sm:$0xff]  ;;  %v10063_v10 = vpack.c.bf16 %v5950_v41, %v5934_v5  ;;  %v5933_v42 = vld [vmem:[#allocation4 + $0x310] sm:$0xff]  ;;  %v5964_v46 = vld [vmem:[#allocation4 + $0x408] sm:$0xff] }
0x1a61   :  { %10060 = vmatprep.subr.bf16.mxu0 %v10059_v31  ;;  %v5949_v44 = vld [vmem:[#allocation4 + $0x390] sm:$0xff]  ;;  %v5980_v3 = vld [vmem:[#allocation4 + $0x488] sm:$0xff]  ;;  %v5966_v16 = vld [vmem:[#allocation4 + $0x418] sm:$0xff]  ;;  %v10033_v60 = vpack.c.bf16 %v5947_v62, %v5931_v43 }
0x1a62   :  { %v5982_v14 = vld [vmem:[#allocation4 + $0x498] sm:$0xff]  ;;  %v10065_v61 = vpack.c.bf16 %v5949_v44, %v5933_v42  ;;  %v10035_v11 = vpack.c.bf16 %v5980_v3, %v5964_v46  ;;  %v5963_v63 = vld [vmem:[#allocation4 + $0x400] sm:$0xff]  ;;  %v5965_v15 = vld [vmem:[#allocation4 + $0x410] sm:$0xff] }
0x1a63   :  { %10030 = vmatpush1.bf16.msra.mxu1 %v10029_v58  ;;  %v5979_v56 = vld [vmem:[#allocation4 + $0x480] sm:$0xff]  ;;  %v10067_v52 = vpack.c.bf16 %v5982_v14, %v5966_v16  ;;  %v5981_v36 = vld [vmem:[#allocation4 + $0x490] sm:$0xff]  ;;  %v5996_v50 = vld [vmem:[#allocation4 + $0x508] sm:$0xff] }
0x1a64   :  { %10062 = vmatpush1.bf16.msra.mxu0 %v10061_v2  ;;  %10032 = vmatprep.subr.bf16.mxu1 %v10031_v25  ;;  %v6012_v53 = vld [vmem:[#allocation4 + $0x588] sm:$0xff]  ;;  %v5998_v23 = vld [vmem:[#allocation4 + $0x518] sm:$0xff]  ;;  %v10037_v4 = vpack.c.bf16 %v5979_v56, %v5963_v63  ;;  %v10069_v7 = vpack.c.bf16 %v5981_v36, %v5965_v15  ;;  %v5995_v0 = vld [vmem:[#allocation4 + $0x500] sm:$0xff] }
0x1a65   :  { %10064 = vmatprep.subr.bf16.mxu0 %v10063_v10  ;;  %v6014_v30 = vld [vmem:[#allocation4 + $0x598] sm:$0xff]  ;;  %v10039_v54 = vpack.c.bf16 %v6012_v53, %v5996_v50  ;;  %v6011_v32 = vld [vmem:[#allocation4 + $0x580] sm:$0xff]  ;;  %v5997_v49 = vld [vmem:[#allocation4 + $0x510] sm:$0xff] }
0x1a66   :  { %v10071_v48 = vpack.c.bf16 %v6014_v30, %v5998_v23  ;;  %v6013_v37 = vld [vmem:[#allocation4 + $0x590] sm:$0xff]  ;;  %v6028_v35 = vld [vmem:[#allocation4 + $0x608] sm:$0xff]  ;;  %v6030_v39 = vld [vmem:[#allocation4 + $0x618] sm:$0xff]  ;;  %v10041_v20 = vpack.c.bf16 %v6011_v32, %v5995_v0 }
0x1a67   :  { %10034 = vmatpush1.bf16.msra.mxu1 %v10033_v60  ;;  %v6044_v18 = vld [vmem:[#allocation4 + $0x688] sm:$0xff]  ;;  %v6046_v51 = vld [vmem:[#allocation4 + $0x698] sm:$0xff]  ;;  %v10073_v26 = vpack.c.bf16 %v6013_v37, %v5997_v49  ;;  %v6027_v29 = vld [vmem:[#allocation4 + $0x600] sm:$0xff] }
0x1a68   :  { %10066 = vmatpush1.bf16.msra.mxu0 %v10065_v61  ;;  %10036 = vmatprep.subr.bf16.mxu1 %v10035_v11  ;;  %v10043_v17 = vpack.c.bf16 %v6044_v18, %v6028_v35  ;;  %v6043_v6 = vld [vmem:[#allocation4 + $0x680] sm:$0xff]  ;;  %v6029_v47 = vld [vmem:[#allocation4 + $0x610] sm:$0xff]  ;;  %v10075_v59 = vpack.c.bf16 %v6046_v51, %v6030_v39  ;;  %v6060_v57 = vld [vmem:[#allocation4 + $0x708] sm:$0xff] }
0x1a69   :  { %10068 = vmatprep.subr.bf16.mxu0 %v10067_v52  ;;  %v6045_v55 = vld [vmem:[#allocation4 + $0x690] sm:$0xff]  ;;  %v6076_v9 = vld [vmem:[#allocation4 + $0x788] sm:$0xff]  ;;  %v6062_v21 = vld [vmem:[#allocation4 + $0x718] sm:$0xff]  ;;  %v10045_v27 = vpack.c.bf16 %v6043_v6, %v6027_v29 }
0x1a6a   :  { %v6078_v34 = vld [vmem:[#allocation4 + $0x798] sm:$0xff]  ;;  %v10077_v8 = vpack.c.bf16 %v6045_v55, %v6029_v47  ;;  %v10047_v31 = vpack.c.bf16 %v6076_v9, %v6060_v57  ;;  %v6059_v40 = vld [vmem:[#allocation4 + $0x700] sm:$0xff]  ;;  %v6061_v38 = vld [vmem:[#allocation4 + $0x710] sm:$0xff] }
0x1a6b   :  { %10038 = vmatpush1.bf16.msra.mxu1 %v10037_v4  ;;  %v6075_v13 = vld [vmem:[#allocation4 + $0x780] sm:$0xff]  ;;  %v10079_v58 = vpack.c.bf16 %v6078_v34, %v6062_v21  ;;  %v6077_v22 = vld [vmem:[#allocation4 + $0x790] sm:$0xff]  ;;  %v5840_v24 = vld [vmem:[#allocation4 + $0x28] sm:$0xff] }
0x1a6c   :  { %10070 = vmatpush1.bf16.msra.mxu0 %v10069_v7  ;;  %10040 = vmatprep.subr.bf16.mxu1 %v10039_v54  ;;  %v5856_v5 = vld [vmem:[#allocation4 + $0xa8] sm:$0xff]  ;;  %v5842_v2 = vld [vmem:[#allocation4 + $0x38] sm:$0xff]  ;;  %v10049_v41 = vpack.c.bf16 %v6075_v13, %v6059_v40  ;;  %v10081_v43 = vpack.c.bf16 %v6077_v22, %v6061_v38  ;;  %v5839_v10 = vld [vmem:[#allocation4 + $0x20] sm:$0xff] }
0x1a6d   :  { %10072 = vmatprep.subr.bf16.mxu0 %v10071_v48  ;;  %v5858_v25 = vld [vmem:[#allocation4 + $0xb8] sm:$0xff]  ;;  %v10083_v62 = vpack.c.bf16 %v5856_v5, %v5840_v24  ;;  %v5855_v42 = vld [vmem:[#allocation4 + $0xa0] sm:$0xff]  ;;  %v5841_v44 = vld [vmem:[#allocation4 + $0x30] sm:$0xff] }
0x1a6e   :  { %v10115_v46 = vpack.c.bf16 %v5858_v25, %v5842_v2  ;;  %v5857_v3 = vld [vmem:[#allocation4 + $0xb0] sm:$0xff]  ;;  %v5872_v16 = vld [vmem:[#allocation4 + $0x128] sm:$0xff]  ;;  %v5874_v60 = vld [vmem:[#allocation4 + $0x138] sm:$0xff]  ;;  %v10085_v11 = vpack.c.bf16 %v5855_v42, %v5839_v10 }
0x1a6f   :  { %10042 = vmatpush1.bf16.msra.mxu1 %v10041_v20  ;;  %v5888_v14 = vld [vmem:[#allocation4 + $0x1a8] sm:$0xff]  ;;  %v5890_v61 = vld [vmem:[#allocation4 + $0x1b8] sm:$0xff]  ;;  %v10117_v63 = vpack.c.bf16 %v5857_v3, %v5841_v44  ;;  %v5871_v15 = vld [vmem:[#allocation4 + $0x120] sm:$0xff] }
0x1a70   :  { %10074 = vmatpush1.bf16.msra.mxu0 %v10073_v26  ;;  %10044 = vmatprep.subr.bf16.mxu1 %v10043_v17  ;;  %v10087_v56 = vpack.c.bf16 %v5888_v14, %v5872_v16  ;;  %v5887_v52 = vld [vmem:[#allocation4 + $0x1a0] sm:$0xff]  ;;  %v5873_v36 = vld [vmem:[#allocation4 + $0x130] sm:$0xff]  ;;  %v10119_v50 = vpack.c.bf16 %v5890_v61, %v5874_v60  ;;  %v5904_v23 = vld [vmem:[#allocation4 + $0x228] sm:$0xff] }
0x1a71   :  { %10076 = vmatprep.subr.bf16.mxu0 %v10075_v59  ;;  %v5889_v53 = vld [vmem:[#allocation4 + $0x1b0] sm:$0xff]  ;;  %v5920_v30 = vld [vmem:[#allocation4 + $0x2a8] sm:$0xff]  ;;  %v5906_v4 = vld [vmem:[#allocation4 + $0x238] sm:$0xff]  ;;  %v10089_v54 = vpack.c.bf16 %v5887_v52, %v5871_v15 }
0x1a72   :  { %v5922_v7 = vld [vmem:[#allocation4 + $0x2b8] sm:$0xff]  ;;  %v10121_v0 = vpack.c.bf16 %v5889_v53, %v5873_v36  ;;  %v10091_v32 = vpack.c.bf16 %v5920_v30, %v5904_v23  ;;  %v5903_v49 = vld [vmem:[#allocation4 + $0x220] sm:$0xff]  ;;  %v5905_v37 = vld [vmem:[#allocation4 + $0x230] sm:$0xff] }
0x1a73   :  { %10046 = vmatpush1.bf16.msra.mxu1 %v10045_v27  ;;  %v5919_v48 = vld [vmem:[#allocation4 + $0x2a0] sm:$0xff]  ;;  %v10123_v35 = vpack.c.bf16 %v5922_v7, %v5906_v4  ;;  %v5921_v18 = vld [vmem:[#allocation4 + $0x2b0] sm:$0xff]  ;;  %v5936_v39 = vld [vmem:[#allocation4 + $0x328] sm:$0xff] }
0x1a74   :  { %10078 = vmatpush1.bf16.msra.mxu0 %v10077_v8  ;;  %10048 = vmatprep.subr.bf16.mxu1 %v10047_v31  ;;  %v5952_v51 = vld [vmem:[#allocation4 + $0x3a8] sm:$0xff]  ;;  %v5938_v20 = vld [vmem:[#allocation4 + $0x338] sm:$0xff]  ;;  %v10093_v17 = vpack.c.bf16 %v5919_v48, %v5903_v49  ;;  %v10125_v29 = vpack.c.bf16 %v5921_v18, %v5905_v37  ;;  %v5935_v47 = vld [vmem:[#allocation4 + $0x320] sm:$0xff] }
0x1a75   :  { %10080 = vmatprep.subr.bf16.mxu0 %v10079_v58  ;;  %v5954_v26 = vld [vmem:[#allocation4 + $0x3b8] sm:$0xff]  ;;  %v10095_v6 = vpack.c.bf16 %v5952_v51, %v5936_v39  ;;  %v5951_v59 = vld [vmem:[#allocation4 + $0x3a0] sm:$0xff]  ;;  %v5937_v55 = vld [vmem:[#allocation4 + $0x330] sm:$0xff] }
0x1a76   :  { %v10127_v57 = vpack.c.bf16 %v5954_v26, %v5938_v20  ;;  %v5953_v9 = vld [vmem:[#allocation4 + $0x3b0] sm:$0xff]  ;;  %v5968_v21 = vld [vmem:[#allocation4 + $0x428] sm:$0xff]  ;;  %v5970_v27 = vld [vmem:[#allocation4 + $0x438] sm:$0xff]  ;;  %v10097_v31 = vpack.c.bf16 %v5951_v59, %v5935_v47 }
0x1a77   :  { %10050 = vmatpush1.bf16.msra.mxu1 %v10049_v41  ;;  %v5984_v34 = vld [vmem:[#allocation4 + $0x4a8] sm:$0xff]  ;;  %v5986_v8 = vld [vmem:[#allocation4 + $0x4b8] sm:$0xff]  ;;  %v10129_v40 = vpack.c.bf16 %v5953_v9, %v5937_v55  ;;  %v5967_v38 = vld [vmem:[#allocation4 + $0x420] sm:$0xff] }
0x1a78   :  { %10082 = vmatpush1.bf16.msra.mxu0 %v10081_v43  ;;  %10084 = vmatprep.subr.bf16.mxu1 %v10083_v62  ;;  %v10099_v13 = vpack.c.bf16 %v5984_v34, %v5968_v21  ;;  %v5983_v58 = vld [vmem:[#allocation4 + $0x4a0] sm:$0xff]  ;;  %v5969_v22 = vld [vmem:[#allocation4 + $0x430] sm:$0xff]  ;;  %v10131_v24 = vpack.c.bf16 %v5986_v8, %v5970_v27  ;;  %v6000_v2 = vld [vmem:[#allocation4 + $0x528] sm:$0xff] }
0x1a79   :  { %10116 = vmatprep.subr.bf16.mxu0 %v10115_v46  ;;  %v5985_v5 = vld [vmem:[#allocation4 + $0x4b0] sm:$0xff]  ;;  %v6016_v25 = vld [vmem:[#allocation4 + $0x5a8] sm:$0xff]  ;;  %v6002_v41 = vld [vmem:[#allocation4 + $0x538] sm:$0xff]  ;;  %v10101_v62 = vpack.c.bf16 %v5983_v58, %v5967_v38 }
0x1a7a   :  { %8152 = vmatmul.mubr.msk.f32.vlgmr.msra.gmra.mrb[48].mxu1 %vm5829_vm9, %v13752_v19  ;;  %v6018_v43 = vld [vmem:[#allocation4 + $0x5b8] sm:$0xff]  ;;  %v10133_v10 = vpack.c.bf16 %v5985_v5, %v5969_v22  ;;  %v10103_v42 = vpack.c.bf16 %v6016_v25, %v6000_v2  ;;  %v5999_v44 = vld [vmem:[#allocation4 + $0x520] sm:$0xff]  ;;  %v6001_v3 = vld [vmem:[#allocation4 + $0x530] sm:$0xff] }
0x1a7b   :  { %8153 = vmatmul.mubr.msk.f32.vlgmr.msra.gmra.mrb[72].mxu0 %vm5829_vm9, %v13752_v19  ;;  %10086 = vmatpush1.bf16.msra.mxu1 %v10085_v11  ;;  %v6015_v46 = vld [vmem:[#allocation4 + $0x5a0] sm:$0xff]  ;;  %v10135_v16 = vpack.c.bf16 %v6018_v43, %v6002_v41  ;;  %v6017_v14 = vld [vmem:[#allocation4 + $0x5b0] sm:$0xff]  ;;  %v6032_v60 = vld [vmem:[#allocation4 + $0x628] sm:$0xff] }
0x1a7c   :  { %10118 = vmatpush1.bf16.msra.mxu0 %v10117_v63  ;;  %10088 = vmatprep.subr.bf16.mxu1 %v10087_v56  ;;  %v6048_v61 = vld [vmem:[#allocation4 + $0x6a8] sm:$0xff]  ;;  %v6034_v11 = vld [vmem:[#allocation4 + $0x638] sm:$0xff]  ;;  %v10105_v56 = vpack.c.bf16 %v6015_v46, %v5999_v44  ;;  %v10137_v15 = vpack.c.bf16 %v6017_v14, %v6001_v3  ;;  %v6031_v36 = vld [vmem:[#allocation4 + $0x620] sm:$0xff] }
0x1a7d   :  { %10120 = vmatprep.subr.bf16.mxu0 %v10119_v50  ;;  %6381 = vmatprep.mubr.f32.mxu1 %v13950_v1  ;;  %v6050_v63 = vld [vmem:[#allocation4 + $0x6b8] sm:$0xff]  ;;  %v10107_v52 = vpack.c.bf16 %v6048_v61, %v6032_v60  ;;  %v6047_v50 = vld [vmem:[#allocation4 + $0x6a0] sm:$0xff]  ;;  %v6033_v53 = vld [vmem:[#allocation4 + $0x630] sm:$0xff] }
0x1a7e   :  { %6452 = vmatprep.mubr.f32.mxu0 %v13950_v1  ;;  %v10139_v23 = vpack.c.bf16 %v6050_v63, %v6034_v11  ;;  %v6049_v30 = vld [vmem:[#allocation4 + $0x6b0] sm:$0xff]  ;;  %v6064_v4 = vld [vmem:[#allocation4 + $0x728] sm:$0xff]  ;;  %v6063_v37 = vld [vmem:[#allocation4 + $0x720] sm:$0xff] }
0x1a7f   :  { %10090 = vmatpush1.bf16.msra.mxu1 %v10089_v54  ;;  %v6080_v7 = vld [vmem:[#allocation4 + $0x7a8] sm:$0xff]  ;;  %v6066_v54 = vld [vmem:[#allocation4 + $0x738] sm:$0xff]  ;;  %v10141_v49 = vpack.c.bf16 %v6049_v30, %v6033_v53  ;;  %v6065_v18 = vld [vmem:[#allocation4 + $0x730] sm:$0xff] }
0x1a80   :  { %10122 = vmatpush1.bf16.msra.mxu0 %v10121_v0  ;;  %10092 = vmatprep.subr.bf16.mxu1 %v10091_v32  ;;  %v6082_v0 = vld [vmem:[#allocation4 + $0x7b8] sm:$0xff]  ;;  %v10109_v32 = vpack.c.bf16 %v6047_v50, %v6031_v36  ;;  %v10111_v48 = vpack.c.bf16 %v6080_v7, %v6064_v4  ;;  %v6081_v51 = vld [vmem:[#allocation4 + $0x7b0] sm:$0xff]  ;;  %v5844_v20 = vld [vmem:[#allocation4 + $0x48] sm:$0xff] }
0x1a81   :  { %10124 = vmatprep.subr.bf16.mxu0 %v10123_v35  ;;  %v6079_v35 = vld [vmem:[#allocation4 + $0x7a0] sm:$0xff]  ;;  %v10143_v39 = vpack.c.bf16 %v6082_v0, %v6066_v54  ;;  %v5860_v26 = vld [vmem:[#allocation4 + $0xc8] sm:$0xff]  ;;  %v10145_v47 = vpack.c.bf16 %v6081_v51, %v6065_v18  ;;  %v5845_v9 = vld [vmem:[#allocation4 + $0x50] sm:$0xff] }
0x1a82   :  { %v10147_v59 = vpack.c.bf16 %v5860_v26, %v5844_v20  ;;  %v5843_v55 = vld [vmem:[#allocation4 + $0x40] sm:$0xff]  ;;  %v5861_v34 = vld [vmem:[#allocation4 + $0xd0] sm:$0xff]  ;;  %v5876_v27 = vld [vmem:[#allocation4 + $0x148] sm:$0xff] }
0x1a83   :  { %10094 = vmatpush1.bf16.msra.mxu1 %v10093_v17  ;;  %v5846_v17 = vld [vmem:[#allocation4 + $0x58] sm:$0xff]  ;;  %v5892_v8 = vld [vmem:[#allocation4 + $0x1c8] sm:$0xff]  ;;  %v10181_v38 = vpack.c.bf16 %v5861_v34, %v5845_v9  ;;  %v5875_v22 = vld [vmem:[#allocation4 + $0x140] sm:$0xff] }
0x1a84   :  { %10126 = vmatpush1.bf16.msra.mxu0 %v10125_v29  ;;  %10096 = vmatprep.subr.bf16.mxu1 %v10095_v6  ;;  %v5862_v29 = vld [vmem:[#allocation4 + $0xd8] sm:$0xff]  ;;  %v10113_v6 = vpack.c.bf16 %v6079_v35, %v6063_v37  ;;  %v10151_v58 = vpack.c.bf16 %v5892_v8, %v5876_v27  ;;  %v5877_v5 = vld [vmem:[#allocation4 + $0x150] sm:$0xff]  ;;  %v5908_v41 = vld [vmem:[#allocation4 + $0x248] sm:$0xff] }
0x1a85   :  { %10128 = vmatprep.subr.bf16.mxu0 %v10127_v57  ;;  %v5859_v57 = vld [vmem:[#allocation4 + $0xc0] sm:$0xff]  ;;  %v10179_v21 = vpack.c.bf16 %v5862_v29, %v5846_v17  ;;  %v5893_v25 = vld [vmem:[#allocation4 + $0x1d0] sm:$0xff]  ;;  %v5924_v43 = vld [vmem:[#allocation4 + $0x2c8] sm:$0xff] }
0x1a86   :  { %v10185_v44 = vpack.c.bf16 %v5893_v25, %v5877_v5  ;;  %v10155_v46 = vpack.c.bf16 %v5924_v43, %v5908_v41  ;;  %v5907_v3 = vld [vmem:[#allocation4 + $0x240] sm:$0xff]  ;;  %v5909_v14 = vld [vmem:[#allocation4 + $0x250] sm:$0xff]  ;;  %v5940_v11 = vld [vmem:[#allocation4 + $0x348] sm:$0xff] }
0x1a87   :  { %10098 = vmatpush1.bf16.msra.mxu1 %v10097_v31  ;;  %v5878_v31 = vld [vmem:[#allocation4 + $0x158] sm:$0xff]  ;;  %v5925_v61 = vld [vmem:[#allocation4 + $0x2d0] sm:$0xff]  ;;  %v5956_v63 = vld [vmem:[#allocation4 + $0x3c8] sm:$0xff] }
0x1a88   :  { %10130 = vmatpush1.bf16.msra.mxu0 %v10129_v40  ;;  %10100 = vmatprep.subr.bf16.mxu1 %v10099_v13  ;;  %v5894_v40 = vld [vmem:[#allocation4 + $0x1d8] sm:$0xff]  ;;  %v10149_v13 = vpack.c.bf16 %v5859_v57, %v5843_v55  ;;  %v10189_v36 = vpack.c.bf16 %v5925_v61, %v5909_v14  ;;  %v10159_v50 = vpack.c.bf16 %v5956_v63, %v5940_v11  ;;  %v5939_v53 = vld [vmem:[#allocation4 + $0x340] sm:$0xff]  ;;  %v5941_v30 = vld [vmem:[#allocation4 + $0x350] sm:$0xff] }
0x1a89   :  { %10132 = vmatprep.subr.bf16.mxu0 %v10131_v24  ;;  %v5891_v24 = vld [vmem:[#allocation4 + $0x1c0] sm:$0xff]  ;;  %v10183_v2 = vpack.c.bf16 %v5894_v40, %v5878_v31  ;;  %v5957_v7 = vld [vmem:[#allocation4 + $0x3d0] sm:$0xff]  ;;  %v5972_v54 = vld [vmem:[#allocation4 + $0x448] sm:$0xff] }
0x1a8a   :  { %v5988_v0 = vld [vmem:[#allocation4 + $0x4c8] sm:$0xff]  ;;  %v10193_v37 = vpack.c.bf16 %v5957_v7, %v5941_v30  ;;  %v5971_v18 = vld [vmem:[#allocation4 + $0x440] sm:$0xff]  ;;  %v5973_v51 = vld [vmem:[#allocation4 + $0x450] sm:$0xff] }
0x1a8b   :  { %10102 = vmatpush1.bf16.msra.mxu1 %v10101_v62  ;;  %v5910_v62 = vld [vmem:[#allocation4 + $0x258] sm:$0xff]  ;;  %v10163_v35 = vpack.c.bf16 %v5988_v0, %v5972_v54  ;;  %v5989_v26 = vld [vmem:[#allocation4 + $0x4d0] sm:$0xff]  ;;  %v6004_v17 = vld [vmem:[#allocation4 + $0x548] sm:$0xff] }
0x1a8c   :  { %10134 = vmatpush1.bf16.msra.mxu0 %v10133_v10  ;;  %10104 = vmatprep.subr.bf16.mxu1 %v10103_v42  ;;  %v5926_v10 = vld [vmem:[#allocation4 + $0x2d8] sm:$0xff]  ;;  %v10153_v42 = vpack.c.bf16 %v5891_v24, %v5875_v22  ;;  %v6020_v29 = vld [vmem:[#allocation4 + $0x5c8] sm:$0xff]  ;;  %v10197_v55 = vpack.c.bf16 %v5989_v26, %v5973_v51  ;;  %v6003_v9 = vld [vmem:[#allocation4 + $0x540] sm:$0xff] }
0x1a8d   :  { %10136 = vmatprep.subr.bf16.mxu0 %v10135_v16  ;;  %v5923_v16 = vld [vmem:[#allocation4 + $0x2c0] sm:$0xff]  ;;  %v10187_v60 = vpack.c.bf16 %v5926_v10, %v5910_v62  ;;  %v10167_v57 = vpack.c.bf16 %v6020_v29, %v6004_v17  ;;  %v6005_v34 = vld [vmem:[#allocation4 + $0x550] sm:$0xff]  ;;  %v6036_v31 = vld [vmem:[#allocation4 + $0x648] sm:$0xff] }
0x1a8e   :  { %v6021_v8 = vld [vmem:[#allocation4 + $0x5d0] sm:$0xff]  ;;  %v6052_v40 = vld [vmem:[#allocation4 + $0x6c8] sm:$0xff]  ;;  %v6035_v5 = vld [vmem:[#allocation4 + $0x640] sm:$0xff] }
0x1a8f   :  { %10106 = vmatpush1.bf16.msra.mxu1 %v10105_v56  ;;  %v5942_v56 = vld [vmem:[#allocation4 + $0x358] sm:$0xff]  ;;  %v10201_v22 = vpack.c.bf16 %v6021_v8, %v6005_v34  ;;  %v10171_v24 = vpack.c.bf16 %v6052_v40, %v6036_v31  ;;  %v6037_v25 = vld [vmem:[#allocation4 + $0x650] sm:$0xff]  ;;  %v6068_v62 = vld [vmem:[#allocation4 + $0x748] sm:$0xff] }
0x1a90   :  { %10138 = vmatpush1.bf16.msra.mxu0 %v10137_v15  ;;  %10108 = vmatprep.subr.bf16.mxu1 %v10107_v52  ;;  %v5958_v15 = vld [vmem:[#allocation4 + $0x3d8] sm:$0xff]  ;;  %v10157_v52 = vpack.c.bf16 %v5923_v16, %v5907_v3  ;;  %v6053_v43 = vld [vmem:[#allocation4 + $0x6d0] sm:$0xff]  ;;  %v6084_v10 = vld [vmem:[#allocation4 + $0x7c8] sm:$0xff] }
0x1a91   :  { %10140 = vmatprep.subr.bf16.mxu0 %v10139_v23  ;;  %v5955_v23 = vld [vmem:[#allocation4 + $0x3c0] sm:$0xff]  ;;  %v10191_v4 = vpack.c.bf16 %v5958_v15, %v5942_v56  ;;  %v10205_v3 = vpack.c.bf16 %v6053_v43, %v6037_v25  ;;  %v10175_v16 = vpack.c.bf16 %v6084_v10, %v6068_v62  ;;  %v6069_v61 = vld [vmem:[#allocation4 + $0x750] sm:$0xff]  ;;  %v5848_v56 = vld [vmem:[#allocation4 + $0x68] sm:$0xff] }
0x1a92   :  { %v6067_v14 = vld [vmem:[#allocation4 + $0x740] sm:$0xff]  ;;  %v6085_v63 = vld [vmem:[#allocation4 + $0x7d0] sm:$0xff]  ;;  %v5864_v15 = vld [vmem:[#allocation4 + $0xe8] sm:$0xff] }
0x1a93   :  { %10110 = vmatpush1.bf16.msra.mxu1 %v10109_v32  ;;  %v5974_v32 = vld [vmem:[#allocation4 + $0x458] sm:$0xff]  ;;  %v5847_v30 = vld [vmem:[#allocation4 + $0x60] sm:$0xff]  ;;  %v5849_v7 = vld [vmem:[#allocation4 + $0x70] sm:$0xff] }
0x1a94   :  { %10142 = vmatpush1.bf16.msra.mxu0 %v10141_v49  ;;  %10112 = vmatprep.subr.bf16.mxu1 %v10111_v48  ;;  %v5990_v49 = vld [vmem:[#allocation4 + $0x4d8] sm:$0xff]  ;;  %v10161_v48 = vpack.c.bf16 %v5955_v23, %v5939_v53  ;;  %v10209_v53 = vpack.c.bf16 %v6085_v63, %v6069_v61  ;;  %v10211_v23 = vpack.c.bf16 %v5864_v15, %v5848_v56  ;;  %v5865_v0 = vld [vmem:[#allocation4 + $0xf0] sm:$0xff]  ;;  %v5879_v51 = vld [vmem:[#allocation4 + $0x160] sm:$0xff] }
0x1a95   :  { %10144 = vmatprep.subr.bf16.mxu0 %v10143_v39  ;;  %v5987_v39 = vld [vmem:[#allocation4 + $0x4c0] sm:$0xff]  ;;  %v10195_v20 = vpack.c.bf16 %v5990_v49, %v5974_v32  ;;  %v5880_v32 = vld [vmem:[#allocation4 + $0x168] sm:$0xff]  ;;  %v5881_v26 = vld [vmem:[#allocation4 + $0x170] sm:$0xff] }
0x1a96   :  { %v5896_v49 = vld [vmem:[#allocation4 + $0x1e8] sm:$0xff]  ;;  %v5897_v29 = vld [vmem:[#allocation4 + $0x1f0] sm:$0xff]  ;;  %v5911_v34 = vld [vmem:[#allocation4 + $0x260] sm:$0xff] }
0x1a97   :  { %10114 = vmatpush1.bf16.msra.mxu1 %v10113_v6  ;;  %v6006_v6 = vld [vmem:[#allocation4 + $0x558] sm:$0xff]  ;;  %v5913_v8 = vld [vmem:[#allocation4 + $0x270] sm:$0xff]  ;;  %v5943_v25 = vld [vmem:[#allocation4 + $0x360] sm:$0xff] }
0x1a98   :  { %10146 = vmatpush1.bf16.msra.mxu0 %v10145_v47  ;;  %10148 = vmatprep.subr.bf16.mxu1 %v10147_v59  ;;  %v6022_v47 = vld [vmem:[#allocation4 + $0x5d8] sm:$0xff]  ;;  %v10165_v59 = vpack.c.bf16 %v5987_v39, %v5971_v18  ;;  %v10245_v18 = vpack.c.bf16 %v5865_v0, %v5849_v7  ;;  %v10215_v39 = vpack.c.bf16 %v5896_v49, %v5880_v32  ;;  %v5929_v40 = vld [vmem:[#allocation4 + $0x2f0] sm:$0xff]  ;;  %v5975_v61 = vld [vmem:[#allocation4 + $0x460] sm:$0xff] }
0x1a99   :  { %10180 = vmatprep.subr.bf16.mxu0 %v10179_v21  ;;  %v6019_v21 = vld [vmem:[#allocation4 + $0x5c0] sm:$0xff]  ;;  %v10199_v27 = vpack.c.bf16 %v6022_v47, %v6006_v6  ;;  %v5912_v6 = vld [vmem:[#allocation4 + $0x268] sm:$0xff]  ;;  %v5945_v43 = vld [vmem:[#allocation4 + $0x370] sm:$0xff] }
0x1a9a   :  { %8154 = vmatmul.mubr.msk.f32.vlgmr.msra.gmra.mrb[50].mxu1 %vm5829_vm9, %v13752_v19  ;;  %v5928_v47 = vld [vmem:[#allocation4 + $0x2e8] sm:$0xff]  ;;  %v5961_v10 = vld [vmem:[#allocation4 + $0x3f0] sm:$0xff]  ;;  %v6007_v7 = vld [vmem:[#allocation4 + $0x560] sm:$0xff] }
0x1a9b   :  { %8155 = vmatmul.mubr.msk.f32.vlgmr.msra.gmra.mrb[74].mxu0 %vm5829_vm9, %v13752_v19  ;;  %10150 = vmatpush1.bf16.msra.mxu1 %v10149_v13  ;;  %v6038_v13 = vld [vmem:[#allocation4 + $0x658] sm:$0xff]  ;;  %v5977_v63 = vld [vmem:[#allocation4 + $0x470] sm:$0xff] }
0x1a9c   :  { %10182 = vmatpush1.bf16.msra.mxu0 %v10181_v38  ;;  %10152 = vmatprep.subr.bf16.mxu1 %v10151_v58  ;;  %v6054_v38 = vld [vmem:[#allocation4 + $0x6d8] sm:$0xff]  ;;  %v10169_v58 = vpack.c.bf16 %v6019_v21, %v6003_v9  ;;  %v10249_v9 = vpack.c.bf16 %v5897_v29, %v5881_v26  ;;  %v10219_v21 = vpack.c.bf16 %v5928_v47, %v5912_v6  ;;  %v5993_v15 = vld [vmem:[#allocation4 + $0x4f0] sm:$0xff]  ;;  %v6039_v26 = vld [vmem:[#allocation4 + $0x660] sm:$0xff] }
0x1a9d   :  { %10184 = vmatprep.subr.bf16.mxu0 %v10183_v2  ;;  %6523 = vmatprep.mubr.f32.mxu1 %v13950_v1  ;;  %v6051_v2 = vld [vmem:[#allocation4 + $0x6c0] sm:$0xff]  ;;  %v10203_v41 = vpack.c.bf16 %v6054_v38, %v6038_v13  ;;  %v5944_v13 = vld [vmem:[#allocation4 + $0x368] sm:$0xff]  ;;  %v6009_v0 = vld [vmem:[#allocation4 + $0x570] sm:$0xff] }
0x1a9e   :  { %6594 = vmatprep.mubr.f32.mxu0 %v13950_v1  ;;  %v5960_v38 = vld [vmem:[#allocation4 + $0x3e8] sm:$0xff]  ;;  %v6025_v49 = vld [vmem:[#allocation4 + $0x5f0] sm:$0xff] }
0x1a9f   :  { %10154 = vmatpush1.bf16.msra.mxu1 %v10153_v42  ;;  %v6070_v42 = vld [vmem:[#allocation4 + $0x758] sm:$0xff]  ;;  %v6041_v29 = vld [vmem:[#allocation4 + $0x670] sm:$0xff] }
0x1aa0   :  { %10186 = vmatpush1.bf16.msra.mxu0 %v10185_v44  ;;  %10156 = vmatprep.subr.bf16.mxu1 %v10155_v46  ;;  %v6086_v44 = vld [vmem:[#allocation4 + $0x7d8] sm:$0xff]  ;;  %v10173_v46 = vpack.c.bf16 %v6051_v2, %v6035_v5  ;;  %v10253_v5 = vpack.c.bf16 %v5929_v40, %v5913_v8  ;;  %v10223_v2 = vpack.c.bf16 %v5960_v38, %v5944_v13  ;;  %v6057_v47 = vld [vmem:[#allocation4 + $0x6f0] sm:$0xff]  ;;  %v6071_v8 = vld [vmem:[#allocation4 + $0x760] sm:$0xff] }
0x1aa1   :  { %10188 = vmatprep.subr.bf16.mxu0 %v10187_v60  ;;  %v6083_v60 = vld [vmem:[#allocation4 + $0x7c0] sm:$0xff]  ;;  %v10207_v11 = vpack.c.bf16 %v6086_v44, %v6070_v42  ;;  %v5976_v42 = vld [vmem:[#allocation4 + $0x468] sm:$0xff]  ;;  %v6073_v13 = vld [vmem:[#allocation4 + $0x770] sm:$0xff] }
0x1aa2   :  { %v5992_v44 = vld [vmem:[#allocation4 + $0x4e8] sm:$0xff]  ;;  %v6089_v38 = vld [vmem:[#allocation4 + $0x7f0] sm:$0xff] }
0x1aa3   :  { %10158 = vmatpush1.bf16.msra.mxu1 %v10157_v52  ;;  %v5850_v52 = vld [vmem:[#allocation4 + $0x78] sm:$0xff] }
0x1aa4   :  { %10190 = vmatpush1.bf16.msra.mxu0 %v10189_v36  ;;  %10160 = vmatprep.subr.bf16.mxu1 %v10159_v50  ;;  %v5866_v36 = vld [vmem:[#allocation4 + $0xf8] sm:$0xff]  ;;  %v10177_v50 = vpack.c.bf16 %v6083_v60, %v6067_v14  ;;  %v10257_v14 = vpack.c.bf16 %v5961_v10, %v5945_v43  ;;  %v10227_v60 = vpack.c.bf16 %v5992_v44, %v5976_v42 }
0x1aa5   :  { %10192 = vmatprep.subr.bf16.mxu0 %v10191_v4  ;;  %v5863_v4 = vld [vmem:[#allocation4 + $0xe0] sm:$0xff]  ;;  %v10243_v54 = vpack.c.bf16 %v5866_v36, %v5850_v52  ;;  %v6008_v52 = vld [vmem:[#allocation4 + $0x568] sm:$0xff] }
0x1aa6   :  { %v6024_v36 = vld [vmem:[#allocation4 + $0x5e8] sm:$0xff] }
0x1aa7   :  { %10162 = vmatpush1.bf16.msra.mxu1 %v10161_v48  ;;  %v5882_v48 = vld [vmem:[#allocation4 + $0x178] sm:$0xff] }
0x1aa8   :  { %10194 = vmatpush1.bf16.msra.mxu0 %v10193_v37  ;;  %10164 = vmatprep.subr.bf16.mxu1 %v10163_v35  ;;  %v5898_v37 = vld [vmem:[#allocation4 + $0x1f8] sm:$0xff]  ;;  %v10213_v35 = vpack.c.bf16 %v5863_v4, %v5847_v30  ;;  %v10261_v30 = vpack.c.bf16 %v5993_v15, %v5977_v63  ;;  %v10231_v4 = vpack.c.bf16 %v6024_v36, %v6008_v52 }
0x1aa9   :  { %10196 = vmatprep.subr.bf16.mxu0 %v10195_v20  ;;  %v5895_v20 = vld [vmem:[#allocation4 + $0x1e0] sm:$0xff]  ;;  %v10247_v17 = vpack.c.bf16 %v5898_v37, %v5882_v48  ;;  %v6040_v48 = vld [vmem:[#allocation4 + $0x668] sm:$0xff] }
0x1aaa   :  { %v6056_v37 = vld [vmem:[#allocation4 + $0x6e8] sm:$0xff] }
0x1aab   :  { %10166 = vmatpush1.bf16.msra.mxu1 %v10165_v59  ;;  %v5914_v59 = vld [vmem:[#allocation4 + $0x278] sm:$0xff] }
0x1aac   :  { %10198 = vmatpush1.bf16.msra.mxu0 %v10197_v55  ;;  %10168 = vmatprep.subr.bf16.mxu1 %v10167_v57  ;;  %v5930_v55 = vld [vmem:[#allocation4 + $0x2f8] sm:$0xff]  ;;  %v10217_v57 = vpack.c.bf16 %v5895_v20, %v5879_v51  ;;  %v10265_v51 = vpack.c.bf16 %v6025_v49, %v6009_v0  ;;  %v10235_v20 = vpack.c.bf16 %v6056_v37, %v6040_v48 }
0x1aad   :  { %10200 = vmatprep.subr.bf16.mxu0 %v10199_v27  ;;  %v5927_v27 = vld [vmem:[#allocation4 + $0x2e0] sm:$0xff]  ;;  %v10251_v31 = vpack.c.bf16 %v5930_v55, %v5914_v59  ;;  %v6072_v59 = vld [vmem:[#allocation4 + $0x768] sm:$0xff] }
0x1aae   :  { %v6088_v55 = vld [vmem:[#allocation4 + $0x7e8] sm:$0xff] }
0x1aaf   :  { %10170 = vmatpush1.bf16.msra.mxu1 %v10169_v58  ;;  %v5946_v58 = vld [vmem:[#allocation4 + $0x378] sm:$0xff] }
0x1ab0   :  { %10202 = vmatpush1.bf16.msra.mxu0 %v10201_v22  ;;  %10172 = vmatprep.subr.bf16.mxu1 %v10171_v24  ;;  %v5962_v22 = vld [vmem:[#allocation4 + $0x3f8] sm:$0xff]  ;;  %v10221_v24 = vpack.c.bf16 %v5927_v27, %v5911_v34  ;;  %v10269_v34 = vpack.c.bf16 %v6057_v47, %v6041_v29  ;;  %v10239_v27 = vpack.c.bf16 %v6088_v55, %v6072_v59 }
0x1ab1   :  { %10204 = vmatprep.subr.bf16.mxu0 %v10203_v41  ;;  %v5959_v41 = vld [vmem:[#allocation4 + $0x3e0] sm:$0xff]  ;;  %v10255_v62 = vpack.c.bf16 %v5962_v22, %v5946_v58  ;;  %v10273_v22 = vpack.c.bf16 %v6089_v38, %v6073_v13 }
0x1ab3   :  { %10174 = vmatpush1.bf16.msra.mxu1 %v10173_v46  ;;  %v5978_v46 = vld [vmem:[#allocation4 + $0x478] sm:$0xff] }
0x1ab4   :  { %10206 = vmatpush1.bf16.msra.mxu0 %v10205_v3  ;;  %10176 = vmatprep.subr.bf16.mxu1 %v10175_v16  ;;  %v5994_v3 = vld [vmem:[#allocation4 + $0x4f8] sm:$0xff]  ;;  %v10225_v16 = vpack.c.bf16 %v5959_v41, %v5943_v25 }
0x1ab5   :  { %10208 = vmatprep.subr.bf16.mxu0 %v10207_v11  ;;  %v5991_v11 = vld [vmem:[#allocation4 + $0x4e0] sm:$0xff]  ;;  %v10259_v56 = vpack.c.bf16 %v5994_v3, %v5978_v46 }
0x1ab7   :  { %10178 = vmatpush1.bf16.msra.mxu1 %v10177_v50  ;;  %v6010_v50 = vld [vmem:[#allocation4 + $0x578] sm:$0xff] }
0x1ab8   :  { %10210 = vmatpush1.bf16.msra.mxu0 %v10209_v53  ;;  %10212 = vmatprep.subr.bf16.mxu1 %v10211_v23  ;;  %v6026_v53 = vld [vmem:[#allocation4 + $0x5f8] sm:$0xff]  ;;  %v10229_v23 = vpack.c.bf16 %v5991_v11, %v5975_v61 }
0x1ab9   :  { %10244 = vmatprep.subr.bf16.mxu0 %v10243_v54  ;;  %v6023_v54 = vld [vmem:[#allocation4 + $0x5e0] sm:$0xff]  ;;  %v10263_v32 = vpack.c.bf16 %v6026_v53, %v6010_v50 }
0x1aba   :  { %8156 = vmatmul.mubr.msk.f32.vlgmr.msra.gmra.mrb[52].mxu1 %vm5829_vm9, %v13752_v19  ;;  %v13959_v11 = vld [vmem:[#allocation59_spill] sm:$0xff] }
0x1abb   :  { %8157 = vmatmul.mubr.msk.f32.vlgmr.msra.gmra.mrb[76].mxu0 %vm5829_vm9, %v13752_v19  ;;  %10214 = vmatpush1.bf16.msra.mxu1 %v10213_v35  ;;  %v6042_v35 = vld [vmem:[#allocation4 + $0x678] sm:$0xff]  ;;  %v6113_v63 = vsub.s32 4, %v13959_v11  ;;  %v6117_v15 = vsub.s32 5, %v13959_v11  ;;  %v6125_v52 = vsub.s32 7, %v13959_v11 }
0x1abc   :  { %10246 = vmatpush1.bf16.msra.mxu0 %v10245_v18  ;;  %10216 = vmatprep.subr.bf16.mxu1 %v10215_v39  ;;  %v6058_v18 = vld [vmem:[#allocation4 + $0x6f8] sm:$0xff]  ;;  %v10233_v39 = vpack.c.bf16 %v6023_v54, %v6007_v7 }
0x1abd   :  { %10248 = vmatprep.subr.bf16.mxu0 %v10247_v17  ;;  %6665 = vmatprep.mubr.f32.mxu1 %v13950_v1  ;;  %v6055_v17 = vld [vmem:[#allocation4 + $0x6e0] sm:$0xff]  ;;  %v10267_v6 = vpack.c.bf16 %v6058_v18, %v6042_v35 }
0x1abe   :  { %6736 = vmatprep.mubr.f32.mxu0 %v13950_v1 }
0x1abf   :  { %10218 = vmatpush1.bf16.msra.mxu1 %v10217_v57  ;;  %v6074_v57 = vld [vmem:[#allocation4 + $0x778] sm:$0xff] }
0x1ac0   :  { %10250 = vmatpush1.bf16.msra.mxu0 %v10249_v9  ;;  %10220 = vmatprep.subr.bf16.mxu1 %v10219_v21  ;;  %v6090_v9 = vld [vmem:[#allocation4 + $0x7f8] sm:$0xff]  ;;  %v10237_v21 = vpack.c.bf16 %v6055_v17, %v6039_v26 }
0x1ac1   :  { %10252 = vmatprep.subr.bf16.mxu0 %v10251_v31  ;;  %v6087_v31 = vld [vmem:[#allocation4 + $0x7e0] sm:$0xff]  ;;  %v10271_v40 = vpack.c.bf16 %v6090_v9, %v6074_v57 }
0x1ac2   :  { %v10241_v58 = vpack.c.bf16 %v6087_v31, %v6071_v8 }
0x1ac3   :  { %10222 = vmatpush1.bf16.msra.mxu1 %v10221_v24  ;;  %v6091_v24 = vld [vmem:[#allocation26] sm:$0xff] }
0x1ac4   :  { %10254 = vmatpush1.bf16.msra.mxu0 %v10253_v5  ;;  %10224 = vmatprep.subr.bf16.mxu1 %v10223_v2  ;;  %v6098_v5 = vrot.slane %v6091_v24, %v13954_v33  ;;  %v6106_v2 = vrot.slane %v6091_v24, %v13956_v12  ;;  %v6102_v25 = vrot.slane %v6091_v24, %v13955_v45 }
0x1ac5   :  { %10256 = vmatprep.subr.bf16.mxu0 %v10255_v62  ;;  %v6110_v41 = vrot.slane %v6091_v24, %v13957_v28  ;;  %v6114_v36 = vrot.slane %v6091_v24, %v6113_v63  ;;  %v6118_v53 = vrot.slane %v6091_v24, %v6117_v15 }
0x1ac7   :  { %10226 = vmatpush1.bf16.msra.mxu1 %v10225_v16 }
0x1ac8   :  { %10258 = vmatpush1.bf16.msra.mxu0 %v10257_v14  ;;  %10228 = vmatprep.subr.bf16.mxu1 %v10227_v60 }
0x1ac9   :  { %10260 = vmatprep.subr.bf16.mxu0 %v10259_v56  ;;  %v6121_v56 = vsub.s32 6, %v13959_v11 }
0x1acb   :  { %10230 = vmatpush1.bf16.msra.mxu1 %v10229_v23  ;;  %v6122_v50 = vrot.slane %v6091_v24, %v6121_v56  ;;  %v6126_v23 = vrot.slane %v6091_v24, %v6125_v52 }
0x1acc   :  { %10262 = vmatpush1.bf16.msra.mxu0 %v10261_v30  ;;  %10232 = vmatprep.subr.bf16.mxu1 %v10231_v4 }
0x1acd   :  { %10264 = vmatprep.subr.bf16.mxu0 %v10263_v32 }
0x1acf   :  { %10234 = vmatpush1.bf16.msra.mxu1 %v10233_v39 }
0x1ad0   :  { %10266 = vmatpush1.bf16.msra.mxu0 %v10265_v51  ;;  %10236 = vmatprep.subr.bf16.mxu1 %v10235_v20  ;;  %v6092_v51 = vld [vmem:[#allocation26 + $0x8] sm:$0xff] }
0x1ad1   :  { %10268 = vmatprep.subr.bf16.mxu0 %v10267_v6  ;;  %v6130_v20 = vrot.slane %v6092_v51, %v13954_v33  ;;  %v6138_v26 = vrot.slane %v6092_v51, %v13956_v12  ;;  %v6134_v17 = vrot.slane %v6092_v51, %v13955_v45  ;;  %v6142_v29 = vrot.slane %v6092_v51, %v13957_v28 }
0x1ad2   :  { %v6146_v28 = vrot.slane %v6092_v51, %v6113_v63  ;;  %v6150_v13 = vrot.slane %v6092_v51, %v6117_v15  ;;  %v6158_v38 = vrot.slane %v6092_v51, %v6125_v52 }
0x1ad3   :  { %10238 = vmatpush1.bf16.msra.mxu1 %v10237_v21 }
0x1ad4   :  { %10270 = vmatpush1.bf16.msra.mxu0 %v10269_v34  ;;  %10240 = vmatprep.subr.bf16.mxu1 %v10239_v27 }
0x1ad5   :  { %10272 = vmatprep.subr.bf16.mxu0 %v10271_v40  ;;  %v6154_v40 = vrot.slane %v6092_v51, %v6121_v56 }
0x1ad7   :  { %10242 = vmatpush1.bf16.msra.mxu1 %v10241_v58 }
0x1ad8   :  { %10274 = vmatpush1.bf16.msra.mxu0 %v10273_v22 }
0x1ada   :  { %8158 = vmatmul.mubr.msk.f32.vlgmr.msra.gmra.mrb[54].mxu1 %vm5829_vm9, %v13752_v19 }
0x1adb   :  { %8159 = vmatmul.mubr.msk.f32.vlgmr.msra.gmra.mrb[78].mxu0 %vm5829_vm9, %v13752_v19 }
0x1b4d   :  { %v6241_v43 = vpop.f32.mrb[48].mxu1 }
0x1b4e   :  { %v6242_v62 = vadd.f32 %v6241_v43, %v6098_v5  ;;  %v6312_v10 = vpop.f32.mrb[72].mxu0  ;;  %v6243_v42 = vpop.f32.mrb[49].mxu1 }
0x1b4f   :  { %v6313_v44 = vadd.f32 %v6312_v10, %v6106_v2  ;;  %v6244_v46 = vadd.f32 %v6243_v42, %v6102_v25  ;;  %v6314_v3 = vpop.f32.mrb[73].mxu0 }
0x1b50   :  { %11323 = vtanh.f32 %v6242_v62  ;;  %v6315_v16 = vadd.f32 %v6314_v3, %v6110_v41 }
0x1b51   :  { %11325 = vtanh.f32 %v6313_v44 }
0x1b52   :  { %11327 = vtanh.f32 %v6244_v46 }
0x1b53   :  { %11329 = vtanh.f32 %v6315_v16 }
0x1b5a   :  { %v13782_v19 = vpop.eup %11323 }
0x1b5b   :  { %v13784_v14 = vpop.eup %11325 }
0x1b5c   :  { %v13786_v60 = vpop.eup %11327 }
0x1b5d   :  { %v13788_v61 = vpop.eup %11329 }
0x1b6d   :  { %v6383_v30 = vpop.f32.mrb[50].mxu1 }
0x1b6e   :  { %v6384_v4 = vadd.f32 %v6383_v30, %v6114_v36  ;;  %v6454_v7 = vpop.f32.mrb[74].mxu0  ;;  %v6385_v54 = vpop.f32.mrb[51].mxu1 }
0x1b6f   :  { %v6455_v0 = vadd.f32 %v6454_v7, %v6122_v50  ;;  %v6386_v32 = vadd.f32 %v6385_v54, %v6118_v53  ;;  %v6456_v49 = vpop.f32.mrb[75].mxu0 }
0x1b70   :  { %11331 = vtanh.f32 %v6384_v4  ;;  %v6457_v48 = vadd.f32 %v6456_v49, %v6126_v23 }
0x1b71   :  { %11333 = vtanh.f32 %v6455_v0 }
0x1b72   :  { %11335 = vtanh.f32 %v6386_v32 }
0x1b73   :  { %11337 = vtanh.f32 %v6457_v48 }
0x1b7a   :  { %v13794_v37 = vpop.eup %11331 }
0x1b7b   :  { %v13796_v35 = vpop.eup %11333 }
0x1b7c   :  { %v13798_v18 = vpop.eup %11335 }
0x1b7d   :  { %v11338_v39 = vpop.eup %11337 }
0x1b8d   :  { %v6525_v6 = vpop.f32.mrb[52].mxu1 }
0x1b8e   :  { %v6526_v47 = vadd.f32 %v6525_v6, %v6130_v20  ;;  %v6596_v59 = vpop.f32.mrb[76].mxu0  ;;  %v6527_v55 = vpop.f32.mrb[53].mxu1 }
0x1b8f   :  { %v6597_v57 = vadd.f32 %v6596_v59, %v6138_v26  ;;  %v6528_v9 = vadd.f32 %v6527_v55, %v6134_v17  ;;  %v6598_v21 = vpop.f32.mrb[77].mxu0 }
0x1b90   :  { %11339 = vtanh.f32 %v6526_v47  ;;  %v6599_v34 = vadd.f32 %v6598_v21, %v6142_v29 }
0x1b91   :  { %11341 = vtanh.f32 %v6597_v57 }
0x1b92   :  { %11343 = vtanh.f32 %v6528_v9 }
0x1b93   :  { %11345 = vtanh.f32 %v6599_v34 }
0x1b9a   :  { %v13804_v27 = vpop.eup %11339 }
0x1b9b   :  { %v13806_v8 = vpop.eup %11341 }
0x1b9c   :  { %v13808_v12 = vpop.eup %11343 }
0x1b9d   :  { %v13810_v31 = vpop.eup %11345 }
0x1bad   :  { %v6667_v58 = vpop.f32.mrb[54].mxu1 }
0x1bae   :  { %v6668_v22 = vadd.f32 %v6667_v58, %v6146_v28  ;;  %v6738_v24 = vpop.f32.mrb[78].mxu0  ;;  %v6669_v5 = vpop.f32.mrb[55].mxu1 }
0x1baf   :  { %v6739_v2 = vadd.f32 %v6738_v24, %v6154_v40  ;;  %v6670_v25 = vadd.f32 %v6669_v5, %v6150_v13  ;;  %v6740_v41 = vpop.f32.mrb[79].mxu0 }
0x1bb0   :  { %11347 = vtanh.f32 %v6668_v22  ;;  %v6741_v43 = vadd.f32 %v6740_v41, %v6158_v38 }
0x1bb1   :  { %11349 = vtanh.f32 %v6739_v2 }
0x1bb2   :  { %11351 = vtanh.f32 %v6670_v25 }
0x1bb3   :  { %11353 = vtanh.f32 %v6741_v43 }
0x1bba   :  { %v13812_v62 = vpop.eup %11347 }
0x1bbb   :  { %v13814_v10 = vpop.eup %11349 }
0x1bbc   :  { %v13816_v42 = vpop.eup %11351 }
0x1bbd   :  { %v13818_v44 = vpop.eup %11353 }
0x1bbe   :  { %11855 = dma.done.wait [#allocation6 + $0x1], 65536 }
0x1bbf   :  { %11856 = vsyncadd [#allocation6 + $0x1], 4294901760  ;;  %7351 = vmatprep.mubr.f32.mxu0 %v13786_v60  ;;  %7564 = vmatprep.mubr.f32.mxu1 %v11338_v39  ;;  %v6764_v46 = vld [vmem:[#allocation5 + $0x8] sm:$0xff]  ;;  %v6766_v3 = vld [vmem:[#allocation5 + $0x18] sm:$0xff]  ;;  %vm11887_vm11 = vmmov 0   ;;  %s11888_s3 = smov [#allocation36]  }
0x1bc0   :  { %v6956_v16 = vld [vmem:[#allocation5 + $0x608] sm:$0xff]  ;;  %v10275_v11 = vpack.c.bf16 %v6766_v3, %v6764_v46  ;;  %v6958_v63 = vld [vmem:[#allocation5 + $0x618] sm:$0xff]  ;;  %v6763_v56 = vld [vmem:[#allocation5] sm:$0xff]  ;;  %s8076_s28 = sshll.u32 %s11888_s3, 4  ;;  %s8077_s28 = int_to_ptr.vmem [resolvable:$true] %s8076_s28 }
0x1bc1   :  { %v6765_v15 = vld [vmem:[#allocation5 + $0x10] sm:$0xff]  ;;  %v10467_v52 = vpack.c.bf16 %v6958_v63, %v6956_v16  ;;  %v6955_v50 = vld [vmem:[#allocation5 + $0x600] sm:$0xff]  ;;  %v6768_v23 = vld [vmem:[#allocation5 + $0x28] sm:$0xff]  ;;  %s11767_s2 = scalar_lea.vmem %s8077_s28, 384  ;;  %p11772_p8 = scmp.lt.s32.totalorder %s8077_s28, %s8077_s28 }
0x1bc2   :  { %v10277_v36 = vpack.c.bf16 %v6765_v15, %v6763_v56  ;;  %v6957_v53 = vld [vmem:[#allocation5 + $0x610] sm:$0xff]  ;;  %10276 = vmatprep.subr.bf16.mxu0 %v10275_v11  ;;  %v6770_v4 = vld [vmem:[#allocation5 + $0x38] sm:$0xff]  ;;  %v6960_v7 = vld [vmem:[#allocation5 + $0x628] sm:$0xff]  ;;  %p11768_p7 = scmp.ne.s32.totalorder %s8077_s28, %s11767_s2  ;;  %p11773_p9 = scmp.lt.s32.totalorder %s11767_s2, %s11767_s2 }
0x1bc3   :  { %v10469_v30 = vpack.c.bf16 %v6957_v53, %v6955_v50  ;;  %v6962_v54 = vld [vmem:[#allocation5 + $0x638] sm:$0xff]  ;;  %10468 = vmatprep.subr.bf16.mxu1 %v10467_v52  ;;  %v10279_v60 = vpack.c.bf16 %v6770_v4, %v6768_v23  ;;  %v6767_v32 = vld [vmem:[#allocation5 + $0x20] sm:$0xff]  ;;  %v6769_v49 = vld [vmem:[#allocation5 + $0x30] sm:$0xff] }
0x1bc4   :  { %10278 = vmatpush1.bf16.msra.mxu0 %v10277_v36  ;;  %v10471_v0 = vpack.c.bf16 %v6962_v54, %v6960_v7  ;;  %v6959_v48 = vld [vmem:[#allocation5 + $0x620] sm:$0xff]  ;;  %v10281_v39 = vpack.c.bf16 %v6769_v49, %v6767_v32  ;;  %v6961_v51 = vld [vmem:[#allocation5 + $0x630] sm:$0xff]  ;;  %v6772_v20 = vld [vmem:[#allocation5 + $0x48] sm:$0xff]  ;;  %p11774_p10 = por %p11773_p9, %p11772_p8 }
0x1bc5   :  { %10470 = vmatpush1.bf16.msra.mxu1 %v10469_v30  ;;  %v6774_v26 = vld [vmem:[#allocation5 + $0x58] sm:$0xff]  ;;  %10280 = vmatprep.subr.bf16.mxu0 %v10279_v60  ;;  %v10473_v17 = vpack.c.bf16 %v6961_v51, %v6959_v48  ;;  %v6964_v6 = vld [vmem:[#allocation5 + $0x648] sm:$0xff]  ;;  %v6771_v59 = vld [vmem:[#allocation5 + $0x40] sm:$0xff] }
0x1bc6   :  { %10472 = vmatprep.subr.bf16.mxu1 %v10471_v0  ;;  %v10283_v29 = vpack.c.bf16 %v6774_v26, %v6772_v20  ;;  %v6966_v47 = vld [vmem:[#allocation5 + $0x658] sm:$0xff]  ;;  %v6773_v57 = vld [vmem:[#allocation5 + $0x50] sm:$0xff]  ;;  %v6963_v9 = vld [vmem:[#allocation5 + $0x640] sm:$0xff]  ;;  %p11775_p11 = pnand %p11774_p10, %p11768_p7 }
0x1bc7   :  { %v10475_v55 = vpack.c.bf16 %v6966_v47, %v6964_v6  ;;  %v6965_v21 = vld [vmem:[#allocation5 + $0x650] sm:$0xff]  ;;  %v10285_v34 = vpack.c.bf16 %v6773_v57, %v6771_v59  ;;  %v6776_v28 = vld [vmem:[#allocation5 + $0x68] sm:$0xff]  ;;  %v6778_v40 = vld [vmem:[#allocation5 + $0x78] sm:$0xff] }
0x1bc8   :  { %10282 = vmatpush1.bf16.msra.mxu0 %v10281_v39  ;;  %v6968_v13 = vld [vmem:[#allocation5 + $0x668] sm:$0xff]  ;;  %v10477_v38 = vpack.c.bf16 %v6965_v21, %v6963_v9  ;;  %v10287_v58 = vpack.c.bf16 %v6778_v40, %v6776_v28  ;;  %v6970_v22 = vld [vmem:[#allocation5 + $0x678] sm:$0xff]  ;;  %v6775_v24 = vld [vmem:[#allocation5 + $0x60] sm:$0xff] }
0x1bc9   :  { %10474 = vmatpush1.bf16.msra.mxu1 %v10473_v17  ;;  %10284 = vmatprep.subr.bf16.mxu0 %v10283_v29  ;;  %v6777_v5 = vld [vmem:[#allocation5 + $0x70] sm:$0xff]  ;;  %v10479_v2 = vpack.c.bf16 %v6970_v22, %v6968_v13  ;;  %v6967_v25 = vld [vmem:[#allocation5 + $0x660] sm:$0xff]  ;;  %v6780_v43 = vld [vmem:[#allocation5 + $0x88] sm:$0xff] }
0x1bca   :  { %10476 = vmatprep.subr.bf16.mxu1 %v10475_v55  ;;  %v6969_v41 = vld [vmem:[#allocation5 + $0x670] sm:$0xff]  ;;  %v6782_v46 = vld [vmem:[#allocation5 + $0x98] sm:$0xff]  ;;  %v6972_v3 = vld [vmem:[#allocation5 + $0x688] sm:$0xff]  ;;  %v10289_v11 = vpack.c.bf16 %v6777_v5, %v6775_v24 }
0x1bcb   :  { %v6974_v16 = vld [vmem:[#allocation5 + $0x698] sm:$0xff]  ;;  %v10481_v63 = vpack.c.bf16 %v6969_v41, %v6967_v25  ;;  %v10291_v56 = vpack.c.bf16 %v6782_v46, %v6780_v43  ;;  %v6779_v15 = vld [vmem:[#allocation5 + $0x80] sm:$0xff]  ;;  %v6781_v52 = vld [vmem:[#allocation5 + $0x90] sm:$0xff] }
0x1bcc   :  { %10286 = vmatpush1.bf16.msra.mxu0 %v10285_v34  ;;  %v6971_v36 = vld [vmem:[#allocation5 + $0x680] sm:$0xff]  ;;  %v10483_v50 = vpack.c.bf16 %v6974_v16, %v6972_v3  ;;  %v6973_v53 = vld [vmem:[#allocation5 + $0x690] sm:$0xff]  ;;  %v6784_v23 = vld [vmem:[#allocation5 + $0xa8] sm:$0xff]  ;;  %v10293_v54 = vpack.c.bf16 %v6781_v52, %v6779_v15 }
0x1bcd   :  { %10478 = vmatpush1.bf16.msra.mxu1 %v10477_v38  ;;  %10288 = vmatprep.subr.bf16.mxu0 %v10287_v58  ;;  %v6786_v30 = vld [vmem:[#allocation5 + $0xb8] sm:$0xff]  ;;  %v6976_v4 = vld [vmem:[#allocation5 + $0x6a8] sm:$0xff]  ;;  %v10485_v60 = vpack.c.bf16 %v6973_v53, %v6971_v36  ;;  %v6783_v32 = vld [vmem:[#allocation5 + $0xa0] sm:$0xff] }
0x1bce   :  { %10480 = vmatprep.subr.bf16.mxu1 %v10479_v2  ;;  %v6978_v7 = vld [vmem:[#allocation5 + $0x6b8] sm:$0xff]  ;;  %v10295_v0 = vpack.c.bf16 %v6786_v30, %v6784_v23  ;;  %v6785_v49 = vld [vmem:[#allocation5 + $0xb0] sm:$0xff]  ;;  %v6975_v48 = vld [vmem:[#allocation5 + $0x6a0] sm:$0xff] }
0x1bcf   :  { %v10487_v39 = vpack.c.bf16 %v6978_v7, %v6976_v4  ;;  %v6977_v51 = vld [vmem:[#allocation5 + $0x6b0] sm:$0xff]  ;;  %v6788_v20 = vld [vmem:[#allocation5 + $0xc8] sm:$0xff]  ;;  %v6790_v26 = vld [vmem:[#allocation5 + $0xd8] sm:$0xff]  ;;  %v10297_v6 = vpack.c.bf16 %v6785_v49, %v6783_v32 }
0x1bd0   :  { %10290 = vmatpush1.bf16.msra.mxu0 %v10289_v11  ;;  %v6980_v17 = vld [vmem:[#allocation5 + $0x6c8] sm:$0xff]  ;;  %v6982_v29 = vld [vmem:[#allocation5 + $0x6d8] sm:$0xff]  ;;  %v10489_v47 = vpack.c.bf16 %v6977_v51, %v6975_v48  ;;  %v10299_v59 = vpack.c.bf16 %v6790_v26, %v6788_v20  ;;  %v6787_v55 = vld [vmem:[#allocation5 + $0xc0] sm:$0xff] }
0x1bd1   :  { %10482 = vmatpush1.bf16.msra.mxu1 %v10481_v63  ;;  %10292 = vmatprep.subr.bf16.mxu0 %v10291_v56  ;;  %v6789_v57 = vld [vmem:[#allocation5 + $0xd0] sm:$0xff]  ;;  %v6979_v9 = vld [vmem:[#allocation5 + $0x6c0] sm:$0xff]  ;;  %v10491_v21 = vpack.c.bf16 %v6982_v29, %v6980_v17  ;;  %v6792_v28 = vld [vmem:[#allocation5 + $0xe8] sm:$0xff] }
0x1bd2   :  { %10484 = vmatprep.subr.bf16.mxu1 %v10483_v50  ;;  %v6981_v34 = vld [vmem:[#allocation5 + $0x6d0] sm:$0xff]  ;;  %v6794_v40 = vld [vmem:[#allocation5 + $0xf8] sm:$0xff]  ;;  %v6984_v13 = vld [vmem:[#allocation5 + $0x6e8] sm:$0xff]  ;;  %v10301_v58 = vpack.c.bf16 %v6789_v57, %v6787_v55 }
0x1bd3   :  { %v6986_v38 = vld [vmem:[#allocation5 + $0x6f8] sm:$0xff]  ;;  %v10493_v22 = vpack.c.bf16 %v6981_v34, %v6979_v9  ;;  %v10303_v24 = vpack.c.bf16 %v6794_v40, %v6792_v28  ;;  %v6791_v5 = vld [vmem:[#allocation5 + $0xe0] sm:$0xff]  ;;  %v6793_v2 = vld [vmem:[#allocation5 + $0xf0] sm:$0xff] }
0x1bd4   :  { %10294 = vmatpush1.bf16.msra.mxu0 %v10293_v54  ;;  %v6983_v25 = vld [vmem:[#allocation5 + $0x6e0] sm:$0xff]  ;;  %v10495_v41 = vpack.c.bf16 %v6986_v38, %v6984_v13  ;;  %v6985_v43 = vld [vmem:[#allocation5 + $0x6f0] sm:$0xff]  ;;  %v6796_v46 = vld [vmem:[#allocation5 + $0x108] sm:$0xff]  ;;  %v10305_v63 = vpack.c.bf16 %v6793_v2, %v6791_v5 }
0x1bd5   :  { %10486 = vmatpush1.bf16.msra.mxu1 %v10485_v60  ;;  %10296 = vmatprep.subr.bf16.mxu0 %v10295_v0  ;;  %v6798_v3 = vld [vmem:[#allocation5 + $0x118] sm:$0xff]  ;;  %v6988_v16 = vld [vmem:[#allocation5 + $0x708] sm:$0xff]  ;;  %v10497_v56 = vpack.c.bf16 %v6985_v43, %v6983_v25  ;;  %v6795_v52 = vld [vmem:[#allocation5 + $0x100] sm:$0xff] }
0x1bd6   :  { %10488 = vmatprep.subr.bf16.mxu1 %v10487_v39  ;;  %v6990_v11 = vld [vmem:[#allocation5 + $0x718] sm:$0xff]  ;;  %v10307_v15 = vpack.c.bf16 %v6798_v3, %v6796_v46  ;;  %v6797_v36 = vld [vmem:[#allocation5 + $0x110] sm:$0xff]  ;;  %v6987_v50 = vld [vmem:[#allocation5 + $0x700] sm:$0xff] }
0x1bd7   :  { %v10499_v53 = vpack.c.bf16 %v6990_v11, %v6988_v16  ;;  %v6989_v23 = vld [vmem:[#allocation5 + $0x710] sm:$0xff]  ;;  %v6800_v30 = vld [vmem:[#allocation5 + $0x128] sm:$0xff]  ;;  %v6802_v4 = vld [vmem:[#allocation5 + $0x138] sm:$0xff]  ;;  %v10309_v60 = vpack.c.bf16 %v6797_v36, %v6795_v52 }
0x1bd8   :  { %10298 = vmatpush1.bf16.msra.mxu0 %v10297_v6  ;;  %v6992_v7 = vld [vmem:[#allocation5 + $0x728] sm:$0xff]  ;;  %v6994_v54 = vld [vmem:[#allocation5 + $0x738] sm:$0xff]  ;;  %v10501_v0 = vpack.c.bf16 %v6989_v23, %v6987_v50  ;;  %v10311_v32 = vpack.c.bf16 %v6802_v4, %v6800_v30  ;;  %v6799_v49 = vld [vmem:[#allocation5 + $0x120] sm:$0xff] }
0x1bd9   :  { %10490 = vmatpush1.bf16.msra.mxu1 %v10489_v47  ;;  %10300 = vmatprep.subr.bf16.mxu0 %v10299_v59  ;;  %v6801_v48 = vld [vmem:[#allocation5 + $0x130] sm:$0xff]  ;;  %v6991_v39 = vld [vmem:[#allocation5 + $0x720] sm:$0xff]  ;;  %v10503_v51 = vpack.c.bf16 %v6994_v54, %v6992_v7  ;;  %v6804_v26 = vld [vmem:[#allocation5 + $0x148] sm:$0xff] }
0x1bda   :  { %10492 = vmatprep.subr.bf16.mxu1 %v10491_v21  ;;  %v6993_v20 = vld [vmem:[#allocation5 + $0x730] sm:$0xff]  ;;  %v6806_v17 = vld [vmem:[#allocation5 + $0x158] sm:$0xff]  ;;  %v6996_v29 = vld [vmem:[#allocation5 + $0x748] sm:$0xff]  ;;  %v10313_v47 = vpack.c.bf16 %v6801_v48, %v6799_v49 }
0x1bdb   :  { %v6998_v6 = vld [vmem:[#allocation5 + $0x758] sm:$0xff]  ;;  %v10505_v59 = vpack.c.bf16 %v6993_v20, %v6991_v39  ;;  %v10315_v55 = vpack.c.bf16 %v6806_v17, %v6804_v26  ;;  %v6803_v57 = vld [vmem:[#allocation5 + $0x140] sm:$0xff]  ;;  %v6805_v9 = vld [vmem:[#allocation5 + $0x150] sm:$0xff] }
0x1bdc   :  { %10302 = vmatpush1.bf16.msra.mxu0 %v10301_v58  ;;  %v6995_v21 = vld [vmem:[#allocation5 + $0x740] sm:$0xff]  ;;  %v10507_v34 = vpack.c.bf16 %v6998_v6, %v6996_v29  ;;  %v6997_v28 = vld [vmem:[#allocation5 + $0x750] sm:$0xff]  ;;  %v6808_v40 = vld [vmem:[#allocation5 + $0x168] sm:$0xff] }
0x1bdd   :  { %10494 = vmatpush1.bf16.msra.mxu1 %v10493_v22  ;;  %10304 = vmatprep.subr.bf16.mxu0 %v10303_v24  ;;  %v6810_v13 = vld [vmem:[#allocation5 + $0x178] sm:$0xff]  ;;  %v7000_v38 = vld [vmem:[#allocation5 + $0x768] sm:$0xff]  ;;  %v10317_v22 = vpack.c.bf16 %v6805_v9, %v6803_v57  ;;  %v10509_v24 = vpack.c.bf16 %v6997_v28, %v6995_v21  ;;  %v6807_v2 = vld [vmem:[#allocation5 + $0x160] sm:$0xff] }
0x1bde   :  { %10496 = vmatprep.subr.bf16.mxu1 %v10495_v41  ;;  %v7002_v58 = vld [vmem:[#allocation5 + $0x778] sm:$0xff]  ;;  %v10319_v5 = vpack.c.bf16 %v6810_v13, %v6808_v40  ;;  %v6809_v25 = vld [vmem:[#allocation5 + $0x170] sm:$0xff]  ;;  %v6999_v41 = vld [vmem:[#allocation5 + $0x760] sm:$0xff] }
0x1bdf   :  { %v10511_v43 = vpack.c.bf16 %v7002_v58, %v7000_v38  ;;  %v7001_v46 = vld [vmem:[#allocation5 + $0x770] sm:$0xff]  ;;  %v6812_v3 = vld [vmem:[#allocation5 + $0x188] sm:$0xff]  ;;  %v6814_v16 = vld [vmem:[#allocation5 + $0x198] sm:$0xff] }
0x1be0   :  { %10306 = vmatpush1.bf16.msra.mxu0 %v10305_v63  ;;  %v7004_v11 = vld [vmem:[#allocation5 + $0x788] sm:$0xff]  ;;  %v7006_v63 = vld [vmem:[#allocation5 + $0x798] sm:$0xff]  ;;  %v10323_v52 = vpack.c.bf16 %v6814_v16, %v6812_v3  ;;  %v6811_v36 = vld [vmem:[#allocation5 + $0x180] sm:$0xff] }
0x1be1   :  { %10498 = vmatpush1.bf16.msra.mxu1 %v10497_v56  ;;  %10308 = vmatprep.subr.bf16.mxu0 %v10307_v15  ;;  %v10321_v56 = vpack.c.bf16 %v6809_v25, %v6807_v2  ;;  %v10513_v15 = vpack.c.bf16 %v7001_v46, %v6999_v41  ;;  %v6813_v50 = vld [vmem:[#allocation5 + $0x190] sm:$0xff]  ;;  %v10515_v23 = vpack.c.bf16 %v7006_v63, %v7004_v11  ;;  %v6816_v4 = vld [vmem:[#allocation5 + $0x1a8] sm:$0xff]  ;;  %v6818_v7 = vld [vmem:[#allocation5 + $0x1b8] sm:$0xff] }
0x1be2   :  { %10500 = vmatprep.subr.bf16.mxu1 %v10499_v53  ;;  %v7003_v53 = vld [vmem:[#allocation5 + $0x780] sm:$0xff]  ;;  %v7005_v30 = vld [vmem:[#allocation5 + $0x790] sm:$0xff]  ;;  %v7008_v54 = vld [vmem:[#allocation5 + $0x7a8] sm:$0xff]  ;;  %v10327_v49 = vpack.c.bf16 %v6818_v7, %v6816_v4 }
0x1be3   :  { %v6815_v48 = vld [vmem:[#allocation5 + $0x1a0] sm:$0xff]  ;;  %v6817_v39 = vld [vmem:[#allocation5 + $0x1b0] sm:$0xff]  ;;  %v6820_v17 = vld [vmem:[#allocation5 + $0x1c8] sm:$0xff] }
0x1be4   :  { %10310 = vmatpush1.bf16.msra.mxu0 %v10309_v60  ;;  %v7010_v60 = vld [vmem:[#allocation5 + $0x7b8] sm:$0xff]  ;;  %v7009_v26 = vld [vmem:[#allocation5 + $0x7b0] sm:$0xff]  ;;  %v7012_v6 = vld [vmem:[#allocation5 + $0x7c8] sm:$0xff] }
0x1be5   :  { %10502 = vmatpush1.bf16.msra.mxu1 %v10501_v0  ;;  %10312 = vmatprep.subr.bf16.mxu0 %v10311_v32  ;;  %v10325_v0 = vpack.c.bf16 %v6813_v50, %v6811_v36  ;;  %v10517_v32 = vpack.c.bf16 %v7005_v30, %v7003_v53  ;;  %v10519_v20 = vpack.c.bf16 %v7010_v60, %v7008_v54  ;;  %v6822_v29 = vld [vmem:[#allocation5 + $0x1d8] sm:$0xff]  ;;  %v6819_v9 = vld [vmem:[#allocation5 + $0x1c0] sm:$0xff]  ;;  %v6821_v21 = vld [vmem:[#allocation5 + $0x1d0] sm:$0xff] }
0x1be6   :  { %10504 = vmatprep.subr.bf16.mxu1 %v10503_v51  ;;  %v7007_v51 = vld [vmem:[#allocation5 + $0x7a0] sm:$0xff]  ;;  %v10331_v57 = vpack.c.bf16 %v6822_v29, %v6820_v17  ;;  %v7013_v40 = vld [vmem:[#allocation5 + $0x7d0] sm:$0xff]  ;;  %v6824_v13 = vld [vmem:[#allocation5 + $0x1e8] sm:$0xff] }
0x1be7   :  { %v6826_v38 = vld [vmem:[#allocation5 + $0x1f8] sm:$0xff]  ;;  %v7016_v58 = vld [vmem:[#allocation5 + $0x7e8] sm:$0xff]  ;;  %v6823_v25 = vld [vmem:[#allocation5 + $0x1e0] sm:$0xff] }
0x1be8   :  { %10314 = vmatpush1.bf16.msra.mxu0 %v10313_v47  ;;  %v7014_v47 = vld [vmem:[#allocation5 + $0x7d8] sm:$0xff]  ;;  %v10335_v2 = vpack.c.bf16 %v6826_v38, %v6824_v13  ;;  %v6825_v41 = vld [vmem:[#allocation5 + $0x1f0] sm:$0xff]  ;;  %v6828_v16 = vld [vmem:[#allocation5 + $0x208] sm:$0xff] }
0x1be9   :  { %10506 = vmatpush1.bf16.msra.mxu1 %v10505_v59  ;;  %10316 = vmatprep.subr.bf16.mxu0 %v10315_v55  ;;  %v10329_v59 = vpack.c.bf16 %v6817_v39, %v6815_v48  ;;  %v10521_v55 = vpack.c.bf16 %v7009_v26, %v7007_v51  ;;  %v10523_v28 = vpack.c.bf16 %v7014_v47, %v7012_v6  ;;  %v7017_v3 = vld [vmem:[#allocation5 + $0x7f0] sm:$0xff]  ;;  %v6830_v11 = vld [vmem:[#allocation5 + $0x218] sm:$0xff]  ;;  %v7020_v63 = vld [vmem:[#allocation5 + $0x808] sm:$0xff] }
0x1bea   :  { %10508 = vmatprep.subr.bf16.mxu1 %v10507_v34  ;;  %v7011_v34 = vld [vmem:[#allocation5 + $0x7c0] sm:$0xff]  ;;  %v10339_v36 = vpack.c.bf16 %v6830_v11, %v6828_v16  ;;  %v6829_v53 = vld [vmem:[#allocation5 + $0x210] sm:$0xff]  ;;  %v6832_v7 = vld [vmem:[#allocation5 + $0x228] sm:$0xff] }
0x1beb   :  { %v6827_v50 = vld [vmem:[#allocation5 + $0x200] sm:$0xff]  ;;  %v7021_v4 = vld [vmem:[#allocation5 + $0x810] sm:$0xff]  ;;  %v6834_v54 = vld [vmem:[#allocation5 + $0x238] sm:$0xff] }
0x1bec   :  { %10318 = vmatpush1.bf16.msra.mxu0 %v10317_v22  ;;  %v7018_v22 = vld [vmem:[#allocation5 + $0x7f8] sm:$0xff]  ;;  %v7024_v60 = vld [vmem:[#allocation5 + $0x828] sm:$0xff]  ;;  %v10343_v48 = vpack.c.bf16 %v6834_v54, %v6832_v7  ;;  %v6831_v39 = vld [vmem:[#allocation5 + $0x220] sm:$0xff] }
0x1bed   :  { %10510 = vmatpush1.bf16.msra.mxu1 %v10509_v24  ;;  %10320 = vmatprep.subr.bf16.mxu0 %v10319_v5  ;;  %v10333_v24 = vpack.c.bf16 %v6821_v21, %v6819_v9  ;;  %v10525_v5 = vpack.c.bf16 %v7013_v40, %v7011_v34  ;;  %v10527_v46 = vpack.c.bf16 %v7018_v22, %v7016_v58  ;;  %v6833_v51 = vld [vmem:[#allocation5 + $0x230] sm:$0xff]  ;;  %v6836_v29 = vld [vmem:[#allocation5 + $0x248] sm:$0xff]  ;;  %v6838_v6 = vld [vmem:[#allocation5 + $0x258] sm:$0xff] }
0x1bee   :  { %10512 = vmatprep.subr.bf16.mxu1 %v10511_v43  ;;  %v7015_v43 = vld [vmem:[#allocation5 + $0x7e0] sm:$0xff]  ;;  %v7025_v17 = vld [vmem:[#allocation5 + $0x830] sm:$0xff]  ;;  %v7028_v47 = vld [vmem:[#allocation5 + $0x848] sm:$0xff]  ;;  %v10347_v9 = vpack.c.bf16 %v6838_v6, %v6836_v29 }
0x1bef   :  { %v6835_v21 = vld [vmem:[#allocation5 + $0x240] sm:$0xff]  ;;  %v6837_v34 = vld [vmem:[#allocation5 + $0x250] sm:$0xff]  ;;  %v6840_v38 = vld [vmem:[#allocation5 + $0x268] sm:$0xff] }
0x1bf0   :  { %10322 = vmatpush1.bf16.msra.mxu0 %v10321_v56  ;;  %v7022_v56 = vld [vmem:[#allocation5 + $0x818] sm:$0xff]  ;;  %v7029_v13 = vld [vmem:[#allocation5 + $0x850] sm:$0xff]  ;;  %v7036_v11 = vld [vmem:[#allocation5 + $0x888] sm:$0xff] }
0x1bf1   :  { %10514 = vmatpush1.bf16.msra.mxu1 %v10513_v15  ;;  %10324 = vmatprep.subr.bf16.mxu0 %v10323_v52  ;;  %v10337_v15 = vpack.c.bf16 %v6825_v41, %v6823_v25  ;;  %v10529_v52 = vpack.c.bf16 %v7017_v3, %v7015_v43  ;;  %v10531_v30 = vpack.c.bf16 %v7022_v56, %v7020_v63  ;;  %v6842_v58 = vld [vmem:[#allocation5 + $0x278] sm:$0xff]  ;;  %v6841_v25 = vld [vmem:[#allocation5 + $0x270] sm:$0xff]  ;;  %v7031_v41 = vld [vmem:[#allocation5 + $0x860] sm:$0xff] }
0x1bf2   :  { %10516 = vmatprep.subr.bf16.mxu1 %v10515_v23  ;;  %v7019_v23 = vld [vmem:[#allocation5 + $0x800] sm:$0xff]  ;;  %v7034_v22 = vld [vmem:[#allocation5 + $0x878] sm:$0xff]  ;;  %v6844_v3 = vld [vmem:[#allocation5 + $0x288] sm:$0xff] }
0x1bf3   :  { %v6846_v16 = vld [vmem:[#allocation5 + $0x298] sm:$0xff] }
0x1bf4   :  { %10326 = vmatpush1.bf16.msra.mxu0 %v10325_v0  ;;  %v7026_v0 = vld [vmem:[#allocation5 + $0x838] sm:$0xff]  ;;  %v10355_v56 = vpack.c.bf16 %v6846_v16, %v6844_v3 }
0x1bf5   :  { %10518 = vmatpush1.bf16.msra.mxu1 %v10517_v32  ;;  %10328 = vmatprep.subr.bf16.mxu0 %v10327_v49  ;;  %v10341_v32 = vpack.c.bf16 %v6829_v53, %v6827_v50  ;;  %v10533_v49 = vpack.c.bf16 %v7021_v4, %v7019_v23  ;;  %v10535_v26 = vpack.c.bf16 %v7026_v0, %v7024_v60  ;;  %v7037_v53 = vld [vmem:[#allocation5 + $0x890] sm:$0xff]  ;;  %v6848_v23 = vld [vmem:[#allocation5 + $0x2a8] sm:$0xff]  ;;  %v7042_v7 = vld [vmem:[#allocation5 + $0x8b8] sm:$0xff] }
0x1bf6   :  { %10520 = vmatprep.subr.bf16.mxu1 %v10519_v20  ;;  %v7023_v20 = vld [vmem:[#allocation5 + $0x820] sm:$0xff]  ;;  %v7040_v4 = vld [vmem:[#allocation5 + $0x8a8] sm:$0xff]  ;;  %v7046_v29 = vld [vmem:[#allocation5 + $0x8d8] sm:$0xff] }
0x1bf7   :  { %v7054_v3 = vld [vmem:[#allocation5 + $0x918] sm:$0xff] }
0x1bf8   :  { %10330 = vmatpush1.bf16.msra.mxu0 %v10329_v59  ;;  %v7030_v59 = vld [vmem:[#allocation5 + $0x858] sm:$0xff] }
0x1bf9   :  { %10522 = vmatpush1.bf16.msra.mxu1 %v10521_v55  ;;  %10332 = vmatprep.subr.bf16.mxu0 %v10331_v57  ;;  %v10345_v55 = vpack.c.bf16 %v6833_v51, %v6831_v39  ;;  %v10537_v57 = vpack.c.bf16 %v7025_v17, %v7023_v20  ;;  %v10539_v40 = vpack.c.bf16 %v7030_v59, %v7028_v47  ;;  %v7041_v51 = vld [vmem:[#allocation5 + $0x8b0] sm:$0xff]  ;;  %v6852_v20 = vld [vmem:[#allocation5 + $0x2c8] sm:$0xff] }
0x1bfa   :  { %10524 = vmatprep.subr.bf16.mxu1 %v10523_v28  ;;  %v7027_v28 = vld [vmem:[#allocation5 + $0x840] sm:$0xff]  ;;  %v10551_v39 = vpack.c.bf16 %v7042_v7, %v7040_v4  ;;  %v7044_v17 = vld [vmem:[#allocation5 + $0x8c8] sm:$0xff] }
0x1bfc   :  { %10334 = vmatpush1.bf16.msra.mxu0 %v10333_v24  ;;  %v10541_v24 = vpack.c.bf16 %v7029_v13, %v7027_v28  ;;  %v6856_v28 = vld [vmem:[#allocation5 + $0x2e8] sm:$0xff] }
0x1bfd   :  { %10526 = vmatpush1.bf16.msra.mxu1 %v10525_v5  ;;  %10336 = vmatprep.subr.bf16.mxu0 %v10335_v2  ;;  %v10351_v5 = vpack.c.bf16 %v6842_v58, %v6840_v38  ;;  %v6839_v2 = vld [vmem:[#allocation5 + $0x260] sm:$0xff]  ;;  %v7048_v13 = vld [vmem:[#allocation5 + $0x8e8] sm:$0xff]  ;;  %v7050_v38 = vld [vmem:[#allocation5 + $0x8f8] sm:$0xff] }
0x1bfe   :  { %10528 = vmatprep.subr.bf16.mxu1 %v10527_v46  ;;  %v7033_v46 = vld [vmem:[#allocation5 + $0x870] sm:$0xff]  ;;  %v10353_v63 = vpack.c.bf16 %v6841_v25, %v6839_v2  ;;  %v10559_v2 = vpack.c.bf16 %v7050_v38, %v7048_v13 }
0x1bff   :  { %v7049_v25 = vld [vmem:[#allocation5 + $0x8f0] sm:$0xff] }
0x1c00   :  { %10338 = vmatpush1.bf16.msra.mxu0 %v10337_v15  ;;  %v6843_v15 = vld [vmem:[#allocation5 + $0x280] sm:$0xff] }
0x1c01   :  { %10530 = vmatpush1.bf16.msra.mxu1 %v10529_v52  ;;  %10340 = vmatprep.subr.bf16.mxu0 %v10339_v36  ;;  %v6845_v52 = vld [vmem:[#allocation5 + $0x290] sm:$0xff]  ;;  %v7035_v36 = vld [vmem:[#allocation5 + $0x880] sm:$0xff] }
0x1c02   :  { %10532 = vmatprep.subr.bf16.mxu1 %v10531_v30  ;;  %v6850_v30 = vld [vmem:[#allocation5 + $0x2b8] sm:$0xff]  ;;  %v10357_v54 = vpack.c.bf16 %v6845_v52, %v6843_v15  ;;  %v10549_v60 = vpack.c.bf16 %v7037_v53, %v7035_v36  ;;  %v7053_v52 = vld [vmem:[#allocation5 + $0x910] sm:$0xff]  ;;  %v6864_v36 = vld [vmem:[#allocation5 + $0x328] sm:$0xff] }
0x1c03   :  { %7352 = vmatmul.mubr.f32.vlgmr.msra.gmra.mrb[80].mxu0 %v13782_v19  ;;  %v7032_v19 = vld [vmem:[#allocation5 + $0x868] sm:$0xff]  ;;  %v10359_v0 = vpack.c.bf16 %v6850_v30, %v6848_v23  ;;  %v7058_v23 = vld [vmem:[#allocation5 + $0x938] sm:$0xff] }
0x1c04   :  { %10342 = vmatpush1.bf16.msra.mxu0 %v10341_v32  ;;  %7565 = vmatmul.mubr.f32.vlgmr.msra.gmra.mrb[56].mxu1 %v13796_v35  ;;  %v10349_v35 = vpack.c.bf16 %v6837_v34, %v6835_v21  ;;  %v10543_v43 = vpack.c.bf16 %v7034_v22, %v7032_v19  ;;  %v6847_v32 = vld [vmem:[#allocation5 + $0x2a0] sm:$0xff]  ;;  %v10555_v21 = vpack.c.bf16 %v7046_v29, %v7044_v17  ;;  %v7045_v34 = vld [vmem:[#allocation5 + $0x8d0] sm:$0xff]  ;;  %v7056_v53 = vld [vmem:[#allocation5 + $0x928] sm:$0xff] }
0x1c05   :  { %10534 = vmatpush1.bf16.msra.mxu1 %v10533_v49  ;;  %10344 = vmatprep.subr.bf16.mxu0 %v10343_v48  ;;  %v6849_v49 = vld [vmem:[#allocation5 + $0x2b0] sm:$0xff]  ;;  %v7039_v48 = vld [vmem:[#allocation5 + $0x8a0] sm:$0xff] }
0x1c06   :  { %10536 = vmatprep.subr.bf16.mxu1 %v10535_v26  ;;  %7422 = vmatprep.mubr.f32.mxu0 %v13788_v61  ;;  %v7038_v61 = vld [vmem:[#allocation5 + $0x898] sm:$0xff]  ;;  %v10361_v6 = vpack.c.bf16 %v6849_v49, %v6847_v32  ;;  %v10553_v47 = vpack.c.bf16 %v7041_v51, %v7039_v48  ;;  %v10567_v32 = vpack.c.bf16 %v7058_v23, %v7056_v53  ;;  %v7057_v49 = vld [vmem:[#allocation5 + $0x930] sm:$0xff]  ;;  %v6868_v48 = vld [vmem:[#allocation5 + $0x348] sm:$0xff] }
0x1c07   :  { %7635 = vmatprep.mubr.f32.mxu1 %v13808_v12  ;;  %v10545_v12 = vpack.c.bf16 %v7033_v46, %v7031_v41  ;;  %v10547_v50 = vpack.c.bf16 %v7038_v61, %v7036_v11  ;;  %v6854_v26 = vld [vmem:[#allocation5 + $0x2d8] sm:$0xff]  ;;  %v6860_v41 = vld [vmem:[#allocation5 + $0x308] sm:$0xff] }
0x1c08   :  { %10346 = vmatpush1.bf16.msra.mxu0 %v10345_v55  ;;  %v10363_v59 = vpack.c.bf16 %v6854_v26, %v6852_v20  ;;  %v6851_v55 = vld [vmem:[#allocation5 + $0x2c0] sm:$0xff]  ;;  %v7052_v46 = vld [vmem:[#allocation5 + $0x908] sm:$0xff]  ;;  %v7062_v20 = vld [vmem:[#allocation5 + $0x958] sm:$0xff] }
0x1c09   :  { %10538 = vmatpush1.bf16.msra.mxu1 %v10537_v57  ;;  %10348 = vmatprep.subr.bf16.mxu0 %v10347_v9  ;;  %v6853_v57 = vld [vmem:[#allocation5 + $0x2d0] sm:$0xff]  ;;  %v7043_v9 = vld [vmem:[#allocation5 + $0x8c0] sm:$0xff]  ;;  %v10563_v15 = vpack.c.bf16 %v7054_v3, %v7052_v46  ;;  %v7060_v51 = vld [vmem:[#allocation5 + $0x948] sm:$0xff] }
0x1c0a   :  { %10540 = vmatprep.subr.bf16.mxu1 %v10539_v40  ;;  %v6858_v40 = vld [vmem:[#allocation5 + $0x2f8] sm:$0xff]  ;;  %v10365_v58 = vpack.c.bf16 %v6853_v57, %v6851_v55  ;;  %v10557_v19 = vpack.c.bf16 %v7045_v34, %v7043_v9  ;;  %v10571_v55 = vpack.c.bf16 %v7062_v20, %v7060_v51  ;;  %v7061_v57 = vld [vmem:[#allocation5 + $0x950] sm:$0xff]  ;;  %v6872_v9 = vld [vmem:[#allocation5 + $0x368] sm:$0xff] }
0x1c0b   :  { %v10367_v22 = vpack.c.bf16 %v6858_v40, %v6856_v28  ;;  %v7064_v34 = vld [vmem:[#allocation5 + $0x968] sm:$0xff]  ;;  %v7066_v28 = vld [vmem:[#allocation5 + $0x978] sm:$0xff] }
0x1c0c   :  { %10350 = vmatpush1.bf16.msra.mxu0 %v10349_v35  ;;  %v6855_v35 = vld [vmem:[#allocation5 + $0x2e0] sm:$0xff] }
0x1c0d   :  { %10542 = vmatpush1.bf16.msra.mxu1 %v10541_v24  ;;  %10352 = vmatprep.subr.bf16.mxu0 %v10351_v5  ;;  %v6857_v24 = vld [vmem:[#allocation5 + $0x2f0] sm:$0xff]  ;;  %v7047_v5 = vld [vmem:[#allocation5 + $0x8e0] sm:$0xff] }
0x1c0e   :  { %10544 = vmatprep.subr.bf16.mxu1 %v10543_v43  ;;  %v6862_v43 = vld [vmem:[#allocation5 + $0x318] sm:$0xff]  ;;  %v10369_v16 = vpack.c.bf16 %v6857_v24, %v6855_v35  ;;  %v10561_v11 = vpack.c.bf16 %v7049_v25, %v7047_v5  ;;  %v10575_v35 = vpack.c.bf16 %v7066_v28, %v7064_v34  ;;  %v7065_v24 = vld [vmem:[#allocation5 + $0x970] sm:$0xff]  ;;  %v6876_v5 = vld [vmem:[#allocation5 + $0x388] sm:$0xff] }
0x1c0f   :  { %v10371_v61 = vpack.c.bf16 %v6862_v43, %v6860_v41  ;;  %v7068_v25 = vld [vmem:[#allocation5 + $0x988] sm:$0xff]  ;;  %v7070_v41 = vld [vmem:[#allocation5 + $0x998] sm:$0xff] }
0x1c10   :  { %10354 = vmatpush1.bf16.msra.mxu0 %v10353_v63  ;;  %v6859_v63 = vld [vmem:[#allocation5 + $0x300] sm:$0xff] }
0x1c11   :  { %10546 = vmatpush1.bf16.msra.mxu1 %v10545_v12  ;;  %10356 = vmatprep.subr.bf16.mxu0 %v10355_v56  ;;  %v6861_v12 = vld [vmem:[#allocation5 + $0x310] sm:$0xff]  ;;  %v7051_v56 = vld [vmem:[#allocation5 + $0x900] sm:$0xff] }
0x1c12   :  { %10548 = vmatprep.subr.bf16.mxu1 %v10547_v50  ;;  %v6866_v50 = vld [vmem:[#allocation5 + $0x338] sm:$0xff]  ;;  %v10373_v30 = vpack.c.bf16 %v6861_v12, %v6859_v63  ;;  %v10565_v4 = vpack.c.bf16 %v7053_v52, %v7051_v56  ;;  %v10579_v63 = vpack.c.bf16 %v7070_v41, %v7068_v25  ;;  %v7069_v12 = vld [vmem:[#allocation5 + $0x990] sm:$0xff]  ;;  %v6880_v56 = vld [vmem:[#allocation5 + $0x3a8] sm:$0xff] }
0x1c13   :  { %v10375_v7 = vpack.c.bf16 %v6866_v50, %v6864_v36  ;;  %v7072_v52 = vld [vmem:[#allocation5 + $0x9a8] sm:$0xff]  ;;  %v7074_v36 = vld [vmem:[#allocation5 + $0x9b8] sm:$0xff] }
0x1c14   :  { %10358 = vmatpush1.bf16.msra.mxu0 %v10357_v54  ;;  %v6863_v54 = vld [vmem:[#allocation5 + $0x320] sm:$0xff] }
0x1c15   :  { %10550 = vmatpush1.bf16.msra.mxu1 %v10549_v60  ;;  %10360 = vmatprep.subr.bf16.mxu0 %v10359_v0  ;;  %v6865_v60 = vld [vmem:[#allocation5 + $0x330] sm:$0xff]  ;;  %v7055_v0 = vld [vmem:[#allocation5 + $0x920] sm:$0xff] }
0x1c16   :  { %10552 = vmatprep.subr.bf16.mxu1 %v10551_v39  ;;  %v6870_v39 = vld [vmem:[#allocation5 + $0x358] sm:$0xff]  ;;  %v10377_v26 = vpack.c.bf16 %v6865_v60, %v6863_v54  ;;  %v10569_v17 = vpack.c.bf16 %v7057_v49, %v7055_v0  ;;  %v10583_v54 = vpack.c.bf16 %v7074_v36, %v7072_v52  ;;  %v7073_v60 = vld [vmem:[#allocation5 + $0x9b0] sm:$0xff]  ;;  %v6884_v0 = vld [vmem:[#allocation5 + $0x3c8] sm:$0xff] }
0x1c17   :  { %v10379_v29 = vpack.c.bf16 %v6870_v39, %v6868_v48  ;;  %v7076_v49 = vld [vmem:[#allocation5 + $0x9c8] sm:$0xff]  ;;  %v7078_v48 = vld [vmem:[#allocation5 + $0x9d8] sm:$0xff] }
0x1c18   :  { %10362 = vmatpush1.bf16.msra.mxu0 %v10361_v6  ;;  %v6867_v6 = vld [vmem:[#allocation5 + $0x340] sm:$0xff] }
0x1c19   :  { %10554 = vmatpush1.bf16.msra.mxu1 %v10553_v47  ;;  %10364 = vmatprep.subr.bf16.mxu0 %v10363_v59  ;;  %v6869_v47 = vld [vmem:[#allocation5 + $0x350] sm:$0xff]  ;;  %v7059_v59 = vld [vmem:[#allocation5 + $0x940] sm:$0xff] }
0x1c1a   :  { %10556 = vmatprep.subr.bf16.mxu1 %v10555_v21  ;;  %v6874_v21 = vld [vmem:[#allocation5 + $0x378] sm:$0xff]  ;;  %v10381_v40 = vpack.c.bf16 %v6869_v47, %v6867_v6  ;;  %v10573_v13 = vpack.c.bf16 %v7061_v57, %v7059_v59  ;;  %v10587_v6 = vpack.c.bf16 %v7078_v48, %v7076_v49  ;;  %v7077_v47 = vld [vmem:[#allocation5 + $0x9d0] sm:$0xff]  ;;  %v6888_v59 = vld [vmem:[#allocation5 + $0x3e8] sm:$0xff] }
0x1c1b   :  { %v10383_v38 = vpack.c.bf16 %v6874_v21, %v6872_v9  ;;  %v7080_v57 = vld [vmem:[#allocation5 + $0x9e8] sm:$0xff]  ;;  %v7082_v9 = vld [vmem:[#allocation5 + $0x9f8] sm:$0xff] }
0x1c1c   :  { %10366 = vmatpush1.bf16.msra.mxu0 %v10365_v58  ;;  %v6871_v58 = vld [vmem:[#allocation5 + $0x360] sm:$0xff] }
0x1c1d   :  { %10558 = vmatpush1.bf16.msra.mxu1 %v10557_v19  ;;  %10368 = vmatprep.subr.bf16.mxu0 %v10367_v22  ;;  %v6873_v19 = vld [vmem:[#allocation5 + $0x370] sm:$0xff]  ;;  %v7063_v22 = vld [vmem:[#allocation5 + $0x960] sm:$0xff] }
0x1c1e   :  { %10560 = vmatprep.subr.bf16.mxu1 %v10559_v2  ;;  %v6878_v2 = vld [vmem:[#allocation5 + $0x398] sm:$0xff]  ;;  %v10385_v43 = vpack.c.bf16 %v6873_v19, %v6871_v58  ;;  %v10577_v46 = vpack.c.bf16 %v7065_v24, %v7063_v22  ;;  %v10591_v58 = vpack.c.bf16 %v7082_v9, %v7080_v57  ;;  %v7081_v19 = vld [vmem:[#allocation5 + $0x9f0] sm:$0xff]  ;;  %v6892_v22 = vld [vmem:[#allocation5 + $0x408] sm:$0xff] }
0x1c1f   :  { %v10387_v3 = vpack.c.bf16 %v6878_v2, %v6876_v5  ;;  %v7084_v24 = vld [vmem:[#allocation5 + $0xa08] sm:$0xff]  ;;  %v7086_v5 = vld [vmem:[#allocation5 + $0xa18] sm:$0xff]  ;;  %v6903_v57 = vld [vmem:[#allocation5 + $0x460] sm:$0xff] }
0x1c20   :  { %10370 = vmatpush1.bf16.msra.mxu0 %v10369_v16  ;;  %v6875_v16 = vld [vmem:[#allocation5 + $0x380] sm:$0xff]  ;;  %v6905_v9 = vld [vmem:[#allocation5 + $0x470] sm:$0xff] }
0x1c21   :  { %10562 = vmatpush1.bf16.msra.mxu1 %v10561_v11  ;;  %10372 = vmatprep.subr.bf16.mxu0 %v10371_v61  ;;  %v6877_v11 = vld [vmem:[#allocation5 + $0x390] sm:$0xff]  ;;  %v7067_v61 = vld [vmem:[#allocation5 + $0x980] sm:$0xff] }
0x1c22   :  { %10564 = vmatprep.subr.bf16.mxu1 %v10563_v15  ;;  %v6882_v15 = vld [vmem:[#allocation5 + $0x3b8] sm:$0xff]  ;;  %v10389_v50 = vpack.c.bf16 %v6877_v11, %v6875_v16  ;;  %v10581_v53 = vpack.c.bf16 %v7069_v12, %v7067_v61  ;;  %v10595_v16 = vpack.c.bf16 %v7086_v5, %v7084_v24  ;;  %v7085_v11 = vld [vmem:[#allocation5 + $0xa10] sm:$0xff]  ;;  %v6896_v61 = vld [vmem:[#allocation5 + $0x428] sm:$0xff] }
0x1c23   :  { %v10391_v23 = vpack.c.bf16 %v6882_v15, %v6880_v56  ;;  %v7088_v12 = vld [vmem:[#allocation5 + $0xa28] sm:$0xff]  ;;  %v7090_v56 = vld [vmem:[#allocation5 + $0xa38] sm:$0xff]  ;;  %v7099_v24 = vld [vmem:[#allocation5 + $0xa80] sm:$0xff] }
0x1c24   :  { %10374 = vmatpush1.bf16.msra.mxu0 %v10373_v30  ;;  %v6879_v30 = vld [vmem:[#allocation5 + $0x3a0] sm:$0xff] }
0x1c25   :  { %10566 = vmatpush1.bf16.msra.mxu1 %v10565_v4  ;;  %10376 = vmatprep.subr.bf16.mxu0 %v10375_v7  ;;  %v6881_v4 = vld [vmem:[#allocation5 + $0x3b0] sm:$0xff]  ;;  %v7071_v7 = vld [vmem:[#allocation5 + $0x9a0] sm:$0xff] }
0x1c26   :  { %10568 = vmatprep.subr.bf16.mxu1 %v10567_v32  ;;  %v6886_v32 = vld [vmem:[#allocation5 + $0x3d8] sm:$0xff]  ;;  %v10393_v39 = vpack.c.bf16 %v6881_v4, %v6879_v30  ;;  %v10585_v51 = vpack.c.bf16 %v7073_v60, %v7071_v7  ;;  %v10599_v30 = vpack.c.bf16 %v7090_v56, %v7088_v12  ;;  %v7089_v4 = vld [vmem:[#allocation5 + $0xa30] sm:$0xff]  ;;  %v6900_v7 = vld [vmem:[#allocation5 + $0x448] sm:$0xff] }
0x1c27   :  { %v10395_v20 = vpack.c.bf16 %v6886_v32, %v6884_v0  ;;  %v7092_v60 = vld [vmem:[#allocation5 + $0xa48] sm:$0xff]  ;;  %v7094_v0 = vld [vmem:[#allocation5 + $0xa58] sm:$0xff]  ;;  %v7103_v12 = vld [vmem:[#allocation5 + $0xaa0] sm:$0xff] }
0x1c28   :  { %10378 = vmatpush1.bf16.msra.mxu0 %v10377_v26  ;;  %v6883_v26 = vld [vmem:[#allocation5 + $0x3c0] sm:$0xff] }
0x1c29   :  { %10570 = vmatpush1.bf16.msra.mxu1 %v10569_v17  ;;  %10380 = vmatprep.subr.bf16.mxu0 %v10379_v29  ;;  %v6885_v17 = vld [vmem:[#allocation5 + $0x3d0] sm:$0xff]  ;;  %v7075_v29 = vld [vmem:[#allocation5 + $0x9c0] sm:$0xff] }
0x1c2a   :  { %10572 = vmatprep.subr.bf16.mxu1 %v10571_v55  ;;  %v6890_v55 = vld [vmem:[#allocation5 + $0x3f8] sm:$0xff]  ;;  %v10397_v21 = vpack.c.bf16 %v6885_v17, %v6883_v26  ;;  %v10589_v34 = vpack.c.bf16 %v7077_v47, %v7075_v29  ;;  %v10603_v26 = vpack.c.bf16 %v7094_v0, %v7092_v60  ;;  %v7093_v17 = vld [vmem:[#allocation5 + $0xa50] sm:$0xff]  ;;  %v6904_v29 = vld [vmem:[#allocation5 + $0x468] sm:$0xff] }
0x1c2b   :  { %v10399_v28 = vpack.c.bf16 %v6890_v55, %v6888_v59  ;;  %v7098_v47 = vld [vmem:[#allocation5 + $0xa78] sm:$0xff]  ;;  %v7107_v60 = vld [vmem:[#allocation5 + $0xac0] sm:$0xff] }
0x1c2c   :  { %10382 = vmatpush1.bf16.msra.mxu0 %v10381_v40  ;;  %v6887_v40 = vld [vmem:[#allocation5 + $0x3e0] sm:$0xff] }
0x1c2d   :  { %10574 = vmatpush1.bf16.msra.mxu1 %v10573_v13  ;;  %10384 = vmatprep.subr.bf16.mxu0 %v10383_v38  ;;  %v6889_v13 = vld [vmem:[#allocation5 + $0x3f0] sm:$0xff]  ;;  %v7079_v38 = vld [vmem:[#allocation5 + $0x9e0] sm:$0xff] }
0x1c2e   :  { %10576 = vmatprep.subr.bf16.mxu1 %v10575_v35  ;;  %v6894_v35 = vld [vmem:[#allocation5 + $0x418] sm:$0xff]  ;;  %v10401_v2 = vpack.c.bf16 %v6889_v13, %v6887_v40  ;;  %v10593_v25 = vpack.c.bf16 %v7081_v19, %v7079_v38  ;;  %v6908_v40 = vld [vmem:[#allocation5 + $0x488] sm:$0xff] }
0x1c2f   :  { %v10403_v41 = vpack.c.bf16 %v6894_v35, %v6892_v22  ;;  %v6910_v13 = vld [vmem:[#allocation5 + $0x498] sm:$0xff]  ;;  %v7100_v38 = vld [vmem:[#allocation5 + $0xa88] sm:$0xff]  ;;  %v6907_v22 = vld [vmem:[#allocation5 + $0x480] sm:$0xff] }
0x1c30   :  { %10386 = vmatpush1.bf16.msra.mxu0 %v10385_v43  ;;  %v6891_v43 = vld [vmem:[#allocation5 + $0x400] sm:$0xff]  ;;  %v10419_v19 = vpack.c.bf16 %v6910_v13, %v6908_v40  ;;  %v6909_v35 = vld [vmem:[#allocation5 + $0x490] sm:$0xff] }
0x1c31   :  { %10578 = vmatpush1.bf16.msra.mxu1 %v10577_v46  ;;  %10388 = vmatprep.subr.bf16.mxu0 %v10387_v3  ;;  %v6893_v46 = vld [vmem:[#allocation5 + $0x410] sm:$0xff]  ;;  %v7083_v3 = vld [vmem:[#allocation5 + $0xa00] sm:$0xff] }
0x1c32   :  { %10580 = vmatprep.subr.bf16.mxu1 %v10579_v63  ;;  %v6898_v63 = vld [vmem:[#allocation5 + $0x438] sm:$0xff]  ;;  %v10405_v15 = vpack.c.bf16 %v6893_v46, %v6891_v43  ;;  %v10597_v52 = vpack.c.bf16 %v7085_v11, %v7083_v3  ;;  %v7104_v43 = vld [vmem:[#allocation5 + $0xaa8] sm:$0xff]  ;;  %v10421_v3 = vpack.c.bf16 %v6909_v35, %v6907_v22  ;;  %v6923_v40 = vld [vmem:[#allocation5 + $0x500] sm:$0xff] }
0x1c33   :  { %v10407_v36 = vpack.c.bf16 %v6898_v63, %v6896_v61  ;;  %v7106_v46 = vld [vmem:[#allocation5 + $0xab8] sm:$0xff]  ;;  %v6911_v61 = vld [vmem:[#allocation5 + $0x4a0] sm:$0xff]  ;;  %v6913_v63 = vld [vmem:[#allocation5 + $0x4b0] sm:$0xff] }
0x1c34   :  { %10390 = vmatpush1.bf16.msra.mxu0 %v10389_v50  ;;  %v6895_v50 = vld [vmem:[#allocation5 + $0x420] sm:$0xff]  ;;  %v10615_v56 = vpack.c.bf16 %v7106_v46, %v7104_v43  ;;  %v6925_v13 = vld [vmem:[#allocation5 + $0x510] sm:$0xff]  ;;  %v7120_v22 = vld [vmem:[#allocation5 + $0xb28] sm:$0xff] }
0x1c35   :  { %10582 = vmatpush1.bf16.msra.mxu1 %v10581_v53  ;;  %10392 = vmatprep.subr.bf16.mxu0 %v10391_v23  ;;  %v6897_v53 = vld [vmem:[#allocation5 + $0x430] sm:$0xff]  ;;  %v7087_v23 = vld [vmem:[#allocation5 + $0xa20] sm:$0xff]  ;;  %v7122_v35 = vld [vmem:[#allocation5 + $0xb38] sm:$0xff] }
0x1c36   :  { %10584 = vmatprep.subr.bf16.mxu1 %v10583_v54  ;;  %v6902_v54 = vld [vmem:[#allocation5 + $0x458] sm:$0xff]  ;;  %v10409_v32 = vpack.c.bf16 %v6897_v53, %v6895_v50  ;;  %v10601_v49 = vpack.c.bf16 %v7089_v4, %v7087_v23  ;;  %v7108_v50 = vld [vmem:[#allocation5 + $0xac8] sm:$0xff]  ;;  %v10425_v23 = vpack.c.bf16 %v6913_v63, %v6911_v61  ;;  %v7119_v43 = vld [vmem:[#allocation5 + $0xb20] sm:$0xff]  ;;  %v10631_v46 = vpack.c.bf16 %v7122_v35, %v7120_v22 }
0x1c37   :  { %v10411_v48 = vpack.c.bf16 %v6902_v54, %v6900_v7  ;;  %v7110_v53 = vld [vmem:[#allocation5 + $0xad8] sm:$0xff]  ;;  %v6915_v7 = vld [vmem:[#allocation5 + $0x4c0] sm:$0xff]  ;;  %v6917_v54 = vld [vmem:[#allocation5 + $0x4d0] sm:$0xff] }
0x1c38   :  { %10394 = vmatpush1.bf16.msra.mxu0 %v10393_v39  ;;  %v6899_v39 = vld [vmem:[#allocation5 + $0x440] sm:$0xff]  ;;  %v10619_v0 = vpack.c.bf16 %v7110_v53, %v7108_v50  ;;  %v7124_v61 = vld [vmem:[#allocation5 + $0xb48] sm:$0xff]  ;;  %v7126_v63 = vld [vmem:[#allocation5 + $0xb58] sm:$0xff] }
0x1c39   :  { %10586 = vmatpush1.bf16.msra.mxu1 %v10585_v51  ;;  %10396 = vmatprep.subr.bf16.mxu0 %v10395_v20  ;;  %v6901_v51 = vld [vmem:[#allocation5 + $0x450] sm:$0xff]  ;;  %v7091_v20 = vld [vmem:[#allocation5 + $0xa40] sm:$0xff]  ;;  %v10635_v53 = vpack.c.bf16 %v7126_v63, %v7124_v61 }
0x1c3a   :  { %10588 = vmatprep.subr.bf16.mxu1 %v10587_v6  ;;  %v6906_v6 = vld [vmem:[#allocation5 + $0x478] sm:$0xff]  ;;  %v10605_v59 = vpack.c.bf16 %v7093_v17, %v7091_v20  ;;  %v10429_v20 = vpack.c.bf16 %v6917_v54, %v6915_v7  ;;  %v7123_v50 = vld [vmem:[#allocation5 + $0xb40] sm:$0xff]  ;;  %v7128_v7 = vld [vmem:[#allocation5 + $0xb68] sm:$0xff] }
0x1c3b   :  { %v10415_v55 = vpack.c.bf16 %v6906_v6, %v6904_v29  ;;  %v6919_v29 = vld [vmem:[#allocation5 + $0x4e0] sm:$0xff]  ;;  %v6921_v6 = vld [vmem:[#allocation5 + $0x4f0] sm:$0xff]  ;;  %v7130_v54 = vld [vmem:[#allocation5 + $0xb78] sm:$0xff] }
0x1c3c   :  { %10398 = vmatpush1.bf16.msra.mxu0 %v10397_v21  ;;  %v7095_v21 = vld [vmem:[#allocation5 + $0xa60] sm:$0xff] }
0x1c3d   :  { %10590 = vmatpush1.bf16.msra.mxu1 %v10589_v34  ;;  %10400 = vmatprep.subr.bf16.mxu0 %v10399_v28  ;;  %v7097_v28 = vld [vmem:[#allocation5 + $0xa70] sm:$0xff]  ;;  %v7135_v22 = vld [vmem:[#allocation5 + $0xba0] sm:$0xff] }
0x1c3e   :  { %10592 = vmatprep.subr.bf16.mxu1 %v10591_v58  ;;  %v10417_v58 = vpack.c.bf16 %v6905_v9, %v6903_v57  ;;  %v7116_v57 = vld [vmem:[#allocation5 + $0xb08] sm:$0xff]  ;;  %v7118_v9 = vld [vmem:[#allocation5 + $0xb18] sm:$0xff]  ;;  %v7139_v61 = vld [vmem:[#allocation5 + $0xbc0] sm:$0xff] }
0x1c40   :  { %10402 = vmatpush1.bf16.msra.mxu0 %v10401_v2  ;;  %v7101_v2 = vld [vmem:[#allocation5 + $0xa90] sm:$0xff] }
0x1c41   :  { %10594 = vmatpush1.bf16.msra.mxu1 %v10593_v25  ;;  %10404 = vmatprep.subr.bf16.mxu0 %v10403_v41  ;;  %v6912_v25 = vld [vmem:[#allocation5 + $0x4a8] sm:$0xff]  ;;  %v6914_v41 = vld [vmem:[#allocation5 + $0x4b8] sm:$0xff] }
0x1c42   :  { %10596 = vmatprep.subr.bf16.mxu1 %v10595_v16  ;;  %v10613_v16 = vpack.c.bf16 %v7101_v2, %v7099_v24  ;;  %v10423_v11 = vpack.c.bf16 %v6914_v41, %v6912_v25  ;;  %v10437_v24 = vpack.c.bf16 %v6925_v13, %v6923_v40  ;;  %v6927_v25 = vld [vmem:[#allocation5 + $0x520] sm:$0xff]  ;;  %v6929_v41 = vld [vmem:[#allocation5 + $0x530] sm:$0xff]  ;;  %v7136_v40 = vld [vmem:[#allocation5 + $0xba8] sm:$0xff] }
0x1c43   :  { %7423 = vmatmul.mubr.f32.vlgmr.msra.gmra.mrb[80].mxu0 %v13784_v14  ;;  %v7096_v14 = vld [vmem:[#allocation5 + $0xa68] sm:$0xff]  ;;  %v7138_v13 = vld [vmem:[#allocation5 + $0xbb8] sm:$0xff] }
0x1c44   :  { %10406 = vmatpush1.bf16.msra.mxu0 %v10405_v15  ;;  %7636 = vmatmul.mubr.f32.vlgmr.msra.gmra.mrb[56].mxu1 %v13804_v27  ;;  %v10413_v27 = vpack.c.bf16 %v6901_v51, %v6899_v39  ;;  %v10607_v34 = vpack.c.bf16 %v7098_v47, %v7096_v14  ;;  %v7105_v15 = vld [vmem:[#allocation5 + $0xab0] sm:$0xff]  ;;  %v7112_v39 = vld [vmem:[#allocation5 + $0xae8] sm:$0xff]  ;;  %v7114_v51 = vld [vmem:[#allocation5 + $0xaf8] sm:$0xff]  ;;  %v10647_v35 = vpack.c.bf16 %v7138_v13, %v7136_v40 }
0x1c45   :  { %10598 = vmatpush1.bf16.msra.mxu1 %v10597_v52  ;;  %10408 = vmatprep.subr.bf16.mxu0 %v10407_v36  ;;  %v6916_v52 = vld [vmem:[#allocation5 + $0x4c8] sm:$0xff]  ;;  %v6918_v36 = vld [vmem:[#allocation5 + $0x4d8] sm:$0xff]  ;;  %v7111_v14 = vld [vmem:[#allocation5 + $0xae0] sm:$0xff]  ;;  %v10623_v47 = vpack.c.bf16 %v7114_v51, %v7112_v39  ;;  %v10639_v51 = vpack.c.bf16 %v7130_v54, %v7128_v7 }
0x1c46   :  { %10600 = vmatprep.subr.bf16.mxu1 %v10599_v30  ;;  %7493 = vmatprep.mubr.f32.mxu0 %v13798_v18  ;;  %v7102_v18 = vld [vmem:[#allocation5 + $0xa98] sm:$0xff]  ;;  %v10617_v30 = vpack.c.bf16 %v7105_v15, %v7103_v12  ;;  %v10427_v4 = vpack.c.bf16 %v6918_v36, %v6916_v52  ;;  %v10441_v12 = vpack.c.bf16 %v6929_v41, %v6927_v25  ;;  %v6931_v52 = vld [vmem:[#allocation5 + $0x540] sm:$0xff]  ;;  %v6933_v36 = vld [vmem:[#allocation5 + $0x550] sm:$0xff] }
0x1c47   :  { %7706 = vmatprep.mubr.f32.mxu1 %v13810_v31  ;;  %v10609_v31 = vpack.c.bf16 %v7097_v28, %v7095_v21  ;;  %v10611_v5 = vpack.c.bf16 %v7102_v18, %v7100_v38  ;;  %v10433_v21 = vpack.c.bf16 %v6921_v6, %v6919_v29  ;;  %v7115_v38 = vld [vmem:[#allocation5 + $0xb00] sm:$0xff]  ;;  %v10627_v18 = vpack.c.bf16 %v7118_v9, %v7116_v57  ;;  %v7132_v29 = vld [vmem:[#allocation5 + $0xb88] sm:$0xff]  ;;  %v7134_v6 = vld [vmem:[#allocation5 + $0xb98] sm:$0xff] }
0x1c48   :  { %10410 = vmatpush1.bf16.msra.mxu0 %v10409_v32  ;;  %v7109_v32 = vld [vmem:[#allocation5 + $0xad0] sm:$0xff]  ;;  %v7127_v39 = vld [vmem:[#allocation5 + $0xb60] sm:$0xff]  ;;  %v10643_v9 = vpack.c.bf16 %v7134_v6, %v7132_v29  ;;  %v7140_v25 = vld [vmem:[#allocation5 + $0xbc8] sm:$0xff] }
0x1c49   :  { %10602 = vmatpush1.bf16.msra.mxu1 %v10601_v49  ;;  %10412 = vmatprep.subr.bf16.mxu0 %v10411_v48  ;;  %v6920_v49 = vld [vmem:[#allocation5 + $0x4e8] sm:$0xff]  ;;  %v6922_v48 = vld [vmem:[#allocation5 + $0x4f8] sm:$0xff]  ;;  %v7131_v57 = vld [vmem:[#allocation5 + $0xb80] sm:$0xff] }
0x1c4a   :  { %10604 = vmatprep.subr.bf16.mxu1 %v10603_v26  ;;  %v10621_v26 = vpack.c.bf16 %v7109_v32, %v7107_v60  ;;  %v10431_v17 = vpack.c.bf16 %v6922_v48, %v6920_v49  ;;  %v10445_v60 = vpack.c.bf16 %v6933_v36, %v6931_v52  ;;  %v6935_v49 = vld [vmem:[#allocation5 + $0x560] sm:$0xff]  ;;  %v6937_v48 = vld [vmem:[#allocation5 + $0x570] sm:$0xff]  ;;  %v7142_v41 = vld [vmem:[#allocation5 + $0xbd8] sm:$0xff] }
0x1c4b   :  { %v10651_v63 = vpack.c.bf16 %v7142_v41, %v7140_v25  ;;  %v7144_v52 = vld [vmem:[#allocation5 + $0xbe8] sm:$0xff]  ;;  %v7146_v36 = vld [vmem:[#allocation5 + $0xbf8] sm:$0xff]  ;;  %v7143_v54 = vld [vmem:[#allocation5 + $0xbe0] sm:$0xff] }
0x1c4c   :  { %10414 = vmatpush1.bf16.msra.mxu0 %v10413_v27  ;;  %v7113_v27 = vld [vmem:[#allocation5 + $0xaf0] sm:$0xff]  ;;  %v10655_v7 = vpack.c.bf16 %v7146_v36, %v7144_v52  ;;  %v7172_v41 = vld [vmem:[#allocation5 + $0xcc8] sm:$0xff] }
0x1c4d   :  { %10606 = vmatpush1.bf16.msra.mxu1 %v10605_v59  ;;  %10416 = vmatprep.subr.bf16.mxu0 %v10415_v55  ;;  %v6924_v59 = vld [vmem:[#allocation5 + $0x508] sm:$0xff]  ;;  %v6926_v55 = vld [vmem:[#allocation5 + $0x518] sm:$0xff]  ;;  %v7169_v25 = vld [vmem:[#allocation5 + $0xcb0] sm:$0xff] }
0x1c4e   :  { %10608 = vmatprep.subr.bf16.mxu1 %v10607_v34  ;;  %v10625_v34 = vpack.c.bf16 %v7113_v27, %v7111_v14  ;;  %v10435_v28 = vpack.c.bf16 %v6926_v55, %v6924_v59  ;;  %v10449_v14 = vpack.c.bf16 %v6937_v48, %v6935_v49  ;;  %v6939_v59 = vld [vmem:[#allocation5 + $0x580] sm:$0xff]  ;;  %v6941_v55 = vld [vmem:[#allocation5 + $0x590] sm:$0xff]  ;;  %v7180_v36 = vld [vmem:[#allocation5 + $0xd08] sm:$0xff] }
0x1c4f   :  { %v7177_v52 = vld [vmem:[#allocation5 + $0xcf0] sm:$0xff] }
0x1c50   :  { %10418 = vmatpush1.bf16.msra.mxu0 %v10417_v58  ;;  %v7117_v58 = vld [vmem:[#allocation5 + $0xb10] sm:$0xff] }
0x1c51   :  { %10610 = vmatpush1.bf16.msra.mxu1 %v10609_v31  ;;  %10420 = vmatprep.subr.bf16.mxu0 %v10419_v19  ;;  %v6928_v31 = vld [vmem:[#allocation5 + $0x528] sm:$0xff]  ;;  %v6930_v19 = vld [vmem:[#allocation5 + $0x538] sm:$0xff] }
0x1c52   :  { %10612 = vmatprep.subr.bf16.mxu1 %v10611_v5  ;;  %v10629_v5 = vpack.c.bf16 %v7117_v58, %v7115_v38  ;;  %v10439_v2 = vpack.c.bf16 %v6930_v19, %v6928_v31  ;;  %v10453_v38 = vpack.c.bf16 %v6941_v55, %v6939_v59  ;;  %v6943_v31 = vld [vmem:[#allocation5 + $0x5a0] sm:$0xff]  ;;  %v6945_v19 = vld [vmem:[#allocation5 + $0x5b0] sm:$0xff]  ;;  %v7158_v59 = vld [vmem:[#allocation5 + $0xc58] sm:$0xff] }
0x1c54   :  { %10422 = vmatpush1.bf16.msra.mxu0 %v10421_v3  ;;  %v7121_v3 = vld [vmem:[#allocation5 + $0xb30] sm:$0xff] }
0x1c55   :  { %10614 = vmatpush1.bf16.msra.mxu1 %v10613_v16  ;;  %10424 = vmatprep.subr.bf16.mxu0 %v10423_v11  ;;  %v6932_v16 = vld [vmem:[#allocation5 + $0x548] sm:$0xff]  ;;  %v6934_v11 = vld [vmem:[#allocation5 + $0x558] sm:$0xff] }
0x1c56   :  { %10616 = vmatprep.subr.bf16.mxu1 %v10615_v56  ;;  %v10633_v56 = vpack.c.bf16 %v7121_v3, %v7119_v43  ;;  %v10443_v15 = vpack.c.bf16 %v6934_v11, %v6932_v16  ;;  %v10457_v43 = vpack.c.bf16 %v6945_v19, %v6943_v31  ;;  %v6947_v16 = vld [vmem:[#allocation5 + $0x5c0] sm:$0xff]  ;;  %v6949_v11 = vld [vmem:[#allocation5 + $0x5d0] sm:$0xff] }
0x1c57   :  { %v7163_v19 = vld [vmem:[#allocation5 + $0xc80] sm:$0xff] }
0x1c58   :  { %10426 = vmatpush1.bf16.msra.mxu0 %v10425_v23  ;;  %v7125_v23 = vld [vmem:[#allocation5 + $0xb50] sm:$0xff] }
0x1c59   :  { %10618 = vmatpush1.bf16.msra.mxu1 %v10617_v30  ;;  %10428 = vmatprep.subr.bf16.mxu0 %v10427_v4  ;;  %v6936_v30 = vld [vmem:[#allocation5 + $0x568] sm:$0xff]  ;;  %v6938_v4 = vld [vmem:[#allocation5 + $0x578] sm:$0xff] }
0x1c5a   :  { %10620 = vmatprep.subr.bf16.mxu1 %v10619_v0  ;;  %v10637_v0 = vpack.c.bf16 %v7125_v23, %v7123_v50  ;;  %v10447_v32 = vpack.c.bf16 %v6938_v4, %v6936_v30  ;;  %v10461_v50 = vpack.c.bf16 %v6949_v11, %v6947_v16  ;;  %v6951_v30 = vld [vmem:[#allocation5 + $0x5e0] sm:$0xff]  ;;  %v6953_v4 = vld [vmem:[#allocation5 + $0x5f0] sm:$0xff] }
0x1c5b   :  { %v10465_v49 = vpack.c.bf16 %v6953_v4, %v6951_v30  ;;  %v7171_v16 = vld [vmem:[#allocation5 + $0xcc0] sm:$0xff]  ;;  %v7173_v11 = vld [vmem:[#allocation5 + $0xcd0] sm:$0xff] }
0x1c5c   :  { %10430 = vmatpush1.bf16.msra.mxu0 %v10429_v20  ;;  %v7129_v20 = vld [vmem:[#allocation5 + $0xb70] sm:$0xff]  ;;  %v7179_v30 = vld [vmem:[#allocation5 + $0xd00] sm:$0xff] }
0x1c5d   :  { %10622 = vmatpush1.bf16.msra.mxu1 %v10621_v26  ;;  %10432 = vmatprep.subr.bf16.mxu0 %v10431_v17  ;;  %v6940_v26 = vld [vmem:[#allocation5 + $0x588] sm:$0xff]  ;;  %v6942_v17 = vld [vmem:[#allocation5 + $0x598] sm:$0xff]  ;;  %v7181_v4 = vld [vmem:[#allocation5 + $0xd10] sm:$0xff] }
0x1c5e   :  { %10624 = vmatprep.subr.bf16.mxu1 %v10623_v47  ;;  %v10641_v47 = vpack.c.bf16 %v7129_v20, %v7127_v39  ;;  %v10451_v27 = vpack.c.bf16 %v6942_v17, %v6940_v26  ;;  %v7149_v20 = vld [vmem:[#allocation5 + $0xc10] sm:$0xff]  ;;  %v7152_v26 = vld [vmem:[#allocation5 + $0xc28] sm:$0xff]  ;;  %v7154_v17 = vld [vmem:[#allocation5 + $0xc38] sm:$0xff] }
0x1c5f   :  { %v10663_v6 = vpack.c.bf16 %v7154_v17, %v7152_v26  ;;  %v7187_v26 = vld [vmem:[#allocation5 + $0xd40] sm:$0xff]  ;;  %v7189_v17 = vld [vmem:[#allocation5 + $0xd50] sm:$0xff] }
0x1c60   :  { %10434 = vmatpush1.bf16.msra.mxu0 %v10433_v21  ;;  %v7133_v21 = vld [vmem:[#allocation5 + $0xb90] sm:$0xff] }
0x1c61   :  { %10626 = vmatpush1.bf16.msra.mxu1 %v10625_v34  ;;  %10436 = vmatprep.subr.bf16.mxu0 %v10435_v28  ;;  %v6944_v34 = vld [vmem:[#allocation5 + $0x5a8] sm:$0xff]  ;;  %v6946_v28 = vld [vmem:[#allocation5 + $0x5b8] sm:$0xff] }
0x1c62   :  { %10628 = vmatprep.subr.bf16.mxu1 %v10627_v18  ;;  %v10645_v18 = vpack.c.bf16 %v7133_v21, %v7131_v57  ;;  %v10455_v58 = vpack.c.bf16 %v6946_v28, %v6944_v34  ;;  %v7157_v21 = vld [vmem:[#allocation5 + $0xc50] sm:$0xff]  ;;  %v7160_v34 = vld [vmem:[#allocation5 + $0xc68] sm:$0xff]  ;;  %v7162_v28 = vld [vmem:[#allocation5 + $0xc78] sm:$0xff] }
0x1c63   :  { %v10671_v13 = vpack.c.bf16 %v7162_v28, %v7160_v34  ;;  %v7195_v34 = vld [vmem:[#allocation5 + $0xd80] sm:$0xff]  ;;  %v7197_v28 = vld [vmem:[#allocation5 + $0xd90] sm:$0xff] }
0x1c64   :  { %10438 = vmatpush1.bf16.msra.mxu0 %v10437_v24  ;;  %v7137_v24 = vld [vmem:[#allocation5 + $0xbb0] sm:$0xff] }
0x1c65   :  { %10630 = vmatpush1.bf16.msra.mxu1 %v10629_v5  ;;  %10440 = vmatprep.subr.bf16.mxu0 %v10439_v2  ;;  %v6948_v5 = vld [vmem:[#allocation5 + $0x5c8] sm:$0xff]  ;;  %v6950_v2 = vld [vmem:[#allocation5 + $0x5d8] sm:$0xff] }
0x1c66   :  { %10632 = vmatprep.subr.bf16.mxu1 %v10631_v46  ;;  %v10649_v46 = vpack.c.bf16 %v7137_v24, %v7135_v22  ;;  %v10459_v3 = vpack.c.bf16 %v6950_v2, %v6948_v5  ;;  %v7168_v22 = vld [vmem:[#allocation5 + $0xca8] sm:$0xff]  ;;  %v7167_v2 = vld [vmem:[#allocation5 + $0xca0] sm:$0xff] }
0x1c68   :  { %10442 = vmatpush1.bf16.msra.mxu0 %v10441_v12  ;;  %v7141_v12 = vld [vmem:[#allocation5 + $0xbd0] sm:$0xff] }
0x1c69   :  { %10634 = vmatpush1.bf16.msra.mxu1 %v10633_v56  ;;  %10444 = vmatprep.subr.bf16.mxu0 %v10443_v15  ;;  %v6952_v56 = vld [vmem:[#allocation5 + $0x5e8] sm:$0xff]  ;;  %v6954_v15 = vld [vmem:[#allocation5 + $0x5f8] sm:$0xff] }
0x1c6a   :  { %10636 = vmatprep.subr.bf16.mxu1 %v10635_v53  ;;  %v10653_v53 = vpack.c.bf16 %v7141_v12, %v7139_v61  ;;  %v10463_v23 = vpack.c.bf16 %v6954_v15, %v6952_v56  ;;  %v7176_v61 = vld [vmem:[#allocation5 + $0xce8] sm:$0xff]  ;;  %v10685_v12 = vpack.c.bf16 %v7173_v11, %v7171_v16  ;;  %v7175_v15 = vld [vmem:[#allocation5 + $0xce0] sm:$0xff] }
0x1c6c   :  { %10446 = vmatpush1.bf16.msra.mxu0 %v10445_v60  ;;  %v7145_v60 = vld [vmem:[#allocation5 + $0xbf0] sm:$0xff] }
0x1c6d   :  { %10638 = vmatpush1.bf16.msra.mxu1 %v10637_v0  ;;  %10448 = vmatprep.subr.bf16.mxu0 %v10447_v32  ;;  %v7148_v0 = vld [vmem:[#allocation5 + $0xc08] sm:$0xff]  ;;  %v7150_v32 = vld [vmem:[#allocation5 + $0xc18] sm:$0xff]  ;;  %v10657_v48 = vpack.c.bf16 %v7145_v60, %v7143_v54  ;;  %v10693_v60 = vpack.c.bf16 %v7181_v4, %v7179_v30 }
0x1c6e   :  { %10640 = vmatprep.subr.bf16.mxu1 %v10639_v51  ;;  %v10659_v39 = vpack.c.bf16 %v7150_v32, %v7148_v0  ;;  %v7147_v51 = vld [vmem:[#allocation5 + $0xc00] sm:$0xff]  ;;  %v7186_v54 = vld [vmem:[#allocation5 + $0xd38] sm:$0xff] }
0x1c6f   :  { %v10661_v29 = vpack.c.bf16 %v7149_v20, %v7147_v51  ;;  %v7183_v32 = vld [vmem:[#allocation5 + $0xd20] sm:$0xff] }
0x1c70   :  { %10450 = vmatpush1.bf16.msra.mxu0 %v10449_v14  ;;  %v7151_v14 = vld [vmem:[#allocation5 + $0xc20] sm:$0xff] }
0x1c71   :  { %10642 = vmatpush1.bf16.msra.mxu1 %v10641_v47  ;;  %10452 = vmatprep.subr.bf16.mxu0 %v10451_v27  ;;  %v7153_v47 = vld [vmem:[#allocation5 + $0xc30] sm:$0xff]  ;;  %v7156_v27 = vld [vmem:[#allocation5 + $0xc48] sm:$0xff] }
0x1c72   :  { %10644 = vmatprep.subr.bf16.mxu1 %v10643_v9  ;;  %v10665_v55 = vpack.c.bf16 %v7153_v47, %v7151_v14  ;;  %v10667_v57 = vpack.c.bf16 %v7158_v59, %v7156_v27  ;;  %v7155_v9 = vld [vmem:[#allocation5 + $0xc40] sm:$0xff]  ;;  %v10701_v14 = vpack.c.bf16 %v7189_v17, %v7187_v26  ;;  %v7193_v59 = vld [vmem:[#allocation5 + $0xd70] sm:$0xff] }
0x1c73   :  { %v10669_v40 = vpack.c.bf16 %v7157_v21, %v7155_v9  ;;  %v7191_v27 = vld [vmem:[#allocation5 + $0xd60] sm:$0xff] }
0x1c74   :  { %10454 = vmatpush1.bf16.msra.mxu0 %v10453_v38  ;;  %v7159_v38 = vld [vmem:[#allocation5 + $0xc60] sm:$0xff]  ;;  %v10705_v9 = vpack.c.bf16 %v7193_v59, %v7191_v27  ;;  %v7233_v59 = vld [vmem:[#allocation5 + $0xeb0] sm:$0xff] }
0x1c75   :  { %10646 = vmatpush1.bf16.msra.mxu1 %v10645_v18  ;;  %10456 = vmatprep.subr.bf16.mxu0 %v10455_v58  ;;  %v7164_v18 = vld [vmem:[#allocation5 + $0xc88] sm:$0xff]  ;;  %v7166_v58 = vld [vmem:[#allocation5 + $0xc98] sm:$0xff]  ;;  %v7227_v17 = vld [vmem:[#allocation5 + $0xe80] sm:$0xff] }
0x1c76   :  { %10648 = vmatprep.subr.bf16.mxu1 %v10647_v35  ;;  %v10675_v31 = vpack.c.bf16 %v7166_v58, %v7164_v18  ;;  %v7170_v35 = vld [vmem:[#allocation5 + $0xcb8] sm:$0xff]  ;;  %v7199_v18 = vld [vmem:[#allocation5 + $0xda0] sm:$0xff]  ;;  %v7201_v58 = vld [vmem:[#allocation5 + $0xdb0] sm:$0xff] }
0x1c77   :  { %v10679_v5 = vpack.c.bf16 %v7170_v35, %v7168_v22  ;;  %v7203_v22 = vld [vmem:[#allocation5 + $0xdc0] sm:$0xff]  ;;  %v7205_v35 = vld [vmem:[#allocation5 + $0xdd0] sm:$0xff] }
0x1c78   :  { %10458 = vmatpush1.bf16.msra.mxu0 %v10457_v43  ;;  %v7174_v43 = vld [vmem:[#allocation5 + $0xcd8] sm:$0xff]  ;;  %v7231_v27 = vld [vmem:[#allocation5 + $0xea0] sm:$0xff] }
0x1c79   :  { %10650 = vmatpush1.bf16.msra.mxu1 %v10649_v46  ;;  %10460 = vmatprep.subr.bf16.mxu0 %v10459_v3  ;;  %v10681_v46 = vpack.c.bf16 %v7169_v25, %v7167_v2  ;;  %v10683_v3 = vpack.c.bf16 %v7174_v43, %v7172_v41  ;;  %v10717_v2 = vpack.c.bf16 %v7205_v35, %v7203_v22  ;;  %v7207_v41 = vld [vmem:[#allocation5 + $0xde0] sm:$0xff]  ;;  %v7209_v43 = vld [vmem:[#allocation5 + $0xdf0] sm:$0xff] }
0x1c7a   :  { %10652 = vmatprep.subr.bf16.mxu1 %v10651_v63  ;;  %v7178_v63 = vld [vmem:[#allocation5 + $0xcf8] sm:$0xff]  ;;  %v10721_v16 = vpack.c.bf16 %v7209_v43, %v7207_v41  ;;  %v7875_v22 = vld [vmem:[#allocation29 + $0x90] sm:$0xff] }
0x1c7b   :  { %v10687_v56 = vpack.c.bf16 %v7178_v63, %v7176_v61  ;;  %v7211_v61 = vld [vmem:[#allocation5 + $0xe00] sm:$0xff]  ;;  %v7213_v63 = vld [vmem:[#allocation5 + $0xe10] sm:$0xff] }
0x1c7c   :  { %10462 = vmatpush1.bf16.msra.mxu0 %v10461_v50  ;;  %v7182_v50 = vld [vmem:[#allocation5 + $0xd18] sm:$0xff] }
0x1c7d   :  { %10654 = vmatpush1.bf16.msra.mxu1 %v10653_v53  ;;  %10464 = vmatprep.subr.bf16.mxu0 %v10463_v23  ;;  %v10689_v53 = vpack.c.bf16 %v7177_v52, %v7175_v15  ;;  %v10691_v23 = vpack.c.bf16 %v7182_v50, %v7180_v36  ;;  %v10725_v15 = vpack.c.bf16 %v7213_v63, %v7211_v61  ;;  %v7215_v36 = vld [vmem:[#allocation5 + $0xe20] sm:$0xff]  ;;  %v7217_v50 = vld [vmem:[#allocation5 + $0xe30] sm:$0xff] }
0x1c7e   :  { %10656 = vmatprep.subr.bf16.mxu1 %v10655_v7  ;;  %v7184_v7 = vld [vmem:[#allocation5 + $0xd28] sm:$0xff]  ;;  %v10729_v30 = vpack.c.bf16 %v7217_v50, %v7215_v36  ;;  %v7876_v35 = vld [vmem:[#allocation29 + $0x98] sm:$0xff]  ;;  %v7877_v43 = vld [vmem:[#allocation29 + $0xa0] sm:$0xff] }
0x1c7f   :  { %v10695_v0 = vpack.c.bf16 %v7186_v54, %v7184_v7  ;;  %v7219_v7 = vld [vmem:[#allocation5 + $0xe40] sm:$0xff]  ;;  %v7221_v54 = vld [vmem:[#allocation5 + $0xe50] sm:$0xff] }
0x1c80   :  { %10466 = vmatpush1.bf16.msra.mxu0 %v10465_v49  ;;  %v7185_v49 = vld [vmem:[#allocation5 + $0xd30] sm:$0xff]  ;;  %v7243_v63 = vld [vmem:[#allocation5 + $0xf00] sm:$0xff] }
0x1c81   :  { %10658 = vmatpush1.bf16.msra.mxu1 %v10657_v48  ;;  %v7188_v48 = vld [vmem:[#allocation5 + $0xd48] sm:$0xff]  ;;  %v10697_v51 = vpack.c.bf16 %v7185_v49, %v7183_v32  ;;  %v10733_v32 = vpack.c.bf16 %v7221_v54, %v7219_v7  ;;  %v7860_v41 = vld [vmem:[#allocation29 + $0x18] sm:$0xff] }
0x1c82   :  { %10660 = vmatprep.subr.bf16.mxu1 %v10659_v39  ;;  %v7190_v39 = vld [vmem:[#allocation5 + $0xd58] sm:$0xff]  ;;  %v7245_v36 = vld [vmem:[#allocation5 + $0xf10] sm:$0xff] }
0x1c83   :  { %7494 = vmatmul.mubr.f32.vlgmr.msra.gmra.mrb[80].mxu0 %v13794_v37  ;;  %v7161_v37 = vld [vmem:[#allocation5 + $0xc70] sm:$0xff]  ;;  %v10699_v20 = vpack.c.bf16 %v7190_v39, %v7188_v48  ;;  %v7223_v48 = vld [vmem:[#allocation5 + $0xe60] sm:$0xff]  ;;  %v10757_v7 = vpack.c.bf16 %v7245_v36, %v7243_v63 }
0x1c84   :  { %7707 = vmatmul.mubr.f32.vlgmr.msra.gmra.mrb[56].mxu1 %v13806_v8  ;;  %v10673_v8 = vpack.c.bf16 %v7161_v37, %v7159_v38  ;;  %v10709_v38 = vpack.c.bf16 %v7197_v28, %v7195_v34  ;;  %v7225_v39 = vld [vmem:[#allocation5 + $0xe70] sm:$0xff]  ;;  %v7235_v34 = vld [vmem:[#allocation5 + $0xec0] sm:$0xff] }
0x1c85   :  { %10662 = vmatpush1.bf16.msra.mxu1 %v10661_v29  ;;  %7777 = vmatprep.mubr.f32.mxu1 %v13816_v42  ;;  %v7165_v42 = vld [vmem:[#allocation5 + $0xc90] sm:$0xff]  ;;  %v7192_v29 = vld [vmem:[#allocation5 + $0xd68] sm:$0xff] }
0x1c86   :  { %10664 = vmatprep.subr.bf16.mxu1 %v10663_v6  ;;  %v10677_v24 = vpack.c.bf16 %v7165_v42, %v7163_v19  ;;  %v7194_v6 = vld [vmem:[#allocation5 + $0xd78] sm:$0xff]  ;;  %v10713_v19 = vpack.c.bf16 %v7201_v58, %v7199_v18  ;;  %v7237_v28 = vld [vmem:[#allocation5 + $0xed0] sm:$0xff]  ;;  %v7874_v58 = vld [vmem:[#allocation29 + $0x88] sm:$0xff] }
0x1c87   :  { %v10703_v47 = vpack.c.bf16 %v7194_v6, %v7192_v29  ;;  %v7232_v29 = vld [vmem:[#allocation5 + $0xea8] sm:$0xff]  ;;  %v7234_v6 = vld [vmem:[#allocation5 + $0xeb8] sm:$0xff] }
0x1c88   :  { %v7873_v18 = vld [vmem:[#allocation29 + $0x80] sm:$0xff]  ;;  %v7879_v50 = vld [vmem:[#allocation29 + $0xb0] sm:$0xff]  ;;  %v7866_v63 = vld [vmem:[#allocation29 + $0x48] sm:$0xff] }
0x1c89   :  { %10666 = vmatpush1.bf16.msra.mxu1 %v10665_v55  ;;  %v7196_v55 = vld [vmem:[#allocation5 + $0xd88] sm:$0xff]  ;;  %v7884_v36 = vld [vmem:[#allocation29 + $0xd8] sm:$0xff] }
0x1c8a   :  { %10668 = vmatprep.subr.bf16.mxu1 %v10667_v57  ;;  %v7198_v57 = vld [vmem:[#allocation5 + $0xd98] sm:$0xff] }
0x1c8b   :  { %v10707_v21 = vpack.c.bf16 %v7198_v57, %v7196_v55  ;;  %v7236_v55 = vld [vmem:[#allocation5 + $0xec8] sm:$0xff]  ;;  %v7238_v57 = vld [vmem:[#allocation5 + $0xed8] sm:$0xff] }
0x1c8d   :  { %10670 = vmatpush1.bf16.msra.mxu1 %v10669_v40  ;;  %v7200_v40 = vld [vmem:[#allocation5 + $0xda8] sm:$0xff] }
0x1c8e   :  { %10672 = vmatprep.subr.bf16.mxu1 %v10671_v13  ;;  %v7202_v13 = vld [vmem:[#allocation5 + $0xdb8] sm:$0xff] }
0x1c8f   :  { %v10711_v37 = vpack.c.bf16 %v7202_v13, %v7200_v40  ;;  %v7240_v40 = vld [vmem:[#allocation5 + $0xee8] sm:$0xff]  ;;  %v7242_v13 = vld [vmem:[#allocation5 + $0xef8] sm:$0xff] }
0x1c91   :  { %10674 = vmatpush1.bf16.msra.mxu1 %v10673_v8  ;;  %v7204_v8 = vld [vmem:[#allocation5 + $0xdc8] sm:$0xff] }
0x1c92   :  { %10676 = vmatprep.subr.bf16.mxu1 %v10675_v31  ;;  %v7206_v31 = vld [vmem:[#allocation5 + $0xdd8] sm:$0xff] }
0x1c93   :  { %v10715_v42 = vpack.c.bf16 %v7206_v31, %v7204_v8  ;;  %v7857_v8 = vld [vmem:[#allocation29] sm:$0xff]  ;;  %v10749_v31 = vpack.c.bf16 %v7237_v28, %v7235_v34  ;;  %v7261_v28 = vld [vmem:[#allocation5 + $0xf90] sm:$0xff] }
0x1c94   :  { %v7259_v34 = vld [vmem:[#allocation5 + $0xf80] sm:$0xff] }
0x1c95   :  { %10678 = vmatpush1.bf16.msra.mxu1 %v10677_v24  ;;  %v7208_v24 = vld [vmem:[#allocation5 + $0xde8] sm:$0xff] }
0x1c96   :  { %10680 = vmatprep.subr.bf16.mxu1 %v10679_v5  ;;  %v7210_v5 = vld [vmem:[#allocation5 + $0xdf8] sm:$0xff] }
0x1c97   :  { %v10719_v25 = vpack.c.bf16 %v7210_v5, %v7208_v24  ;;  %v10751_v24 = vpack.c.bf16 %v7242_v13, %v7240_v40  ;;  %v7264_v40 = vld [vmem:[#allocation5 + $0xfa8] sm:$0xff]  ;;  %v7266_v13 = vld [vmem:[#allocation5 + $0xfb8] sm:$0xff] }
0x1c99   :  { %10682 = vmatpush1.bf16.msra.mxu1 %v10681_v46  ;;  %v7212_v46 = vld [vmem:[#allocation5 + $0xe08] sm:$0xff] }
0x1c9a   :  { %10684 = vmatprep.subr.bf16.mxu1 %v10683_v3  ;;  %v7214_v3 = vld [vmem:[#allocation5 + $0xe18] sm:$0xff] }
0x1c9b   :  { %v10723_v11 = vpack.c.bf16 %v7214_v3, %v7212_v46  ;;  %v7244_v46 = vld [vmem:[#allocation5 + $0xf08] sm:$0xff]  ;;  %v7246_v3 = vld [vmem:[#allocation5 + $0xf18] sm:$0xff] }
0x1c9d   :  { %10686 = vmatpush1.bf16.msra.mxu1 %v10685_v12  ;;  %v7216_v12 = vld [vmem:[#allocation5 + $0xe28] sm:$0xff] }
0x1c9e   :  { %10688 = vmatprep.subr.bf16.mxu1 %v10687_v56  ;;  %v7218_v56 = vld [vmem:[#allocation5 + $0xe38] sm:$0xff] }
0x1c9f   :  { %v10727_v52 = vpack.c.bf16 %v7218_v56, %v7216_v12  ;;  %v7861_v56 = vld [vmem:[#allocation29 + $0x20] sm:$0xff] }
0x1ca1   :  { %10690 = vmatpush1.bf16.msra.mxu1 %v10689_v53  ;;  %v7220_v53 = vld [vmem:[#allocation5 + $0xe48] sm:$0xff] }
0x1ca2   :  { %10692 = vmatprep.subr.bf16.mxu1 %v10691_v23  ;;  %v7222_v23 = vld [vmem:[#allocation5 + $0xe58] sm:$0xff] }
0x1ca3   :  { %v10731_v4 = vpack.c.bf16 %v7222_v23, %v7220_v53  ;;  %v7880_v53 = vld [vmem:[#allocation29 + $0xb8] sm:$0xff]  ;;  %v7248_v23 = vld [vmem:[#allocation5 + $0xf28] sm:$0xff] }
0x1ca4   :  { %v10799_v54 = vpack.c.bf16 %v7880_v53, %v7879_v50  ;;  %v7867_v53 = vld [vmem:[#allocation29 + $0x50] sm:$0xff] }
0x1ca5   :  { %10694 = vmatpush1.bf16.msra.mxu1 %v10693_v60  ;;  %v7224_v60 = vld [vmem:[#allocation5 + $0xe68] sm:$0xff] }
0x1ca6   :  { %10696 = vmatprep.subr.bf16.mxu1 %v10695_v0  ;;  %v7226_v0 = vld [vmem:[#allocation5 + $0xe78] sm:$0xff] }
0x1ca7   :  { %v10735_v49 = vpack.c.bf16 %v7226_v0, %v7224_v60  ;;  %v7863_v60 = vld [vmem:[#allocation29 + $0x30] sm:$0xff]  ;;  %v7864_v0 = vld [vmem:[#allocation29 + $0x38] sm:$0xff] }
0x1ca9   :  { %10698 = vmatpush1.bf16.msra.mxu1 %v10697_v51  ;;  %v7228_v51 = vld [vmem:[#allocation5 + $0xe88] sm:$0xff] }
0x1caa   :  { %10700 = vmatprep.subr.bf16.mxu1 %v10699_v20  ;;  %v7230_v20 = vld [vmem:[#allocation5 + $0xe98] sm:$0xff] }
0x1cab   :  { %v10739_v26 = vpack.c.bf16 %v7230_v20, %v7228_v51  ;;  %v7254_v51 = vld [vmem:[#allocation5 + $0xf58] sm:$0xff]  ;;  %v10801_v20 = vpack.c.bf16 %v7864_v0, %v7863_v60  ;;  %v7870_v60 = vld [vmem:[#allocation29 + $0x68] sm:$0xff]  ;;  %v7887_v0 = vld [vmem:[#allocation29 + $0xf0] sm:$0xff] }
0x1cad   :  { %10702 = vmatpush1.bf16.msra.mxu1 %v10701_v14 }
0x1cae   :  { %10704 = vmatprep.subr.bf16.mxu1 %v10703_v47  ;;  %v10743_v47 = vpack.c.bf16 %v7234_v6, %v7232_v29  ;;  %v7256_v29 = vld [vmem:[#allocation5 + $0xf68] sm:$0xff]  ;;  %v7258_v6 = vld [vmem:[#allocation5 + $0xf78] sm:$0xff] }
0x1cb1   :  { %10706 = vmatpush1.bf16.msra.mxu1 %v10705_v9  ;;  %v10745_v9 = vpack.c.bf16 %v7233_v59, %v7231_v27  ;;  %v7255_v27 = vld [vmem:[#allocation5 + $0xf60] sm:$0xff]  ;;  %v7257_v59 = vld [vmem:[#allocation5 + $0xf70] sm:$0xff] }
0x1cb2   :  { %10708 = vmatprep.subr.bf16.mxu1 %v10707_v21  ;;  %v10747_v21 = vpack.c.bf16 %v7238_v57, %v7236_v55  ;;  %v7260_v55 = vld [vmem:[#allocation5 + $0xf88] sm:$0xff]  ;;  %v7262_v57 = vld [vmem:[#allocation5 + $0xf98] sm:$0xff] }
0x1cb5   :  { %10710 = vmatpush1.bf16.msra.mxu1 %v10709_v38  ;;  %v7239_v38 = vld [vmem:[#allocation5 + $0xee0] sm:$0xff] }
0x1cb6   :  { %10712 = vmatprep.subr.bf16.mxu1 %v10711_v37  ;;  %v7241_v37 = vld [vmem:[#allocation5 + $0xef0] sm:$0xff] }
0x1cb7   :  { %v10753_v61 = vpack.c.bf16 %v7241_v37, %v7239_v38  ;;  %v10773_v38 = vpack.c.bf16 %v7261_v28, %v7259_v34  ;;  %v10775_v37 = vpack.c.bf16 %v7266_v13, %v7264_v40  ;;  %v7969_v34 = vld [vmem:[#allocation32 + $0x10] sm:$0xff]  ;;  %v7970_v28 = vld [vmem:[#allocation32 + $0x18] sm:$0xff]  ;;  %v7972_v13 = vld [vmem:[#allocation32 + $0x28] sm:$0xff] }
0x1cb9   :  { %10714 = vmatpush1.bf16.msra.mxu1 %v10713_v19  ;;  %v10787_v19 = vpack.c.bf16 %v7874_v58, %v7873_v18  ;;  %v7263_v18 = vld [vmem:[#allocation5 + $0xfa0] sm:$0xff]  ;;  %v7265_v58 = vld [vmem:[#allocation5 + $0xfb0] sm:$0xff] }
0x1cba   :  { %10716 = vmatprep.subr.bf16.mxu1 %v10715_v42  ;;  %v7858_v42 = vld [vmem:[#allocation29 + $0x8] sm:$0xff] }
0x1cbb   :  { %v10789_v5 = vpack.c.bf16 %v7858_v42, %v7857_v8  ;;  %10788 = vmatprep.subr.bf16.mxu0 %v10787_v19  ;;  %v7268_v8 = vld [vmem:[#allocation5 + $0xfc8] sm:$0xff]  ;;  %v10777_v19 = vpack.c.bf16 %v7265_v58, %v7263_v18  ;;  %v7974_v18 = vld [vmem:[#allocation32 + $0x38] sm:$0xff] }
0x1cbd   :  { %10718 = vmatpush1.bf16.msra.mxu1 %v10717_v2  ;;  %v10791_v2 = vpack.c.bf16 %v7876_v35, %v7875_v22  ;;  %10790 = vmatpush3.bf16.msra.mxu0 %v10789_v5  ;;  %v7267_v22 = vld [vmem:[#allocation5 + $0xfc0] sm:$0xff]  ;;  %v7269_v35 = vld [vmem:[#allocation5 + $0xfd0] sm:$0xff]  ;;  %v7274_v5 = vld [vmem:[#allocation5 + $0xff8] sm:$0xff] }
0x1cbe   :  { %10720 = vmatprep.subr.bf16.mxu1 %v10719_v25  ;;  %v7859_v25 = vld [vmem:[#allocation29 + $0x10] sm:$0xff] }
0x1cbf   :  { %10792 = vmatprep.subr.bf16.mxu0 %v10791_v2  ;;  %v10781_v2 = vpack.c.bf16 %v7269_v35, %v7267_v22  ;;  %v7978_v22 = vld [vmem:[#allocation32 + $0x58] sm:$0xff] }
0x1cc1   :  { %10722 = vmatpush1.bf16.msra.mxu1 %v10721_v16  ;;  %v7878_v16 = vld [vmem:[#allocation29 + $0xa8] sm:$0xff] }
0x1cc2   :  { %10724 = vmatprep.subr.bf16.mxu1 %v10723_v11  ;;  %v10793_v11 = vpack.c.bf16 %v7860_v41, %v7859_v25  ;;  %v10795_v12 = vpack.c.bf16 %v7878_v16, %v7877_v43  ;;  %v7271_v41 = vld [vmem:[#allocation5 + $0xfe0] sm:$0xff]  ;;  %v7273_v43 = vld [vmem:[#allocation5 + $0xff0] sm:$0xff] }
0x1cc3   :  { %v7882_v16 = vld [vmem:[#allocation29 + $0xc8] sm:$0xff] }
0x1cc4   :  { %7778 = vmatmul.mubr.f32.vlgmr.msra.gmra.mrb[56].mxu1 %v13812_v62  ;;  %v10737_v62 = vpack.c.bf16 %v7225_v39, %v7223_v48  ;;  %10794 = vmatpush3.bf16.msra.mxu0 %v10793_v11  ;;  %v7249_v48 = vld [vmem:[#allocation5 + $0xf30] sm:$0xff]  ;;  %v7252_v39 = vld [vmem:[#allocation5 + $0xf48] sm:$0xff] }
0x1cc5   :  { %10726 = vmatpush1.bf16.msra.mxu1 %v10725_v15  ;;  %7848 = vmatprep.mubr.f32.mxu1 %v13818_v44  ;;  %v7229_v44 = vld [vmem:[#allocation5 + $0xe90] sm:$0xff]  ;;  %v7862_v15 = vld [vmem:[#allocation29 + $0x28] sm:$0xff] }
0x1cc6   :  { %10728 = vmatprep.subr.bf16.mxu1 %v10727_v52  ;;  %v10741_v14 = vpack.c.bf16 %v7229_v44, %v7227_v17  ;;  %v10755_v52 = vpack.c.bf16 %v7246_v3, %v7244_v46  ;;  %10796 = vmatprep.subr.bf16.mxu0 %v10795_v12  ;;  %v7251_v17 = vld [vmem:[#allocation5 + $0xf40] sm:$0xff]  ;;  %v7253_v44 = vld [vmem:[#allocation5 + $0xf50] sm:$0xff]  ;;  %v10785_v46 = vpack.c.bf16 %v7273_v43, %v7271_v41  ;;  %v7982_v41 = vld [vmem:[#allocation32 + $0x78] sm:$0xff] }
0x1cc7   :  { %v7881_v3 = vld [vmem:[#allocation29 + $0xc0] sm:$0xff] }
0x1cc8   :  { %v10803_v11 = vpack.c.bf16 %v7882_v16, %v7881_v3  ;;  %v8160_v3 = vld [vmem:[#allocation30] ss:$0 sm:$0xff] }
0x1cc9   :  { %10730 = vmatpush1.bf16.msra.mxu1 %v10729_v30  ;;  %v7250_v30 = vld [vmem:[#allocation5 + $0xf38] sm:$0xff] }
0x1cca   :  { %10732 = vmatprep.subr.bf16.mxu1 %v10731_v4  ;;  %v10797_v4 = vpack.c.bf16 %v7862_v15, %v7861_v56 }
0x1ccc   :  { %10798 = vmatpush3.bf16.msra.mxu0 %v10797_v4  ;;  %v7885_v4 = vld [vmem:[#allocation29 + $0xe0] sm:$0xff] }
0x1ccd   :  { %10734 = vmatpush1.bf16.msra.mxu1 %v10733_v32  ;;  %v10759_v32 = vpack.c.bf16 %v7250_v30, %v7248_v23  ;;  %10800 = vmatprep.subr.bf16.mxu0 %v10799_v54  ;;  %v7868_v23 = vld [vmem:[#allocation29 + $0x58] sm:$0xff] }
0x1cce   :  { %10736 = vmatprep.subr.bf16.mxu1 %v10735_v49  ;;  %v7247_v49 = vld [vmem:[#allocation5 + $0xf20] sm:$0xff]  ;;  %v10809_v30 = vpack.c.bf16 %v7868_v23, %v7867_v53 }
0x1cd0   :  { %10802 = vmatpush3.bf16.msra.mxu0 %v10801_v20 }
0x1cd1   :  { %10738 = vmatpush1.bf16.msra.mxu1 %v10737_v62  ;;  %v10761_v62 = vpack.c.bf16 %v7249_v48, %v7247_v49  ;;  %10804 = vmatprep.subr.bf16.mxu0 %v10803_v11 }
0x1cd2   :  { %10740 = vmatprep.subr.bf16.mxu1 %v10739_v26  ;;  %v10763_v26 = vpack.c.bf16 %v7254_v51, %v7252_v39  ;;  %v7871_v39 = vld [vmem:[#allocation29 + $0x70] sm:$0xff]  ;;  %v7872_v51 = vld [vmem:[#allocation29 + $0x78] sm:$0xff] }
0x1cd3   :  { %v10817_v20 = vpack.c.bf16 %v7872_v51, %v7871_v39 }
0x1cd5   :  { %10742 = vmatpush1.bf16.msra.mxu1 %v10741_v14  ;;  %v10765_v14 = vpack.c.bf16 %v7253_v44, %v7251_v17 }
0x1cd6   :  { %10744 = vmatprep.subr.bf16.mxu1 %v10743_v47  ;;  %v10767_v47 = vpack.c.bf16 %v7258_v6, %v7256_v29 }
0x1cd9   :  { %10746 = vmatpush1.bf16.msra.mxu1 %v10745_v9  ;;  %v10769_v9 = vpack.c.bf16 %v7257_v59, %v7255_v27 }
0x1cda   :  { %10748 = vmatprep.subr.bf16.mxu1 %v10747_v21  ;;  %v10771_v21 = vpack.c.bf16 %v7262_v57, %v7260_v55  ;;  %v7967_v55 = vld [vmem:[#allocation32] sm:$0xff]  ;;  %v7968_v57 = vld [vmem:[#allocation32 + $0x8] sm:$0xff] }
0x1cdd   :  { %10750 = vmatpush1.bf16.msra.mxu1 %v10749_v31  ;;  %v7270_v31 = vld [vmem:[#allocation5 + $0xfd8] sm:$0xff] }
0x1cde   :  { %10752 = vmatprep.subr.bf16.mxu1 %v10751_v24  ;;  %v10779_v42 = vpack.c.bf16 %v7270_v31, %v7268_v8  ;;  %v7272_v24 = vld [vmem:[#allocation5 + $0xfe8] sm:$0xff]  ;;  %v7975_v8 = vld [vmem:[#allocation32 + $0x40] sm:$0xff] }
0x1cdf   :  { %v10783_v25 = vpack.c.bf16 %v7274_v5, %v7272_v24  ;;  %v7976_v31 = vld [vmem:[#allocation32 + $0x48] sm:$0xff]  ;;  %v7979_v24 = vld [vmem:[#allocation32 + $0x60] sm:$0xff] }
0x1ce0   :  { %v7980_v5 = vld [vmem:[#allocation32 + $0x68] sm:$0xff] }
0x1ce1   :  { %10754 = vmatpush1.bf16.msra.mxu1 %v10753_v61  ;;  %v7865_v61 = vld [vmem:[#allocation29 + $0x40] sm:$0xff] }
0x1ce2   :  { %10756 = vmatprep.subr.bf16.mxu1 %v10755_v52  ;;  %v10805_v56 = vpack.c.bf16 %v7866_v63, %v7865_v61  ;;  %v7883_v52 = vld [vmem:[#allocation29 + $0xd0] sm:$0xff] }
0x1ce3   :  { %v10807_v50 = vpack.c.bf16 %v7884_v36, %v7883_v52 }
0x1ce4   :  { %10806 = vmatpush3.bf16.msra.mxu0 %v10805_v56 }
0x1ce5   :  { %10758 = vmatpush1.bf16.msra.mxu1 %v10757_v7  ;;  %10808 = vmatprep.subr.bf16.mxu0 %v10807_v50  ;;  %v7886_v7 = vld [vmem:[#allocation29 + $0xe8] sm:$0xff] }
0x1ce6   :  { %10760 = vmatprep.subr.bf16.mxu1 %v10759_v32  ;;  %v10811_v54 = vpack.c.bf16 %v7886_v7, %v7885_v4  ;;  %v7888_v32 = vld [vmem:[#allocation29 + $0xf8] sm:$0xff] }
0x1ce7   :  { %v10815_v48 = vpack.c.bf16 %v7888_v32, %v7887_v0 }
0x1ce8   :  { %10810 = vmatpush3.bf16.msra.mxu0 %v10809_v30 }
0x1ce9   :  { %10762 = vmatpush1.bf16.msra.mxu1 %v10761_v62  ;;  %10812 = vmatprep.subr.bf16.mxu0 %v10811_v54  ;;  %v11886_v62 = vmov 0.0|0.0  }
0x1cea   :  { %10764 = vmatprep.subr.bf16.mxu1 %v10763_v26  ;;  %v7275_v26 = vld [vmem:[#allocation27] sm:$0x3] }
0x1ceb   :  { %v7280_v17 = vrot.slane %v7275_v26, %v13954_v33  ;;  %v7284_v44 = vrot.slane %v7275_v26, %v13955_v45  ;;  %v10823_v33 = vpack.c.bf16 %v7970_v28, %v7969_v34  ;;  %v7971_v45 = vld [vmem:[#allocation32 + $0x20] sm:$0xff] }
0x1ced   :  { %10766 = vmatpush1.bf16.msra.mxu1 %v10765_v14 }
0x1cee   :  { %10768 = vmatprep.subr.bf16.mxu1 %v10767_v47 }
0x1cf1   :  { %10770 = vmatpush1.bf16.msra.mxu1 %v10769_v9  ;;  %v10820_v9 = vpack.c.bf16 %v7968_v57, %v7967_v55 }
0x1cf2   :  { %10772 = vmatprep.subr.bf16.mxu1 %v10771_v21 }
0x1cf5   :  { %10774 = vmatpush1.bf16.msra.mxu1 %v10773_v38  ;;  %v10826_v38 = vpack.c.bf16 %v7972_v13, %v7971_v45 }
0x1cf6   :  { %10776 = vmatprep.subr.bf16.mxu1 %v10775_v37  ;;  %v7973_v37 = vld [vmem:[#allocation32 + $0x30] sm:$0xff] }
0x1cf7   :  { %v10829_v58 = vpack.c.bf16 %v7974_v18, %v7973_v37 }
0x1cf9   :  { %10778 = vmatpush1.bf16.msra.mxu1 %v10777_v19  ;;  %v10832_v19 = vpack.c.bf16 %v7976_v31, %v7975_v8 }
0x1cfa   :  { %10780 = vmatprep.subr.bf16.mxu1 %v10779_v42  ;;  %v7977_v42 = vld [vmem:[#allocation32 + $0x50] sm:$0xff] }
0x1cfb   :  { %v10835_v35 = vpack.c.bf16 %v7978_v22, %v7977_v42 }
0x1cfd   :  { %10782 = vmatpush1.bf16.msra.mxu1 %v10781_v2  ;;  %v10838_v2 = vpack.c.bf16 %v7980_v5, %v7979_v24 }
0x1cfe   :  { %10784 = vmatprep.subr.bf16.mxu1 %v10783_v25  ;;  %v7981_v25 = vld [vmem:[#allocation32 + $0x70] sm:$0xff] }
0x1cff   :  { %v10841_v43 = vpack.c.bf16 %v7982_v41, %v7981_v25 }
0x1d01   :  { %10786 = vmatpush1.bf16.msra.mxu1 %v10785_v46 }
0x1d04   :  { %7849 = vmatmul.mubr.f32.vlgmr.msra.gmra.mrb[56].mxu1 %v13814_v10  ;;  %v7869_v10 = vld [vmem:[#allocation29 + $0x60] sm:$0xff] }
0x1d05   :  { %v10813_v49 = vpack.c.bf16 %v7870_v60, %v7869_v10 }
0x1d07   :  { %10814 = vmatpush3.bf16.msra.mxu0 %v10813_v49 }
0x1d08   :  { %10816 = vmatprep.subr.bf16.mxu0 %v10815_v48 }
0x1d0b   :  { %10818 = vmatpush3.bf16.msra.mxu0 %v10817_v20 }
0x1d0c   :  { %10819 = vmatprep.subr.bf16.mxu0 %v11886_v62 }
0x1d56   :  { %v7495_v12 = vpop.f32.mrb[80].mxu0 }
0x1d57   :  { %v7497_v15 = vpop.f32.mrb[81].mxu0  ;;  %v10955_v29 = vadd.f32 %v7495_v12, %v7280_v17 }
0x1d58   :  { %v10957_v6 = vadd.f32 %v7497_v15, %v7284_v44 }
0x1dd7   :  { %v7850_v14 = vpop.f32.mrb[56].mxu1 }
0x1dd8   :  { %v10956_v47 = vadd.f32 %v10955_v29, %v7850_v14  ;;  %v7852_v27 = vpop.f32.mrb[57].mxu1 }
0x1dd9   :  { %v10958_v59 = vadd.f32 %v10957_v6, %v7852_v27 }
0x1ddb   :  { %11355 = vtanh.f32 %v10958_v59 }
0x1ddc   :  { %11357 = vtanh.f32 %v10956_v47 }
0x1de5   :  { %v11356_v21 = vpop.eup %11355 }
0x1de6   :  { %v11358_v40 = vpop.eup %11357  ;;  %7960 = vmatprep.mubr.f32.mxu0 %v11356_v21 }
0x1de7   :  { %7961 = vmatmul.mubr.f32.vlgmr.msra.gmra.mrb[82].mxu0 %v11358_v40 }
0x1de8   :  { %10821 = vmatpush3.bf16.msra.mxu0 %v10820_v9  ;;  %8280 = vmatprep.mubr.msk.f32.mxu0 %vm11887_vm11, %v13950_v1 }
0x1de9   :  { %10822 = vmatprep.subr.bf16.mxu0 %v11886_v62 }
0x1dec   :  { %10824 = vmatpush3.bf16.msra.mxu0 %v10823_v33 }
0x1ded   :  { %10825 = vmatprep.subr.bf16.mxu0 %v11886_v62 }
0x1df0   :  { %10827 = vmatpush3.bf16.msra.mxu0 %v10826_v38 }
0x1df1   :  { %10828 = vmatprep.subr.bf16.mxu0 %v11886_v62 }
0x1df4   :  { %10830 = vmatpush3.bf16.msra.mxu0 %v10829_v58 }
0x1df5   :  { %10831 = vmatprep.subr.bf16.mxu0 %v11886_v62 }
0x1df8   :  { %10833 = vmatpush3.bf16.msra.mxu0 %v10832_v19 }
0x1df9   :  { %10834 = vmatprep.subr.bf16.mxu0 %v11886_v62 }
0x1dfc   :  { %10836 = vmatpush3.bf16.msra.mxu0 %v10835_v35 }
0x1dfd   :  { %10837 = vmatprep.subr.bf16.mxu0 %v11886_v62 }
0x1e00   :  { %10839 = vmatpush3.bf16.msra.mxu0 %v10838_v2 }
0x1e01   :  { %10840 = vmatprep.subr.bf16.mxu0 %v11886_v62 }
0x1e04   :  { %10842 = vmatpush3.bf16.msra.mxu0 %v10841_v43 }
0x1eba   :  { %v8208_v46 = vpop.f32.mrb[82].mxu0 }
0x1ebb   :  { %v8209_v16 = vpop.f32.mrb[83].mxu0 }
0x1ebc   :  { %v8210_v11 = vadd.f32 %v8209_v16, %v8208_v46 }
0x1ebe   :  { %v7963_v61 = vadd.f32 %v8210_v11, %v8160_v3 }
0x1ec0   :  { %11359 = vtanh.f32 %v7963_v61 }
0x1eca   :  { %v11360_v63 = vpop.eup %11359 }
0x1ecb   :  { %8281 = vmatmul.mubr.f32.vlgmr.msra.gmra.mrb[84].mxu0 %v11360_v63 }
0x1ecc   :  { %11778 = shalt.err (!%p11775_p11)
}
0x1ecd   :  { %s11779_s18 = scalar_lea.hbm %s13901_s21, 384 }
0x1ece   :  { %p11780_p12 = scmp.ne.s32.totalorder %s13901_s21, %s11779_s18  ;;  %p11783_p13 = scmp.lt.u32.totalorder %s11779_s18, %s13901_s21 }
0x1ed0   :  { %p11785_p0 = pnand %p11783_p13, %p11780_p12 }
0x1ed2   :  { %11788 = shalt.err (!%p11785_p0)
}
0x1ed3   :  { %8082 = dma.vmem_to_hbm [thread:$0]  %s8077_s28, 384, %s13901_s21, [#allocation37], %s11872_s17, %s11872_s17, %s11873_s27  }
0x1ed4   :  { %s11889_s4 = smov [#allocation38]  }
0x1ed5   :  { %s8088_s25 = sshll.u32 %s11889_s4, 4  ;;  %s8089_s25 = int_to_ptr.vmem [resolvable:$true] %s8088_s25 }
0x1ed6   :  { %s11789_s26 = scalar_lea.vmem %s8089_s25, 384  ;;  %p11794_p2 = scmp.lt.s32.totalorder %s8089_s25, %s8089_s25 }
0x1ed7   :  { %p11790_p1 = scmp.ne.s32.totalorder %s8089_s25, %s11789_s26  ;;  %p11795_p3 = scmp.lt.s32.totalorder %s11789_s26, %s11789_s26 }
0x1ed9   :  { %p11796_p4 = por %p11795_p3, %p11794_p2 }
0x1edb   :  { %p11797_p5 = pnand %p11796_p4, %p11790_p1 }
0x1edd   :  { %11800 = shalt.err (!%p11797_p5)
}
0x1ede   :  { %s13960_s15 = sld [smem:[#allocation76_spill]] }
0x1ee4   :  { %s11801_s20 = scalar_lea.hbm %s13960_s15, 384 }
0x1ee5   :  { %p11802_p6 = scmp.ne.s32.totalorder %s13960_s15, %s11801_s20  ;;  %p11805_p7 = scmp.lt.u32.totalorder %s11801_s20, %s13960_s15 }
0x1ee7   :  { %p11807_p8 = pnand %p11805_p7, %p11802_p6 }
0x1ee9   :  { %11810 = shalt.err (!%p11807_p8)
}
0x1eea   :  { %8094 = dma.vmem_to_hbm [thread:$0]  %s8089_s25, 384, %s13960_s15, [#allocation37], %s11872_s17, %s11872_s17, %s11873_s27   ;;  %v8161_v1 = vld [vmem:[#allocation33] ss:$0 sm:$0xff] }
0x1eeb   :  { %s11890_s23 = smov [#allocation35]  }
0x1eec   :  { %s8067_s6 = sshll.u32 %s11890_s23, 4  ;;  %s8068_s6 = int_to_ptr.vmem [resolvable:$true] %s8067_s6 }
0x1eed   :  { %s11811_s14 = scalar_lea.vmem %s8068_s6, 128  ;;  %p11816_p10 = scmp.lt.s32.totalorder %s8068_s6, %s8068_s6 }
0x1eee   :  { %p11812_p9 = scmp.ne.s32.totalorder %s8068_s6, %s11811_s14  ;;  %p11817_p11 = scmp.lt.s32.totalorder %s11811_s14, %s11811_s14 }
0x1ef0   :  { %p11818_p12 = por %p11817_p11, %p11816_p10 }
0x1ef2   :  { %p11819_p13 = pnand %p11818_p12, %p11812_p9 }
0x1f9e   :  { %v8056_v12 = vpop.f32.mrb[84].mxu0 }
0x1f9f   :  { %v8057_v56 = vadd.f32 %v8161_v1, %v8056_v12  ;;  %v8282_v15 = vpop.f32.mrb[85].mxu0 }
0x1fa1   :  { %8060 = vst [vmem:[#allocation35] sm:$0xff] %v8057_v56 }
0x1fa2   :  { %11822 = shalt.err (!%p11819_p13)
}
0x1fa3   :  { %s13961_s28 = sld [smem:[#allocation75_spill]] }
0x1fa9   :  { %s11823_s2 = scalar_lea.hbm %s13961_s28, 128 }
0x1faa   :  { %p11824_p0 = scmp.ne.s32.totalorder %s13961_s28, %s11823_s2  ;;  %p11827_p1 = scmp.lt.u32.totalorder %s11823_s2, %s13961_s28 }
0x1fac   :  { %p11829_p2 = pnand %p11827_p1, %p11824_p0 }
0x1fae   :  { %11832 = shalt.err (!%p11829_p2)
}
0x1faf   :  { %8070 = dma.vmem_to_hbm [thread:$0]  %s8068_s6, 128, %s13961_s28, [#allocation11]  }
0x1fb0   :  { %11857 = dma.done.wait [#allocation11], 128  }
0x1fb1   :  { %11858 = vsyncadd [#allocation11], 4294967168 }
0x1fb2   :  { %11859 = dma.done.wait [#allocation37], 768  }
0x1fb3   :  { %11860 = vsyncadd [#allocation37], 4294966528 }
0x1fb4   :  { %8104 = vsyncpa [#allocation10], 1 }
0x1fb5   :  { %8105 = vsyncpa [#allocation13], 1 }
0x1fb6   :  { %8106 = vsyncpa [#allocation16], 1 }
0x1fb7   :  { %8107 = vsyncpa [#allocation19], 1 }
0x1fb8   :  { %8108 = vsyncpa [#allocation22], 1 }
0x1fb9   :  { %8109 = vsyncpa [#allocation25], 1 }
0x1fba   :  { %8110 = vsyncpa [#allocation28], 1 }
0x1fbb   :  { %8111 = vsyncpa [#allocation31], 1 }
0x1fbc   :  { %8112 = vsyncpa [#allocation34], 1 }
0x1fbd   :  { %8113 = vsyncpa [#allocation11], 1 }
0x1fbe   :  { %8114 = vsyncpa [#allocation37], 1 }
0x1fbf   :  { %8115 = vsyncmov [#allocation6] }
0x1fc2   :  { %s8116_s19 = vpop.sfrf %8115 }
0x1fc3   :  { %p8162_p3 = scmp.ne.s32.totalorder %s8116_s19, 0 }
0x1fc5   :  { %8120 = shalt.err (%p8162_p3)  }
0x1fc6   :  { %8122 = vsyncmov [#allocation6 + $0x1] }
0x1fc9   :  { %s8123_s11 = vpop.sfrf %8122 }
0x1fca   :  { %p8163_p4 = scmp.ne.s32.totalorder %s8123_s11, 0 }
0x1fcc   :  { %8127 = shalt.err (%p8163_p4)  }

</bundles_post_ra>
